<compile_context>
chip_gen: v7x
topology: tpu7x:2x2x1
jax: 0.10.0
libtpu: 0.0.40
codegen_flags: <defaults>
</compile_context>

<pallas_src>
import functools

import jax
import jax.numpy as jnp
import numpy as np
from jax.experimental import pallas as pl
from jax.experimental.pallas import tpu as pltpu


def _round_up(x, m):
    return ((x + m - 1) // m) * m


def _vmem_budget_bytes():
    """Generation-aware (tile_budget_bytes, vmem_limit_cap_bytes)."""
    try:
        vmem_cap = pltpu.get_tpu_info().vmem_capacity_bytes
    except Exception:  # noqa: BLE001 - fall back to conservative budgets
        vmem_cap = None
    if vmem_cap is not None and vmem_cap >= (100 << 20):
        # v5e / v6e: 128 MiB physical VMEM per TensorCore.
        return 64 << 20, 96 << 20
    # v7x (64 MiB per TC) or unknown: leave headroom for compiler scratch.
    return 24 << 20, 48 << 20


def _sine_layer_kernel(x_ref, wt_ref, b_ref, o_ref, *, compute_dtype):
    # x_ref : [TN, in_f]         batch-row tile (pipelined over the grid)
    # wt_ref: [in_f, out_f_pad]  pre-transposed, w0-scaled, 128-padded (resident)
    # b_ref : [1, out_f_pad]     w0-scaled, 128-padded bias (resident, f32)
    # o_ref : [TN, out_f_pad]    lane-dense output tile
    x = x_ref[...]
    wt = wt_ref[...]
    if compute_dtype is not None:
        if x.dtype != compute_dtype:
            x = x.astype(compute_dtype)
        if wt.dtype != compute_dtype:
            wt = wt.astype(compute_dtype)
    # MXU matmul with f32 accumulation; bias add + sin on the VPU/EUP in f32.
    z = jnp.dot(x, wt, preferred_element_type=jnp.float32)
    b = b_ref[...]
    if b.dtype != jnp.float32:
        b = b.astype(jnp.float32)
    o_ref[...] = jnp.sin(z + b).astype(o_ref.dtype)


def prepare_sine_layer_params(weight, bias, *, is_first=False, param_dtype=None):
    """One-time (init-time) prep: transpose W, fold w0, pad out_feature to 128.

    weight: [out_feature, in_feature] (nn.Linear layout)
    bias:   [out_feature]
    returns (wt_pad [in_f, out_f_pad], b_pad [1, out_f_pad] f32)
    """
    w0 = 1.0 if is_first else 30.0
    out_f, in_f = weight.shape
    out_f_pad = _round_up(out_f, 128)
    if param_dtype is None:
        param_dtype = weight.dtype
    wt = (w0 * weight.T.astype(jnp.float32)).astype(param_dtype)
    b = (w0 * bias.astype(jnp.float32))
    wt_pad = jnp.zeros((in_f, out_f_pad), param_dtype).at[:, :out_f].set(wt)
    b_pad = jnp.zeros((1, out_f_pad), jnp.float32).at[0, :out_f].set(b)
    return wt_pad, b_pad


def _choose_tile_rows(n, in_f, out_f_pad, x_itemsize, out_itemsize, budget_bytes):
    # Double-buffered x tile + out tile per grid step must fit the budget.
    per_row = 2 * (in_f * x_itemsize + out_f_pad * out_itemsize)
    max_rows = max(8, (budget_bytes // per_row) // 8 * 8)
    tn = min(8192, max_rows, _round_up(n, 8))
    # Megacore guard: keep >= ~8 grid steps when N is large so the "parallel"
    # batch axis feeds both TensorCores on v7x (never drops below 2048 rows,
    # where per-step pipeline overhead would start to dominate again).
    min_steps = 8
    tn = min(tn, max(2048, _round_up(-(-n // min_steps), 8)))
    return max(8, (tn // 8) * 8)


def sine_layer(x, wt_pad, b_pad, out_feature, *, compute_dtype=None,
               out_dtype=None, tile_rows=None, return_padded=False):
    """Pallas TPU SineLayer.forward.

    x:        [N, in_feature]
    wt_pad:   [in_feature, out_f_pad]  from prepare_sine_layer_params (w0 folded)
    b_pad:    [1, out_f_pad]           from prepare_sine_layer_params (w0 folded)
    returns:  [N, out_feature]  (or [N, out_f_pad] if return_padded=True)
    """
    n, in_f = x.shape
    in_f2, out_f_pad = wt_pad.shape
    assert in_f == in_f2, (in_f, in_f2)
    assert out_f_pad % 128 == 0, out_f_pad
    if out_dtype is None:
        out_dtype = x.dtype

    x_itemsize = jnp.dtype(x.dtype).itemsize
    out_itemsize = jnp.dtype(out_dtype).itemsize
    tile_budget, vmem_cap = _vmem_budget_bytes()
    if tile_rows is not None:
        tn = max(8, min((tile_rows // 8) * 8, _round_up(n, 8)))
    else:
        tn = _choose_tile_rows(n, in_f, out_f_pad, x_itemsize, out_itemsize,
                               tile_budget)

    grid = (pl.cdiv(n, tn),)   # ragged last block: Pallas masks its writeback

    # VMEM: double-buffered x/out tiles + single-buffered resident W/bias + headroom.
    required = (2 * tn * (in_f * x_itemsize + out_f_pad * out_itemsize)
                + wt_pad.size * jnp.dtype(wt_pad.dtype).itemsize
                + b_pad.size * jnp.dtype(b_pad.dtype).itemsize)
    vmem_limit = int(min(max(required + (4 << 20), 16 << 20), vmem_cap))

    kernel = functools.partial(_sine_layer_kernel, compute_dtype=compute_dtype)

    out = pl.pallas_call(
        kernel,
        out_shape=jax.ShapeDtypeStruct((n, out_f_pad), out_dtype),
        grid_spec=pltpu.PrefetchScalarGridSpec(
            num_scalar_prefetch=0,
            grid=grid,
            in_specs=[
                pl.BlockSpec((tn, in_f), lambda i: (i, 0)),          # x tile
                pl.BlockSpec((in_f, out_f_pad), lambda i: (0, 0),
                             pipeline_mode=pl.Buffered(1)),          # W resident
                pl.BlockSpec((1, out_f_pad), lambda i: (0, 0),
                             pipeline_mode=pl.Buffered(1)),          # b resident
            ],
            out_specs=pl.BlockSpec((tn, out_f_pad), lambda i: (i, 0)),
        ),
        compiler_params=pltpu.CompilerParams(
            dimension_semantics=("parallel",),   # rows independent -> 2 TCs on v7x
            vmem_limit_bytes=vmem_limit,
        ),
    )(x, wt_pad, b_pad)

    if return_padded or out_f_pad == out_feature:
        return out
    # TODO(synk): when out_feature % 128 != 0, have the consumer read the
    # lane-padded layout directly (return_padded=True) to skip this copy.
    return out[:, :out_feature]


def _reference(x, weight, bias, *, is_first=False):
    w0 = 1.0 if is_first else 30.0
    return jnp.sin(w0 * (x @ weight.T + bias))


if __name__ == "__main__":
    key = jax.random.PRNGKey(0)
    k_x, k_w, k_b, k_x2, k_w2, k_b2 = jax.random.split(key, 6)

    # ---- Test 1: hidden layer (w0=30), lane-aligned width -> no padding/slice.
    batch, in_feature, out_feature = 200, 32, 256
    bound = float(np.sqrt(6.0 / in_feature))
    weight = jax.random.uniform(k_w, (out_feature, in_feature), jnp.float32,
                                minval=-bound, maxval=bound)
    bias = jax.random.uniform(k_b, (out_feature,), jnp.float32,
                              minval=-1.0 / np.sqrt(in_feature),
                              maxval=1.0 / np.sqrt(in_feature))
    x = jax.random.normal(k_x, (batch, in_feature), jnp.float32)

    wt_pad, b_pad = prepare_sine_layer_params(weight, bias, is_first=False)
    out = jax.block_until_ready(sine_layer(x, wt_pad, b_pad, out_feature))
    ref = _reference(x, weight, bias, is_first=False)
    np.testing.assert_allclose(np.asarray(out), np.asarray(ref),
                               rtol=5e-4, atol=5e-4)

    # ---- Test 2: first layer (w0=1), ragged batch + lane-padded out_feature.
    batch2, in_feature2, out_feature2 = 203, 16, 64   # 203 -> ragged last block
    bound2 = 1.0 / in_feature2
    weight2 = jax.random.uniform(k_w2, (out_feature2, in_feature2), jnp.float32,
                                 minval=-bound2, maxval=bound2)
    bias2 = jax.random.uniform(k_b2, (out_feature2,), jnp.float32,
                               minval=-1.0 / np.sqrt(in_feature2),
                               maxval=1.0 / np.sqrt(in_feature2))
    x2 = jax.random.normal(k_x2, (batch2, in_feature2), jnp.float32)

    wt_pad2, b_pad2 = prepare_sine_layer_params(weight2, bias2, is_first=True)
    out2 = jax.block_until_ready(
        sine_layer(x2, wt_pad2, b_pad2, out_feature2, tile_rows=64))
    ref2 = _reference(x2, weight2, bias2, is_first=True)
    np.testing.assert_allclose(np.asarray(out2), np.asarray(ref2),
                               rtol=5e-4, atol=5e-4)

    # ---- Test 3: bf16 output path (halves dominant write traffic); f32 compute.
    out_bf16 = jax.block_until_ready(
        sine_layer(x, wt_pad, b_pad, out_feature, out_dtype=jnp.bfloat16))
    np.testing.assert_allclose(np.asarray(out_bf16, dtype=np.float32),
                               np.asarray(ref), rtol=2e-2, atol=2e-2)

    print("KERNEL_OK")
</pallas_src>

<mosaic_0001>
module attributes {stable_mosaic.version = 11 : i64} {
  func.func @_sine_layer_kernel(%arg0: i32, %arg1: memref<200x32xf32, #tpu.memory_space<vmem>>, %arg2: memref<32x256xf32, #tpu.memory_space<vmem>>, %arg3: memref<1x256xf32, #tpu.memory_space<vmem>>, %arg4: memref<200x256xf32, #tpu.memory_space<vmem>>) attributes {dimension_semantics = [#tpu.dimension_semantics<parallel>], iteration_bounds = array<i64: 1>, scalar_prefetch = 0 : i64, scratch_operands = 0 : i64, tpu.core_type = #tpu.core_type<tc>, window_params = [{transform_indices = @transform_0, window_bounds = array<i64: 200, 32>}, {pipeline_mode = #tpu.pipeline_mode<synchronous>, transform_indices = @transform_1, window_bounds = array<i64: 32, 256>}, {pipeline_mode = #tpu.pipeline_mode<synchronous>, transform_indices = @transform_2, window_bounds = array<i64: 1, 256>}, {transform_indices = @transform_3, window_bounds = array<i64: 200, 256>}]} {
    %c0 = arith.constant 0 : index
    %c0_0 = arith.constant 0 : index
    %0 = vector.load %arg1[%c0, %c0_0] : memref<200x32xf32, #tpu.memory_space<vmem>>, vector<200x32xf32>
    %c0_1 = arith.constant 0 : index
    %c0_2 = arith.constant 0 : index
    %1 = vector.load %arg2[%c0_1, %c0_2] : memref<32x256xf32, #tpu.memory_space<vmem>>, vector<32x256xf32>
    %cst = arith.constant dense<0.000000e+00> : vector<200x256xf32>
    %2 = tpu.matmul %0, %1, %cst {dimension_numbers = #tpu.dot_dimension_numbers<[1], [0], [0], [1], [0, 0, 1, 1], [], []>} : vector<200x32xf32>, vector<32x256xf32>, vector<200x256xf32> -> vector<200x256xf32>
    %c0_3 = arith.constant 0 : index
    %c0_4 = arith.constant 0 : index
    %3 = vector.load %arg3[%c0_3, %c0_4] : memref<1x256xf32, #tpu.memory_space<vmem>>, vector<1x256xf32>
    %4 = vector.broadcast %3 : vector<1x256xf32> to vector<200x256xf32>
    %5 = arith.addf %2, %4 : vector<200x256xf32>
    %6 = math.sin %5 : vector<200x256xf32>
    %c0_5 = arith.constant 0 : index
    %c0_6 = arith.constant 0 : index
    %7 = vector.load %arg4[%c0_5, %c0_6] : memref<200x256xf32, #tpu.memory_space<vmem>>, vector<200x256xf32>
    tpu.vector_store %arg4[%c0_5, %c0_6], %6 {strides = array<i32>} : memref<200x256xf32, #tpu.memory_space<vmem>>, vector<200x256xf32>,
    return
  }
  func.func @transform_0(%arg0: i32) -> (i32, i32) {
    %c0_i32 = arith.constant 0 : i32
    %c0_i32_0 = arith.constant 0 : i32
    return %arg0, %c0_i32 : i32, i32
  }
  func.func @transform_1(%arg0: i32) -> (i32, i32) {
    %c0_i32 = arith.constant 0 : i32
    %c0_i32_0 = arith.constant 0 : i32
    %c0_i32_1 = arith.constant 0 : i32
    return %c0_i32, %c0_i32_0 : i32, i32
  }
  func.func @transform_2(%arg0: i32) -> (i32, i32) {
    %c0_i32 = arith.constant 0 : i32
    %c0_i32_0 = arith.constant 0 : i32
    %c0_i32_1 = arith.constant 0 : i32
    return %c0_i32, %c0_i32_0 : i32, i32
  }
  func.func @transform_3(%arg0: i32) -> (i32, i32) {
    %c0_i32 = arith.constant 0 : i32
    %c0_i32_0 = arith.constant 0 : i32
    return %arg0, %c0_i32 : i32, i32
  }
}

</mosaic_0001>

<bundles_post_ra>
// kernel: tpu_custom_call.1
= control target key start
LH: loop header
LB: loop body
LE: loop exit
PB: predicated region body
PF: predicated region fallthrough
CT: control target
= control target key end

     0   :  { %v6288_v7 = vmov 0.0   ;;  %vm60_vm0 = vcmask 261120   ;;  %s10511_s0 = inlined_call_operand.vmem [shape: f32[200,32], index: 0, kind: input, shape index: {}]   ;;  %s10512_s1 = inlined_call_operand.vmem [shape: f32[32,256], index: 1, kind: input, shape index: {}]   ;;  %s10513_s2 = inlined_call_operand.vmem [shape: f32[1,256], index: 2, kind: input, shape index: {}]   ;;  %s10514_s3 = inlined_call_operand.hbm [shape: f32[200,256], index: 3, kind: output, shape index: {}]  }
   0x1   :  { %v41_v0 = vld [vmem:[%s10512_s1 + $0x8] sm:$0xff]  ;;  %v43_v1 = vld [vmem:[%s10512_s1 + $0x18] sm:$0xff]  ;;  %v40_v2 = vld [vmem:[%s10512_s1] sm:$0xff]  ;;  %200 = vmatprep.mubr.f32.mxu0 %v6288_v7  ;;  %278 = vmatprep.mubr.f32.mxu1 %v6288_v7 }
   0x2   :  { %v5842_v3 = vpack.c.bf16 %v43_v1, %v41_v0  ;;  %v42_v4 = vld [vmem:[%s10512_s1 + $0x10] sm:$0xff]  ;;  %v45_v5 = vld [vmem:[%s10512_s1 + $0x28] sm:$0xff]  ;;  %v47_v6 = vld [vmem:[%s10512_s1 + $0x38] sm:$0xff] }
   0x3   :  { %v5844_v8 = vpack.c.bf16 %v42_v4, %v40_v2  ;;  %v5846_v9 = vpack.c.bf16 %v47_v6, %v45_v5  ;;  %v44_v10 = vld [vmem:[%s10512_s1 + $0x20] sm:$0xff]  ;;  %v46_v11 = vld [vmem:[%s10512_s1 + $0x30] sm:$0xff]  ;;  %v28_v14 = vld [vmem:[%s10511_s0 + $0x68] sm:$0xff] }
   0x4   :  { %5843 = vmatprep.subr.bf16.mxu0 %v5842_v3  ;;  %5850 = vmatprep.subr.bf16.mxu1 %v5842_v3  ;;  %v5848_v12 = vpack.c.bf16 %v46_v11, %v44_v10  ;;  %v15_v13 = vld [vmem:[%s10511_s0] sm:$0xff] }
   0x5   :  { %5845 = vmatpush1.bf16.msra.mxu0 %v5844_v8  ;;  %5852 = vmatpush1.bf16.msra.mxu1 %v5844_v8 }
   0x6   :  { %5847 = vmatprep.subr.bf16.mxu0 %v5846_v9  ;;  %5851 = vmatprep.subr.bf16.mxu1 %v5846_v9 }
   0x9   :  { %5849 = vmatpush1.bf16.msra.mxu0 %v5848_v12  ;;  %5853 = vmatpush1.bf16.msra.mxu1 %v5848_v12 }
   0xc   :  { %5617 = vmatmul.mubr.msk.f32.vlgmr.msra.gmra.mrb[0].mxu0 %vm60_vm0, %v15_v13  ;;  %5630 = vmatmul.mubr.msk.f32.vlgmr.msra.gmra.mrb[0].mxu1 %vm60_vm0, %v28_v14 }
   0xd   :  { %8 = vsyncpa [#allocation3], 0  ;;  %206 = vmatprep.mubr.f32.mxu0 %v6288_v7  ;;  %284 = vmatprep.mubr.f32.mxu1 %v6288_v7  ;;  %v16_v15 = vld [vmem:[%s10511_s0 + $0x8] sm:$0xff]  ;;  %v29_v16 = vld [vmem:[%s10511_s0 + $0x70] sm:$0xff]  ;;  %v50_v38 = vlaneseq }
   0xe   :  { %v17_v17 = vld [vmem:[%s10511_s0 + $0x10] sm:$0xff]  ;;  %v30_v18 = vld [vmem:[%s10511_s0 + $0x78] sm:$0xff]  ;;  %v31_v20 = vld [vmem:[%s10511_s0 + $0x80] sm:$0xff] }
   0xf   :  { %v18_v19 = vld [vmem:[%s10511_s0 + $0x18] sm:$0xff]  ;;  %v19_v21 = vld [vmem:[%s10511_s0 + $0x20] sm:$0xff]  ;;  %v32_v22 = vld [vmem:[%s10511_s0 + $0x88] sm:$0xff]  ;;  %v51_v39 = vshrl.u32 %v50_v38, 7  ;;  %v6294_v38 = vmov 1326507024  }
  0x10   :  { %5618 = vmatmul.mubr.msk.f32.gmra.mrb[2].mxu0 %vm60_vm0, %v16_v15  ;;  %5631 = vmatmul.mubr.msk.f32.gmra.mrb[2].mxu1 %vm60_vm0, %v29_v16  ;;  %v20_v23 = vld [vmem:[%s10511_s0 + $0x28] sm:$0xff]  ;;  %v33_v24 = vld [vmem:[%s10511_s0 + $0x90] sm:$0xff]  ;;  %v34_v26 = vld [vmem:[%s10511_s0 + $0x98] sm:$0xff] }
  0x11   :  { %212 = vmatprep.mubr.f32.mxu0 %v6288_v7  ;;  %290 = vmatprep.mubr.f32.mxu1 %v6288_v7  ;;  %v21_v25 = vld [vmem:[%s10511_s0 + $0x30] sm:$0xff]  ;;  %v22_v27 = vld [vmem:[%s10511_s0 + $0x38] sm:$0xff]  ;;  %v35_v28 = vld [vmem:[%s10511_s0 + $0xa0] sm:$0xff]  ;;  %v52_v40 = vsub.s32 0, %v51_v39  ;;  %v56_v42 = vsub.s32 1, %v51_v39 }
  0x12   :  { %v23_v29 = vld [vmem:[%s10511_s0 + $0x40] sm:$0xff]  ;;  %v36_v30 = vld [vmem:[%s10511_s0 + $0xa8] sm:$0xff]  ;;  %v37_v32 = vld [vmem:[%s10511_s0 + $0xb0] sm:$0xff] }
  0x13   :  { %v24_v31 = vld [vmem:[%s10511_s0 + $0x48] sm:$0xff]  ;;  %v25_v33 = vld [vmem:[%s10511_s0 + $0x50] sm:$0xff]  ;;  %v38_v34 = vld [vmem:[%s10511_s0 + $0xb8] sm:$0xff] }
  0x14   :  { %5619 = vmatmul.mubr.msk.f32.gmra.mrb[4].mxu0 %vm60_vm0, %v17_v17  ;;  %5632 = vmatmul.mubr.msk.f32.gmra.mrb[4].mxu1 %vm60_vm0, %v30_v18  ;;  %v26_v35 = vld [vmem:[%s10511_s0 + $0x58] sm:$0xff]  ;;  %v39_v36 = vld [vmem:[%s10511_s0 + $0xc0] sm:$0xff] }
  0x15   :  { %218 = vmatprep.mubr.f32.mxu0 %v6288_v7  ;;  %296 = vmatprep.mubr.f32.mxu1 %v6288_v7  ;;  %v27_v37 = vld [vmem:[%s10511_s0 + $0x60] sm:$0xff]  ;;  %s6295_s0 = smov [#allocation2]  }
  0x16   :  { %v48_v41 = vld [vmem:[%s10513_s2] sm:$0x3]  ;;  %s5606_s2 = sshll.u32 %s6295_s0, 4  ;;  %s5607_s2 = int_to_ptr.vmem [resolvable:$true] %s5606_s2 }
  0x17   :  { %v6470_v43 = vrot.slane %v48_v41, %v52_v40  ;;  %v6472_v44 = vrot.slane %v48_v41, %v56_v42  ;;  %s6264_s24 = scalar_lea.vmem %s5607_s2, 6400  ;;  %p6269_p1 = scmp.lt.s32.totalorder %s5607_s2, %s5607_s2 }
  0x18   :  { %5620 = vmatmul.mubr.msk.f32.gmra.mrb[6].mxu0 %vm60_vm0, %v18_v19  ;;  %5633 = vmatmul.mubr.msk.f32.gmra.mrb[6].mxu1 %vm60_vm0, %v31_v20  ;;  %p6265_p0 = scmp.ne.s32.totalorder %s5607_s2, %s6264_s24  ;;  %p6270_p2 = scmp.lt.s32.totalorder %s6264_s24, %s6264_s24 }
  0x19   :  { %224 = vmatprep.mubr.f32.mxu0 %v6288_v7  ;;  %302 = vmatprep.mubr.f32.mxu1 %v6288_v7 }
  0x1a   :  { %p6271_p3 = por %p6270_p2, %p6269_p1 }
  0x1c   :  { %5621 = vmatmul.mubr.msk.f32.gmra.mrb[8].mxu0 %vm60_vm0, %v19_v21  ;;  %5634 = vmatmul.mubr.msk.f32.gmra.mrb[8].mxu1 %vm60_vm0, %v32_v22  ;;  %v6289_v21 = vmov 683565275   ;;  %p6272_p4 = pnand %p6271_p3, %p6265_p0 }
  0x1d   :  { %230 = vmatprep.mubr.f32.mxu0 %v6288_v7  ;;  %308 = vmatprep.mubr.f32.mxu1 %v6288_v7 }
  0x20   :  { %5622 = vmatmul.mubr.msk.f32.gmra.mrb[10].mxu0 %vm60_vm0, %v20_v23  ;;  %5635 = vmatmul.mubr.msk.f32.gmra.mrb[10].mxu1 %vm60_vm0, %v33_v24 }
  0x21   :  { %236 = vmatprep.mubr.f32.mxu0 %v6288_v7  ;;  %314 = vmatprep.mubr.f32.mxu1 %v6288_v7 }
  0x24   :  { %5623 = vmatmul.mubr.msk.f32.gmra.mrb[12].mxu0 %vm60_vm0, %v21_v25  ;;  %5636 = vmatmul.mubr.msk.f32.gmra.mrb[12].mxu1 %vm60_vm0, %v34_v26  ;;  %v6290_v25 = vmov 2475754826  }
  0x25   :  { %242 = vmatprep.mubr.f32.mxu0 %v6288_v7  ;;  %320 = vmatprep.mubr.f32.mxu1 %v6288_v7 }
  0x28   :  { %5624 = vmatmul.mubr.msk.f32.gmra.mrb[14].mxu0 %vm60_vm0, %v22_v27  ;;  %5637 = vmatmul.mubr.msk.f32.gmra.mrb[14].mxu1 %vm60_vm0, %v35_v28  ;;  %v6291_v27 = vmov 2131351028  }
  0x29   :  { %248 = vmatprep.mubr.f32.mxu0 %v6288_v7  ;;  %326 = vmatprep.mubr.f32.mxu1 %v6288_v7 }
  0x2c   :  { %5625 = vmatmul.mubr.msk.f32.gmra.mrb[16].mxu0 %vm60_vm0, %v23_v29  ;;  %5638 = vmatmul.mubr.msk.f32.gmra.mrb[16].mxu1 %vm60_vm0, %v36_v30  ;;  %v6292_v29 = vmov 2102212464  }
  0x2d   :  { %254 = vmatprep.mubr.f32.mxu0 %v6288_v7  ;;  %332 = vmatprep.mubr.f32.mxu1 %v6288_v7 }
  0x30   :  { %5626 = vmatmul.mubr.msk.f32.gmra.mrb[18].mxu0 %vm60_vm0, %v24_v31  ;;  %5639 = vmatmul.mubr.msk.f32.gmra.mrb[18].mxu1 %vm60_vm0, %v37_v32  ;;  %v6293_v31 = vmov 920167782  }
  0x31   :  { %260 = vmatprep.mubr.f32.mxu0 %v6288_v7  ;;  %338 = vmatprep.mubr.f32.mxu1 %v6288_v7 }
  0x34   :  { %5627 = vmatmul.mubr.msk.f32.gmra.mrb[20].mxu0 %vm60_vm0, %v25_v33  ;;  %5640 = vmatmul.mubr.msk.f32.gmra.mrb[20].mxu1 %vm60_vm0, %v38_v34 }
  0x35   :  { %266 = vmatprep.mubr.f32.mxu0 %v6288_v7  ;;  %344 = vmatprep.mubr.f32.mxu1 %v6288_v7 }
  0x38   :  { %5628 = vmatmul.mubr.msk.f32.gmra.mrb[22].mxu0 %vm60_vm0, %v26_v35  ;;  %5641 = vmatmul.mubr.msk.f32.gmra.mrb[22].mxu1 %vm60_vm0, %v39_v36 }
  0x39   :  { %272 = vmatprep.mubr.f32.mxu0 %v6288_v7 }
  0x3c   :  { %5629 = vmatmul.mubr.msk.f32.gmra.mrb[24].mxu0 %vm60_vm0, %v27_v37 }
  0xdf   :  { %v202_v45 = vpop.f32.mrb[0].mxu0  ;;  %v280_v46 = vpop.f32.mrb[0].mxu1 }
  0xe0   :  { %v6475_v47 = vadd.f32 %v202_v45, %v6470_v43  ;;  %v6478_v48 = vadd.f32 %v280_v46, %v6470_v43  ;;  %v204_v49 = vpop.f32.mrb[1].mxu0  ;;  %v282_v50 = vpop.f32.mrb[1].mxu1 }
  0xe1   :  { %v6481_v51 = vadd.f32 %v204_v49, %v6472_v44  ;;  %v6499_v5 = vadd.f32 %v282_v50, %v6472_v44 }
  0xe2   :  { %v351_v52 = vand.u32 2147483647, %v6475_v47  ;;  %v354_v53 = vand.u32 2139095040, %v6475_v47  ;;  %v3055_v54 = vand.u32 2147483647, %v6478_v48  ;;  %v3058_v55 = vand.u32 2139095040, %v6478_v48 }
  0xe3   :  { %v6487_v56 = vpop.f32.mrb[2].mxu0  ;;  %v6489_v57 = vpop.f32.mrb[2].mxu1  ;;  %v458_v62 = vand.u32 2139095040, %v6481_v51  ;;  %v455_v8 = vand.u32 2147483647, %v6481_v51  ;;  %v3162_v19 = vand.u32 2139095040, %v6499_v5 }
  0xe4   :  { %v355_v58 = vshrl.u32 %v354_v53, 23  ;;  %v358_v59 = vand.u32 8388607, %v351_v52  ;;  %v3059_v60 = vshrl.u32 %v3058_v55, 23  ;;  %v3062_v61 = vand.u32 8388607, %v3055_v54 }
  0xe5   :  { %v6496_v0 = vpop.f32.mrb[3].mxu0  ;;  %v459_v2 = vshrl.u32 %v458_v62, 23  ;;  %v6502_v10 = vpop.f32.mrb[3].mxu1  ;;  %v6510_v17 = vand.u32 8388607, %v455_v8  ;;  %vm353_vm13 = vcmp.lt.s32.totalorder %v6475_v47, 0 }
  0xe6   :  { %v5642_v63 = vadd.s32 4294967169, %v355_v58  ;;  %v5746_v1 = vadd.s32 4294967169, %v3059_v60  ;;  %v359_v3 = vor.u32 8388608, %v358_v59  ;;  %v3063_v6 = vor.u32 8388608, %v3062_v61 }
  0xe7   :  { %v5646_v9 = vadd.s32 4294967169, %v459_v2  ;;  %vm6590_vm14 = vcmp.le.f32.partialorder %v351_v52, 0.7853982  ;;  %vm3057_vm0 = vcmp.lt.s32.totalorder %v6478_v48, 0 }
  0xe8   :  { %v361_v4 = vadd.s32 1, %v5642_v63  ;;  %v3065_v7 = vadd.s32 1, %v5746_v1  ;;  %v6504_v14 = vshll.u32 %v359_v3, 8  ;;  %v6506_v16 = vshll.u32 %v3063_v6, 8 }
  0xe9   :  { %v6512_v18 = vadd.s32 1, %v5646_v9 }
  0xea   :  { %vm362_vm1 = vcmp.gt.s32.totalorder %v361_v4, 0  ;;  %vm3066_vm2 = vcmp.gt.s32.totalorder %v3065_v7, 0 }
  0xeb   :  { %v363_v11 = vsel %vm362_vm1, %v361_v4, 0  ;;  %v3067_v15 = vsel %vm3066_vm2, %v3065_v7, 0  ;;  %vm466_vm6 = vcmp.gt.s32.totalorder %v6512_v18, 0 }
  0xec   :  { %v364_v12 = vshrl.u32 %v363_v11, 5  ;;  %v365_v13 = vand.u32 31, %v363_v11  ;;  %v6516_v23 = vshrl.u32 %v3067_v15, 5  ;;  %v3069_v24 = vand.u32 31, %v3067_v15 }
  0xee   :  { %v366_v20 = vsub.s32 32, %v365_v13  ;;  %v368_v22 = vshll.u32 %v6289_v21, %v365_v13  ;;  %v371_v26 = vshll.u32 %v6290_v25, %v365_v13  ;;  %v374_v28 = vshll.u32 %v6291_v27, %v365_v13 }
  0xef   :  { %v377_v30 = vshll.u32 %v6292_v29, %v365_v13  ;;  %v380_v32 = vshll.u32 %v6293_v31, %v365_v13  ;;  %vm383_vm3 = vcmp.lt.s32.totalorder %v364_v12, 1  ;;  %vm385_vm4 = vcmp.lt.s32.totalorder %v364_v12, 3 }
  0xf0   :  { %v369_v33 = vshrl.u32 %v6290_v25, %v366_v20  ;;  %v372_v34 = vshrl.u32 %v6291_v27, %v366_v20  ;;  %v375_v35 = vshrl.u32 %v6292_v29, %v366_v20  ;;  %v367_v36 = vshrl.u32 %v6289_v21, %v366_v20 }
  0xf1   :  { %v378_v37 = vshrl.u32 %v6293_v31, %v366_v20  ;;  %v381_v39 = vshrl.u32 %v6294_v38, %v366_v20  ;;  %v3070_v45 = vsub.s32 32, %v3069_v24  ;;  %vm386_vm5 = vcmp.lt.s32.totalorder %v364_v12, 4 }
  0xf2   :  { %v370_v40 = vor.u32 %v369_v33, %v368_v22  ;;  %v373_v41 = vor.u32 %v372_v34, %v371_v26  ;;  %v376_v42 = vor.u32 %v375_v35, %v374_v28  ;;  %v3072_v50 = vshll.u32 %v6289_v21, %v3069_v24 }
  0xf3   :  { %v379_v46 = vor.u32 %v378_v37, %v377_v30  ;;  %v382_v49 = vor.u32 %v381_v39, %v380_v32  ;;  %v3075_v63 = vshll.u32 %v6290_v25, %v3069_v24  ;;  %vm384_vm7 = vcmp.lt.s32.totalorder %v364_v12, 2 }
  0xf4   :  { %v387_v53 = vsel %vm383_vm3, %v367_v36, %v370_v40  ;;  %v388_v55 = vsel %vm386_vm5, %v376_v42, 2102212464  ;;  %v391_v58 = vsel %vm383_vm3, %v370_v40, %v373_v41  ;;  %v395_v59 = vsel %vm383_vm3, %v373_v41, %v376_v42 }
  0xf5   :  { %v389_v60 = vsel %vm385_vm4, %v373_v41, %v388_v55  ;;  %v392_v61 = vsel %vm386_vm5, %v379_v46, 920167782  ;;  %v396_v62 = vsel %vm386_vm5, %v382_v49, 1326507024  ;;  %v3073_v3 = vshrl.u32 %v6290_v25, %v3070_v45 }
  0xf6   :  { %v393_v1 = vsel %vm385_vm4, %v376_v42, %v392_v61  ;;  %v397_v2 = vsel %vm385_vm4, %v379_v46, %v396_v62  ;;  %v390_v4 = vsel %vm384_vm7, %v387_v53, %v389_v60  ;;  %v3076_v9 = vshrl.u32 %v6291_v27, %v3070_v45 }
  0xf7   :  { %v394_v6 = vsel %vm384_vm7, %v391_v58, %v393_v1  ;;  %v398_v7 = vsel %vm384_vm7, %v395_v59, %v397_v2  ;;  %v3074_v22 = vor.u32 %v3073_v3, %v3072_v50  ;;  %v3078_v12 = vshll.u32 %v6291_v27, %v3069_v24 }
  0xf8   :  { %v6540_v11 = vmul.u32.u64.low %v6504_v14, %v398_v7  ;;  %v6541_v13 = vmul.u32.u64.high %v6504_v14, %v398_v7, %v6540_v11  ;;  %v6544_v15 = vmul.u32.u64.low %v6504_v14, %v394_v6  ;;  %v6545_v20 = vmul.u32.u64.high %v6504_v14, %v394_v6, %v6544_v15 }
  0xf9   :  { %v3077_v26 = vor.u32 %v3076_v9, %v3075_v63  ;;  %v3079_v28 = vshrl.u32 %v6292_v29, %v3070_v45  ;;  %v3081_v30 = vshll.u32 %v6292_v29, %v3069_v24  ;;  %v3082_v32 = vshrl.u32 %v6293_v31, %v3070_v45 }
  0xfa   :  { %v3084_v33 = vshll.u32 %v6293_v31, %v3069_v24  ;;  %v3085_v34 = vshrl.u32 %v6294_v38, %v3070_v45  ;;  %v406_v35 = vmul.u32 %v6504_v14, %v390_v4  ;;  %v3071_v36 = vshrl.u32 %v6289_v21, %v3070_v45 }
  0xfb   :  { %v3080_v37 = vor.u32 %v3079_v28, %v3078_v12  ;;  %vm3087_vm8 = vcmp.lt.s32.totalorder %v6516_v23, 1  ;;  %vm408_vm9 = vc.u32 %v6541_v13, %v6544_v15  ;;  %v409_v39 = vadd.s32 1, %v6545_v20 }
  0xfc   :  { %v3083_v40 = vor.u32 %v3082_v32, %v3081_v30  ;;  %vm3088_vm10 = vcmp.lt.s32.totalorder %v6516_v23, 2  ;;  %v3086_v41 = vor.u32 %v3085_v34, %v3084_v33  ;;  %vm3089_vm11 = vcmp.lt.s32.totalorder %v6516_v23, 3 }
  0xfd   :  { %vm3090_vm12 = vcmp.lt.s32.totalorder %v6516_v23, 4  ;;  %v3095_v24 = vsel %vm3087_vm8, %v3074_v22, %v3077_v26  ;;  %v410_v14 = vsel %vm408_vm9, %v409_v39, %v6545_v20  ;;  %v3099_v46 = vsel %vm3087_vm8, %v3077_v26, %v3080_v37  ;;  %v6583_v20 = vpop.f32.mrb[4].mxu0 }
  0xfe   :  { %v3092_v42 = vsel %vm3090_vm12, %v3080_v37, 2102212464  ;;  %v3096_v45 = vsel %vm3090_vm12, %v3083_v40, 920167782  ;;  %v411_v49 = vadd.s32 %v410_v14, %v406_v35  ;;  %v3091_v50 = vsel %vm3087_vm8, %v3071_v36, %v3074_v22 }
  0xff   :  { %v3097_v53 = vsel %vm3089_vm11, %v3080_v37, %v3096_v45  ;;  %v3100_v55 = vsel %vm3090_vm12, %v3086_v41, 1326507024  ;;  %v3093_v58 = vsel %vm3089_vm11, %v3077_v26, %v3092_v42  ;;  %v467_v61 = vsel %vm466_vm6, %v6512_v18, 0 }
 0x100   :  { %v3098_v59 = vsel %vm3088_vm10, %v3095_v24, %v3097_v53  ;;  %v3101_v60 = vsel %vm3089_vm11, %v3083_v40, %v3100_v55  ;;  %v412_v62 = vadd.s32 536870912, %v411_v49  ;;  %v3159_v6 = vand.u32 2147483647, %v6499_v5 }
 0x101   :  { %v3102_v63 = vsel %vm3088_vm10, %v3099_v46, %v3101_v60  ;;  %v6570_v1 = vmul.u32.u64.low %v6506_v16, %v3098_v59  ;;  %v6571_v2 = vmul.u32.u64.high %v6506_v16, %v3098_v59, %v6570_v1  ;;  %v3094_v9 = vsel %vm3088_vm10, %v3091_v50, %v3093_v58 }
 0x102   :  { %v6575_v3 = vmul.u32.u64.low %v6506_v16, %v3102_v63  ;;  %v6576_v4 = vmul.u32.u64.high %v6506_v16, %v3102_v63, %v6575_v3  ;;  %v413_v7 = vshrl.u32 %v412_v62, 30  ;;  %v463_v18 = vor.u32 8388608, %v6510_v17 }
 0x103   :  { %v469_v11 = vand.u32 31, %v467_v61  ;;  %v3113_v26 = vadd.s32 1, %v6571_v2  ;;  %v3163_v28 = vshrl.u32 %v3162_v19, 23  ;;  %v3110_v17 = vmul.u32 %v6506_v16, %v3094_v9 }
 0x104   :  { %v414_v22 = vshll.u32 %v413_v7, 30  ;;  %vm3112_vm15 = vc.u32 %v6576_v4, %v6570_v1  ;;  %v6599_v23 = vand.u32 8388607, %v3159_v6  ;;  %v437_v33 = vsub.s32 4, %v413_v7 }
 0x105   :  { %v470_v12 = vsub.s32 32, %v469_v11  ;;  %v3114_v19 = vsel %vm3112_vm15, %v3113_v26, %v6571_v2  ;;  %v6604_v34 = vshll.u32 %v463_v18, 8  ;;  %v407_v52 = vadd.s32 %v6544_v15, %v6541_v13 }
 0x106   :  { %v6601_v32 = vsub.s32 %v411_v49, %v414_v22  ;;  %v3115_v35 = vadd.s32 %v3114_v19, %v3110_v17  ;;  %v6607_v36 = vshrl.u32 %v467_v61, 5  ;;  %v5750_v41 = vadd.s32 4294967169, %v3163_v28 }
 0x107   :  { %v473_v16 = vshrl.u32 %v6290_v25, %v470_v12  ;;  %v476_v39 = vshrl.u32 %v6291_v27, %v470_v12  ;;  %v479_v40 = vshrl.u32 %v6292_v29, %v470_v12  ;;  %v472_v14 = vshll.u32 %v6289_v21, %v469_v11 }
 0x108   :  { %v417_v37 = vsub.s32 0, %v6601_v32  ;;  %v3116_v24 = vadd.s32 536870912, %v3115_v35  ;;  %v475_v42 = vshll.u32 %v6290_v25, %v469_v11  ;;  %v3167_v45 = vor.u32 8388608, %v6599_v23 }
 0x109   :  { %v438_v15 = vsel %vm353_vm13, %v437_v33, %v413_v7  ;;  %v478_v46 = vshll.u32 %v6291_v27, %v469_v11  ;;  %v482_v49 = vshrl.u32 %v6293_v31, %v470_v12  ;;  %v474_v53 = vor.u32 %v473_v16, %v472_v14 }
 0x10a   :  { %v5643_v13 = vmin.u32 %v417_v37, %v6601_v32  ;;  %v3117_v50 = vshrl.u32 %v3116_v24, 30  ;;  %v481_v55 = vshll.u32 %v6292_v29, %v469_v11  ;;  %v485_v58 = vshrl.u32 %v6294_v38, %v470_v12 }
 0x10b   :  { %v477_v60 = vor.u32 %v476_v39, %v475_v42  ;;  %v480_v61 = vor.u32 %v479_v40, %v478_v46  ;;  %v484_v62 = vshll.u32 %v6293_v31, %v469_v11  ;;  %v440_v63 = vsel %vm6590_vm14, 0, %v438_v15 }
 0x10c   :  { %v419_v59 = vclz %v5643_v13  ;;  %v3118_v2 = vshll.u32 %v3117_v50, 30  ;;  %v483_v3 = vor.u32 %v482_v49, %v481_v55  ;;  %vm487_vm1 = vcmp.lt.s32.totalorder %v6607_v36, 1 }
 0x10d   :  { %v486_v9 = vor.u32 %v485_v58, %v484_v62  ;;  %vm488_vm2 = vcmp.lt.s32.totalorder %v6607_v36, 2  ;;  %vm490_vm3 = vcmp.lt.s32.totalorder %v6607_v36, 4  ;;  %v471_v22 = vshrl.u32 %v6289_v21, %v470_v12  ;;  %v6669_v62 = vpop.f32.mrb[4].mxu1 }
 0x10e   :  { %v5644_v7 = vadd.s32 4294967294, %v419_v59  ;;  %v6630_v18 = vsub.s32 %v3115_v35, %v3118_v2  ;;  %vm489_vm4 = vcmp.lt.s32.totalorder %v6607_v36, 3  ;;  %v496_v11 = vsel %vm490_vm3, %v483_v3, 920167782 }
 0x10f   :  { %v444_v26 = vadd.s32 3, %v440_v63  ;;  %vm6638_vm6 = vcmp.le.f32.partialorder %v3055_v54, 0.7853982  ;;  %v495_v17 = vsel %vm487_vm1, %v474_v53, %v477_v60  ;;  %v497_v33 = vsel %vm489_vm4, %v480_v61, %v496_v11 }
 0x110   :  { %vm5645_vm5 = vcmp.lt.s32.totalorder %v5644_v7, 0  ;;  %v3121_v19 = vsub.s32 0, %v6630_v18  ;;  %v3141_v35 = vsub.s32 4, %v3117_v50  ;;  %v499_v16 = vsel %vm487_vm1, %v477_v60, %v480_v61 }
 0x111   :  { %v422_v12 = vsel %vm5645_vm5, 0, %v5644_v7  ;;  %v492_v54 = vsel %vm490_vm3, %v480_v61, 2102212464  ;;  %v500_v40 = vsel %vm490_vm3, %v486_v9, 1326507024  ;;  %v498_v42 = vsel %vm488_vm2, %v495_v17, %v497_v33 }
 0x112   :  { %v423_v37 = vsub.s32 32, %v422_v12  ;;  %v427_v39 = vsub.s32 4294967266, %v422_v12  ;;  %v424_v24 = vshll.u32 %v6601_v32, %v422_v12  ;;  %v5747_v14 = vmin.u32 %v3121_v19, %v6630_v18 }
 0x113   :  { %v501_v13 = vsel %vm489_vm4, %v483_v3, %v500_v40  ;;  %v3169_v55 = vadd.s32 1, %v5750_v41  ;;  %v6663_v59 = vsel %vm3057_vm0, %v3141_v35, %v3117_v50  ;;  %v491_v32 = vsel %vm487_vm1, %v471_v22, %v474_v53 }
 0x114   :  { %v425_v15 = vshrl.u32 %v407_v52, %v423_v37  ;;  %v428_v46 = vadd.s32 127, %v427_v39  ;;  %v502_v49 = vsel %vm488_vm2, %v499_v16, %v501_v13  ;;  %v3123_v58 = vclz %v5747_v14 }
 0x115   :  { %v493_v61 = vsel %vm489_vm4, %v477_v60, %v492_v54  ;;  %v6672_v2 = vmul.u32.u64.low %v6604_v34, %v502_v49  ;;  %v6673_v3 = vmul.u32.u64.high %v6604_v34, %v502_v49, %v6672_v2  ;;  %vm3170_vm7 = vcmp.gt.s32.totalorder %v3169_v55, 0 }
 0x116   :  { %v426_v63 = vor.u32 %v425_v15, %v424_v24  ;;  %v429_v52 = vshll.u32 %v428_v46, 23  ;;  %v5748_v41 = vadd.s32 4294967294, %v3123_v58  ;;  %v3111_v53 = vadd.s32 %v6570_v1, %v6576_v4 }
 0x117   :  { %v6676_v7 = vmul.u32.u64.low %v6604_v34, %v498_v42  ;;  %v6677_v9 = vmul.u32.u64.high %v6604_v34, %v498_v42, %v6676_v7  ;;  %v494_v60 = vsel %vm488_vm2, %v491_v32, %v493_v61  ;;  %v3171_v22 = vsel %vm3170_vm7, %v3169_v55, 0 }
 0x118   :  { %v430_v50 = vor.u32 4788187, %v429_v52  ;;  %v6684_v11 = vand.u32 3, %v444_v26  ;;  %vm5749_vm8 = vcmp.lt.s32.totalorder %v5748_v41, 0  ;;  %v3144_v17 = vsel %vm6638_vm6, 0, %v6663_v59 }
 0x119   :  { %v3173_v33 = vand.u32 31, %v3171_v22  ;;  %v433_v19 = vcvt.s32.f32 %v426_v63  ;;  %v3126_v35 = vsel %vm5749_vm8, 0, %v5748_v41  ;;  %vm512_vm9 = vc.u32 %v6673_v3, %v6676_v7 }
 0x11a   :  { %v431_v12 = vand.u32 2147483647, %v430_v50  ;;  %v3127_v16 = vsub.s32 32, %v3126_v35  ;;  %v3131_v1 = vsub.s32 4294967266, %v3126_v35  ;;  %v510_v4 = vmul.u32 %v6604_v34, %v494_v60 }
 0x11b   :  { %v513_v36 = vadd.s32 1, %v6677_v9  ;;  %v3128_v37 = vshll.u32 %v6630_v18, %v3126_v35  ;;  %v6694_v39 = vshrl.u32 %v3171_v22, 5  ;;  %v3174_v54 = vsub.s32 32, %v3173_v33 }
 0x11c   :  { %v434_v26 = vmul.f32 %v433_v19, %v431_v12  ;;  %v3129_v40 = vshrl.u32 %v3111_v53, %v3127_v16  ;;  %v3132_v24 = vadd.s32 127, %v3131_v1  ;;  %v3176_v42 = vshll.u32 %v6289_v21, %v3173_v33 }
 0x11d   :  { %v514_v14 = vsel %vm512_vm9, %v513_v36, %v6677_v9  ;;  %v3177_v46 = vshrl.u32 %v6290_v25, %v3174_v54  ;;  %v3179_v34 = vshll.u32 %v6290_v25, %v3173_v33  ;;  %v3180_v58 = vshrl.u32 %v6291_v27, %v3174_v54 }
 0x11e   :  { %v435_v13 = vxor.u32 2147483648, %v434_v26  ;;  %v515_v15 = vadd.s32 %v514_v14, %v510_v4  ;;  %v3130_v49 = vor.u32 %v3129_v40, %v3128_v37  ;;  %v3133_v55 = vshll.u32 %v3132_v24, 23 }
 0x11f   :  { %v3182_v18 = vshll.u32 %v6291_v27, %v3173_v33  ;;  %v3183_v61 = vshrl.u32 %v6292_v29, %v3174_v54  ;;  %v3185_v63 = vshll.u32 %v6292_v29, %v3173_v33  ;;  %v3178_v9 = vor.u32 %v3177_v46, %v3176_v42 }
 0x120   :  { %v436_v59 = vsel %vm353_vm13, %v435_v13, %v434_v26  ;;  %v516_v32 = vadd.s32 536870912, %v515_v15  ;;  %v3134_v2 = vor.u32 4788187, %v3133_v55  ;;  %v3137_v41 = vcvt.s32.f32 %v3130_v49 }
 0x121   :  { %v439_v52 = vsel %vm6590_vm14, %v6475_v47, %v436_v59  ;;  %v3181_v53 = vor.u32 %v3180_v58, %v3179_v34  ;;  %v3186_v60 = vshrl.u32 %v6293_v31, %v3174_v54  ;;  %v3188_v12 = vshll.u32 %v6293_v31, %v3173_v33 }
 0x122   :  { %6064 = vcosq.f32 %v439_v52  ;;  %v6709_v50 = vshrl.u32 %v516_v32, 30  ;;  %v3135_v22 = vand.u32 2147483647, %v3134_v2  ;;  %v3189_v19 = vshrl.u32 %v6294_v38, %v3174_v54 }
 0x123   :  { %6066 = vsinq.f32 %v439_v52  ;;  %v3187_v16 = vor.u32 %v3186_v60, %v3185_v63  ;;  %v3184_v1 = vor.u32 %v3183_v61, %v3182_v18  ;;  %v3148_v4 = vadd.s32 3, %v3144_v17 }
 0x124   :  { %v518_v35 = vshll.u32 %v6709_v50, 30  ;;  %v3138_v30 = vmul.f32 %v3137_v41, %v3135_v22  ;;  %vm3191_vm10 = vcmp.lt.s32.totalorder %v6694_v39, 1  ;;  %v6720_v26 = vshll.u32 %v3167_v45, 8 }
 0x125   :  { %vm447_vm11 = vcmp.eq.s32.totalorder %v6684_v11, 0  ;;  %v3190_v33 = vor.u32 %v3189_v19, %v3188_v12  ;;  %vm3194_vm12 = vcmp.lt.s32.totalorder %v6694_v39, 4  ;;  %v3199_v40 = vsel %vm3191_vm10, %v3178_v9, %v3181_v53 }
 0x126   :  { %v6715_v36 = vsub.s32 %v515_v15, %v518_v35  ;;  %v3139_v37 = vxor.u32 2147483648, %v3138_v30  ;;  %vm446_vm13 = vcmp.lt.s32.totalorder %v6684_v11, 2  ;;  %v3175_v24 = vshrl.u32 %v6289_v21, %v3174_v54 }
 0x127   :  { %vm3193_vm14 = vcmp.lt.s32.totalorder %v6694_v39, 3  ;;  %v3200_v23 = vsel %vm3194_vm12, %v3187_v16, 920167782  ;;  %vm443_vm15 = vweird.f32 %v6475_v47  ;;  %vm457_vm1 = vcmp.lt.s32.totalorder %v6481_v51, 0 }
 0x128   :  { %v521_v17 = vsub.s32 0, %v6715_v36  ;;  %v3140_v45 = vsel %vm3057_vm0, %v3139_v37, %v3138_v30  ;;  %vm3192_vm2 = vcmp.lt.s32.totalorder %v6694_v39, 2  ;;  %v3196_v14 = vsel %vm3194_vm12, %v3184_v1, 2102212464 }
 0x129   :  { %v3201_v54 = vsel %vm3193_vm14, %v3184_v1, %v3200_v23  ;;  %v3143_v42 = vsel %vm6638_vm6, %v6478_v48, %v3140_v45  ;;  %v3203_v46 = vsel %vm3191_vm10, %v3181_v53, %v3184_v1  ;;  %v3204_v34 = vsel %vm3194_vm12, %v3190_v33, 1326507024 }
 0x12a   :  { %v5647_v13 = vmin.u32 %v521_v17, %v6715_v36  ;;  %v3202_v15 = vsel %vm3192_vm2, %v3199_v40, %v3201_v54  ;;  %6068 = vcosq.f32 %v3143_v42  ;;  %vm450_vm0 = vcmp.eq.s32.totalorder %v6684_v11, 2 }
 0x12b   :  { %v6752_v49 = vmul.u32.u64.low %v6720_v26, %v3202_v15  ;;  %v6753_v55 = vmul.u32.u64.high %v6720_v26, %v3202_v15, %v6752_v49  ;;  %6070 = vsinq.f32 %v3143_v42  ;;  %v541_v18 = vsub.s32 4, %v6709_v50 }
 0x12c   :  { %v6065_v58 = vpop.eup %6064  ;;  %v523_v28 = vclz %v5647_v13  ;;  %v3195_v61 = vsel %vm3191_vm10, %v3175_v24, %v3178_v9  ;;  %v3197_v63 = vsel %vm3193_vm14, %v3181_v53, %v3196_v14  ;;  %v3205_v52 = vsel %vm3193_vm14, %v3187_v16, %v3204_v34  ;;  %v6790_v24 = vpop.f32.mrb[5].mxu0 }
 0x12d   :  { %v6067_v59 = vpop.eup %6066  ;;  %v451_v32 = vxor.u32 2147483648, %v6065_v58  ;;  %v3206_v60 = vsel %vm3192_vm2, %v3203_v46, %v3205_v52  ;;  %v6768_v22 = vadd.f32 %v6487_v56, %v6470_v43  ;;  %v3149_v19 = vand.u32 3, %v3148_v4 }
 0x12e   :  { %v448_v2 = vxor.u32 2147483648, %v6067_v59  ;;  %v5648_v41 = vadd.s32 4294967294, %v523_v28  ;;  %v6771_v35 = vmul.u32.u64.low %v6720_v26, %v3206_v60  ;;  %v6772_v9 = vmul.u32.u64.high %v6720_v26, %v3206_v60, %v6771_v35 }
 0x12f   :  { %v452_v12 = vsel %vm450_vm0, %v451_v32, %v6067_v59  ;;  %v3198_v16 = vsel %vm3192_vm2, %v3195_v61, %v3197_v63  ;;  %v3217_v30 = vadd.s32 1, %v6753_v55  ;;  %v511_v56 = vadd.s32 %v6676_v7, %v6673_v3 }
 0x130   :  { %v449_v53 = vsel %vm447_vm11, %v6065_v58, %v448_v2  ;;  %vm5649_vm3 = vcmp.lt.s32.totalorder %v5648_v41, 0  ;;  %v562_v37 = vand.u32 2139095040, %v6768_v22  ;;  %vm3147_vm4 = vweird.f32 %v6478_v48 }
 0x131   :  { %v453_v1 = vsel %vm446_vm13, %v449_v53, %v452_v12  ;;  %v526_v4 = vsel %vm5649_vm3, 0, %v5648_v41  ;;  %v542_v39 = vsel %vm457_vm1, %v541_v18, %v6709_v50  ;;  %v3214_v11 = vmul.u32 %v6720_v26, %v3198_v16 }
 0x132   :  { %v454_v33 = vsel %vm443_vm15, nan, %v453_v1  ;;  %v527_v40 = vsub.s32 32, %v526_v4  ;;  %v531_v17 = vsub.s32 4294967266, %v526_v4  ;;  %vm3216_vm5 = vc.u32 %v6772_v9, %v6752_v49 }
 0x133   :  { %5551 = vst [vmem:[#allocation2] sm:$0xff] %v454_v33  ;;  %v559_v3 = vand.u32 2147483647, %v6768_v22  ;;  %v563_v47 = vshrl.u32 %v562_v37, 23  ;;  %v528_v7 = vshll.u32 %v6715_v36, %v526_v4  ;;  %v3218_v14 = vsel %vm3216_vm5, %v3217_v30, %v6753_v55 }
 0x134   :  { %v529_v23 = vshrl.u32 %v511_v56, %v527_v40  ;;  %v532_v45 = vadd.s32 127, %v531_v17  ;;  %v6069_v54 = vpop.eup %6068  ;;  %vm3154_vm6 = vcmp.eq.s32.totalorder %v3149_v19, 2  ;;  %vm6800_vm7 = vcmp.le.f32.partialorder %v455_v8, 0.7853982 }
 0x135   :  { %v3219_v26 = vadd.s32 %v3218_v14, %v3214_v11  ;;  %v5650_v42 = vadd.s32 4294967169, %v563_v47  ;;  %v6071_v13 = vpop.eup %6070  ;;  %v3155_v15 = vxor.u32 2147483648, %v6069_v54  ;;  %v544_v36 = vsel %vm6800_vm7, 0, %v542_v39 }
 0x136   :  { %v530_v46 = vor.u32 %v529_v23, %v528_v7  ;;  %v533_v34 = vshll.u32 %v532_v45, 23  ;;  %v3152_v58 = vxor.u32 2147483648, %v6071_v13  ;;  %v566_v55 = vand.u32 8388607, %v559_v3 }
 0x137   :  { %v3220_v28 = vadd.s32 536870912, %v3219_v26  ;;  %v569_v18 = vadd.s32 1, %v5650_v42  ;;  %vm3150_vm8 = vcmp.lt.s32.totalorder %v3149_v19, 2  ;;  %vm3151_vm9 = vcmp.eq.s32.totalorder %v3149_v19, 0 }
 0x138   :  { %v3156_v8 = vsel %vm3154_vm6, %v3155_v15, %v6071_v13  ;;  %v534_v59 = vor.u32 4788187, %v533_v34  ;;  %v3153_v32 = vsel %vm3151_vm9, %v6069_v54, %v3152_v58  ;;  %v548_v61 = vadd.s32 3, %v544_v36 }
 0x139   :  { %v6808_v63 = vshrl.u32 %v3220_v28, 30  ;;  %vm570_vm10 = vcmp.gt.s32.totalorder %v569_v18, 0  ;;  %v3157_v52 = vsel %vm3150_vm8, %v3153_v32, %v3156_v8  ;;  %v537_v41 = vcvt.s32.f32 %v530_v46 }
 0x13a   :  { %v535_v2 = vand.u32 2147483647, %v534_v59  ;;  %v571_v60 = vsel %vm570_vm10, %v569_v18, 0  ;;  %v3158_v12 = vsel %vm3147_vm4, nan, %v3157_v52  ;;  %v567_v53 = vor.u32 8388608, %v566_v55 }
 0x13b   :  { %v3222_v35 = vshll.u32 %v6808_v63, 30  ;;  %5577 = vst [vmem:[#allocation2 + $0xd0] sm:$0xff] %v3158_v12  ;;  %v573_v19 = vand.u32 31, %v571_v60  ;;  %v6817_v1 = vadd.f32 %v6489_v57, %v6470_v43  ;;  %v6819_v4 = vand.u32 3, %v548_v61  ;;  %v6859_v61 = vpop.f32.mrb[5].mxu1 }
 0x13c   :  { %v538_v16 = vmul.f32 %v537_v41, %v535_v2  ;;  %v3215_v37 = vadd.s32 %v6752_v49, %v6772_v9  ;;  %v6824_v40 = vshrl.u32 %v571_v60, 5  ;;  %v6826_v17 = vshll.u32 %v567_v53, 8 }
 0x13d   :  { %v6813_v30 = vsub.s32 %v3219_v26, %v3222_v35  ;;  %v574_v48 = vsub.s32 32, %v573_v19  ;;  %v3263_v39 = vand.u32 2147483647, %v6817_v1  ;;  %v576_v57 = vshll.u32 %v6289_v21, %v573_v19 }
 0x13e   :  { %v539_v56 = vxor.u32 2147483648, %v538_v16  ;;  %v579_v23 = vshll.u32 %v6290_v25, %v573_v19  ;;  %v3245_v14 = vsub.s32 4, %v6808_v63  ;;  %v582_v54 = vshll.u32 %v6291_v27, %v573_v19 }
 0x13f   :  { %v3225_v33 = vsub.s32 0, %v6813_v30  ;;  %v577_v47 = vshrl.u32 %v6290_v25, %v574_v48  ;;  %v580_v7 = vshrl.u32 %v6291_v27, %v574_v48  ;;  %v583_v45 = vshrl.u32 %v6292_v29, %v574_v48 }
 0x140   :  { %v540_v11 = vsel %vm457_vm1, %v539_v56, %v538_v16  ;;  %v3266_v26 = vand.u32 2139095040, %v6817_v1  ;;  %vm3161_vm11 = vcmp.lt.s32.totalorder %v6499_v5, 0  ;;  %v585_v46 = vshll.u32 %v6292_v29, %v573_v19 }
 0x141   :  { %v543_v49 = vsel %vm6800_vm7, %v6481_v51, %v540_v11  ;;  %v5751_v9 = vmin.u32 %v3225_v33, %v6813_v30  ;;  %v578_v13 = vor.u32 %v577_v47, %v576_v57  ;;  %v581_v15 = vor.u32 %v580_v7, %v579_v23 }
 0x142   :  { %6072 = vcosq.f32 %v543_v49  ;;  %v584_v50 = vor.u32 %v583_v45, %v582_v54  ;;  %v586_v34 = vshrl.u32 %v6293_v31, %v574_v48  ;;  %vm591_vm12 = vcmp.lt.s32.totalorder %v6824_v40, 1 }
 0x143   :  { %6074 = vsinq.f32 %v543_v49  ;;  %v3227_v42 = vclz %v5751_v9  ;;  %v588_v58 = vshll.u32 %v6293_v31, %v573_v19  ;;  %v589_v28 = vshrl.u32 %v6294_v38, %v574_v48 }
 0x144   :  { %vm592_vm13 = vcmp.lt.s32.totalorder %v6824_v40, 2  ;;  %vm554_vm14 = vcmp.eq.s32.totalorder %v6819_v4, 2  ;;  %v575_v55 = vshrl.u32 %v6289_v21, %v574_v48  ;;  %v587_v18 = vor.u32 %v586_v34, %v585_v46 }
 0x145   :  { %v5752_v36 = vadd.s32 4294967294, %v3227_v42  ;;  %vm593_vm15 = vcmp.lt.s32.totalorder %v6824_v40, 3  ;;  %vm594_vm1 = vcmp.lt.s32.totalorder %v6824_v40, 4  ;;  %vm551_vm2 = vcmp.eq.s32.totalorder %v6819_v4, 0 }
 0x146   :  { %v590_v8 = vor.u32 %v589_v28, %v588_v58  ;;  %v596_v59 = vsel %vm594_vm1, %v584_v50, 2102212464  ;;  %v599_v32 = vsel %vm591_vm12, %v578_v13, %v581_v15  ;;  %vm550_vm3 = vcmp.lt.s32.totalorder %v6819_v4, 2 }
 0x147   :  { %vm5753_vm0 = vcmp.lt.s32.totalorder %v5752_v36, 0  ;;  %vm6864_vm4 = vcmp.le.f32.partialorder %v3159_v6, 0.7853982  ;;  %v595_v41 = vsel %vm591_vm12, %v575_v55, %v578_v13  ;;  %v600_v60 = vsel %vm594_vm1, %v587_v18, 920167782 }
 0x148   :  { %v3230_v2 = vsel %vm5753_vm0, 0, %v5752_v36  ;;  %v3267_v12 = vshrl.u32 %v3266_v26, 23  ;;  %vm547_vm5 = vweird.f32 %v6481_v51  ;;  %v601_v16 = vsel %vm593_vm15, %v584_v50, %v600_v60 }
 0x149   :  { %v3231_v35 = vsub.s32 32, %v3230_v2  ;;  %v3235_v53 = vsub.s32 4294967266, %v3230_v2  ;;  %v603_v6 = vsel %vm591_vm12, %v581_v15, %v584_v50  ;;  %v597_v19 = vsel %vm593_vm15, %v581_v15, %v596_v59 }
 0x14a   :  { %v602_v56 = vsel %vm592_vm13, %v599_v32, %v601_v16  ;;  %v604_v48 = vsel %vm594_vm1, %v590_v8, 1326507024  ;;  %v5754_v33 = vadd.s32 4294967169, %v3267_v12  ;;  %v3232_v11 = vshll.u32 %v6813_v30, %v3230_v2 }
 0x14b   :  { %v3233_v57 = vshrl.u32 %v3215_v37, %v3231_v35  ;;  %v3236_v47 = vadd.s32 127, %v3235_v53  ;;  %v605_v7 = vsel %vm593_vm15, %v587_v18, %v604_v48  ;;  %v3246_v30 = vsel %vm3161_vm11, %v3245_v14, %v6808_v63 }
 0x14c   :  { %v6073_v49 = vpop.eup %6072  ;;  %v606_v9 = vsel %vm592_vm13, %v603_v6, %v605_v7  ;;  %v6889_v23 = vmul.u32.u64.low %v6826_v17, %v602_v56  ;;  %v6890_v45 = vmul.u32.u64.high %v6826_v17, %v602_v56, %v6889_v23  ;;  %v3273_v54 = vadd.s32 1, %v5754_v33 }
 0x14d   :  { %v6075_v26 = vpop.eup %6074  ;;  %v555_v42 = vxor.u32 2147483648, %v6073_v49  ;;  %v3234_v13 = vor.u32 %v3233_v57, %v3232_v11  ;;  %v3237_v15 = vshll.u32 %v3236_v47, 23  ;;  %v598_v58 = vsel %vm592_vm13, %v595_v41, %v597_v19 }
 0x14e   :  { %v552_v37 = vxor.u32 2147483648, %v6075_v26  ;;  %v6897_v50 = vmul.u32.u64.low %v6826_v17, %v606_v9  ;;  %v6898_v46 = vmul.u32.u64.high %v6826_v17, %v606_v9, %v6897_v50  ;;  %vm3274_vm6 = vcmp.gt.s32.totalorder %v3273_v54, 0 }
 0x14f   :  { %v556_v34 = vsel %vm554_vm14, %v555_v42, %v6075_v26  ;;  %v3238_v36 = vor.u32 4788187, %v3237_v15  ;;  %v3275_v28 = vsel %vm3274_vm6, %v3273_v54, 0  ;;  %v617_v18 = vadd.s32 1, %v6890_v45 }
 0x150   :  { %v553_v55 = vsel %vm551_vm2, %v6073_v49, %v552_v37  ;;  %v3270_v63 = vand.u32 8388607, %v3263_v39  ;;  %v3277_v14 = vand.u32 31, %v3275_v28  ;;  %v3241_v32 = vcvt.s32.f32 %v3234_v13 }
 0x151   :  { %v557_v8 = vsel %vm550_vm3, %v553_v55, %v556_v34  ;;  %v3239_v59 = vand.u32 2147483647, %v3238_v36  ;;  %v3248_v2 = vsel %vm6864_vm4, 0, %v3246_v30  ;;  %v614_v41 = vmul.u32 %v6826_v17, %v598_v58 }
 0x152   :  { %v558_v40 = vsel %vm547_vm5, nan, %v557_v8  ;;  %vm616_vm7 = vc.u32 %v6898_v46, %v6889_v23  ;;  %v3278_v60 = vsub.s32 32, %v3277_v14  ;;  %v3280_v4 = vshll.u32 %v6289_v21, %v3277_v14 }
 0x153   :  { %5552 = vst [vmem:[#allocation2 + $0x8] sm:$0xff] %v558_v40  ;;  %v3242_v12 = vmul.f32 %v3241_v32, %v3239_v59  ;;  %v618_v35 = vsel %vm616_vm7, %v617_v18, %v6890_v45  ;;  %v3283_v53 = vshll.u32 %v6290_v25, %v3277_v14  ;;  %v3276_v6 = vshrl.u32 %v3275_v28, 5 }
 0x154   :  { %v619_v16 = vadd.s32 %v618_v35, %v614_v41  ;;  %v3281_v19 = vshrl.u32 %v6290_v25, %v3278_v60  ;;  %v3284_v51 = vshrl.u32 %v6291_v27, %v3278_v60  ;;  %v3286_v17 = vshll.u32 %v6291_v27, %v3277_v14 }
 0x155   :  { %v3243_v56 = vxor.u32 2147483648, %v3242_v12  ;;  %v3287_v48 = vshrl.u32 %v6292_v29, %v3278_v60  ;;  %v3289_v33 = vshll.u32 %v6292_v29, %v3277_v14  ;;  %v3252_v11 = vadd.s32 3, %v3248_v2 }
 0x156   :  { %v620_v57 = vadd.s32 536870912, %v619_v16  ;;  %v3282_v47 = vor.u32 %v3281_v19, %v3280_v4  ;;  %v3290_v7 = vshrl.u32 %v6293_v31, %v3278_v60  ;;  %v3285_v9 = vor.u32 %v3284_v51, %v3283_v53 }
 0x157   :  { %v3244_v49 = vsel %vm3161_vm11, %v3243_v56, %v3242_v12  ;;  %v3292_v45 = vshll.u32 %v6293_v31, %v3277_v14  ;;  %v3293_v54 = vshrl.u32 %v6294_v38, %v3278_v60  ;;  %v3288_v13 = vor.u32 %v3287_v48, %v3286_v17 }
 0x158   :  { %v3247_v26 = vsel %vm6864_vm4, %v6499_v5, %v3244_v49  ;;  %v621_v42 = vshrl.u32 %v620_v57, 30  ;;  %v3291_v15 = vor.u32 %v3290_v7, %v3289_v33  ;;  %v3271_v30 = vor.u32 8388608, %v3270_v63 }
 0x159   :  { %6076 = vcosq.f32 %v3247_v26  ;;  %v3279_v37 = vshrl.u32 %v6289_v21, %v3278_v60  ;;  %vm3295_vm8 = vcmp.lt.s32.totalorder %v3276_v6, 1  ;;  %v3294_v34 = vor.u32 %v3293_v54, %v3292_v45 }
 0x15a   :  { %6078 = vsinq.f32 %v3247_v26  ;;  %v622_v50 = vshll.u32 %v621_v42, 30  ;;  %vm3298_vm9 = vcmp.lt.s32.totalorder %v3276_v6, 4  ;;  %vm3297_vm10 = vcmp.lt.s32.totalorder %v3276_v6, 3 }
 0x15b   :  { %v3303_v36 = vsel %vm3295_vm8, %v3282_v47, %v3285_v9  ;;  %v3304_v58 = vsel %vm3298_vm9, %v3291_v15, 920167782  ;;  %v6939_v52 = vadd.f32 %v6496_v0, %v6472_v44  ;;  %vm3296_vm11 = vcmp.lt.s32.totalorder %v3276_v6, 2 }
 0x15c   :  { %v6941_v28 = vsub.s32 %v619_v16, %v622_v50  ;;  %v3300_v55 = vsel %vm3298_vm9, %v3288_v13, 2102212464  ;;  %v3305_v18 = vsel %vm3297_vm10, %v3288_v13, %v3304_v58  ;;  %v645_v63 = vsub.s32 4, %v621_v42 }
 0x15d   :  { %v3306_v14 = vsel %vm3296_vm11, %v3303_v36, %v3305_v18  ;;  %v3307_v8 = vsel %vm3295_vm8, %v3285_v9, %v3288_v13  ;;  %v3311_v59 = vshll.u32 %v3271_v30, 8  ;;  %v3253_v32 = vand.u32 3, %v3252_v11  ;;  %v6981_v36 = vpop.f32.mrb[6].mxu0 }
 0x15e   :  { %v625_v2 = vsub.s32 0, %v6941_v28  ;;  %v3299_v40 = vsel %vm3295_vm8, %v3279_v37, %v3282_v47  ;;  %v3308_v0 = vsel %vm3298_vm9, %v3294_v34, 1326507024  ;;  %v3301_v41 = vsel %vm3297_vm10, %v3285_v9, %v3300_v55 }
 0x15f   :  { %v3309_v60 = vsel %vm3297_vm10, %v3291_v15, %v3308_v0  ;;  %v6952_v12 = vmul.u32.u64.low %v3311_v59, %v3306_v14  ;;  %v6953_v35 = vmul.u32.u64.high %v3311_v59, %v3306_v14, %v6952_v12  ;;  %vm3251_vm12 = vweird.f32 %v6499_v5 }
 0x160   :  { %vm561_vm13 = vcmp.lt.s32.totalorder %v6768_v22, 0  ;;  %v5651_v4 = vmin.u32 %v625_v2, %v6941_v28  ;;  %v3310_v53 = vsel %vm3296_vm11, %v3307_v8, %v3309_v60  ;;  %v666_v56 = vand.u32 2139095040, %v6939_v52 }
 0x161   :  { %v646_v16 = vsel %vm561_vm13, %v645_v63, %v621_v42  ;;  %v6961_v19 = vmul.u32.u64.low %v3311_v59, %v3310_v53  ;;  %v6962_v51 = vmul.u32.u64.high %v3311_v59, %v3310_v53, %v6961_v19  ;;  %vm6967_vm14 = vcmp.le.f32.partialorder %v559_v3, 0.7853982 }
 0x162   :  { %v627_v48 = vclz %v5651_v4  ;;  %v3302_v33 = vsel %vm3296_vm11, %v3299_v40, %v3301_v41  ;;  %v663_v11 = vand.u32 2147483647, %v6939_v52  ;;  %vm3254_vm15 = vcmp.lt.s32.totalorder %v3253_v32, 2 }
 0x163   :  { %v6077_v57 = vpop.eup %6076  ;;  %vm3255_vm1 = vcmp.eq.s32.totalorder %v3253_v32, 0  ;;  %v3321_v47 = vadd.s32 1, %v6953_v35  ;;  %v667_v7 = vshrl.u32 %v666_v56, 23  ;;  %vm3258_vm2 = vcmp.eq.s32.totalorder %v3253_v32, 2 }
 0x164   :  { %v6079_v49 = vpop.eup %6078  ;;  %v3259_v9 = vxor.u32 2147483648, %v6077_v57  ;;  %v5652_v45 = vadd.s32 4294967294, %v627_v48  ;;  %v648_v3 = vsel %vm6967_vm14, 0, %v646_v16  ;;  %v3318_v26 = vmul.u32 %v3311_v59, %v3302_v33 }
 0x165   :  { %v3256_v54 = vxor.u32 2147483648, %v6079_v49  ;;  %vm3320_vm0 = vc.u32 %v6962_v51, %v6952_v12  ;;  %v5654_v6 = vadd.s32 4294967169, %v667_v7  ;;  %v670_v15 = vand.u32 8388607, %v663_v11 }
 0x166   :  { %v3260_v42 = vsel %vm3258_vm2, %v3259_v9, %v6079_v49  ;;  %vm5653_vm3 = vcmp.lt.s32.totalorder %v5652_v45, 0  ;;  %v3322_v13 = vsel %vm3320_vm0, %v3321_v47, %v6953_v35  ;;  %v615_v55 = vadd.s32 %v6889_v23, %v6898_v46 }
 0x167   :  { %v3257_v30 = vsel %vm3255_vm1, %v6077_v57, %v3256_v54  ;;  %v630_v37 = vsel %vm5653_vm3, 0, %v5652_v45  ;;  %v3323_v50 = vadd.s32 %v3322_v13, %v3318_v26  ;;  %v673_v34 = vadd.s32 1, %v5654_v6 }
 0x168   :  { %v3261_v58 = vsel %vm3254_vm15, %v3257_v30, %v3260_v42  ;;  %v631_v18 = vsub.s32 32, %v630_v37  ;;  %v635_v63 = vsub.s32 4294967266, %v630_v37  ;;  %v652_v8 = vadd.s32 3, %v648_v3 }
 0x169   :  { %v3262_v14 = vsel %vm3251_vm12, nan, %v3261_v58  ;;  %v3324_v59 = vadd.s32 536870912, %v3323_v50  ;;  %vm674_vm4 = vcmp.gt.s32.totalorder %v673_v34, 0  ;;  %v632_v2 = vshll.u32 %v6941_v28, %v630_v37 }
 0x16a   :  { %5578 = vst [vmem:[#allocation2 + $0xd8] sm:$0xff] %v3262_v14  ;;  %v633_v40 = vshrl.u32 %v615_v55, %v631_v18  ;;  %v636_v0 = vadd.s32 127, %v635_v63  ;;  %v675_v41 = vsel %vm674_vm4, %v673_v34, 0  ;;  %v671_v32 = vor.u32 8388608, %v670_v15 }
 0x16b   :  { %v3325_v60 = vshrl.u32 %v3324_v59, 30  ;;  %v677_v35 = vand.u32 31, %v675_v41  ;;  %vm3265_vm5 = vcmp.lt.s32.totalorder %v6817_v1, 0  ;;  %v6990_v16 = vand.u32 3, %v652_v8 }
 0x16c   :  { %v634_v4 = vor.u32 %v633_v40, %v632_v2  ;;  %v637_v53 = vshll.u32 %v636_v0, 23  ;;  %v3319_v19 = vadd.s32 %v6952_v12, %v6962_v51  ;;  %v6995_v28 = vadd.f32 %v6502_v10, %v6472_v44 }
 0x16d   :  { %v3326_v23 = vshll.u32 %v3325_v60, 30  ;;  %v678_v46 = vsub.s32 32, %v677_v35  ;;  %v676_v48 = vshrl.u32 %v675_v41, 5  ;;  %v7000_v57 = vshll.u32 %v671_v32, 8 }
 0x16e   :  { %v638_v5 = vor.u32 4788187, %v637_v53  ;;  %v641_v7 = vcvt.s32.f32 %v634_v4  ;;  %v3349_v12 = vsub.s32 4, %v3325_v60  ;;  %v680_v51 = vshll.u32 %v6289_v21, %v677_v35  ;;  %v7025_v4 = vpop.f32.mrb[6].mxu1 }
 0x16f   :  { %v6997_v56 = vsub.s32 %v3323_v50, %v3326_v23  ;;  %v681_v33 = vshrl.u32 %v6290_v25, %v678_v46  ;;  %v684_v49 = vshrl.u32 %v6291_v27, %v678_v46  ;;  %v687_v9 = vshrl.u32 %v6292_v29, %v678_v46 }
 0x170   :  { %v639_v47 = vand.u32 2147483647, %v638_v5  ;;  %v683_v10 = vshll.u32 %v6290_v25, %v677_v35  ;;  %v686_v54 = vshll.u32 %v6291_v27, %v677_v35  ;;  %v689_v26 = vshll.u32 %v6292_v29, %v677_v35 }
 0x171   :  { %v3329_v45 = vsub.s32 0, %v6997_v56  ;;  %v690_v6 = vshrl.u32 %v6293_v31, %v678_v46  ;;  %v682_v13 = vor.u32 %v681_v33, %v680_v51  ;;  %v693_v30 = vshrl.u32 %v6294_v38, %v678_v46 }
 0x172   :  { %v642_v3 = vmul.f32 %v641_v7, %v639_v47  ;;  %v685_v15 = vor.u32 %v684_v49, %v683_v10  ;;  %v688_v50 = vor.u32 %v687_v9, %v686_v54  ;;  %v692_v58 = vshll.u32 %v6293_v31, %v677_v35 }
 0x173   :  { %v5755_v42 = vmin.u32 %v3329_v45, %v6997_v56  ;;  %v691_v34 = vor.u32 %v690_v6, %v689_v26  ;;  %v3350_v18 = vsel %vm3265_vm5, %v3349_v12, %v3325_v60  ;;  %v679_v63 = vshrl.u32 %v6289_v21, %v678_v46 }
 0x174   :  { %v643_v37 = vxor.u32 2147483648, %v642_v3  ;;  %v3370_v14 = vand.u32 2139095040, %v6995_v28  ;;  %v694_v59 = vor.u32 %v693_v30, %v692_v58  ;;  %vm695_vm6 = vcmp.lt.s32.totalorder %v676_v48, 1 }
 0x175   :  { %v3331_v55 = vclz %v5755_v42  ;;  %vm696_vm7 = vcmp.lt.s32.totalorder %v676_v48, 2  ;;  %vm697_vm8 = vcmp.lt.s32.totalorder %v676_v48, 3  ;;  %vm698_vm9 = vcmp.lt.s32.totalorder %v676_v48, 4 }
 0x176   :  { %v644_v8 = vsel %vm561_vm13, %v643_v37, %v642_v3  ;;  %v700_v0 = vsel %vm698_vm9, %v688_v50, 2102212464  ;;  %v703_v41 = vsel %vm695_vm6, %v682_v13, %v685_v15  ;;  %v704_v60 = vsel %vm698_vm9, %v691_v34, 920167782 }
 0x177   :  { %v647_v2 = vsel %vm6967_vm14, %v6768_v22, %v644_v8  ;;  %v5756_v40 = vadd.s32 4294967294, %v3331_v55  ;;  %v699_v32 = vsel %vm695_vm6, %v679_v63, %v682_v13  ;;  %v705_v35 = vsel %vm697_vm8, %v688_v50, %v704_v60 }
 0x178   :  { %6080 = vcosq.f32 %v647_v2  ;;  %v706_v17 = vsel %vm696_vm7, %v703_v41, %v705_v35  ;;  %v707_v23 = vsel %vm695_vm6, %v685_v15, %v688_v50  ;;  %v708_v46 = vsel %vm698_vm9, %v694_v59, 1326507024 }
 0x179   :  { %6082 = vsinq.f32 %v647_v2  ;;  %vm5757_vm10 = vcmp.lt.s32.totalorder %v5756_v40, 0  ;;  %v701_v47 = vsel %vm697_vm8, %v685_v15, %v700_v0  ;;  %v709_v7 = vsel %vm697_vm8, %v691_v34, %v708_v46 }
 0x17a   :  { %v3334_v53 = vsel %vm5757_vm10, 0, %v5756_v40  ;;  %v710_v9 = vsel %vm696_vm7, %v707_v23, %v709_v7  ;;  %v7034_v45 = vmul.u32.u64.low %v7000_v57, %v706_v17  ;;  %v7035_v12 = vmul.u32.u64.high %v7000_v57, %v706_v17, %v7034_v45 }
 0x17b   :  { %v3335_v5 = vsub.s32 32, %v3334_v53  ;;  %v3339_v33 = vsub.s32 4294967266, %v3334_v53  ;;  %v3336_v49 = vshll.u32 %v6997_v56, %v3334_v53  ;;  %vm7044_vm11 = vcmp.le.f32.partialorder %v3263_v39, 0.7853982 }
 0x17c   :  { %v7039_v3 = vmul.u32.u64.low %v7000_v57, %v710_v9  ;;  %v7040_v54 = vmul.u32.u64.high %v7000_v57, %v710_v9, %v7039_v3  ;;  %v702_v56 = vsel %vm696_vm7, %v699_v32, %v701_v47  ;;  %v3371_v6 = vshrl.u32 %v3370_v14, 23 }
 0x17d   :  { %v3337_v51 = vshrl.u32 %v3319_v19, %v3335_v5  ;;  %v3340_v10 = vadd.s32 127, %v3339_v33  ;;  %v7051_v42 = vadd.f32 %v6583_v20, %v6470_v43  ;;  %v3352_v15 = vsel %vm7044_vm11, 0, %v3350_v18 }
 0x17e   :  { %vm651_vm12 = vweird.f32 %v6768_v22  ;;  %v721_v30 = vadd.s32 1, %v7035_v12  ;;  %v3367_v39 = vand.u32 2147483647, %v6995_v28  ;;  %v5758_v37 = vadd.s32 4294967169, %v3371_v6 }
 0x17f   :  { %v3338_v13 = vor.u32 %v3337_v51, %v3336_v49  ;;  %v3341_v19 = vshll.u32 %v3340_v10, 23  ;;  %vm655_vm13 = vcmp.eq.s32.totalorder %v6990_v16, 0  ;;  %v718_v50 = vmul.u32 %v7000_v57, %v702_v56 }
 0x180   :  { %vm720_vm14 = vc.u32 %v7040_v54, %v7034_v45  ;;  %v3356_v34 = vadd.s32 3, %v3352_v15  ;;  %v3377_v55 = vadd.s32 1, %v5758_v37  ;;  %v770_v18 = vand.u32 2139095040, %v7051_v42 }
 0x181   :  { %v3342_v48 = vor.u32 4788187, %v3341_v19  ;;  %v722_v58 = vsel %vm720_vm14, %v721_v30, %v7035_v12  ;;  %v3345_v59 = vcvt.s32.f32 %v3338_v13  ;;  %vm658_vm15 = vcmp.eq.s32.totalorder %v6990_v16, 2 }
 0x182   :  { %v6081_v20 = vpop.eup %6080  ;;  %v723_v2 = vadd.s32 %v722_v58, %v718_v50  ;;  %v3374_v57 = vand.u32 8388607, %v3367_v39  ;;  %vm3378_vm1 = vcmp.gt.s32.totalorder %v3377_v55, 0  ;;  %vm654_vm2 = vcmp.lt.s32.totalorder %v6990_v16, 2 }
 0x183   :  { %v6083_v63 = vpop.eup %6082  ;;  %v659_v14 = vxor.u32 2147483648, %v6081_v20  ;;  %v3343_v8 = vand.u32 2147483647, %v3342_v48  ;;  %v3379_v32 = vsel %vm3378_vm1, %v3377_v55, 0  ;;  %v7070_v53 = vand.u32 3, %v3356_v34 }
 0x184   :  { %v656_v40 = vxor.u32 2147483648, %v6083_v63  ;;  %v724_v60 = vadd.s32 536870912, %v723_v2  ;;  %v3381_v17 = vand.u32 31, %v3379_v32  ;;  %v771_v33 = vshrl.u32 %v770_v18, 23 }
 0x185   :  { %v660_v0 = vsel %vm658_vm15, %v659_v14, %v6083_v63  ;;  %v3346_v41 = vmul.f32 %v3345_v59, %v3343_v8  ;;  %v3375_v7 = vor.u32 8388608, %v3374_v57  ;;  %v767_v9 = vand.u32 2147483647, %v7051_v42 }
 0x186   :  { %v657_v35 = vsel %vm655_vm13, %v6081_v20, %v656_v40  ;;  %v7072_v5 = vshrl.u32 %v724_v60, 30  ;;  %v3382_v49 = vsub.s32 32, %v3381_v17  ;;  %v3384_v51 = vshll.u32 %v6289_v21, %v3381_v17 }
 0x187   :  { %v661_v23 = vsel %vm654_vm2, %v657_v35, %v660_v0  ;;  %v3347_v46 = vxor.u32 2147483648, %v3346_v41  ;;  %v3387_v10 = vshll.u32 %v6290_v25, %v3381_v17  ;;  %v3390_v6 = vshll.u32 %v6291_v27, %v3381_v17 }
 0x188   :  { %v662_v47 = vsel %vm651_vm12, nan, %v661_v23  ;;  %v726_v12 = vshll.u32 %v7072_v5, 30  ;;  %v3385_v22 = vshrl.u32 %v6290_v25, %v3382_v49  ;;  %v3388_v56 = vshrl.u32 %v6291_v27, %v3382_v49 }
 0x189   :  { %5553 = vst [vmem:[#allocation2 + $0x10] sm:$0xff] %v662_v47  ;;  %v3348_v16 = vsel %vm3265_vm5, %v3347_v46, %v3346_v41  ;;  %v3391_v19 = vshrl.u32 %v6292_v29, %v3382_v49  ;;  %v5658_v15 = vadd.s32 4294967169, %v771_v33  ;;  %v719_v30 = vadd.s32 %v7034_v45, %v7040_v54 }
 0x18a   :  { %v3351_v3 = vsel %vm7044_vm11, %v6817_v1, %v3348_v16  ;;  %v7088_v13 = vsub.s32 %v723_v2, %v726_v12  ;;  %v3380_v37 = vshrl.u32 %v3379_v32, 5  ;;  %v7093_v48 = vshll.u32 %v3375_v7, 8 }
 0x18b   :  { %6084 = vcosq.f32 %v3351_v3  ;;  %v3386_v50 = vor.u32 %v3385_v22, %v3384_v51  ;;  %v3389_v20 = vor.u32 %v3388_v56, %v3387_v10  ;;  %v3393_v34 = vshll.u32 %v6292_v29, %v3381_v17  ;;  %v7119_v10 = vpop.f32.mrb[7].mxu0 }
 0x18c   :  { %6086 = vsinq.f32 %v3351_v3  ;;  %v729_v26 = vsub.s32 0, %v7088_v13  ;;  %v3392_v58 = vor.u32 %v3391_v19, %v3390_v6  ;;  %v3394_v55 = vshrl.u32 %v6293_v31, %v3382_v49 }
 0x18d   :  { %v3396_v18 = vshll.u32 %v6293_v31, %v3381_v17  ;;  %v3397_v63 = vshrl.u32 %v6294_v38, %v3382_v49  ;;  %vm3362_vm0 = vcmp.eq.s32.totalorder %v7070_v53, 2  ;;  %v3383_v54 = vshrl.u32 %v6289_v21, %v3382_v49 }
 0x18e   :  { %v5655_v45 = vmin.u32 %v729_v26, %v7088_v13  ;;  %v7105_v14 = vand.u32 8388607, %v767_v9  ;;  %v777_v8 = vadd.s32 1, %v5658_v15  ;;  %vm3359_vm3 = vcmp.eq.s32.totalorder %v7070_v53, 0 }
 0x18f   :  { %v749_v59 = vsub.s32 4, %v7072_v5  ;;  %v3395_v2 = vor.u32 %v3394_v55, %v3393_v34  ;;  %v3398_v40 = vor.u32 %v3397_v63, %v3396_v18  ;;  %vm3399_vm4 = vcmp.lt.s32.totalorder %v3380_v37, 1 }
 0x190   :  { %vm3358_vm5 = vcmp.lt.s32.totalorder %v7070_v53, 2  ;;  %vm665_vm6 = vcmp.lt.s32.totalorder %v6939_v52, 0  ;;  %v731_v57 = vclz %v5655_v45  ;;  %vm3400_vm7 = vcmp.lt.s32.totalorder %v3380_v37, 2 }
 0x191   :  { %vm3401_vm8 = vcmp.lt.s32.totalorder %v3380_v37, 3  ;;  %vm3402_vm9 = vcmp.lt.s32.totalorder %v3380_v37, 4  ;;  %vm3355_vm10 = vweird.f32 %v6817_v1  ;;  %v3407_v41 = vsel %vm3399_vm4, %v3386_v50, %v3389_v20 }
 0x192   :  { %v3404_v0 = vsel %vm3402_vm9, %v3392_v58, 2102212464  ;;  %v3408_v60 = vsel %vm3402_vm9, %v3395_v2, 920167782  ;;  %v3411_v32 = vsel %vm3399_vm4, %v3389_v20, %v3392_v58  ;;  %v5656_v35 = vadd.s32 4294967294, %v731_v57 }
 0x193   :  { %v3403_v17 = vsel %vm3399_vm4, %v3383_v54, %v3386_v50  ;;  %v3409_v23 = vsel %vm3401_vm8, %v3392_v58, %v3408_v60  ;;  %v3412_v46 = vsel %vm3402_vm9, %v3398_v40, 1326507024  ;;  %v3405_v33 = vsel %vm3401_vm8, %v3389_v20, %v3404_v0 }
 0x194   :  { %v3410_v47 = vsel %vm3400_vm7, %v3407_v41, %v3409_v23  ;;  %v3413_v7 = vsel %vm3401_vm8, %v3395_v2, %v3412_v46  ;;  %vm778_vm11 = vcmp.gt.s32.totalorder %v777_v8, 0  ;;  %vm5657_vm12 = vcmp.lt.s32.totalorder %v5656_v35, 0 }
 0x195   :  { %v6085_v49 = vpop.eup %6084  ;;  %v3414_v16 = vsel %vm3400_vm7, %v3411_v32, %v3413_v7  ;;  %v7115_v12 = vmul.u32.u64.low %v7093_v48, %v3410_v47  ;;  %v7116_v51 = vmul.u32.u64.high %v7093_v48, %v3410_v47, %v7115_v12  ;;  %v734_v56 = vsel %vm5657_vm12, 0, %v5656_v35 }
 0x196   :  { %v6087_v3 = vpop.eup %6086  ;;  %v3363_v22 = vxor.u32 2147483648, %v6085_v49  ;;  %v7122_v6 = vmul.u32.u64.low %v7093_v48, %v3414_v16  ;;  %v7123_v19 = vmul.u32.u64.high %v7093_v48, %v3414_v16, %v7122_v6  ;;  %v735_v26 = vsub.s32 32, %v734_v56 }
 0x197   :  { %v3360_v15 = vxor.u32 2147483648, %v6087_v3  ;;  %v739_v50 = vsub.s32 4294967266, %v734_v56  ;;  %v3406_v20 = vsel %vm3400_vm7, %v3403_v17, %v3405_v33  ;;  %v736_v58 = vshll.u32 %v7088_v13, %v734_v56 }
 0x198   :  { %v3364_v34 = vsel %vm3362_vm0, %v3363_v22, %v6087_v3  ;;  %v775_v55 = vor.u32 8388608, %v7105_v14  ;;  %v779_v18 = vsel %vm778_vm11, %v777_v8, 0  ;;  %v737_v45 = vshrl.u32 %v719_v30, %v735_v26 }
 0x199   :  { %v3361_v63 = vsel %vm3359_vm3, %v6085_v49, %v3360_v15  ;;  %v740_v54 = vadd.s32 127, %v739_v50  ;;  %v3425_v2 = vadd.s32 1, %v7116_v51  ;;  %v750_v40 = vsel %vm665_vm6, %v749_v59, %v7072_v5 }
 0x19a   :  { %v3365_v37 = vsel %vm3358_vm5, %v3361_v63, %v3364_v34  ;;  %v3422_v13 = vmul.u32 %v7093_v48, %v3406_v20  ;;  %vm3424_vm13 = vc.u32 %v7123_v19, %v7115_v12  ;;  %v738_v8 = vor.u32 %v737_v45, %v736_v58 }
 0x19b   :  { %v3366_v14 = vsel %vm3355_vm10, nan, %v3365_v37  ;;  %v741_v30 = vshll.u32 %v740_v54, 23  ;;  %v3426_v57 = vsel %vm3424_vm13, %v3425_v2, %v7116_v51  ;;  %vm7147_vm14 = vcmp.le.f32.partialorder %v663_v11, 0.7853982 }
 0x19c   :  { %5579 = vst [vmem:[#allocation2 + $0xe0] sm:$0xff] %v3366_v14  ;;  %v3427_v5 = vadd.s32 %v3426_v57, %v3422_v13  ;;  %v781_v59 = vand.u32 31, %v779_v18  ;;  %v752_v0 = vsel %vm7147_vm14, 0, %v750_v40  ;;  %v7153_v41 = vshll.u32 %v775_v55, 8 }
 0x19d   :  { %v742_v48 = vor.u32 4788187, %v741_v30  ;;  %v745_v1 = vcvt.s32.f32 %v738_v8  ;;  %v780_v32 = vshrl.u32 %v779_v18, 5  ;;  %v756_v56 = vadd.s32 3, %v752_v0 }
 0x19e   :  { %v3428_v60 = vadd.s32 536870912, %v3427_v5  ;;  %v782_v35 = vsub.s32 32, %v781_v59  ;;  %v784_v23 = vshll.u32 %v6289_v21, %v781_v59  ;;  %v787_v11 = vshll.u32 %v6290_v25, %v781_v59 }
 0x19f   :  { %v743_v17 = vand.u32 2147483647, %v742_v48  ;;  %v790_v46 = vshll.u32 %v6291_v27, %v781_v59  ;;  %v793_v49 = vshll.u32 %v6292_v29, %v781_v59  ;;  %v796_v58 = vshll.u32 %v6293_v31, %v781_v59 }
 0x1a0   :  { %v3429_v33 = vshrl.u32 %v3428_v60, 30  ;;  %v785_v47 = vshrl.u32 %v6290_v25, %v782_v35  ;;  %v788_v7 = vshrl.u32 %v6291_v27, %v782_v35  ;;  %v791_v51 = vshrl.u32 %v6292_v29, %v782_v35  ;;  %v7191_v60 = vpop.f32.mrb[7].mxu1 }
 0x1a1   :  { %v746_v16 = vmul.f32 %v745_v1, %v743_v17  ;;  %v794_v3 = vshrl.u32 %v6293_v31, %v782_v35  ;;  %v797_v22 = vshrl.u32 %v6294_v38, %v782_v35  ;;  %vm799_vm15 = vcmp.lt.s32.totalorder %v780_v32, 1 }
 0x1a2   :  { %v3430_v6 = vshll.u32 %v3429_v33, 30  ;;  %v786_v15 = vor.u32 %v785_v47, %v784_v23  ;;  %v789_v26 = vor.u32 %v788_v7, %v787_v11  ;;  %v792_v20 = vor.u32 %v791_v51, %v790_v46 }
 0x1a3   :  { %v747_v50 = vxor.u32 2147483648, %v746_v16  ;;  %v795_v34 = vor.u32 %v794_v3, %v793_v49  ;;  %vm802_vm1 = vcmp.lt.s32.totalorder %v780_v32, 4  ;;  %v7169_v18 = vadd.f32 %v6669_v62, %v6470_v43 }
 0x1a4   :  { %v7165_v55 = vsub.s32 %v3427_v5, %v3430_v6  ;;  %v798_v45 = vor.u32 %v797_v22, %v796_v58  ;;  %v807_v54 = vsel %vm799_vm15, %v786_v15, %v789_v26  ;;  %vm800_vm2 = vcmp.lt.s32.totalorder %v780_v32, 2 }
 0x1a5   :  { %v748_v63 = vsel %vm665_vm6, %v747_v50, %v746_v16  ;;  %v808_v2 = vsel %vm802_vm1, %v795_v34, 920167782  ;;  %vm801_vm0 = vcmp.lt.s32.totalorder %v780_v32, 3  ;;  %v3453_v13 = vsub.s32 4, %v3429_v33 }
 0x1a6   :  { %v751_v37 = vsel %vm7147_vm14, %v6939_v52, %v748_v63  ;;  %v3433_v40 = vsub.s32 0, %v7165_v55  ;;  %v783_v62 = vshrl.u32 %v6289_v21, %v782_v35  ;;  %v809_v14 = vsel %vm801_vm0, %v792_v20, %v808_v2 }
 0x1a7   :  { %6088 = vcosq.f32 %v751_v37  ;;  %v804_v30 = vsel %vm802_vm1, %v792_v20, 2102212464  ;;  %v810_v57 = vsel %vm800_vm2, %v807_v54, %v809_v14  ;;  %v811_v53 = vsel %vm799_vm15, %v789_v26, %v792_v20 }
 0x1a8   :  { %6090 = vsinq.f32 %v751_v37  ;;  %v5759_v8 = vmin.u32 %v3433_v40, %v7165_v55  ;;  %v812_v5 = vsel %vm802_vm1, %v798_v45, 1326507024  ;;  %v757_v0 = vand.u32 3, %v756_v56 }
 0x1a9   :  { %v7187_v59 = vmul.u32.u64.low %v7153_v41, %v810_v57  ;;  %v7188_v48 = vmul.u32.u64.high %v7153_v41, %v810_v57, %v7187_v59  ;;  %v803_v35 = vsel %vm799_vm15, %v783_v62, %v786_v15  ;;  %v805_v17 = vsel %vm801_vm0, %v789_v26, %v804_v30 }
 0x1aa   :  { %v3435_v1 = vclz %v5759_v8  ;;  %v813_v23 = vsel %vm801_vm0, %v795_v34, %v812_v5  ;;  %v3474_v11 = vand.u32 2139095040, %v7169_v18  ;;  %vm3369_vm3 = vcmp.lt.s32.totalorder %v6995_v28, 0 }
 0x1ab   :  { %v814_v47 = vsel %vm800_vm2, %v811_v53, %v813_v23  ;;  %vm7201_vm4 = vcmp.le.f32.partialorder %v3367_v39, 0.7853982  ;;  %v3454_v49 = vsel %vm3369_vm3, %v3453_v13, %v3429_v33  ;;  %v806_v3 = vsel %vm800_vm2, %v803_v35, %v805_v17 }
 0x1ac   :  { %v5760_v46 = vadd.s32 4294967294, %v3435_v1  ;;  %v7208_v16 = vmul.u32.u64.low %v7153_v41, %v814_v47  ;;  %v7209_v51 = vmul.u32.u64.high %v7153_v41, %v814_v47, %v7208_v16  ;;  %v825_v22 = vadd.s32 1, %v7188_v48 }
 0x1ad   :  { %v3475_v56 = vshrl.u32 %v3474_v11, 23  ;;  %vm758_vm6 = vcmp.lt.s32.totalorder %v757_v0, 2  ;;  %vm759_vm7 = vcmp.eq.s32.totalorder %v757_v0, 0  ;;  %v3423_v39 = vadd.s32 %v7115_v12, %v7123_v19 }
 0x1ae   :  { %vm5761_vm5 = vcmp.lt.s32.totalorder %v5760_v46, 0  ;;  %v3456_v33 = vsel %vm7201_vm4, 0, %v3454_v49  ;;  %vm762_vm8 = vcmp.eq.s32.totalorder %v757_v0, 2  ;;  %v822_v34 = vmul.u32 %v7153_v41, %v806_v3 }
 0x1af   :  { %v3438_v6 = vsel %vm5761_vm5, 0, %v5760_v46  ;;  %v5762_v50 = vadd.s32 4294967169, %v3475_v56  ;;  %vm824_vm9 = vc.u32 %v7209_v51, %v7187_v59  ;;  %v3460_v2 = vadd.s32 3, %v3456_v33 }
 0x1b0   :  { %v3439_v15 = vsub.s32 32, %v3438_v6  ;;  %v3443_v26 = vsub.s32 4294967266, %v3438_v6  ;;  %v3440_v32 = vshll.u32 %v7165_v55, %v3438_v6  ;;  %v826_v19 = vsel %vm824_vm9, %v825_v22, %v7188_v48 }
 0x1b1   :  { %v6089_v20 = vpop.eup %6088  ;;  %v827_v37 = vadd.s32 %v826_v19, %v822_v34  ;;  %v3481_v40 = vadd.s32 1, %v5762_v50  ;;  %v3471_v55 = vand.u32 2147483647, %v7169_v18  ;;  %v7226_v30 = vadd.f32 %v6790_v24, %v6472_v44 }
 0x1b2   :  { %v6091_v58 = vpop.eup %6090  ;;  %v763_v63 = vxor.u32 2147483648, %v6089_v20  ;;  %v3441_v45 = vshrl.u32 %v3423_v39, %v3439_v15  ;;  %v3444_v12 = vadd.s32 127, %v3443_v26  ;;  %vm755_vm11 = vweird.f32 %v6939_v52 }
 0x1b3   :  { %v760_v54 = vxor.u32 2147483648, %v6091_v58  ;;  %v828_v8 = vadd.s32 536870912, %v827_v37  ;;  %vm3482_vm10 = vcmp.gt.s32.totalorder %v3481_v40, 0  ;;  %v7230_v11 = vand.u32 3, %v3460_v2 }
 0x1b4   :  { %v764_v13 = vsel %vm762_vm8, %v763_v63, %v6091_v58  ;;  %v3442_v62 = vor.u32 %v3441_v45, %v3440_v32  ;;  %v3445_v14 = vshll.u32 %v3444_v12, 23  ;;  %v3483_v5 = vsel %vm3482_vm10, %v3481_v40, 0 }
 0x1b5   :  { %v761_v41 = vsel %vm759_vm7, %v6089_v20, %v760_v54  ;;  %v829_v1 = vshrl.u32 %v828_v8, 30  ;;  %v3485_v35 = vand.u32 31, %v3483_v5  ;;  %vm769_vm12 = vcmp.lt.s32.totalorder %v7051_v42, 0 }
 0x1b6   :  { %v765_v57 = vsel %vm758_vm6, %v761_v41, %v764_v13  ;;  %v3446_v53 = vor.u32 4788187, %v3445_v14  ;;  %v3449_v23 = vcvt.s32.f32 %v3442_v62  ;;  %v3478_v24 = vand.u32 8388607, %v3471_v55 }
 0x1b7   :  { %v766_v48 = vsel %vm755_vm11, nan, %v765_v57  ;;  %v830_v46 = vshll.u32 %v829_v1, 30  ;;  %v3486_v47 = vsub.s32 32, %v3485_v35  ;;  %v874_v52 = vand.u32 2139095040, %v7226_v30 }
 0x1b8   :  { %5554 = vst [vmem:[#allocation2 + $0x18] sm:$0xff] %v766_v48  ;;  %v3447_v17 = vand.u32 2147483647, %v3446_v53  ;;  %v823_v49 = vadd.s32 %v7187_v59, %v7209_v51  ;;  %v3488_v16 = vshll.u32 %v6289_v21, %v3485_v35  ;;  %v871_v3 = vand.u32 2147483647, %v7226_v30 }
 0x1b9   :  { %v7240_v22 = vsub.s32 %v827_v37, %v830_v46  ;;  %v3489_v56 = vshrl.u32 %v6290_v25, %v3486_v47  ;;  %v3491_v39 = vshll.u32 %v6290_v25, %v3485_v35  ;;  %v3494_v6 = vshll.u32 %v6291_v27, %v3485_v35 }
 0x1ba   :  { %v3450_v0 = vmul.f32 %v3449_v23, %v3447_v17  ;;  %v3492_v26 = vshrl.u32 %v6291_v27, %v3486_v47  ;;  %v3495_v33 = vshrl.u32 %v6292_v29, %v3486_v47  ;;  %v3497_v50 = vshll.u32 %v6292_v29, %v3485_v35 }
 0x1bb   :  { %v833_v59 = vsub.s32 0, %v7240_v22  ;;  %v3479_v51 = vor.u32 8388608, %v3478_v24  ;;  %v3498_v20 = vshrl.u32 %v6293_v31, %v3486_v47  ;;  %v875_v32 = vshrl.u32 %v874_v52, 23 }
 0x1bc   :  { %v3451_v15 = vxor.u32 2147483648, %v3450_v0  ;;  %v853_v58 = vsub.s32 4, %v829_v1  ;;  %v3484_v63 = vshrl.u32 %v3483_v5, 5  ;;  %v3500_v45 = vshll.u32 %v6293_v31, %v3485_v35 }
 0x1bd   :  { %v5659_v19 = vmin.u32 %v833_v59, %v7240_v22  ;;  %v3490_v54 = vor.u32 %v3489_v56, %v3488_v16  ;;  %v3493_v2 = vor.u32 %v3492_v26, %v3491_v39  ;;  %v3496_v37 = vor.u32 %v3495_v33, %v3494_v6  ;;  %v7290_v59 = vpop.f32.mrb[8].mxu0 }
 0x1be   :  { %v3452_v34 = vsel %vm3369_vm3, %v3451_v15, %v3450_v0  ;;  %v3499_v40 = vor.u32 %v3498_v20, %v3497_v50  ;;  %v3501_v13 = vshrl.u32 %v6294_v38, %v3486_v47  ;;  %v7258_v14 = vshll.u32 %v3479_v51, 8 }
 0x1bf   :  { %v3455_v12 = vsel %vm7201_vm4, %v6995_v28, %v3452_v34  ;;  %v835_v62 = vclz %v5659_v19  ;;  %v5662_v41 = vadd.s32 4294967169, %v875_v32  ;;  %v7262_v8 = vsel %vm769_vm12, %v853_v58, %v829_v1 }
 0x1c0   :  { %6092 = vcosq.f32 %v3455_v12  ;;  %v3487_v7 = vshrl.u32 %v6289_v21, %v3486_v47  ;;  %v3502_v57 = vor.u32 %v3501_v13, %v3500_v45  ;;  %vm3503_vm13 = vcmp.lt.s32.totalorder %v3484_v63, 1 }
 0x1c1   :  { %6094 = vsinq.f32 %v3455_v12  ;;  %vm7267_vm14 = vcmp.le.f32.partialorder %v767_v9, 0.7853982  ;;  %v5660_v5 = vadd.s32 4294967294, %v835_v62  ;;  %vm3505_vm15 = vcmp.lt.s32.totalorder %v3484_v63, 3 }
 0x1c2   :  { %vm3506_vm1 = vcmp.lt.s32.totalorder %v3484_v63, 4  ;;  %v3511_v48 = vsel %vm3503_vm13, %v3490_v54, %v3493_v2  ;;  %v3515_v1 = vsel %vm3503_vm13, %v3493_v2, %v3496_v37  ;;  %vm3504_vm0 = vcmp.lt.s32.totalorder %v3484_v63, 2 }
 0x1c3   :  { %v3508_v35 = vsel %vm3506_vm1, %v3496_v37, 2102212464  ;;  %v3512_v17 = vsel %vm3506_vm1, %v3499_v40, 920167782  ;;  %v3516_v23 = vsel %vm3506_vm1, %v3502_v57, 1326507024  ;;  %v3507_v47 = vsel %vm3503_vm13, %v3487_v7, %v3490_v54 }
 0x1c4   :  { %vm5661_vm2 = vcmp.lt.s32.totalorder %v5660_v5, 0  ;;  %v3513_v46 = vsel %vm3505_vm15, %v3496_v37, %v3512_v17  ;;  %v3517_v24 = vsel %vm3505_vm15, %v3499_v40, %v3516_v23  ;;  %vm3462_vm3 = vcmp.lt.s32.totalorder %v7230_v11, 2 }
 0x1c5   :  { %v838_v9 = vsel %vm5661_vm2, 0, %v5660_v5  ;;  %v3514_v52 = vsel %vm3504_vm0, %v3511_v48, %v3513_v46  ;;  %v3518_v0 = vsel %vm3504_vm0, %v3515_v1, %v3517_v24  ;;  %vm3459_vm4 = vweird.f32 %v6995_v28 }
 0x1c6   :  { %v839_v16 = vsub.s32 32, %v838_v9  ;;  %v843_v56 = vsub.s32 4294967266, %v838_v9  ;;  %v3509_v39 = vsel %vm3505_vm15, %v3493_v2, %v3508_v35  ;;  %v881_v6 = vadd.s32 1, %v5662_v41 }
 0x1c7   :  { %v7282_v15 = vmul.u32.u64.low %v7258_v14, %v3518_v0  ;;  %v7283_v26 = vmul.u32.u64.high %v7258_v14, %v3518_v0, %v7282_v15  ;;  %v7286_v33 = vmul.u32.u64.low %v7258_v14, %v3514_v52  ;;  %v7287_v50 = vmul.u32.u64.high %v7258_v14, %v3514_v52, %v7286_v33 }
 0x1c8   :  { %v840_v51 = vshll.u32 %v7240_v22, %v838_v9  ;;  %v841_v20 = vshrl.u32 %v823_v49, %v839_v16  ;;  %v844_v32 = vadd.s32 127, %v843_v56  ;;  %vm882_vm5 = vcmp.gt.s32.totalorder %v881_v6, 0 }
 0x1c9   :  { %vm3463_vm6 = vcmp.eq.s32.totalorder %v7230_v11, 0  ;;  %v3510_v58 = vsel %vm3504_vm0, %v3507_v47, %v3509_v39  ;;  %v878_v45 = vand.u32 8388607, %v871_v3  ;;  %v883_v12 = vsel %vm882_vm5, %v881_v6, 0 }
 0x1ca   :  { %v6093_v34 = vpop.eup %6092  ;;  %vm3466_vm7 = vcmp.eq.s32.totalorder %v7230_v11, 2  ;;  %v842_v2 = vor.u32 %v841_v20, %v840_v51  ;;  %v845_v37 = vshll.u32 %v844_v32, 23  ;;  %v856_v49 = vsel %vm7267_vm14, 0, %v7262_v8 }
 0x1cb   :  { %v6095_v19 = vpop.eup %6094  ;;  %v3467_v54 = vxor.u32 2147483648, %v6093_v34  ;;  %vm3528_vm8 = vc.u32 %v7283_v26, %v7286_v33  ;;  %v3529_v22 = vadd.s32 1, %v7287_v50  ;;  %v3526_v62 = vmul.u32 %v7258_v14, %v3510_v58 }
 0x1cc   :  { %v3464_v40 = vxor.u32 2147483648, %v6095_v19  ;;  %v846_v13 = vor.u32 4788187, %v845_v37  ;;  %v885_v41 = vand.u32 31, %v883_v12  ;;  %v849_v57 = vcvt.s32.f32 %v842_v2 }
 0x1cd   :  { %v3468_v63 = vsel %vm3466_vm7, %v3467_v54, %v6095_v19  ;;  %v3530_v5 = vsel %vm3528_vm8, %v3529_v22, %v7287_v50  ;;  %v879_v48 = vor.u32 8388608, %v878_v45  ;;  %v860_v46 = vadd.s32 3, %v856_v49 }
 0x1ce   :  { %v3465_v7 = vsel %vm3463_vm6, %v6093_v34, %v3464_v40  ;;  %v847_v35 = vand.u32 2147483647, %v846_v13  ;;  %v3531_v17 = vadd.s32 %v3530_v5, %v3526_v62  ;;  %v886_v1 = vsub.s32 32, %v885_v41 }
 0x1cf   :  { %v3469_v8 = vsel %vm3462_vm3, %v3465_v7, %v3468_v63  ;;  %v7312_v24 = vshrl.u32 %v883_v12, 5  ;;  %v7316_v14 = vadd.f32 %v6859_v61, %v6472_v44  ;;  %v888_v52 = vshll.u32 %v6289_v21, %v885_v41 }
 0x1d0   :  { %v3470_v23 = vsel %vm3459_vm4, nan, %v3469_v8  ;;  %v850_v9 = vmul.f32 %v849_v57, %v847_v35  ;;  %v3532_v47 = vadd.s32 536870912, %v3531_v17  ;;  %v889_v11 = vshrl.u32 %v6290_v25, %v886_v1 }
 0x1d1   :  { %5580 = vst [vmem:[#allocation2 + $0xe8] sm:$0xff] %v3470_v23  ;;  %v891_v0 = vshll.u32 %v6290_v25, %v885_v41  ;;  %v892_v16 = vshrl.u32 %v6291_v27, %v886_v1  ;;  %v895_v28 = vshrl.u32 %v6292_v29, %v886_v1  ;;  %v898_v56 = vshrl.u32 %v6293_v31, %v886_v1 }
 0x1d2   :  { %v851_v39 = vxor.u32 2147483648, %v850_v9  ;;  %v3533_v6 = vshrl.u32 %v3532_v47, 30  ;;  %v894_v61 = vshll.u32 %v6291_v27, %v885_v41  ;;  %v897_v15 = vshll.u32 %v6292_v29, %v885_v41 }
 0x1d3   :  { %v890_v50 = vor.u32 %v889_v11, %v888_v52  ;;  %v893_v51 = vor.u32 %v892_v16, %v891_v0  ;;  %v900_v20 = vshll.u32 %v6293_v31, %v885_v41  ;;  %v901_v32 = vshrl.u32 %v6294_v38, %v886_v1 }
 0x1d4   :  { %v852_v34 = vsel %vm769_vm12, %v851_v39, %v850_v9  ;;  %v7330_v58 = vand.u32 3, %v860_v46  ;;  %v3534_v45 = vshll.u32 %v3533_v6, 30  ;;  %v899_v12 = vor.u32 %v898_v56, %v897_v15  ;;  %v7377_v39 = vpop.f32.mrb[8].mxu1 }
 0x1d5   :  { %v855_v19 = vsel %vm7267_vm14, %v7051_v42, %v852_v34  ;;  %v896_v54 = vor.u32 %v895_v28, %v894_v61  ;;  %v902_v2 = vor.u32 %v901_v32, %v900_v20  ;;  %v7335_v37 = vshll.u32 %v879_v48, 8 }
 0x1d6   :  { %6096 = vcosq.f32 %v855_v19  ;;  %v7337_v40 = vsub.s32 %v3531_v17, %v3534_v45  ;;  %vm903_vm9 = vcmp.lt.s32.totalorder %v7312_v24, 1  ;;  %v3578_v49 = vand.u32 2139095040, %v7316_v14 }
 0x1d7   :  { %6098 = vsinq.f32 %v855_v19  ;;  %vm904_vm10 = vcmp.lt.s32.totalorder %v7312_v24, 2  ;;  %vm906_vm11 = vcmp.lt.s32.totalorder %v7312_v24, 4  ;;  %v911_v53 = vsel %vm903_vm9, %v890_v50, %v893_v51 }
 0x1d8   :  { %v3537_v22 = vsub.s32 0, %v7337_v40  ;;  %v3557_v63 = vsub.s32 4, %v3533_v6  ;;  %vm905_vm12 = vcmp.lt.s32.totalorder %v7312_v24, 3  ;;  %v912_v13 = vsel %vm906_vm11, %v899_v12, 920167782 }
 0x1d9   :  { %v908_v62 = vsel %vm906_vm11, %v896_v54, 2102212464  ;;  %v913_v41 = vsel %vm905_vm12, %v896_v54, %v912_v13  ;;  %v915_v7 = vsel %vm903_vm9, %v893_v51, %v896_v54  ;;  %v916_v57 = vsel %vm906_vm11, %v902_v2, 1326507024 }
 0x1da   :  { %v5763_v5 = vmin.u32 %v3537_v22, %v7337_v40  ;;  %v887_v48 = vshrl.u32 %v6289_v21, %v886_v1  ;;  %v914_v8 = vsel %vm904_vm10, %v911_v53, %v913_v41  ;;  %v917_v35 = vsel %vm905_vm12, %v899_v12, %v916_v57 }
 0x1db   :  { %v918_v17 = vsel %vm904_vm10, %v915_v7, %v917_v35  ;;  %v7356_v23 = vmul.u32.u64.low %v7335_v37, %v914_v8  ;;  %v7357_v46 = vmul.u32.u64.high %v7335_v37, %v914_v8, %v7356_v23  ;;  %vm3473_vm13 = vcmp.lt.s32.totalorder %v7169_v18, 0 }
 0x1dc   :  { %v3539_v9 = vclz %v5763_v5  ;;  %v907_v47 = vsel %vm903_vm9, %v887_v48, %v890_v50  ;;  %v909_v52 = vsel %vm905_vm12, %v893_v51, %v908_v62  ;;  %vm859_vm14 = vweird.f32 %v7051_v42 }
 0x1dd   :  { %v3558_v1 = vsel %vm3473_vm13, %v3557_v63, %v3533_v6  ;;  %v7366_v11 = vmul.u32.u64.low %v7335_v37, %v918_v17  ;;  %v7367_v0 = vmul.u32.u64.high %v7335_v37, %v918_v17, %v7366_v11  ;;  %v3579_v16 = vshrl.u32 %v3578_v49, 23 }
 0x1de   :  { %vm862_vm15 = vcmp.lt.s32.totalorder %v7330_v58, 2  ;;  %vm863_vm1 = vcmp.eq.s32.totalorder %v7330_v58, 0  ;;  %vm7373_vm2 = vcmp.le.f32.partialorder %v3471_v55, 0.7853982  ;;  %v5764_v56 = vadd.s32 4294967294, %v3539_v9 }
 0x1df   :  { %vm866_vm0 = vcmp.eq.s32.totalorder %v7330_v58, 2  ;;  %v910_v6 = vsel %vm904_vm10, %v907_v47, %v909_v52  ;;  %v929_v61 = vadd.s32 1, %v7357_v46  ;;  %v5766_v15 = vadd.s32 4294967169, %v3579_v16 }
 0x1e0   :  { %v6097_v50 = vpop.eup %6096  ;;  %v3527_v51 = vadd.s32 %v7286_v33, %v7283_v26  ;;  %vm5765_vm3 = vcmp.lt.s32.totalorder %v5764_v56, 0  ;;  %v3560_v55 = vsel %vm7373_vm2, 0, %v3558_v1  ;;  %v3575_v20 = vand.u32 2147483647, %v7316_v14 }
 0x1e1   :  { %v6099_v32 = vpop.eup %6098  ;;  %v867_v34 = vxor.u32 2147483648, %v6097_v50  ;;  %v3542_v45 = vsel %vm5765_vm3, 0, %v5764_v56  ;;  %vm928_vm4 = vc.u32 %v7367_v0, %v7356_v23  ;;  %v7391_v24 = vadd.f32 %v6981_v36, %v6470_v43 }
 0x1e2   :  { %v864_v12 = vxor.u32 2147483648, %v6099_v32  ;;  %v3543_v19 = vsub.s32 32, %v3542_v45  ;;  %v3547_v54 = vsub.s32 4294967266, %v3542_v45  ;;  %v926_v26 = vmul.u32 %v7335_v37, %v910_v6 }
 0x1e3   :  { %v868_v33 = vsel %vm866_vm0, %v867_v34, %v6099_v32  ;;  %v3544_v2 = vshll.u32 %v7337_v40, %v3542_v45  ;;  %v930_v49 = vsel %vm928_vm4, %v929_v61, %v7357_v46  ;;  %v3585_v53 = vadd.s32 1, %v5766_v15 }
 0x1e4   :  { %v865_v22 = vsel %vm863_vm1, %v6097_v50, %v864_v12  ;;  %v3545_v63 = vshrl.u32 %v3527_v51, %v3543_v19  ;;  %v3548_v13 = vadd.s32 127, %v3547_v54  ;;  %v931_v36 = vadd.s32 %v930_v49, %v926_v26 }
 0x1e5   :  { %v869_v62 = vsel %vm862_vm15, %v865_v22, %v868_v33  ;;  %v3564_v41 = vadd.s32 3, %v3560_v55  ;;  %vm3586_vm5 = vcmp.gt.s32.totalorder %v3585_v53, 0  ;;  %v978_v37 = vand.u32 2139095040, %v7391_v24 }
 0x1e6   :  { %v870_v7 = vsel %vm859_vm14, nan, %v869_v62  ;;  %v3546_v40 = vor.u32 %v3545_v63, %v3544_v2  ;;  %v3549_v57 = vshll.u32 %v3548_v13, 23  ;;  %v932_v5 = vadd.s32 536870912, %v931_v36 }
 0x1e7   :  { %5555 = vst [vmem:[#allocation2 + $0x20] sm:$0xff] %v870_v7  ;;  %v3582_v48 = vand.u32 8388607, %v3575_v20  ;;  %v3587_v8 = vsel %vm3586_vm5, %v3585_v53, 0  ;;  %v7407_v46 = vand.u32 3, %v3564_v41  ;;  %v979_v1 = vshrl.u32 %v978_v37, 23 }
 0x1e8   :  { %v3550_v35 = vor.u32 4788187, %v3549_v57  ;;  %v933_v17 = vshrl.u32 %v932_v5, 30  ;;  %v3589_v58 = vand.u32 31, %v3587_v8  ;;  %v3553_v47 = vcvt.s32.f32 %v3546_v40 }
 0x1e9   :  { %v7410_v42 = vadd.s32 %v7356_v23, %v7367_v0  ;;  %v3583_v11 = vor.u32 8388608, %v3582_v48  ;;  %v975_v56 = vand.u32 2147483647, %v7391_v24  ;;  %vm873_vm6 = vcmp.lt.s32.totalorder %v7226_v30, 0 }
 0x1ea   :  { %v3551_v9 = vand.u32 2147483647, %v3550_v35  ;;  %v934_v52 = vshll.u32 %v933_v17, 30  ;;  %v3590_v16 = vsub.s32 32, %v3589_v58  ;;  %v3592_v15 = vshll.u32 %v6289_v21, %v3589_v58 }
 0x1eb   :  { %v3595_v50 = vshll.u32 %v6290_v25, %v3589_v58  ;;  %v3598_v32 = vshll.u32 %v6291_v27, %v3589_v58  ;;  %v3601_v23 = vshll.u32 %v6292_v29, %v3589_v58  ;;  %v5666_v12 = vadd.s32 4294967169, %v979_v1 }
 0x1ec   :  { %v3554_v6 = vmul.f32 %v3553_v47, %v3551_v9  ;;  %v7413_v61 = vsub.s32 %v931_v36, %v934_v52  ;;  %v3593_v51 = vshrl.u32 %v6290_v25, %v3590_v16  ;;  %v3596_v55 = vshrl.u32 %v6291_v27, %v3590_v16 }
 0x1ed   :  { %v3599_v45 = vshrl.u32 %v6292_v29, %v3590_v16  ;;  %v3588_v19 = vshrl.u32 %v3587_v8, 5  ;;  %v3602_v54 = vshrl.u32 %v6293_v31, %v3590_v16  ;;  %v3604_v26 = vshll.u32 %v6293_v31, %v3589_v58 }
 0x1ee   :  { %v3555_v0 = vxor.u32 2147483648, %v3554_v6  ;;  %v937_v34 = vsub.s32 0, %v7413_v61  ;;  %v7426_v33 = vshll.u32 %v3583_v11, 8  ;;  %v3594_v53 = vor.u32 %v3593_v51, %v3592_v15 }
 0x1ef   :  { %v3597_v22 = vor.u32 %v3596_v55, %v3595_v50  ;;  %v3600_v13 = vor.u32 %v3599_v45, %v3598_v32  ;;  %v3603_v36 = vor.u32 %v3602_v54, %v3601_v23  ;;  %v3605_v62 = vshrl.u32 %v6294_v38, %v3590_v16 }
 0x1f0   :  { %v3556_v2 = vsel %vm3473_vm13, %v3555_v0, %v3554_v6  ;;  %v5663_v49 = vmin.u32 %v937_v34, %v7413_v61  ;;  %v957_v37 = vsub.s32 4, %v933_v17  ;;  %v985_v7 = vadd.s32 1, %v5666_v12 }
 0x1f1   :  { %v3559_v63 = vsel %vm7373_vm2, %v7169_v18, %v3556_v2  ;;  %v3591_v40 = vshrl.u32 %v6289_v21, %v3590_v16  ;;  %v3606_v57 = vor.u32 %v3605_v62, %v3604_v26  ;;  %vm3607_vm7 = vcmp.lt.s32.totalorder %v3588_v19, 1 }
 0x1f2   :  { %6100 = vcosq.f32 %v3559_v63  ;;  %v939_v41 = vclz %v5663_v49  ;;  %vm7438_vm8 = vcmp.le.f32.partialorder %v871_v3, 0.7853982  ;;  %vm3609_vm9 = vcmp.lt.s32.totalorder %v3588_v19, 3  ;;  %v7446_v3 = vpop.f32.mrb[9].mxu0 }
 0x1f3   :  { %6102 = vsinq.f32 %v3559_v63  ;;  %vm3610_vm10 = vcmp.lt.s32.totalorder %v3588_v19, 4  ;;  %v3615_v48 = vsel %vm3607_vm7, %v3594_v53, %v3597_v22  ;;  %v3619_v58 = vsel %vm3607_vm7, %v3597_v22, %v3600_v13 }
 0x1f4   :  { %v5664_v28 = vadd.s32 4294967294, %v939_v41  ;;  %v3612_v8 = vsel %vm3610_vm10, %v3600_v13, 2102212464  ;;  %v3616_v35 = vsel %vm3610_vm10, %v3603_v36, 920167782  ;;  %vm3608_vm12 = vcmp.lt.s32.totalorder %v3588_v19, 2 }
 0x1f5   :  { %v3620_v9 = vsel %vm3610_vm10, %v3606_v57, 1326507024  ;;  %v3617_v47 = vsel %vm3609_vm9, %v3600_v13, %v3616_v35  ;;  %v958_v11 = vsel %vm873_vm6, %v957_v37, %v933_v17  ;;  %vm3566_vm13 = vcmp.lt.s32.totalorder %v7407_v46, 2 }
 0x1f6   :  { %vm5665_vm11 = vcmp.lt.s32.totalorder %v5664_v28, 0  ;;  %v3621_v52 = vsel %vm3609_vm9, %v3603_v36, %v3620_v9  ;;  %v3618_v16 = vsel %vm3608_vm12, %v3615_v48, %v3617_v47  ;;  %v3611_v51 = vsel %vm3607_vm7, %v3591_v40, %v3594_v53 }
 0x1f7   :  { %v942_v1 = vsel %vm5665_vm11, 0, %v5664_v28  ;;  %v3622_v6 = vsel %vm3608_vm12, %v3619_v58, %v3621_v52  ;;  %v3613_v55 = vsel %vm3609_vm9, %v3597_v22, %v3612_v8  ;;  %vm3563_vm14 = vweird.f32 %v7169_v18 }
 0x1f8   :  { %v943_v15 = vsub.s32 32, %v942_v1  ;;  %v947_v50 = vsub.s32 4294967266, %v942_v1  ;;  %v7457_v32 = vmul.u32.u64.low %v7426_v33, %v3622_v6  ;;  %v7458_v23 = vmul.u32.u64.high %v7426_v33, %v3622_v6, %v7457_v32 }
 0x1f9   :  { %v7461_v17 = vmul.u32.u64.low %v7426_v33, %v3618_v16  ;;  %v7462_v0 = vmul.u32.u64.high %v7426_v33, %v3618_v16, %v7461_v17  ;;  %v944_v34 = vshll.u32 %v7413_v61, %v942_v1  ;;  %vm986_vm15 = vcmp.gt.s32.totalorder %v985_v7, 0 }
 0x1fa   :  { %v945_v45 = vshrl.u32 %v7410_v42, %v943_v15  ;;  %v948_v12 = vadd.s32 127, %v947_v50  ;;  %vm3567_vm1 = vcmp.eq.s32.totalorder %v7407_v46, 0  ;;  %v3614_v54 = vsel %vm3608_vm12, %v3611_v51, %v3613_v55 }
 0x1fb   :  { %v982_v26 = vand.u32 8388607, %v975_v56  ;;  %v987_v2 = vsel %vm986_vm15, %v985_v7, 0  ;;  %vm3570_vm2 = vcmp.eq.s32.totalorder %v7407_v46, 2  ;;  %v960_v42 = vsel %vm7438_vm8, 0, %v958_v11 }
 0x1fc   :  { %v6101_v49 = vpop.eup %6100  ;;  %v946_v53 = vor.u32 %v945_v45, %v944_v34  ;;  %v949_v22 = vshll.u32 %v948_v12, 23  ;;  %v989_v63 = vand.u32 31, %v987_v2  ;;  %vm3632_vm0 = vc.u32 %v7458_v23, %v7461_v17 }
 0x1fd   :  { %v6103_v13 = vpop.eup %6102  ;;  %v3571_v61 = vxor.u32 2147483648, %v6101_v49  ;;  %v3633_v19 = vadd.s32 1, %v7462_v0  ;;  %v3630_v41 = vmul.u32 %v7426_v33, %v3614_v54  ;;  %v983_v57 = vor.u32 8388608, %v982_v26 }
 0x1fe   :  { %v3568_v36 = vxor.u32 2147483648, %v6103_v13  ;;  %v950_v62 = vor.u32 4788187, %v949_v22  ;;  %v990_v37 = vsub.s32 32, %v989_v63  ;;  %v7481_v28 = vadd.f32 %v7025_v4, %v6470_v43 }
 0x1ff   :  { %v3572_v7 = vsel %vm3570_vm2, %v3571_v61, %v6103_v13  ;;  %v3634_v40 = vsel %vm3632_vm0, %v3633_v19, %v7462_v0  ;;  %v953_v35 = vcvt.s32.f32 %v946_v53  ;;  %v964_v47 = vadd.s32 3, %v960_v42 }
 0x200   :  { %v3569_v48 = vsel %vm3567_vm1, %v6101_v49, %v3568_v36  ;;  %v951_v8 = vand.u32 2147483647, %v950_v62  ;;  %v3635_v58 = vadd.s32 %v3634_v40, %v3630_v41  ;;  %v993_v33 = vshrl.u32 %v6290_v25, %v990_v37 }
 0x201   :  { %v3573_v9 = vsel %vm3566_vm13, %v3569_v48, %v3572_v7  ;;  %v996_v52 = vshrl.u32 %v6291_v27, %v990_v37  ;;  %v988_v16 = vshrl.u32 %v987_v2, 5  ;;  %v992_v6 = vshll.u32 %v6289_v21, %v989_v63 }
 0x202   :  { %v3574_v1 = vsel %vm3563_vm14, nan, %v3573_v9  ;;  %v954_v11 = vmul.f32 %v953_v35, %v951_v8  ;;  %v3636_v4 = vadd.s32 536870912, %v3635_v58  ;;  %v995_v15 = vshll.u32 %v6290_v25, %v989_v63 }
 0x203   :  { %5581 = vst [vmem:[#allocation2 + $0xf0] sm:$0xff] %v3574_v1  ;;  %v999_v50 = vshrl.u32 %v6292_v29, %v990_v37  ;;  %v1002_v46 = vshrl.u32 %v6293_v31, %v990_v37  ;;  %v998_v32 = vshll.u32 %v6291_v27, %v989_v63  ;;  %v1001_v18 = vshll.u32 %v6292_v29, %v989_v63 }
 0x204   :  { %v955_v51 = vxor.u32 2147483648, %v954_v11  ;;  %v7495_v55 = vshrl.u32 %v3636_v4, 30  ;;  %v994_v0 = vor.u32 %v993_v33, %v992_v6  ;;  %v997_v34 = vor.u32 %v996_v52, %v995_v15  ;;  %v7525_v52 = vpop.f32.mrb[9].mxu1 }
 0x205   :  { %v1004_v45 = vshll.u32 %v6293_v31, %v989_v63  ;;  %v1005_v12 = vshrl.u32 %v6294_v38, %v990_v37  ;;  %v1003_v2 = vor.u32 %v1002_v46, %v1001_v18  ;;  %v7507_v53 = vand.u32 3, %v964_v47 }
 0x206   :  { %v956_v54 = vsel %vm873_vm6, %v955_v51, %v954_v11  ;;  %v3638_v26 = vshll.u32 %v7495_v55, 30  ;;  %v1000_v22 = vor.u32 %v999_v50, %v998_v32  ;;  %vm1007_vm3 = vcmp.lt.s32.totalorder %v988_v16, 1 }
 0x207   :  { %v959_v49 = vsel %vm7438_vm8, %v7226_v30, %v956_v54  ;;  %v1006_v13 = vor.u32 %v1005_v12, %v1004_v45  ;;  %v1023_v63 = vshll.u32 %v983_v57, 8  ;;  %vm1010_vm4 = vcmp.lt.s32.totalorder %v988_v16, 4 }
 0x208   :  { %6104 = vcosq.f32 %v959_v49  ;;  %v7509_v61 = vsub.s32 %v3635_v58, %v3638_v26  ;;  %v1015_v42 = vsel %vm1007_vm3, %v994_v0, %v997_v34  ;;  %v3682_v19 = vand.u32 2139095040, %v7481_v28 }
 0x209   :  { %6106 = vsinq.f32 %v959_v49  ;;  %vm1008_vm5 = vcmp.lt.s32.totalorder %v988_v16, 2  ;;  %vm1009_vm6 = vcmp.lt.s32.totalorder %v988_v16, 3  ;;  %v1016_v5 = vsel %vm1010_vm4, %v1003_v2, 920167782 }
 0x20a   :  { %v3641_v36 = vsub.s32 0, %v7509_v61  ;;  %v1012_v62 = vsel %vm1010_vm4, %v1000_v22, 2102212464  ;;  %v1017_v41 = vsel %vm1009_vm6, %v1000_v22, %v1016_v5  ;;  %v1019_v7 = vsel %vm1007_vm3, %v997_v34, %v1000_v22 }
 0x20b   :  { %v1020_v40 = vsel %vm1010_vm4, %v1006_v13, 1326507024  ;;  %v991_v57 = vshrl.u32 %v6289_v21, %v990_v37  ;;  %v1018_v8 = vsel %vm1008_vm5, %v1015_v42, %v1017_v41  ;;  %v3683_v33 = vshrl.u32 %v3682_v19, 23 }
 0x20c   :  { %v5767_v48 = vmin.u32 %v3641_v36, %v7509_v61  ;;  %v1021_v35 = vsel %vm1009_vm6, %v1003_v2, %v1020_v40  ;;  %v7521_v9 = vmul.u32.u64.low %v1023_v63, %v1018_v8  ;;  %v7522_v47 = vmul.u32.u64.high %v1023_v63, %v1018_v8, %v7521_v9 }
 0x20d   :  { %v1022_v58 = vsel %vm1008_vm5, %v1019_v7, %v1021_v35  ;;  %vm3577_vm7 = vcmp.lt.s32.totalorder %v7316_v14, 0  ;;  %v1011_v11 = vsel %vm1007_vm3, %v991_v57, %v994_v0  ;;  %v1013_v37 = vsel %vm1009_vm6, %v997_v34, %v1012_v62 }
 0x20e   :  { %v3643_v1 = vclz %v5767_v48  ;;  %vm963_vm8 = vweird.f32 %v7226_v30  ;;  %v3661_v4 = vsub.s32 4, %v7495_v55  ;;  %v5770_v50 = vadd.s32 4294967169, %v3683_v33 }
 0x20f   :  { %v7532_v6 = vmul.u32.u64.low %v1023_v63, %v1022_v58  ;;  %v7533_v15 = vmul.u32.u64.high %v1023_v63, %v1022_v58, %v7532_v6  ;;  %vm7537_vm9 = vcmp.le.f32.partialorder %v3575_v20, 0.7853982  ;;  %v3679_v32 = vand.u32 2147483647, %v7481_v28 }
 0x210   :  { %v5768_v51 = vadd.s32 4294967294, %v3643_v1  ;;  %v7544_v18 = vadd.f32 %v7119_v10, %v6472_v44  ;;  %vm966_vm10 = vcmp.lt.s32.totalorder %v7507_v53, 2  ;;  %v1014_v0 = vsel %vm1008_vm5, %v1011_v11, %v1013_v37 }
 0x211   :  { %v1033_v34 = vadd.s32 1, %v7522_v47  ;;  %v3689_v45 = vadd.s32 1, %v5770_v50  ;;  %vm967_vm11 = vcmp.eq.s32.totalorder %v7507_v53, 0  ;;  %vm970_vm12 = vcmp.eq.s32.totalorder %v7507_v53, 2 }
 0x212   :  { %v6105_v12 = vpop.eup %6104  ;;  %v3631_v20 = vadd.s32 %v7461_v17, %v7458_v23  ;;  %vm5769_vm13 = vcmp.lt.s32.totalorder %v5768_v51, 0  ;;  %v3662_v16 = vsel %vm3577_vm7, %v3661_v4, %v7495_v55  ;;  %vm1032_vm14 = vc.u32 %v7533_v15, %v7521_v9 }
 0x213   :  { %v6107_v54 = vpop.eup %6106  ;;  %v971_v26 = vxor.u32 2147483648, %v6105_v12  ;;  %v3646_v10 = vsel %vm5769_vm13, 0, %v5768_v51  ;;  %v1030_v13 = vmul.u32 %v1023_v63, %v1014_v0  ;;  %v1034_v23 = vsel %vm1032_vm14, %v1033_v34, %v7522_v47 }
 0x214   :  { %v968_v2 = vxor.u32 2147483648, %v6107_v54  ;;  %v3647_v49 = vsub.s32 32, %v3646_v10  ;;  %v3651_v22 = vsub.s32 4294967266, %v3646_v10  ;;  %v3648_v19 = vshll.u32 %v7509_v61, %v3646_v10 }
 0x215   :  { %v972_v42 = vsel %vm970_vm12, %v971_v26, %v6107_v54  ;;  %vm3690_vm15 = vcmp.gt.s32.totalorder %v3689_v45, 0  ;;  %v1035_v62 = vadd.s32 %v1034_v23, %v1030_v13  ;;  %v3664_v41 = vsel %vm7537_vm9, 0, %v3662_v16 }
 0x216   :  { %v969_v17 = vsel %vm967_vm11, %v6105_v12, %v968_v2  ;;  %v3649_v36 = vshrl.u32 %v3631_v20, %v3647_v49  ;;  %v3652_v5 = vadd.s32 127, %v3651_v22  ;;  %v3686_v63 = vand.u32 8388607, %v3679_v32 }
 0x217   :  { %v973_v55 = vsel %vm966_vm10, %v969_v17, %v972_v42  ;;  %v3691_v7 = vsel %vm3690_vm15, %v3689_v45, 0  ;;  %v1036_v57 = vadd.s32 536870912, %v1035_v62  ;;  %v3668_v58 = vadd.s32 3, %v3664_v41 }
 0x218   :  { %v974_v61 = vsel %vm963_vm8, nan, %v973_v55  ;;  %v3650_v40 = vor.u32 %v3649_v36, %v3648_v19  ;;  %v3653_v48 = vshll.u32 %v3652_v5, 23  ;;  %v3693_v8 = vand.u32 31, %v3691_v7 }
 0x219   :  { %5556 = vst [vmem:[#allocation2 + $0x28] sm:$0xff] %v974_v61  ;;  %v7570_v47 = vshrl.u32 %v1036_v57, 30  ;;  %v1079_v53 = vand.u32 2147483647, %v7544_v18  ;;  %v3687_v1 = vor.u32 8388608, %v3686_v63  ;;  %v1082_v37 = vand.u32 2139095040, %v7544_v18 }
 0x21a   :  { %v3654_v35 = vor.u32 4788187, %v3653_v48  ;;  %v3657_v33 = vcvt.s32.f32 %v3650_v40  ;;  %v3694_v11 = vsub.s32 32, %v3693_v8  ;;  %v3696_v6 = vshll.u32 %v6289_v21, %v3693_v8 }
 0x21b   :  { %v1038_v30 = vshll.u32 %v7570_v47, 30  ;;  %v3699_v50 = vshll.u32 %v6290_v25, %v3693_v8  ;;  %v3702_v34 = vshll.u32 %v6291_v27, %v3693_v8  ;;  %v3705_v54 = vshll.u32 %v6292_v29, %v3693_v8 }
 0x21c   :  { %v3655_v4 = vand.u32 2147483647, %v3654_v35  ;;  %v3697_v51 = vshrl.u32 %v6290_v25, %v3694_v11  ;;  %v3700_v0 = vshrl.u32 %v6291_v27, %v3694_v11  ;;  %v3703_v45 = vshrl.u32 %v6292_v29, %v3694_v11 }
 0x21d   :  { %v7581_v20 = vsub.s32 %v1035_v62, %v1038_v30  ;;  %v3706_v26 = vshrl.u32 %v6293_v31, %v3694_v11  ;;  %v7585_v10 = vand.u32 3, %v3668_v58  ;;  %v1031_v16 = vadd.s32 %v7521_v9, %v7533_v15 }
 0x21e   :  { %v3658_v12 = vmul.f32 %v3657_v33, %v3655_v4  ;;  %v1083_v2 = vshrl.u32 %v1082_v37, 23  ;;  %v7591_v49 = vand.u32 8388607, %v1079_v53  ;;  %v3692_v42 = vshrl.u32 %v3691_v7, 5 }
 0x21f   :  { %v1041_v13 = vsub.s32 0, %v7581_v20  ;;  %v3698_v19 = vor.u32 %v3697_v51, %v3696_v6  ;;  %v3701_v23 = vor.u32 %v3700_v0, %v3699_v50  ;;  %v3704_v17 = vor.u32 %v3703_v45, %v3702_v34 }
 0x220   :  { %v3659_v22 = vxor.u32 2147483648, %v3658_v12  ;;  %v3708_v36 = vshll.u32 %v6293_v31, %v3693_v8  ;;  %v3709_v5 = vshrl.u32 %v6294_v38, %v3694_v11  ;;  %v3707_v15 = vor.u32 %v3706_v26, %v3705_v54  ;;  %v7614_v54 = vpop.f32.mrb[10].mxu0 }
 0x221   :  { %v5667_v9 = vmin.u32 %v1041_v13, %v7581_v20  ;;  %v7599_v55 = vshll.u32 %v3687_v1, 8  ;;  %v3695_v63 = vshrl.u32 %v6289_v21, %v3694_v11  ;;  %v5670_v61 = vadd.s32 4294967169, %v1083_v2 }
 0x222   :  { %v3660_v62 = vsel %vm3577_vm7, %v3659_v22, %v3658_v12  ;;  %v3710_v7 = vor.u32 %v3709_v5, %v3708_v36  ;;  %vm3711_vm1 = vcmp.lt.s32.totalorder %v3692_v42, 1  ;;  %vm3714_vm2 = vcmp.lt.s32.totalorder %v3692_v42, 4 }
 0x223   :  { %v3663_v41 = vsel %vm7537_vm9, %v7316_v14, %v3660_v62  ;;  %v1043_v40 = vclz %v5667_v9  ;;  %vm977_vm0 = vcmp.lt.s32.totalorder %v7391_v24, 0  ;;  %vm3712_vm3 = vcmp.lt.s32.totalorder %v3692_v42, 2 }
 0x224   :  { %6108 = vcosq.f32 %v3663_v41  ;;  %v3716_v48 = vsel %vm3714_vm2, %v3704_v17, 2102212464  ;;  %v3719_v57 = vsel %vm3711_vm1, %v3698_v19, %v3701_v23  ;;  %vm3713_vm4 = vcmp.lt.s32.totalorder %v3692_v42, 3 }
 0x225   :  { %6110 = vsinq.f32 %v3663_v41  ;;  %v5668_v8 = vadd.s32 4294967294, %v1043_v40  ;;  %v3720_v35 = vsel %vm3714_vm2, %v3707_v15, 920167782  ;;  %v3723_v58 = vsel %vm3711_vm1, %v3701_v23, %v3704_v17 }
 0x226   :  { %v3715_v46 = vsel %vm3711_vm1, %v3695_v63, %v3698_v19  ;;  %v3721_v33 = vsel %vm3713_vm4, %v3704_v17, %v3720_v35  ;;  %v3724_v1 = vsel %vm3714_vm2, %v3710_v7, 1326507024  ;;  %v1089_v11 = vadd.s32 1, %v5670_v61 }
 0x227   :  { %vm5669_vm5 = vcmp.lt.s32.totalorder %v5668_v8, 0  ;;  %v3717_v37 = vsel %vm3713_vm4, %v3701_v23, %v3716_v48  ;;  %v3722_v4 = vsel %vm3712_vm3, %v3719_v57, %v3721_v33  ;;  %v3725_v30 = vsel %vm3713_vm4, %v3707_v15, %v3724_v1 }
 0x228   :  { %v1046_v6 = vsel %vm5669_vm5, 0, %v5668_v8  ;;  %v3726_v50 = vsel %vm3712_vm3, %v3723_v58, %v3725_v30  ;;  %v7609_v51 = vmul.u32.u64.low %v7599_v55, %v3722_v4  ;;  %v7610_v0 = vmul.u32.u64.high %v7599_v55, %v3722_v4, %v7609_v51 }
 0x229   :  { %v1047_v34 = vsub.s32 32, %v1046_v6  ;;  %v1051_v45 = vsub.s32 4294967266, %v1046_v6  ;;  %v1061_v12 = vsub.s32 4, %v7570_v47  ;;  %vm1090_vm6 = vcmp.gt.s32.totalorder %v1089_v11, 0 }
 0x22a   :  { %vm3667_vm7 = vweird.f32 %v7316_v14  ;;  %v3718_v26 = vsel %vm3712_vm3, %v3715_v46, %v3717_v37  ;;  %v7619_v2 = vmul.u32.u64.low %v7599_v55, %v3726_v50  ;;  %v7620_v22 = vmul.u32.u64.high %v7599_v55, %v3726_v50, %v7619_v2 }
 0x22b   :  { %v1091_v13 = vsel %vm1090_vm6, %v1089_v11, 0  ;;  %v1048_v19 = vshll.u32 %v7581_v20, %v1046_v6  ;;  %v1049_v23 = vshrl.u32 %v1031_v16, %v1047_v34  ;;  %v1052_v17 = vadd.s32 127, %v1051_v45 }
 0x22c   :  { %v1093_v36 = vand.u32 31, %v1091_v13  ;;  %vm3670_vm8 = vcmp.lt.s32.totalorder %v7585_v10, 2  ;;  %vm3671_vm9 = vcmp.eq.s32.totalorder %v7585_v10, 0  ;;  %vm7627_vm10 = vcmp.le.f32.partialorder %v975_v56, 0.7853982 }
 0x22d   :  { %v3737_v42 = vadd.s32 1, %v7610_v0  ;;  %vm3674_vm11 = vcmp.eq.s32.totalorder %v7585_v10, 2  ;;  %v1050_v9 = vor.u32 %v1049_v23, %v1048_v19  ;;  %v1053_v20 = vshll.u32 %v1052_v17, 23 }
 0x22e   :  { %v6109_v62 = vpop.eup %6108  ;;  %v1062_v16 = vsel %vm977_vm0, %v1061_v12, %v7570_v47  ;;  %v3734_v63 = vmul.u32 %v7599_v55, %v3718_v26  ;;  %vm3736_vm12 = vc.u32 %v7620_v22, %v7609_v51  ;;  %v1094_v56 = vsub.s32 32, %v1093_v36 }
 0x22f   :  { %v6111_v15 = vpop.eup %6110  ;;  %v3675_v41 = vxor.u32 2147483648, %v6109_v62  ;;  %v1054_v61 = vor.u32 4788187, %v1053_v20  ;;  %v3738_v40 = vsel %vm3736_vm12, %v3737_v42, %v7610_v0  ;;  %v1087_v48 = vor.u32 8388608, %v7591_v49 }
 0x230   :  { %v3672_v7 = vxor.u32 2147483648, %v6111_v15  ;;  %v1064_v8 = vsel %vm7627_vm10, 0, %v1062_v16  ;;  %v3739_v35 = vadd.s32 %v3738_v40, %v3734_v63  ;;  %v7645_v47 = vadd.f32 %v7191_v60, %v6472_v44 }
 0x231   :  { %v3676_v57 = vsel %vm3674_vm11, %v3675_v41, %v6111_v15  ;;  %v1055_v58 = vand.u32 2147483647, %v1054_v61  ;;  %v1057_v46 = vcvt.s32.f32 %v1050_v9  ;;  %v7649_v33 = vshrl.u32 %v1091_v13, 5 }
 0x232   :  { %v3673_v55 = vsel %vm3671_vm9, %v6109_v62, %v3672_v7  ;;  %v3740_v49 = vadd.s32 536870912, %v3739_v35  ;;  %v1097_v11 = vshrl.u32 %v6290_v25, %v1094_v56  ;;  %v1100_v37 = vshrl.u32 %v6291_v27, %v1094_v56 }
 0x233   :  { %v3677_v1 = vsel %vm3670_vm8, %v3673_v55, %v3676_v57  ;;  %v1058_v60 = vmul.f32 %v1057_v46, %v1055_v58  ;;  %v1096_v30 = vshll.u32 %v6289_v21, %v1093_v36  ;;  %v1103_v6 = vshrl.u32 %v6292_v29, %v1094_v56 }
 0x234   :  { %v3678_v4 = vsel %vm3667_vm7, nan, %v3677_v1  ;;  %v7659_v50 = vshrl.u32 %v3740_v49, 30  ;;  %v1099_v0 = vshll.u32 %v6290_v25, %v1093_v36  ;;  %v1102_v10 = vshll.u32 %v6291_v27, %v1093_v36 }
 0x235   :  { %5582 = vst [vmem:[#allocation2 + $0xf8] sm:$0xff] %v3678_v4  ;;  %v1106_v34 = vshrl.u32 %v6293_v31, %v1094_v56  ;;  %v1059_v45 = vxor.u32 2147483648, %v1058_v60  ;;  %v1105_v12 = vshll.u32 %v6292_v29, %v1093_v36  ;;  %v1108_v14 = vshll.u32 %v6293_v31, %v1093_v36 }
 0x236   :  { %v1109_v26 = vshrl.u32 %v6294_v38, %v1094_v56  ;;  %v3742_v2 = vshll.u32 %v7659_v50, 30  ;;  %v1098_v13 = vor.u32 %v1097_v11, %v1096_v30  ;;  %v1101_v19 = vor.u32 %v1100_v37, %v1099_v0 }
 0x237   :  { %v7668_v23 = vshll.u32 %v1087_v48, 8  ;;  %v1060_v17 = vsel %vm977_vm0, %v1059_v45, %v1058_v60  ;;  %v1104_v42 = vor.u32 %v1103_v6, %v1102_v10  ;;  %v1107_v62 = vor.u32 %v1106_v34, %v1105_v12 }
 0x238   :  { %v1110_v9 = vor.u32 %v1109_v26, %v1108_v14  ;;  %v1063_v20 = vsel %vm7627_vm10, %v7391_v24, %v1060_v17  ;;  %v1068_v16 = vadd.s32 3, %v1064_v8  ;;  %v7675_v36 = vsub.s32 %v3739_v35, %v3742_v2 }
 0x239   :  { %v3786_v15 = vand.u32 2139095040, %v7645_v47  ;;  %6112 = vcosq.f32 %v1063_v20  ;;  %v1095_v41 = vshrl.u32 %v6289_v21, %v1094_v56  ;;  %vm1111_vm13 = vcmp.lt.s32.totalorder %v7649_v33, 1 }
 0x23a   :  { %vm1113_vm14 = vcmp.lt.s32.totalorder %v7649_v33, 3  ;;  %6114 = vsinq.f32 %v1063_v20  ;;  %v3745_v63 = vsub.s32 0, %v7675_v36  ;;  %vm1114_vm15 = vcmp.lt.s32.totalorder %v7649_v33, 4 }
 0x23b   :  { %v1119_v5 = vsel %vm1111_vm13, %v1098_v13, %v1101_v19  ;;  %v1116_v7 = vsel %vm1114_vm15, %v1104_v42, 2102212464  ;;  %v1120_v61 = vsel %vm1114_vm15, %v1107_v62, 920167782  ;;  %v1123_v40 = vsel %vm1111_vm13, %v1101_v19, %v1104_v42 }
 0x23c   :  { %v1124_v48 = vsel %vm1114_vm15, %v1110_v9, 1326507024  ;;  %v5771_v56 = vmin.u32 %v3745_v63, %v7675_v36  ;;  %vm1112_vm1 = vcmp.lt.s32.totalorder %v7649_v33, 2  ;;  %v1121_v57 = vsel %vm1113_vm14, %v1104_v42, %v1120_v61 }
 0x23d   :  { %v1125_v8 = vsel %vm1113_vm14, %v1107_v62, %v1124_v48  ;;  %v1069_v35 = vand.u32 3, %v1068_v16  ;;  %v1122_v55 = vsel %vm1112_vm1, %v1119_v5, %v1121_v57  ;;  %v3787_v46 = vshrl.u32 %v3786_v15, 23 }
 0x23e   :  { %v1126_v58 = vsel %vm1112_vm1, %v1123_v40, %v1125_v8  ;;  %v3747_v1 = vclz %v5771_v56  ;;  %v3765_v49 = vsub.s32 4, %v7659_v50  ;;  %v1115_v11 = vsel %vm1111_vm13, %v1095_v41, %v1098_v13 }
 0x23f   :  { %v1117_v37 = vsel %vm1113_vm14, %v1101_v19, %v1116_v7  ;;  %v7703_v4 = vmul.u32.u64.low %v7668_v23, %v1126_v58  ;;  %v7704_v60 = vmul.u32.u64.high %v7668_v23, %v1126_v58, %v7703_v4  ;;  %vm1067_vm2 = vweird.f32 %v7391_v24 }
 0x240   :  { %v7707_v30 = vmul.u32.u64.low %v7668_v23, %v1122_v55  ;;  %v7708_v6 = vmul.u32.u64.high %v7668_v23, %v1122_v55, %v7707_v30  ;;  %vm7714_vm0 = vcmp.le.f32.partialorder %v3679_v32, 0.7853982  ;;  %vm3681_vm3 = vcmp.lt.s32.totalorder %v7481_v28, 0 }
 0x241   :  { %v5772_v10 = vadd.s32 4294967294, %v3747_v1  ;;  %v5774_v34 = vadd.s32 4294967169, %v3787_v46  ;;  %vm1070_vm4 = vcmp.lt.s32.totalorder %v1069_v35, 2  ;;  %vm1071_vm5 = vcmp.eq.s32.totalorder %v1069_v35, 0 }
 0x242   :  { %vm1074_vm6 = vcmp.eq.s32.totalorder %v1069_v35, 2  ;;  %v1118_v45 = vsel %vm1112_vm1, %v1115_v11, %v1117_v37  ;;  %v3735_v12 = vadd.s32 %v7609_v51, %v7620_v22  ;;  %v3783_v14 = vand.u32 2147483647, %v7645_v47 }
 0x243   :  { %vm5773_vm7 = vcmp.lt.s32.totalorder %v5772_v10, 0  ;;  %v3793_v32 = vadd.s32 1, %v5774_v34  ;;  %v6113_v26 = vpop.eup %6112  ;;  %v3766_v13 = vsel %vm3681_vm3, %v3765_v49, %v7659_v50  ;;  %vm1136_vm8 = vc.u32 %v7704_v60, %v7707_v30 }
 0x244   :  { %v3750_v2 = vsel %vm5773_vm7, 0, %v5772_v10  ;;  %v1137_v19 = vadd.s32 1, %v7708_v6  ;;  %v6115_v33 = vpop.eup %6114  ;;  %v1075_v17 = vxor.u32 2147483648, %v6113_v26  ;;  %v1134_v51 = vmul.u32 %v7668_v23, %v1118_v45 }
 0x245   :  { %v3751_v42 = vsub.s32 32, %v3750_v2  ;;  %v3755_v62 = vsub.s32 4294967266, %v3750_v2  ;;  %v1072_v22 = vxor.u32 2147483648, %v6115_v33  ;;  %v3752_v9 = vshll.u32 %v7675_v36, %v3750_v2 }
 0x246   :  { %v1138_v20 = vsel %vm1136_vm8, %v1137_v19, %v7708_v6  ;;  %vm3794_vm9 = vcmp.gt.s32.totalorder %v3793_v32, 0  ;;  %v1076_v16 = vsel %vm1074_vm6, %v1075_v17, %v6115_v33  ;;  %v3768_v5 = vsel %vm7714_vm0, 0, %v3766_v13 }
 0x247   :  { %v3753_v50 = vshrl.u32 %v3735_v12, %v3751_v42  ;;  %v3756_v15 = vadd.s32 127, %v3755_v62  ;;  %v1139_v41 = vadd.s32 %v1138_v20, %v1134_v51  ;;  %v1073_v63 = vsel %vm1071_vm5, %v6113_v26, %v1072_v22  ;;  %v7755_v12 = vpop.f32.mrb[10].mxu1 }
 0x248   :  { %v3790_v7 = vand.u32 8388607, %v3783_v14  ;;  %v3795_v23 = vsel %vm3794_vm9, %v3793_v32, 0  ;;  %v1077_v61 = vsel %vm1070_vm4, %v1073_v63, %v1076_v16  ;;  %v3772_v55 = vadd.s32 3, %v3768_v5 }
 0x249   :  { %v3754_v36 = vor.u32 %v3753_v50, %v3752_v9  ;;  %v3757_v40 = vshll.u32 %v3756_v15, 23  ;;  %v1140_v48 = vadd.s32 536870912, %v1139_v41  ;;  %v1078_v56 = vsel %vm1067_vm2, nan, %v1077_v61 }
 0x24a   :  { %v3797_v57 = vand.u32 31, %v3795_v23  ;;  %5557 = vst [vmem:[#allocation2 + $0x30] sm:$0xff] %v1078_v56  ;;  %v3791_v1 = vor.u32 8388608, %v3790_v7  ;;  %v7746_v11 = vadd.f32 %v7290_v59, %v6470_v43  ;;  %v7761_v13 = vand.u32 3, %v3772_v55 }
 0x24b   :  { %v3758_v8 = vor.u32 4788187, %v3757_v40  ;;  %v7742_v58 = vshrl.u32 %v1140_v48, 30  ;;  %v3761_v46 = vcvt.s32.f32 %v3754_v36  ;;  %v3796_v42 = vshrl.u32 %v3795_v23, 5 }
 0x24c   :  { %v3798_v49 = vsub.s32 32, %v3797_v57  ;;  %v3800_v4 = vshll.u32 %v6289_v21, %v3797_v57  ;;  %v3803_v24 = vshll.u32 %v6290_v25, %v3797_v57  ;;  %v3806_v34 = vshll.u32 %v6291_v27, %v3797_v57 }
 0x24d   :  { %v3759_v35 = vand.u32 2147483647, %v3758_v8  ;;  %v1142_v37 = vshll.u32 %v7742_v58, 30  ;;  %v3809_v26 = vshll.u32 %v6292_v29, %v3797_v57  ;;  %v7763_v19 = vshll.u32 %v3791_v1, 8 }
 0x24e   :  { %v3801_v6 = vshrl.u32 %v6290_v25, %v3798_v49  ;;  %v3804_v10 = vshrl.u32 %v6291_v27, %v3798_v49  ;;  %v3807_v45 = vshrl.u32 %v6292_v29, %v3798_v49  ;;  %v3810_v2 = vshrl.u32 %v6293_v31, %v3798_v49 }
 0x24f   :  { %v3762_v32 = vmul.f32 %v3761_v46, %v3759_v35  ;;  %v7757_v59 = vsub.s32 %v1139_v41, %v1142_v37  ;;  %v3812_v9 = vshll.u32 %v6293_v31, %v3797_v57  ;;  %v3813_v20 = vshrl.u32 %v6294_v38, %v3798_v49 }
 0x250   :  { %v3802_v62 = vor.u32 %v3801_v6, %v3800_v4  ;;  %v3805_v51 = vor.u32 %v3804_v10, %v3803_v24  ;;  %v3808_v22 = vor.u32 %v3807_v45, %v3806_v34  ;;  %v3811_v15 = vor.u32 %v3810_v2, %v3809_v26 }
 0x251   :  { %v3763_v33 = vxor.u32 2147483648, %v3762_v32  ;;  %v1145_v17 = vsub.s32 0, %v7757_v59  ;;  %v1186_v41 = vand.u32 2139095040, %v7746_v11  ;;  %v1165_v5 = vsub.s32 4, %v7742_v58 }
 0x252   :  { %v3799_v7 = vshrl.u32 %v6289_v21, %v3798_v49  ;;  %v3814_v23 = vor.u32 %v3813_v20, %v3812_v9  ;;  %vm1081_vm10 = vcmp.lt.s32.totalorder %v7544_v18, 0  ;;  %vm3815_vm11 = vcmp.lt.s32.totalorder %v3796_v42, 1 }
 0x253   :  { %v3764_v16 = vsel %vm3681_vm3, %v3763_v33, %v3762_v32  ;;  %v5671_v50 = vmin.u32 %v1145_v17, %v7757_v59  ;;  %vm3818_vm12 = vcmp.lt.s32.totalorder %v3796_v42, 4  ;;  %vm3816_vm13 = vcmp.lt.s32.totalorder %v3796_v42, 2 }
 0x254   :  { %v3767_v63 = vsel %vm7714_vm0, %v7481_v28, %v3764_v16  ;;  %v3820_v36 = vsel %vm3818_vm12, %v3808_v22, 2102212464  ;;  %v3823_v40 = vsel %vm3815_vm11, %v3802_v62, %v3805_v51  ;;  %vm3817_vm14 = vcmp.lt.s32.totalorder %v3796_v42, 3 }
 0x255   :  { %6116 = vcosq.f32 %v3767_v63  ;;  %v1147_v61 = vclz %v5671_v50  ;;  %v3824_v56 = vsel %vm3818_vm12, %v3811_v15, 920167782  ;;  %v3827_v0 = vsel %vm3815_vm11, %v3805_v51, %v3808_v22 }
 0x256   :  { %6118 = vsinq.f32 %v3767_v63  ;;  %vm7780_vm15 = vcmp.le.f32.partialorder %v1079_v53, 0.7853982  ;;  %v3819_v8 = vsel %vm3815_vm11, %v3799_v7, %v3802_v62  ;;  %v3825_v55 = vsel %vm3817_vm14, %v3808_v22, %v3824_v56  ;;  %v7791_v53 = vpop.f32.mrb[11].mxu0 }
 0x257   :  { %v5672_v48 = vadd.s32 4294967294, %v1147_v61  ;;  %v3828_v46 = vsel %vm3818_vm12, %v3814_v23, 1326507024  ;;  %v1187_v1 = vshrl.u32 %v1186_v41, 23  ;;  %v3821_v49 = vsel %vm3817_vm14, %v3805_v51, %v3820_v36 }
 0x258   :  { %v3826_v35 = vsel %vm3816_vm13, %v3823_v40, %v3825_v55  ;;  %v3829_v37 = vsel %vm3817_vm14, %v3811_v15, %v3828_v46  ;;  %v1135_v34 = vadd.s32 %v7707_v30, %v7704_v60  ;;  %vm3771_vm2 = vweird.f32 %v7481_v28 }
 0x259   :  { %vm5673_vm1 = vcmp.lt.s32.totalorder %v5672_v48, 0  ;;  %v3830_v24 = vsel %vm3816_vm13, %v3827_v0, %v3829_v37  ;;  %v7787_v6 = vmul.u32.u64.low %v7763_v19, %v3826_v35  ;;  %v7788_v10 = vmul.u32.u64.high %v7763_v19, %v3826_v35, %v7787_v6 }
 0x25a   :  { %v1150_v4 = vsel %vm5673_vm1, 0, %v5672_v48  ;;  %v5674_v26 = vadd.s32 4294967169, %v1187_v1  ;;  %vm3774_vm0 = vcmp.lt.s32.totalorder %v7761_v13, 2  ;;  %v3822_v2 = vsel %vm3816_vm13, %v3819_v8, %v3821_v49 }
 0x25b   :  { %v1151_v45 = vsub.s32 32, %v1150_v4  ;;  %v1155_v32 = vsub.s32 4294967266, %v1150_v4  ;;  %v7799_v33 = vmul.u32.u64.low %v7763_v19, %v3830_v24  ;;  %v7800_v17 = vmul.u32.u64.high %v7763_v19, %v3830_v24, %v7799_v33 }
 0x25c   :  { %v1152_v62 = vshll.u32 %v7757_v59, %v1150_v4  ;;  %v1193_v9 = vadd.s32 1, %v5674_v26  ;;  %vm3775_vm3 = vcmp.eq.s32.totalorder %v7761_v13, 0  ;;  %vm3778_vm4 = vcmp.eq.s32.totalorder %v7761_v13, 2 }
 0x25d   :  { %v1153_v51 = vshrl.u32 %v1135_v34, %v1151_v45  ;;  %v1156_v22 = vadd.s32 127, %v1155_v32  ;;  %v1166_v60 = vsel %vm1081_vm10, %v1165_v5, %v7742_v58  ;;  %v3841_v30 = vadd.s32 1, %v7788_v10 }
 0x25e   :  { %v1183_v50 = vand.u32 2147483647, %v7746_v11  ;;  %vm1194_vm5 = vcmp.gt.s32.totalorder %v1193_v9, 0  ;;  %v3838_v41 = vmul.u32 %v7763_v19, %v3822_v2  ;;  %vm3840_vm6 = vc.u32 %v7800_v17, %v7787_v6 }
 0x25f   :  { %v6117_v42 = vpop.eup %6116  ;;  %v1154_v20 = vor.u32 %v1153_v51, %v1152_v62  ;;  %v1157_v16 = vshll.u32 %v1156_v22, 23  ;;  %v1195_v63 = vsel %vm1194_vm5, %v1193_v9, 0  ;;  %v1168_v58 = vsel %vm7780_vm15, 0, %v1166_v60 }
 0x260   :  { %v6119_v59 = vpop.eup %6118  ;;  %v3779_v15 = vxor.u32 2147483648, %v6117_v42  ;;  %v3842_v5 = vsel %vm3840_vm6, %v3841_v30, %v7788_v10  ;;  %v1197_v40 = vand.u32 31, %v1195_v63  ;;  %v7820_v48 = vadd.f32 %v7377_v39, %v6470_v43 }
 0x261   :  { %v3776_v7 = vxor.u32 2147483648, %v6119_v59  ;;  %v1158_v23 = vor.u32 4788187, %v1157_v16  ;;  %v3843_v36 = vadd.s32 %v3842_v5, %v3838_v41  ;;  %v1161_v0 = vcvt.s32.f32 %v1154_v20 }
 0x262   :  { %v3780_v61 = vsel %vm3778_vm4, %v3779_v15, %v6119_v59  ;;  %v1190_v8 = vand.u32 8388607, %v1183_v50  ;;  %v1172_v46 = vadd.s32 3, %v1168_v58  ;;  %v1198_v49 = vsub.s32 32, %v1197_v40 }
 0x263   :  { %v3777_v19 = vsel %vm3775_vm3, %v6117_v42, %v3776_v7  ;;  %v1159_v56 = vand.u32 2147483647, %v1158_v23  ;;  %v3844_v1 = vadd.s32 536870912, %v3843_v36  ;;  %v1200_v39 = vshll.u32 %v6289_v21, %v1197_v40 }
 0x264   :  { %v3781_v55 = vsel %vm3774_vm0, %v3777_v19, %v3780_v61  ;;  %v1203_v4 = vshll.u32 %v6290_v25, %v1197_v40  ;;  %v1201_v10 = vshrl.u32 %v6290_v25, %v1198_v49  ;;  %v1204_v34 = vshrl.u32 %v6291_v27, %v1198_v49 }
 0x265   :  { %v3782_v35 = vsel %vm3771_vm2, nan, %v3781_v55  ;;  %v1162_v37 = vmul.f32 %v1161_v0, %v1159_v56  ;;  %v7832_v24 = vshrl.u32 %v3844_v1, 30  ;;  %v1206_v13 = vshll.u32 %v6291_v27, %v1197_v40 }
 0x266   :  { %5583 = vst [vmem:[#allocation2 + $0x100] sm:$0xff] %v3782_v35  ;;  %v1207_v32 = vshrl.u32 %v6292_v29, %v1198_v49  ;;  %v1209_v28 = vshll.u32 %v6292_v29, %v1197_v40  ;;  %v1210_v26 = vshrl.u32 %v6293_v31, %v1198_v49  ;;  %v1196_v33 = vshrl.u32 %v1195_v63, 5 }
 0x267   :  { %v1163_v45 = vxor.u32 2147483648, %v1162_v37  ;;  %v3846_v2 = vshll.u32 %v7832_v24, 30  ;;  %v1202_v62 = vor.u32 %v1201_v10, %v1200_v39  ;;  %v3890_v51 = vand.u32 2139095040, %v7820_v48 }
 0x268   :  { %v1205_v9 = vor.u32 %v1204_v34, %v1203_v4  ;;  %v1208_v60 = vor.u32 %v1207_v32, %v1206_v13  ;;  %v1211_v30 = vor.u32 %v1210_v26, %v1209_v28  ;;  %v1212_v16 = vshll.u32 %v6293_v31, %v1197_v40 }
 0x269   :  { %v1164_v22 = vsel %vm1081_vm10, %v1163_v45, %v1162_v37  ;;  %v7847_v20 = vsub.s32 %v3843_v36, %v3846_v2  ;;  %v1213_v59 = vshrl.u32 %v6294_v38, %v1198_v49  ;;  %v7851_v15 = vand.u32 3, %v1172_v46 }
 0x26a   :  { %v1167_v42 = vsel %vm7780_vm15, %v7544_v18, %v1164_v22  ;;  %v1191_v41 = vor.u32 8388608, %v1190_v8  ;;  %vm3785_vm7 = vcmp.lt.s32.totalorder %v7645_v47, 0  ;;  %v3891_v23 = vshrl.u32 %v3890_v51, 23  ;;  %v7858_v8 = vpop.f32.mrb[11].mxu1 }
 0x26b   :  { %6120 = vcosq.f32 %v1167_v42  ;;  %v3849_v63 = vsub.s32 0, %v7847_v20  ;;  %v1214_v7 = vor.u32 %v1213_v59, %v1212_v16  ;;  %v1199_v57 = vshrl.u32 %v6289_v21, %v1198_v49 }
 0x26c   :  { %6122 = vsinq.f32 %v1167_v42  ;;  %vm1215_vm8 = vcmp.lt.s32.totalorder %v1196_v33, 1  ;;  %vm1217_vm9 = vcmp.lt.s32.totalorder %v1196_v33, 3  ;;  %vm1218_vm10 = vcmp.lt.s32.totalorder %v1196_v33, 4 }
 0x26d   :  { %v5775_v58 = vmin.u32 %v3849_v63, %v7847_v20  ;;  %v1220_v5 = vsel %vm1218_vm10, %v1208_v60, 2102212464  ;;  %v1223_v61 = vsel %vm1215_vm8, %v1202_v62, %v1205_v9  ;;  %v1224_v36 = vsel %vm1218_vm10, %v1211_v30, 920167782 }
 0x26e   :  { %v1225_v40 = vsel %vm1217_vm9, %v1208_v60, %v1224_v36  ;;  %v1227_v19 = vsel %vm1215_vm8, %v1205_v9, %v1208_v60  ;;  %v1228_v56 = vsel %vm1218_vm10, %v1214_v7, 1326507024  ;;  %v1231_v0 = vshll.u32 %v1191_v41, 8 }
 0x26f   :  { %vm7862_vm11 = vcmp.le.f32.partialorder %v3783_v14, 0.7853982  ;;  %v3851_v46 = vclz %v5775_v58  ;;  %vm1216_vm12 = vcmp.lt.s32.totalorder %v1196_v33, 2  ;;  %v1219_v1 = vsel %vm1215_vm8, %v1199_v57, %v1202_v62 }
 0x270   :  { %v1221_v49 = vsel %vm1217_vm9, %v1205_v9, %v1220_v5  ;;  %v3869_v35 = vsub.s32 4, %v7832_v24  ;;  %v1226_v37 = vsel %vm1216_vm12, %v1223_v61, %v1225_v40  ;;  %v1229_v39 = vsel %vm1217_vm9, %v1211_v30, %v1228_v56 }
 0x271   :  { %v5778_v4 = vadd.s32 4294967169, %v3891_v23  ;;  %vm1171_vm13 = vweird.f32 %v7544_v18  ;;  %v5776_v10 = vadd.s32 4294967294, %v3851_v46  ;;  %v1230_v34 = vsel %vm1216_vm12, %v1227_v19, %v1229_v39 }
 0x272   :  { %v7870_v13 = vmul.u32.u64.low %v1231_v0, %v1226_v37  ;;  %v7871_v14 = vmul.u32.u64.high %v1231_v0, %v1226_v37, %v7870_v13  ;;  %vm1174_vm14 = vcmp.lt.s32.totalorder %v7851_v15, 2  ;;  %v1222_v45 = vsel %vm1216_vm12, %v1219_v1, %v1221_v49 }
 0x273   :  { %v7875_v32 = vmul.u32.u64.low %v1231_v0, %v1230_v34  ;;  %v7876_v28 = vmul.u32.u64.high %v1231_v0, %v1230_v34, %v7875_v32  ;;  %vm1175_vm15 = vcmp.eq.s32.totalorder %v7851_v15, 0  ;;  %vm1178_vm1 = vcmp.eq.s32.totalorder %v7851_v15, 2 }
 0x274   :  { %vm5777_vm2 = vcmp.lt.s32.totalorder %v5776_v10, 0  ;;  %v3897_v26 = vadd.s32 1, %v5778_v4  ;;  %v3839_v33 = vadd.s32 %v7787_v6, %v7800_v17  ;;  %v3870_v51 = vsel %vm3785_vm7, %v3869_v35, %v7832_v24 }
 0x275   :  { %v6121_v2 = vpop.eup %6120  ;;  %v3854_v62 = vsel %vm5777_vm2, 0, %v5776_v10  ;;  %v3887_v22 = vand.u32 2147483647, %v7820_v48  ;;  %v1238_v16 = vmul.u32 %v1231_v0, %v1222_v45  ;;  %vm1240_vm0 = vc.u32 %v7876_v28, %v7870_v13 }
 0x276   :  { %v6123_v9 = vpop.eup %6122  ;;  %v1179_v60 = vxor.u32 2147483648, %v6121_v2  ;;  %v3855_v30 = vsub.s32 32, %v3854_v62  ;;  %v3859_v42 = vsub.s32 4294967266, %v3854_v62  ;;  %v3856_v41 = vshll.u32 %v7847_v20, %v3854_v62 }
 0x277   :  { %v1176_v59 = vxor.u32 2147483648, %v6123_v9  ;;  %v1241_v6 = vadd.s32 1, %v7871_v14  ;;  %vm3898_vm3 = vcmp.gt.s32.totalorder %v3897_v26, 0  ;;  %v3872_v23 = vsel %vm7862_vm11, 0, %v3870_v51 }
 0x278   :  { %v1180_v17 = vsel %vm1178_vm1, %v1179_v60, %v6123_v9  ;;  %v3857_v63 = vshrl.u32 %v3839_v33, %v3855_v30  ;;  %v3860_v24 = vadd.s32 127, %v3859_v42  ;;  %v3899_v20 = vsel %vm3898_vm3, %v3897_v26, 0 }
 0x279   :  { %v1177_v7 = vsel %vm1175_vm15, %v6121_v2, %v1176_v59  ;;  %v1242_v57 = vsel %vm1240_vm0, %v1241_v6, %v7871_v14  ;;  %v3901_v19 = vand.u32 31, %v3899_v20  ;;  %v3894_v46 = vand.u32 8388607, %v3887_v22 }
 0x27a   :  { %v1181_v58 = vsel %vm1174_vm14, %v1177_v7, %v1180_v17  ;;  %v3858_v5 = vor.u32 %v3857_v63, %v3856_v41  ;;  %v3861_v61 = vshll.u32 %v3860_v24, 23  ;;  %v1243_v36 = vadd.s32 %v1242_v57, %v1238_v16 }
 0x27b   :  { %v1182_v40 = vsel %vm1171_vm13, nan, %v1181_v58  ;;  %v7905_v1 = vadd.f32 %v7446_v3, %v6472_v44  ;;  %v3876_v15 = vadd.s32 3, %v3872_v23  ;;  %v3902_v35 = vsub.s32 32, %v3901_v19 }
 0x27c   :  { %5558 = vst [vmem:[#allocation2 + $0x38] sm:$0xff] %v1182_v40  ;;  %v3862_v56 = vor.u32 4788187, %v3861_v61  ;;  %v1244_v0 = vadd.s32 536870912, %v1243_v36  ;;  %v3865_v49 = vcvt.s32.f32 %v3858_v5  ;;  %v3904_v37 = vshll.u32 %v6289_v21, %v3901_v19 }
 0x27d   :  { %v3907_v18 = vshll.u32 %v6290_v25, %v3901_v19  ;;  %v3910_v10 = vshll.u32 %v6291_v27, %v3901_v19  ;;  %v3905_v34 = vshrl.u32 %v6290_v25, %v3902_v35  ;;  %v3908_v14 = vshrl.u32 %v6291_v27, %v3902_v35 }
 0x27e   :  { %v3863_v39 = vand.u32 2147483647, %v3862_v56  ;;  %v7908_v4 = vshrl.u32 %v1244_v0, 30  ;;  %v3911_v45 = vshrl.u32 %v6292_v29, %v3902_v35  ;;  %v3913_v3 = vshll.u32 %v6292_v29, %v3901_v19 }
 0x27f   :  { %v3895_v2 = vor.u32 8388608, %v3894_v46  ;;  %v3914_v33 = vshrl.u32 %v6293_v31, %v3902_v35  ;;  %v3900_v62 = vshrl.u32 %v3899_v20, 5  ;;  %v3916_v51 = vshll.u32 %v6293_v31, %v3901_v19 }
 0x280   :  { %v3866_v32 = vmul.f32 %v3865_v49, %v3863_v39  ;;  %v1246_v26 = vshll.u32 %v7908_v4, 30  ;;  %v3917_v9 = vshrl.u32 %v6294_v38, %v3902_v35  ;;  %v1290_v60 = vand.u32 2139095040, %v7905_v1 }
 0x281   :  { %v7921_v42 = vand.u32 3, %v3876_v15  ;;  %v3912_v59 = vor.u32 %v3911_v45, %v3910_v10  ;;  %v3906_v41 = vor.u32 %v3905_v34, %v3904_v37  ;;  %v3909_v6 = vor.u32 %v3908_v14, %v3907_v18 }
 0x282   :  { %v3867_v30 = vxor.u32 2147483648, %v3866_v32  ;;  %v7923_v16 = vsub.s32 %v1243_v36, %v1246_v26  ;;  %v3915_v17 = vor.u32 %v3914_v33, %v3913_v3  ;;  %v1287_v63 = vand.u32 2147483647, %v7905_v1 }
 0x283   :  { %v3903_v23 = vshrl.u32 %v6289_v21, %v3902_v35  ;;  %v3935_v57 = vshll.u32 %v3895_v2, 8  ;;  %v3918_v58 = vor.u32 %v3917_v9, %v3916_v51  ;;  %vm3922_vm4 = vcmp.lt.s32.totalorder %v3900_v62, 4 }
 0x284   :  { %v3868_v24 = vsel %vm3785_vm7, %v3867_v30, %v3866_v32  ;;  %v1249_v7 = vsub.s32 0, %v7923_v16  ;;  %v1291_v5 = vshrl.u32 %v1290_v60, 23  ;;  %vm3919_vm5 = vcmp.lt.s32.totalorder %v3900_v62, 1 }
 0x285   :  { %v3871_v20 = vsel %vm7862_vm11, %v7645_v47, %v3868_v24  ;;  %v3924_v36 = vsel %vm3922_vm4, %v3912_v59, 2102212464  ;;  %vm3921_vm6 = vcmp.lt.s32.totalorder %v3900_v62, 3  ;;  %v3927_v40 = vsel %vm3919_vm5, %v3906_v41, %v3909_v6 }
 0x286   :  { %6124 = vcosq.f32 %v3871_v20  ;;  %v5675_v61 = vmin.u32 %v1249_v7, %v7923_v16  ;;  %v3928_v19 = vsel %vm3922_vm4, %v3915_v17, 920167782  ;;  %vm7938_vm7 = vcmp.le.f32.partialorder %v1183_v50, 0.7853982 }
 0x287   :  { %6126 = vsinq.f32 %v3871_v20  ;;  %v3923_v0 = vsel %vm3919_vm5, %v3903_v23, %v3906_v41  ;;  %v3925_v46 = vsel %vm3921_vm6, %v3909_v6, %v3924_v36  ;;  %v3931_v49 = vsel %vm3919_vm5, %v3909_v6, %v3912_v59 }
 0x288   :  { %v1251_v55 = vclz %v5675_v61  ;;  %vm3920_vm8 = vcmp.lt.s32.totalorder %v3900_v62, 2  ;;  %v3929_v15 = vsel %vm3921_vm6, %v3912_v59, %v3928_v19  ;;  %v3932_v35 = vsel %vm3922_vm4, %v3918_v58, 1326507024 }
 0x289   :  { %v5678_v37 = vadd.s32 4294967169, %v1291_v5  ;;  %v1269_v18 = vsub.s32 4, %v7908_v4  ;;  %v3930_v10 = vsel %vm3920_vm8, %v3927_v40, %v3929_v15  ;;  %v3933_v34 = vsel %vm3921_vm6, %v3915_v17, %v3932_v35  ;;  %v7962_v17 = vpop.f32.mrb[12].mxu0 }
 0x28a   :  { %v5676_v39 = vadd.s32 4294967294, %v1251_v55  ;;  %v3926_v14 = vsel %vm3920_vm8, %v3923_v0, %v3925_v46  ;;  %v3934_v45 = vsel %vm3920_vm8, %v3931_v49, %v3933_v34  ;;  %vm3875_vm10 = vweird.f32 %v7645_v47 }
 0x28b   :  { %v7944_v50 = vmul.u32.u64.low %v3935_v57, %v3930_v10  ;;  %v7945_v3 = vmul.u32.u64.high %v3935_v57, %v3930_v10, %v7944_v50  ;;  %v7948_v32 = vmul.u32.u64.low %v3935_v57, %v3934_v45  ;;  %v7949_v26 = vmul.u32.u64.high %v3935_v57, %v3934_v45, %v7948_v32 }
 0x28c   :  { %vm5677_vm9 = vcmp.lt.s32.totalorder %v5676_v39, 0  ;;  %v1297_v2 = vadd.s32 1, %v5678_v37  ;;  %vm3882_vm11 = vcmp.eq.s32.totalorder %v7921_v42, 2  ;;  %vm1185_vm12 = vcmp.lt.s32.totalorder %v7746_v11, 0 }
 0x28d   :  { %v1239_v33 = vadd.s32 %v7870_v13, %v7876_v28  ;;  %v1254_v62 = vsel %vm5677_vm9, 0, %v5676_v39  ;;  %v1270_v60 = vsel %vm1185_vm12, %v1269_v18, %v7908_v4  ;;  %v3942_v30 = vmul.u32 %v3935_v57, %v3926_v14 }
 0x28e   :  { %v1255_v51 = vsub.s32 32, %v1254_v62  ;;  %v1259_v9 = vsub.s32 4294967266, %v1254_v62  ;;  %vm1298_vm13 = vcmp.gt.s32.totalorder %v1297_v2, 0  ;;  %v3945_v59 = vadd.s32 1, %v7945_v3 }
 0x28f   :  { %v1294_v41 = vand.u32 8388607, %v1287_v63  ;;  %v1299_v6 = vsel %vm1298_vm13, %v1297_v2, 0  ;;  %v1256_v13 = vshll.u32 %v7923_v16, %v1254_v62  ;;  %vm3944_vm14 = vc.u32 %v7949_v26, %v7944_v50 }
 0x290   :  { %v6125_v24 = vpop.eup %6124  ;;  %v1257_v28 = vshrl.u32 %v1239_v33, %v1255_v51  ;;  %v1260_v7 = vadd.s32 127, %v1259_v9  ;;  %v1272_v57 = vsel %vm7938_vm7, 0, %v1270_v60  ;;  %v3946_v20 = vsel %vm3944_vm14, %v3945_v59, %v7945_v3 }
 0x291   :  { %v6127_v23 = vpop.eup %6126  ;;  %v3883_v4 = vxor.u32 2147483648, %v6125_v24  ;;  %v1301_v58 = vand.u32 31, %v1299_v6  ;;  %v3947_v40 = vadd.s32 %v3946_v20, %v3942_v30  ;;  %vm3879_vm15 = vcmp.eq.s32.totalorder %v7921_v42, 0 }
 0x292   :  { %v3880_v5 = vxor.u32 2147483648, %v6127_v23  ;;  %v1258_v61 = vor.u32 %v1257_v28, %v1256_v13  ;;  %v1261_v36 = vshll.u32 %v1260_v7, 23  ;;  %v7975_v55 = vadd.f32 %v7525_v52, %v6472_v44 }
 0x293   :  { %v3884_v16 = vsel %vm3882_vm11, %v3883_v4, %v6127_v23  ;;  %v1302_v19 = vsub.s32 32, %v1301_v58  ;;  %vm3878_vm1 = vcmp.lt.s32.totalorder %v7921_v42, 2  ;;  %v3948_v49 = vadd.s32 536870912, %v3947_v40 }
 0x294   :  { %v3881_v0 = vsel %vm3879_vm15, %v6125_v24, %v3880_v5  ;;  %v1262_v46 = vor.u32 4788187, %v1261_v36  ;;  %v1276_v35 = vadd.s32 3, %v1272_v57  ;;  %v1295_v37 = vor.u32 8388608, %v1294_v41 }
 0x295   :  { %v3885_v15 = vsel %vm3878_vm1, %v3881_v0, %v3884_v16  ;;  %v7980_v39 = vadd.f32 %v7614_v54, %v6470_v43  ;;  %v1265_v34 = vcvt.s32.f32 %v1258_v61  ;;  %v3949_v14 = vshrl.u32 %v3948_v49, 30 }
 0x296   :  { %v3886_v18 = vsel %vm3875_vm10, nan, %v3885_v15  ;;  %v1263_v10 = vand.u32 2147483647, %v1262_v46  ;;  %v1300_v52 = vshrl.u32 %v1299_v6, 5  ;;  %v1305_v42 = vshrl.u32 %v6290_v25, %v1302_v19 }
 0x297   :  { %5584 = vst [vmem:[#allocation2 + $0x108] sm:$0xff] %v3886_v18  ;;  %v1308_v45 = vshrl.u32 %v6291_v27, %v1302_v19  ;;  %v1311_v3 = vshrl.u32 %v6292_v29, %v1302_v19  ;;  %v3950_v2 = vshll.u32 %v3949_v14, 30  ;;  %v1310_v33 = vshll.u32 %v6291_v27, %v1301_v58 }
 0x298   :  { %v1266_v32 = vmul.f32 %v1265_v34, %v1263_v10  ;;  %v1314_v54 = vshrl.u32 %v6293_v31, %v1302_v19  ;;  %vm3889_vm2 = vcmp.lt.s32.totalorder %v7820_v48, 0  ;;  %v1304_v47 = vshll.u32 %v6289_v21, %v1301_v58 }
 0x299   :  { %v1307_v62 = vshll.u32 %v6290_v25, %v1301_v58  ;;  %v1313_v51 = vshll.u32 %v6292_v29, %v1301_v58  ;;  %v1317_v9 = vshrl.u32 %v6294_v38, %v1302_v19  ;;  %v7994_v30 = vand.u32 3, %v1276_v35 }
 0x29a   :  { %v1267_v60 = vxor.u32 2147483648, %v1266_v32  ;;  %v7996_v59 = vsub.s32 %v3947_v40, %v3950_v2  ;;  %v1312_v41 = vor.u32 %v1311_v3, %v1310_v33  ;;  %v1306_v6 = vor.u32 %v1305_v42, %v1304_v47 }
 0x29b   :  { %v1309_v24 = vor.u32 %v1308_v45, %v1307_v62  ;;  %v1315_v13 = vor.u32 %v1314_v54, %v1313_v51  ;;  %v1316_v28 = vshll.u32 %v6293_v31, %v1301_v58  ;;  %v1303_v4 = vshrl.u32 %v6289_v21, %v1302_v19 }
 0x29c   :  { %v1268_v7 = vsel %vm1185_vm12, %v1267_v60, %v1266_v32  ;;  %v3953_v23 = vsub.s32 0, %v7996_v59  ;;  %v1335_v57 = vshll.u32 %v1295_v37, 8  ;;  %v3973_v5 = vsub.s32 4, %v3949_v14  ;;  %v8008_v37 = vpop.f32.mrb[12].mxu1 }
 0x29d   :  { %v1271_v20 = vsel %vm7938_vm7, %v7746_v11, %v1268_v7  ;;  %v1318_v61 = vor.u32 %v1317_v9, %v1316_v28  ;;  %vm1322_vm0 = vcmp.lt.s32.totalorder %v1300_v52, 4  ;;  %vm1319_vm3 = vcmp.lt.s32.totalorder %v1300_v52, 1 }
 0x29e   :  { %6128 = vcosq.f32 %v1271_v20  ;;  %v5779_v36 = vmin.u32 %v3953_v23, %v7996_v59  ;;  %v1324_v58 = vsel %vm1322_vm0, %v1312_v41, 2102212464  ;;  %vm1320_vm4 = vcmp.lt.s32.totalorder %v1300_v52, 2 }
 0x29f   :  { %6130 = vsinq.f32 %v1271_v20  ;;  %v1327_v40 = vsel %vm1319_vm3, %v1306_v6, %v1309_v24  ;;  %v1328_v16 = vsel %vm1322_vm0, %v1315_v13, 920167782  ;;  %vm1321_vm5 = vcmp.lt.s32.totalorder %v1300_v52, 3 }
 0x2a0   :  { %v3955_v0 = vclz %v5779_v36  ;;  %v1323_v19 = vsel %vm1319_vm3, %v1303_v4, %v1306_v6  ;;  %v1331_v46 = vsel %vm1319_vm3, %v1309_v24, %v1312_v41  ;;  %v1325_v49 = vsel %vm1321_vm5, %v1309_v24, %v1324_v58 }
 0x2a1   :  { %v1329_v15 = vsel %vm1321_vm5, %v1312_v41, %v1328_v16  ;;  %v1332_v56 = vsel %vm1322_vm0, %v1318_v61, 1326507024  ;;  %v3994_v35 = vand.u32 2139095040, %v7975_v55  ;;  %v3974_v10 = vsel %vm3889_vm2, %v3973_v5, %v3949_v14 }
 0x2a2   :  { %v5780_v18 = vadd.s32 4294967294, %v3955_v0  ;;  %v1330_v34 = vsel %vm1320_vm4, %v1327_v40, %v1329_v15  ;;  %v1333_v42 = vsel %vm1321_vm5, %v1315_v13, %v1332_v56  ;;  %v1326_v33 = vsel %vm1320_vm4, %v1323_v19, %v1325_v49 }
 0x2a3   :  { %v1334_v45 = vsel %vm1320_vm4, %v1331_v46, %v1333_v42  ;;  %v8014_v3 = vmul.u32.u64.low %v1335_v57, %v1330_v34  ;;  %v8015_v32 = vmul.u32.u64.high %v1335_v57, %v1330_v34, %v8014_v3  ;;  %v3995_v2 = vshrl.u32 %v3994_v35, 23 }
 0x2a4   :  { %vm5781_vm6 = vcmp.lt.s32.totalorder %v5780_v18, 0  ;;  %v8019_v54 = vmul.u32.u64.low %v1335_v57, %v1334_v45  ;;  %v8020_v47 = vmul.u32.u64.high %v1335_v57, %v1334_v45, %v8019_v54  ;;  %vm1282_vm7 = vcmp.eq.s32.totalorder %v7994_v30, 2 }
 0x2a5   :  { %vm8025_vm8 = vcmp.le.f32.partialorder %v3887_v22, 0.7853982  ;;  %v3958_v62 = vsel %vm5781_vm6, 0, %v5780_v18  ;;  %v5782_v51 = vadd.s32 4294967169, %v3995_v2  ;;  %v3943_v9 = vadd.s32 %v7944_v50, %v7949_v26 }
 0x2a6   :  { %v3959_v60 = vsub.s32 32, %v3958_v62  ;;  %v3963_v41 = vsub.s32 4294967266, %v3958_v62  ;;  %v3976_v52 = vsel %vm8025_vm8, 0, %v3974_v10  ;;  %v1342_v6 = vmul.u32 %v1335_v57, %v1326_v33 }
 0x2a7   :  { %v1345_v24 = vadd.s32 1, %v8015_v32  ;;  %v3991_v13 = vand.u32 2147483647, %v7975_v55  ;;  %v4001_v28 = vadd.s32 1, %v5782_v51  ;;  %v3960_v7 = vshll.u32 %v7996_v59, %v3958_v62 }
 0x2a8   :  { %v6129_v22 = vpop.eup %6128  ;;  %v3961_v23 = vshrl.u32 %v3943_v9, %v3959_v60  ;;  %v3964_v4 = vadd.s32 127, %v3963_v41  ;;  %vm1344_vm9 = vc.u32 %v8020_v47, %v8014_v3  ;;  %v3980_v20 = vadd.s32 3, %v3976_v52 }
 0x2a9   :  { %v6131_v50 = vpop.eup %6130  ;;  %v1283_v26 = vxor.u32 2147483648, %v6129_v22  ;;  %v1346_v5 = vsel %vm1344_vm9, %v1345_v24, %v8015_v32  ;;  %vm4002_vm10 = vcmp.gt.s32.totalorder %v4001_v28, 0  ;;  %vm1279_vm11 = vcmp.eq.s32.totalorder %v7994_v30, 0 }
 0x2aa   :  { %v1280_v57 = vxor.u32 2147483648, %v6131_v50  ;;  %v3962_v61 = vor.u32 %v3961_v23, %v3960_v7  ;;  %v3965_v36 = vshll.u32 %v3964_v4, 23  ;;  %v1347_v58 = vadd.s32 %v1346_v5, %v1342_v6 }
 0x2ab   :  { %v1284_v59 = vsel %vm1282_vm7, %v1283_v26, %v6131_v50  ;;  %v3998_v40 = vand.u32 8388607, %v3991_v13  ;;  %v4003_v16 = vsel %vm4002_vm10, %v4001_v28, 0  ;;  %vm1278_vm12 = vcmp.lt.s32.totalorder %v7994_v30, 2 }
 0x2ac   :  { %v1281_v0 = vsel %vm1279_vm11, %v6129_v22, %v1280_v57  ;;  %v3966_v19 = vor.u32 4788187, %v3965_v36  ;;  %v1348_v46 = vadd.s32 536870912, %v1347_v58  ;;  %vm1275_vm13 = vweird.f32 %v7746_v11 }
 0x2ad   :  { %v1285_v49 = vsel %vm1278_vm12, %v1281_v0, %v1284_v59  ;;  %v8046_v15 = vand.u32 3, %v3980_v20  ;;  %v4005_v56 = vand.u32 31, %v4003_v16  ;;  %v3969_v10 = vcvt.s32.f32 %v3962_v61 }
 0x2ae   :  { %v1286_v35 = vsel %vm1275_vm13, nan, %v1285_v49  ;;  %v3967_v18 = vand.u32 2147483647, %v3966_v19  ;;  %v8048_v34 = vshrl.u32 %v1348_v46, 30  ;;  %v3999_v42 = vor.u32 8388608, %v3998_v40 }
 0x2af   :  { %5559 = vst [vmem:[#allocation2 + $0x40] sm:$0xff] %v1286_v35  ;;  %v4006_v45 = vsub.s32 32, %v4005_v56  ;;  %v4008_v32 = vshll.u32 %v6289_v21, %v4005_v56  ;;  %v1394_v30 = vand.u32 2139095040, %v7980_v39  ;;  %v4011_v11 = vshll.u32 %v6290_v25, %v4005_v56 }
 0x2b0   :  { %v3970_v2 = vmul.f32 %v3969_v10, %v3967_v18  ;;  %v1350_v33 = vshll.u32 %v8048_v34, 30  ;;  %v4014_v54 = vshll.u32 %v6291_v27, %v4005_v56  ;;  %v4017_v60 = vshll.u32 %v6292_v29, %v4005_v56 }
 0x2b1   :  { %v4009_v62 = vshrl.u32 %v6290_v25, %v4006_v45  ;;  %v4012_v51 = vshrl.u32 %v6291_v27, %v4006_v45  ;;  %v4015_v9 = vshrl.u32 %v6292_v29, %v4006_v45  ;;  %v4018_v6 = vshrl.u32 %v6293_v31, %v4006_v45 }
 0x2b2   :  { %v3971_v41 = vxor.u32 2147483648, %v3970_v2  ;;  %v8059_v52 = vsub.s32 %v1347_v58, %v1350_v33  ;;  %v1391_v24 = vand.u32 2147483647, %v7980_v39  ;;  %v4004_v28 = vshrl.u32 %v4003_v16, 5 }
 0x2b3   :  { %v4010_v22 = vor.u32 %v4009_v62, %v4008_v32  ;;  %v8063_v7 = vshll.u32 %v3999_v42, 8  ;;  %v1395_v23 = vshrl.u32 %v1394_v30, 23  ;;  %v4013_v26 = vor.u32 %v4012_v51, %v4011_v11  ;;  %v8101_v51 = vpop.f32.mrb[13].mxu0 }
 0x2b4   :  { %v3972_v4 = vsel %vm3889_vm2, %v3971_v41, %v3970_v2  ;;  %v1353_v50 = vsub.s32 0, %v8059_v52  ;;  %v4016_v20 = vor.u32 %v4015_v9, %v4014_v54  ;;  %vm1289_vm14 = vcmp.lt.s32.totalorder %v7905_v1, 0 }
 0x2b5   :  { %v3975_v5 = vsel %vm8025_vm8, %v7820_v48, %v3972_v4  ;;  %v4019_v57 = vor.u32 %v4018_v6, %v4017_v60  ;;  %v4020_v61 = vshll.u32 %v6293_v31, %v4005_v56  ;;  %v4021_v36 = vshrl.u32 %v6294_v38, %v4006_v45 }
 0x2b6   :  { %6132 = vcosq.f32 %v3975_v5  ;;  %v1343_v58 = vadd.s32 %v8014_v3, %v8020_v47  ;;  %v5679_v59 = vmin.u32 %v1353_v50, %v8059_v52  ;;  %v4007_v40 = vshrl.u32 %v6289_v21, %v4006_v45 }
 0x2b7   :  { %6134 = vsinq.f32 %v3975_v5  ;;  %v1373_v16 = vsub.s32 4, %v8048_v34  ;;  %v4022_v14 = vor.u32 %v4021_v36, %v4020_v61  ;;  %v5682_v0 = vadd.s32 4294967169, %v1395_v23 }
 0x2b8   :  { %vm8081_vm15 = vcmp.le.f32.partialorder %v1287_v63, 0.7853982  ;;  %v1355_v46 = vclz %v5679_v59  ;;  %vm4023_vm1 = vcmp.lt.s32.totalorder %v4004_v28, 1  ;;  %vm4024_vm2 = vcmp.lt.s32.totalorder %v4004_v28, 2 }
 0x2b9   :  { %vm4026_vm0 = vcmp.lt.s32.totalorder %v4004_v28, 4  ;;  %vm4025_vm3 = vcmp.lt.s32.totalorder %v4004_v28, 3  ;;  %v4031_v47 = vsel %vm4023_vm1, %v4010_v22, %v4013_v26  ;;  %vm3986_vm4 = vcmp.eq.s32.totalorder %v8046_v15, 2 }
 0x2ba   :  { %v4028_v3 = vsel %vm4026_vm0, %v4016_v20, 2102212464  ;;  %v4032_v49 = vsel %vm4026_vm0, %v4019_v57, 920167782  ;;  %v5680_v56 = vadd.s32 4294967294, %v1355_v46  ;;  %v4027_v35 = vsel %vm4023_vm1, %v4007_v40, %v4010_v22 }
 0x2bb   :  { %v4033_v18 = vsel %vm4025_vm3, %v4016_v20, %v4032_v49  ;;  %v4035_v10 = vsel %vm4023_vm1, %v4013_v26, %v4016_v20  ;;  %vm3983_vm5 = vcmp.eq.s32.totalorder %v8046_v15, 0  ;;  %v4029_v63 = vsel %vm4025_vm3, %v4013_v26, %v4028_v3 }
 0x2bc   :  { %v4034_v42 = vsel %vm4024_vm2, %v4031_v47, %v4033_v18  ;;  %v4036_v45 = vsel %vm4026_vm0, %v4022_v14, 1326507024  ;;  %v1401_v32 = vadd.s32 1, %v5682_v0  ;;  %vm3982_vm6 = vcmp.lt.s32.totalorder %v8046_v15, 2 }
 0x2bd   :  { %vm5681_vm7 = vcmp.lt.s32.totalorder %v5680_v56, 0  ;;  %v4037_v30 = vsel %vm4025_vm3, %v4019_v57, %v4036_v45  ;;  %v8093_v2 = vmul.u32.u64.low %v8063_v7, %v4034_v42  ;;  %v8094_v33 = vmul.u32.u64.high %v8063_v7, %v4034_v42, %v8093_v2 }
 0x2be   :  { %vm3979_vm8 = vweird.f32 %v7820_v48  ;;  %v1358_v11 = vsel %vm5681_vm7, 0, %v5680_v56  ;;  %v4038_v54 = vsel %vm4024_vm2, %v4035_v10, %v4037_v30  ;;  %v1398_v62 = vand.u32 8388607, %v1391_v24 }
 0x2bf   :  { %vm1402_vm9 = vcmp.gt.s32.totalorder %v1401_v32, 0  ;;  %v1359_v9 = vsub.s32 32, %v1358_v11  ;;  %v1363_v60 = vsub.s32 4294967266, %v1358_v11  ;;  %v1374_v41 = vsel %vm1289_vm14, %v1373_v16, %v8048_v34 }
 0x2c0   :  { %v1403_v6 = vsel %vm1402_vm9, %v1401_v32, 0  ;;  %v4030_v22 = vsel %vm4024_vm2, %v4027_v35, %v4029_v63  ;;  %v8108_v23 = vmul.u32.u64.low %v8063_v7, %v4038_v54  ;;  %v8109_v4 = vmul.u32.u64.high %v8063_v7, %v4038_v54, %v8108_v23  ;;  %v6133_v26 = vpop.eup %6132 }
 0x2c1   :  { %v1405_v50 = vand.u32 31, %v1403_v6  ;;  %v1360_v20 = vshll.u32 %v8059_v52, %v1358_v11  ;;  %v1361_v5 = vshrl.u32 %v1343_v58, %v1359_v9  ;;  %v1364_v57 = vadd.s32 127, %v1363_v60  ;;  %v6135_v36 = vpop.eup %6134 }
 0x2c2   :  { %v4049_v61 = vadd.s32 1, %v8094_v33  ;;  %v3987_v59 = vxor.u32 2147483648, %v6133_v26  ;;  %v1376_v34 = vsel %vm8081_vm15, 0, %v1374_v41  ;;  %v1399_v40 = vor.u32 8388608, %v1398_v62 }
 0x2c3   :  { %v1406_v28 = vsub.s32 32, %v1405_v50  ;;  %v3984_v16 = vxor.u32 2147483648, %v6135_v36  ;;  %v1362_v14 = vor.u32 %v1361_v5, %v1360_v20  ;;  %v1365_v0 = vshll.u32 %v1364_v57, 23 }
 0x2c4   :  { %v4046_v46 = vmul.u32 %v8063_v7, %v4030_v22  ;;  %v3988_v3 = vsel %vm3986_vm4, %v3987_v59, %v6135_v36  ;;  %vm4048_vm10 = vc.u32 %v8109_v4, %v8093_v2  ;;  %v8120_v52 = vshrl.u32 %v1403_v6, 5 }
 0x2c5   :  { %v1408_v58 = vshll.u32 %v6289_v21, %v1405_v50  ;;  %v3985_v47 = vsel %vm3983_vm5, %v6133_v26, %v3984_v16  ;;  %v1366_v49 = vor.u32 4788187, %v1365_v0  ;;  %v4050_v56 = vsel %vm4048_vm10, %v4049_v61, %v8094_v33 }
 0x2c6   :  { %v1411_v35 = vshll.u32 %v6290_v25, %v1405_v50  ;;  %v3989_v7 = vsel %vm3982_vm6, %v3985_v47, %v3988_v3  ;;  %v4051_v18 = vadd.s32 %v4050_v56, %v4046_v46  ;;  %v1409_v10 = vshrl.u32 %v6290_v25, %v1406_v28 }
 0x2c7   :  { %v1412_v63 = vshrl.u32 %v6291_v27, %v1406_v28  ;;  %v3990_v42 = vsel %vm3979_vm8, nan, %v3989_v7  ;;  %v1367_v45 = vand.u32 2147483647, %v1366_v49  ;;  %v1369_v32 = vcvt.s32.f32 %v1362_v14 }
 0x2c8   :  { %v1415_v30 = vshrl.u32 %v6292_v29, %v1406_v28  ;;  %5585 = vst [vmem:[#allocation2 + $0x110] sm:$0xff] %v3990_v42  ;;  %v4052_v11 = vadd.s32 536870912, %v4051_v18  ;;  %v1414_v33 = vshll.u32 %v6291_v27, %v1405_v50  ;;  %v1417_v54 = vshll.u32 %v6292_v29, %v1405_v50 }
 0x2c9   :  { %v1418_v15 = vshrl.u32 %v6293_v31, %v1406_v28  ;;  %v1370_v62 = vmul.f32 %v1369_v32, %v1367_v45  ;;  %v1410_v9 = vor.u32 %v1409_v10, %v1408_v58  ;;  %v1413_v60 = vor.u32 %v1412_v63, %v1411_v35  ;;  %v8186_v45 = vpop.f32.mrb[13].mxu1 }
 0x2ca   :  { %v1421_v41 = vshrl.u32 %v6294_v38, %v1406_v28  ;;  %v4053_v6 = vshrl.u32 %v4052_v11, 30  ;;  %v1380_v23 = vadd.s32 3, %v1376_v34  ;;  %v1416_v26 = vor.u32 %v1415_v30, %v1414_v33 }
 0x2cb   :  { %v1419_v48 = vor.u32 %v1418_v15, %v1417_v54  ;;  %v1371_v22 = vxor.u32 2147483648, %v1370_v62  ;;  %v1420_v20 = vshll.u32 %v6293_v31, %v1405_v50  ;;  %vm1423_vm11 = vcmp.lt.s32.totalorder %v8120_v52, 1 }
 0x2cc   :  { %v4054_v5 = vshll.u32 %v4053_v6, 30  ;;  %vm1426_vm12 = vcmp.lt.s32.totalorder %v8120_v52, 4  ;;  %v8141_v57 = vshll.u32 %v1399_v40, 8  ;;  %v1431_v59 = vsel %vm1423_vm11, %v1410_v9, %v1413_v60 }
 0x2cd   :  { %v1372_v61 = vsel %vm1289_vm14, %v1371_v22, %v1370_v62  ;;  %v1422_v36 = vor.u32 %v1421_v41, %v1420_v20  ;;  %v1432_v34 = vsel %vm1426_vm12, %v1419_v48, 920167782  ;;  %v1407_v14 = vshrl.u32 %v6289_v21, %v1406_v28 }
 0x2ce   :  { %v1375_v50 = vsel %vm8081_vm15, %v7905_v1, %v1372_v61  ;;  %v8152_v16 = vsub.s32 %v4051_v18, %v4054_v5  ;;  %vm1425_vm13 = vcmp.lt.s32.totalorder %v8120_v52, 3  ;;  %vm1424_vm14 = vcmp.lt.s32.totalorder %v8120_v52, 2 }
 0x2cf   :  { %6136 = vcosq.f32 %v1375_v50  ;;  %v1428_v40 = vsel %vm1426_vm12, %v1416_v26, 2102212464  ;;  %v1433_v0 = vsel %vm1425_vm13, %v1416_v26, %v1432_v34  ;;  %v1435_v28 = vsel %vm1423_vm11, %v1413_v60, %v1416_v26 }
 0x2d0   :  { %6138 = vsinq.f32 %v1375_v50  ;;  %v4057_v46 = vsub.s32 0, %v8152_v16  ;;  %v1434_v19 = vsel %vm1424_vm14, %v1431_v59, %v1433_v0  ;;  %v4077_v3 = vsub.s32 4, %v4053_v6 }
 0x2d1   :  { %v1436_v58 = vsel %vm1426_vm12, %v1422_v36, 1326507024  ;;  %v8169_v47 = vmul.u32.u64.low %v8141_v57, %v1434_v19  ;;  %v8170_v49 = vmul.u32.u64.high %v8141_v57, %v1434_v19, %v8169_v47  ;;  %v1381_v56 = vand.u32 3, %v1380_v23 }
 0x2d2   :  { %v5783_v35 = vmin.u32 %v4057_v46, %v8152_v16  ;;  %v1437_v7 = vsel %vm1425_vm13, %v1419_v48, %v1436_v58  ;;  %v1427_v18 = vsel %vm1423_vm11, %v1407_v14, %v1410_v9  ;;  %v1429_v10 = vsel %vm1425_vm13, %v1413_v60, %v1428_v40 }
 0x2d3   :  { %v1438_v63 = vsel %vm1424_vm14, %v1435_v28, %v1437_v7  ;;  %v8184_v42 = vadd.f32 %v7755_v12, %v6470_v43  ;;  %vm3993_vm15 = vcmp.lt.s32.totalorder %v7975_v55, 0  ;;  %vm1379_vm1 = vweird.f32 %v7905_v1 }
 0x2d4   :  { %v4059_v32 = vclz %v5783_v35  ;;  %v4078_v30 = vsel %vm3993_vm15, %v4077_v3, %v4053_v6  ;;  %v8192_v11 = vmul.u32.u64.low %v8141_v57, %v1438_v63  ;;  %v8193_v33 = vmul.u32.u64.high %v8141_v57, %v1438_v63, %v8192_v11 }
 0x2d5   :  { %vm8198_vm2 = vcmp.le.f32.partialorder %v3991_v13, 0.7853982  ;;  %v1430_v15 = vsel %vm1424_vm14, %v1427_v18, %v1429_v10  ;;  %v4098_v62 = vand.u32 2139095040, %v8184_v42  ;;  %vm1382_vm0 = vcmp.lt.s32.totalorder %v1381_v56, 2 }
 0x2d6   :  { %v5784_v12 = vadd.s32 4294967294, %v4059_v32  ;;  %vm1383_vm3 = vcmp.eq.s32.totalorder %v1381_v56, 0  ;;  %vm1386_vm4 = vcmp.eq.s32.totalorder %v1381_v56, 2  ;;  %v1449_v9 = vadd.s32 1, %v8170_v49 }
 0x2d7   :  { %v4047_v60 = vadd.s32 %v8093_v2, %v8109_v4  ;;  %v4080_v13 = vsel %vm8198_vm2, 0, %v4078_v30  ;;  %v4099_v41 = vshrl.u32 %v4098_v62, 23  ;;  %v1446_v52 = vmul.u32 %v8141_v57, %v1430_v15 }
 0x2d8   :  { %vm5785_vm5 = vcmp.lt.s32.totalorder %v5784_v12, 0  ;;  %vm1448_vm6 = vc.u32 %v8193_v33, %v8169_v47  ;;  %v8215_v22 = vadd.f32 %v7791_v53, %v6472_v44  ;;  %v4095_v4 = vand.u32 2147483647, %v8184_v42 }
 0x2d9   :  { %v6137_v6 = vpop.eup %6136  ;;  %v4062_v48 = vsel %vm5785_vm5, 0, %v5784_v12  ;;  %v1450_v36 = vsel %vm1448_vm6, %v1449_v9, %v8170_v49  ;;  %v5786_v59 = vadd.s32 4294967169, %v4099_v41  ;;  %v4084_v40 = vadd.s32 3, %v4080_v13 }
 0x2da   :  { %v6139_v23 = vpop.eup %6138  ;;  %v1387_v26 = vxor.u32 2147483648, %v6137_v6  ;;  %v4063_v20 = vsub.s32 32, %v4062_v48  ;;  %v4067_v2 = vsub.s32 4294967266, %v4062_v48  ;;  %v4064_v61 = vshll.u32 %v8152_v16, %v4062_v48 }
 0x2db   :  { %v1384_v5 = vxor.u32 2147483648, %v6139_v23  ;;  %v1451_v14 = vadd.s32 %v1450_v36, %v1446_v52  ;;  %v4105_v0 = vadd.s32 1, %v5786_v59  ;;  %v1498_v46 = vand.u32 2139095040, %v8215_v22 }
 0x2dc   :  { %v1388_v57 = vsel %vm1386_vm4, %v1387_v26, %v6139_v23  ;;  %v4065_v34 = vshrl.u32 %v4047_v60, %v4063_v20  ;;  %v4068_v50 = vadd.s32 127, %v4067_v2  ;;  %v4102_v49 = vand.u32 8388607, %v4095_v4 }
 0x2dd   :  { %v1385_v53 = vsel %vm1383_vm3, %v6137_v6, %v1384_v5  ;;  %v1452_v58 = vadd.s32 536870912, %v1451_v14  ;;  %vm4106_vm7 = vcmp.gt.s32.totalorder %v4105_v0, 0  ;;  %v8228_v10 = vand.u32 3, %v4084_v40 }
 0x2de   :  { %v1389_v19 = vsel %vm1382_vm0, %v1385_v53, %v1388_v57  ;;  %v4066_v28 = vor.u32 %v4065_v34, %v4064_v61  ;;  %v4069_v3 = vshll.u32 %v4068_v50, 23  ;;  %v4107_v18 = vsel %vm4106_vm7, %v4105_v0, 0 }
 0x2df   :  { %v1390_v16 = vsel %vm1379_vm1, nan, %v1389_v19  ;;  %v1453_v7 = vshrl.u32 %v1452_v58, 30  ;;  %v4109_v63 = vand.u32 31, %v4107_v18  ;;  %v8232_v56 = vadd.f32 %v7858_v8, %v6472_v44 }
 0x2e0   :  { %5560 = vst [vmem:[#allocation2 + $0x48] sm:$0xff] %v1390_v16  ;;  %v4070_v35 = vor.u32 4788187, %v4069_v3  ;;  %v4073_v30 = vcvt.s32.f32 %v4066_v28  ;;  %vm1393_vm8 = vcmp.lt.s32.totalorder %v7980_v39, 0  ;;  %v1499_v11 = vshrl.u32 %v1498_v46, 23 }
 0x2e1   :  { %v1454_v1 = vshll.u32 %v1453_v7, 30  ;;  %v1447_v12 = vadd.s32 %v8169_v47, %v8193_v33  ;;  %v4103_v15 = vor.u32 8388608, %v4102_v49  ;;  %v4110_v62 = vsub.s32 32, %v4109_v63 }
 0x2e2   :  { %v4071_v32 = vand.u32 2147483647, %v4070_v35  ;;  %v1495_v9 = vand.u32 2147483647, %v8215_v22  ;;  %v4112_v41 = vshll.u32 %v6289_v21, %v4109_v63  ;;  %v4115_v8 = vshll.u32 %v6290_v25, %v4109_v63 }
 0x2e3   :  { %v8238_v13 = vsub.s32 %v1451_v14, %v1454_v1  ;;  %v4113_v6 = vshrl.u32 %v6290_v25, %v4110_v62  ;;  %v4116_v48 = vshrl.u32 %v6291_v27, %v4110_v62  ;;  %v4118_v52 = vshll.u32 %v6291_v27, %v4109_v63 }
 0x2e4   :  { %v4074_v60 = vmul.f32 %v4073_v30, %v4071_v32  ;;  %v4121_v23 = vshll.u32 %v6292_v29, %v4109_v63  ;;  %v4119_v26 = vshrl.u32 %v6292_v29, %v4110_v62  ;;  %v5686_v20 = vadd.s32 4294967169, %v1499_v11 }
 0x2e5   :  { %v1457_v33 = vsub.s32 0, %v8238_v13  ;;  %v1477_v2 = vsub.s32 4, %v1453_v7  ;;  %v4108_v5 = vshrl.u32 %v4107_v18, 5  ;;  %v4122_v61 = vshrl.u32 %v6293_v31, %v4110_v62 }
 0x2e6   :  { %v4075_v47 = vxor.u32 2147483648, %v4074_v60  ;;  %v4124_v36 = vshll.u32 %v6293_v31, %v4109_v63  ;;  %v4114_v34 = vor.u32 %v4113_v6, %v4112_v41  ;;  %v4117_v50 = vor.u32 %v4116_v48, %v4115_v8 }
 0x2e7   :  { %v5683_v57 = vmin.u32 %v1457_v33, %v8238_v13  ;;  %v4120_v53 = vor.u32 %v4119_v26, %v4118_v52  ;;  %v4123_v40 = vor.u32 %v4122_v61, %v4121_v23  ;;  %v4125_v0 = vshrl.u32 %v6294_v38, %v4110_v62 }
 0x2e8   :  { %v4076_v59 = vsel %vm3993_vm15, %v4075_v47, %v4074_v60  ;;  %v8257_v19 = vshll.u32 %v4103_v15, 8  ;;  %v1505_v28 = vadd.s32 1, %v5686_v20  ;;  %v1478_v3 = vsel %vm1393_vm8, %v1477_v2, %v1453_v7  ;;  %v8283_v47 = vpop.f32.mrb[14].mxu0 }
 0x2e9   :  { %v4079_v14 = vsel %vm8198_vm2, %v7975_v55, %v4076_v59  ;;  %v1459_v46 = vclz %v5683_v57  ;;  %v4111_v58 = vshrl.u32 %v6289_v21, %v4110_v62  ;;  %v4126_v16 = vor.u32 %v4125_v0, %v4124_v36 }
 0x2ea   :  { %6140 = vcosq.f32 %v4079_v14  ;;  %vm8264_vm9 = vcmp.le.f32.partialorder %v1391_v24, 0.7853982  ;;  %vm4127_vm10 = vcmp.lt.s32.totalorder %v4108_v5, 1  ;;  %vm4129_vm11 = vcmp.lt.s32.totalorder %v4108_v5, 3 }
 0x2eb   :  { %6142 = vsinq.f32 %v4079_v14  ;;  %v5684_v49 = vadd.s32 4294967294, %v1459_v46  ;;  %vm4130_vm12 = vcmp.lt.s32.totalorder %v4108_v5, 4  ;;  %v4135_v18 = vsel %vm4127_vm10, %v4114_v34, %v4117_v50 }
 0x2ec   :  { %v4132_v35 = vsel %vm4130_vm12, %v4120_v53, 2102212464  ;;  %v4136_v63 = vsel %vm4130_vm12, %v4123_v40, 920167782  ;;  %v4139_v32 = vsel %vm4127_vm10, %v4117_v50, %v4120_v53  ;;  %vm4128_vm14 = vcmp.lt.s32.totalorder %v4108_v5, 2 }
 0x2ed   :  { %vm5685_vm13 = vcmp.lt.s32.totalorder %v5684_v49, 0  ;;  %v4137_v7 = vsel %vm4129_vm11, %v4120_v53, %v4136_v63  ;;  %v4140_v30 = vsel %vm4130_vm12, %v4126_v16, 1326507024  ;;  %v4131_v11 = vsel %vm4127_vm10, %v4111_v58, %v4114_v34 }
 0x2ee   :  { %v1462_v1 = vsel %vm5685_vm13, 0, %v5684_v49  ;;  %v4138_v24 = vsel %vm4128_vm14, %v4135_v18, %v4137_v7  ;;  %v4141_v15 = vsel %vm4129_vm11, %v4123_v40, %v4140_v30  ;;  %v4133_v41 = vsel %vm4129_vm11, %v4117_v50, %v4132_v35 }
 0x2ef   :  { %v1463_v62 = vsub.s32 32, %v1462_v1  ;;  %v1467_v60 = vsub.s32 4294967266, %v1462_v1  ;;  %v4142_v8 = vsel %vm4128_vm14, %v4139_v32, %v4141_v15  ;;  %vm4083_vm15 = vweird.f32 %v7975_v55 }
 0x2f0   :  { %v8275_v6 = vmul.u32.u64.low %v8257_v19, %v4142_v8  ;;  %v8276_v48 = vmul.u32.u64.high %v8257_v19, %v4142_v8, %v8275_v6  ;;  %v8279_v52 = vmul.u32.u64.low %v8257_v19, %v4138_v24  ;;  %v8280_v23 = vmul.u32.u64.high %v8257_v19, %v4138_v24, %v8279_v52 }
 0x2f1   :  { %v1464_v33 = vshll.u32 %v8238_v13, %v1462_v1  ;;  %v1465_v26 = vshrl.u32 %v1447_v12, %v1463_v62  ;;  %v1468_v20 = vadd.s32 127, %v1467_v60  ;;  %vm1506_vm1 = vcmp.gt.s32.totalorder %v1505_v28, 0 }
 0x2f2   :  { %vm4086_vm2 = vcmp.lt.s32.totalorder %v8228_v10, 2  ;;  %v4134_v2 = vsel %vm4128_vm14, %v4131_v11, %v4133_v41  ;;  %v1502_v61 = vand.u32 8388607, %v1495_v9  ;;  %v1507_v36 = vsel %vm1506_vm1, %v1505_v28, 0 }
 0x2f3   :  { %vm4090_vm0 = vcmp.eq.s32.totalorder %v8228_v10, 2  ;;  %v1466_v57 = vor.u32 %v1465_v26, %v1464_v33  ;;  %v1469_v34 = vshll.u32 %v1468_v20, 23  ;;  %v1509_v50 = vand.u32 31, %v1507_v36 }
 0x2f4   :  { %v6141_v59 = vpop.eup %6140  ;;  %v1480_v12 = vsel %vm8264_vm9, 0, %v1478_v3  ;;  %vm4152_vm3 = vc.u32 %v8276_v48, %v8279_v52  ;;  %v4153_v13 = vadd.s32 1, %v8280_v23  ;;  %v4150_v0 = vmul.u32 %v8257_v19, %v4134_v2 }
 0x2f5   :  { %v6143_v14 = vpop.eup %6142  ;;  %v4091_v53 = vxor.u32 2147483648, %v6141_v59  ;;  %v1470_v40 = vor.u32 4788187, %v1469_v34  ;;  %v1510_v46 = vsub.s32 32, %v1509_v50  ;;  %vm4087_vm4 = vcmp.eq.s32.totalorder %v8228_v10, 0 }
 0x2f6   :  { %v4088_v5 = vxor.u32 2147483648, %v6143_v14  ;;  %v4154_v58 = vsel %vm4152_vm3, %v4153_v13, %v8280_v23  ;;  %v1503_v16 = vor.u32 8388608, %v1502_v61  ;;  %v1473_v18 = vcvt.s32.f32 %v1466_v57 }
 0x2f7   :  { %v4092_v28 = vsel %vm4090_vm0, %v4091_v53, %v6143_v14  ;;  %v1471_v35 = vand.u32 2147483647, %v1470_v40  ;;  %v4155_v3 = vadd.s32 %v4154_v58, %v4150_v0  ;;  %v1484_v32 = vadd.s32 3, %v1480_v12 }
 0x2f8   :  { %v4089_v49 = vsel %vm4087_vm4, %v6141_v59, %v4088_v5  ;;  %v1513_v7 = vshrl.u32 %v6290_v25, %v1510_v46  ;;  %v1516_v30 = vshrl.u32 %v6291_v27, %v1510_v46  ;;  %v1508_v24 = vshrl.u32 %v1507_v36, 5 }
 0x2f9   :  { %v4093_v63 = vsel %vm4086_vm2, %v4089_v49, %v4092_v28  ;;  %v1474_v1 = vmul.f32 %v1473_v18, %v1471_v35  ;;  %v4156_v11 = vadd.s32 536870912, %v4155_v3  ;;  %v1512_v15 = vshll.u32 %v6289_v21, %v1509_v50 }
 0x2fa   :  { %v4094_v19 = vsel %vm4083_vm15, nan, %v4093_v63  ;;  %v1515_v62 = vshll.u32 %v6290_v25, %v1509_v50  ;;  %v1519_v60 = vshrl.u32 %v6292_v29, %v1510_v46  ;;  %v1522_v10 = vshrl.u32 %v6293_v31, %v1510_v46 }
 0x2fb   :  { %5586 = vst [vmem:[#allocation2 + $0x118] sm:$0xff] %v4094_v19  ;;  %v1475_v41 = vxor.u32 2147483648, %v1474_v1  ;;  %v4157_v8 = vshrl.u32 %v4156_v11, 30  ;;  %v1518_v6 = vshll.u32 %v6291_v27, %v1509_v50  ;;  %v1521_v23 = vshll.u32 %v6292_v29, %v1509_v50 }
 0x2fc   :  { %v1514_v55 = vor.u32 %v1513_v7, %v1512_v15  ;;  %v1517_v33 = vor.u32 %v1516_v30, %v1515_v62  ;;  %v1524_v26 = vshll.u32 %v6293_v31, %v1509_v50  ;;  %v1525_v20 = vshrl.u32 %v6294_v38, %v1510_v46 }
 0x2fd   :  { %v1476_v2 = vsel %vm1393_vm8, %v1475_v41, %v1474_v1  ;;  %vm4097_vm5 = vcmp.lt.s32.totalorder %v8184_v42, 0  ;;  %v4158_v61 = vshll.u32 %v4157_v8, 30  ;;  %v1523_v36 = vor.u32 %v1522_v10, %v1521_v23  ;;  %v8352_v41 = vpop.f32.mrb[14].mxu1 }
 0x2fe   :  { %v1479_v59 = vsel %vm8264_vm9, %v7980_v39, %v1476_v2  ;;  %v8319_v57 = vand.u32 3, %v1484_v32  ;;  %v1520_v34 = vor.u32 %v1519_v60, %v1518_v6  ;;  %v1526_v14 = vor.u32 %v1525_v20, %v1524_v26 }
 0x2ff   :  { %6144 = vcosq.f32 %v1479_v59  ;;  %v8321_v53 = vsub.s32 %v4155_v3, %v4158_v61  ;;  %vm1527_vm6 = vcmp.lt.s32.totalorder %v1508_v24, 1  ;;  %v1543_v50 = vshll.u32 %v1503_v16, 8 }
 0x300   :  { %6146 = vsinq.f32 %v1479_v59  ;;  %vm1528_vm7 = vcmp.lt.s32.totalorder %v1508_v24, 2  ;;  %vm1530_vm8 = vcmp.lt.s32.totalorder %v1508_v24, 4  ;;  %v1535_v12 = vsel %vm1527_vm6, %v1514_v55, %v1517_v33 }
 0x301   :  { %v4161_v13 = vsub.s32 0, %v8321_v53  ;;  %v4181_v5 = vsub.s32 4, %v4157_v8  ;;  %vm1529_vm10 = vcmp.lt.s32.totalorder %v1508_v24, 3  ;;  %v1536_v54 = vsel %vm1530_vm8, %v1523_v36, 920167782 }
 0x302   :  { %v1532_v40 = vsel %vm1530_vm8, %v1520_v34, 2102212464  ;;  %v1537_v0 = vsel %vm1529_vm10, %v1520_v34, %v1536_v54  ;;  %v1539_v28 = vsel %vm1527_vm6, %v1517_v33, %v1520_v34  ;;  %v1540_v58 = vsel %vm1530_vm8, %v1526_v14, 1326507024 }
 0x303   :  { %v5787_v49 = vmin.u32 %v4161_v13, %v8321_v53  ;;  %v1511_v16 = vshrl.u32 %v6289_v21, %v1510_v46  ;;  %v1538_v35 = vsel %vm1528_vm7, %v1535_v12, %v1537_v0  ;;  %v1541_v18 = vsel %vm1529_vm10, %v1523_v36, %v1540_v58 }
 0x304   :  { %v1542_v3 = vsel %vm1528_vm7, %v1539_v28, %v1541_v18  ;;  %v8332_v63 = vmul.u32.u64.low %v1543_v50, %v1538_v35  ;;  %v8333_v32 = vmul.u32.u64.high %v1543_v50, %v1538_v35, %v8332_v63  ;;  %v4202_v7 = vand.u32 2139095040, %v8232_v56 }
 0x305   :  { %vm8338_vm9 = vcmp.le.f32.partialorder %v4095_v4, 0.7853982  ;;  %v4163_v19 = vclz %v5787_v49  ;;  %v1531_v46 = vsel %vm1527_vm6, %v1511_v16, %v1514_v55  ;;  %v1533_v1 = vsel %vm1529_vm10, %v1517_v33, %v1532_v40 }
 0x306   :  { %v4182_v11 = vsel %vm4097_vm5, %v4181_v5, %v4157_v8  ;;  %v8346_v15 = vmul.u32.u64.low %v1543_v50, %v1542_v3  ;;  %v8347_v62 = vmul.u32.u64.high %v1543_v50, %v1542_v3, %v8346_v15  ;;  %v4203_v60 = vshrl.u32 %v4202_v7, 23 }
 0x307   :  { %vm1483_vm11 = vweird.f32 %v7980_v39  ;;  %vm1486_vm12 = vcmp.lt.s32.totalorder %v8319_v57, 2  ;;  %v5788_v4 = vadd.s32 4294967294, %v4163_v19  ;;  %v4199_v10 = vand.u32 2147483647, %v8232_v56 }
 0x308   :  { %vm1487_vm13 = vcmp.eq.s32.totalorder %v8319_v57, 0  ;;  %v1534_v6 = vsel %vm1528_vm7, %v1531_v46, %v1533_v1  ;;  %v1553_v23 = vadd.s32 1, %v8333_v32  ;;  %v5790_v8 = vadd.s32 4294967169, %v4203_v60 }
 0x309   :  { %v6145_v55 = vpop.eup %6144  ;;  %vm1490_vm14 = vcmp.eq.s32.totalorder %v8319_v57, 2  ;;  %v4151_v33 = vadd.s32 %v8279_v52, %v8276_v48  ;;  %vm5789_vm15 = vcmp.lt.s32.totalorder %v5788_v4, 0  ;;  %v4184_v26 = vsel %vm8338_vm9, 0, %v4182_v11 }
 0x30a   :  { %v6147_v20 = vpop.eup %6146  ;;  %v1491_v2 = vxor.u32 2147483648, %v6145_v55  ;;  %v4166_v61 = vsel %vm5789_vm15, 0, %v5788_v4  ;;  %vm1552_vm1 = vc.u32 %v8347_v62, %v8332_v63  ;;  %v8365_v24 = vadd.f32 %v7962_v17, %v6470_v43 }
 0x30b   :  { %v1488_v36 = vxor.u32 2147483648, %v6147_v20  ;;  %v4167_v59 = vsub.s32 32, %v4166_v61  ;;  %v4171_v34 = vsub.s32 4294967266, %v4166_v61  ;;  %v1550_v14 = vmul.u32 %v1543_v50, %v1534_v6 }
 0x30c   :  { %v1492_v12 = vsel %vm1490_vm14, %v1491_v2, %v6147_v20  ;;  %v4168_v48 = vshll.u32 %v8321_v53, %v4166_v61  ;;  %v1554_v52 = vsel %vm1552_vm1, %v1553_v23, %v8333_v32  ;;  %v4209_v13 = vadd.s32 1, %v5790_v8 }
 0x30d   :  { %v1489_v5 = vsel %vm1487_vm13, %v6145_v55, %v1488_v36  ;;  %v4169_v54 = vshrl.u32 %v4151_v33, %v4167_v59  ;;  %v4172_v40 = vadd.s32 127, %v4171_v34  ;;  %v1555_v0 = vadd.s32 %v1554_v52, %v1550_v14 }
 0x30e   :  { %v1493_v17 = vsel %vm1486_vm12, %v1489_v5, %v1492_v12  ;;  %v4188_v28 = vadd.s32 3, %v4184_v26  ;;  %vm4210_vm2 = vcmp.gt.s32.totalorder %v4209_v13, 0  ;;  %v1602_v58 = vand.u32 2139095040, %v8365_v24 }
 0x30f   :  { %v1494_v50 = vsel %vm1483_vm11, nan, %v1493_v17  ;;  %v4170_v53 = vor.u32 %v4169_v54, %v4168_v48  ;;  %v4173_v49 = vshll.u32 %v4172_v40, 23  ;;  %v1556_v16 = vadd.s32 536870912, %v1555_v0 }
 0x310   :  { %5561 = vst [vmem:[#allocation2 + $0x50] sm:$0xff] %v1494_v50  ;;  %v4206_v35 = vand.u32 8388607, %v4199_v10  ;;  %v4211_v18 = vsel %vm4210_vm2, %v4209_v13, 0  ;;  %v8378_v7 = vand.u32 3, %v4188_v28  ;;  %v1603_v11 = vshrl.u32 %v1602_v58, 23 }
 0x311   :  { %v4174_v3 = vor.u32 4788187, %v4173_v49  ;;  %v1557_v32 = vshrl.u32 %v1556_v16, 30  ;;  %v4213_v57 = vand.u32 31, %v4211_v18  ;;  %v4177_v46 = vcvt.s32.f32 %v4170_v53 }
 0x312   :  { %v8381_v39 = vadd.s32 %v8332_v63, %v8347_v62  ;;  %v4207_v15 = vor.u32 8388608, %v4206_v35  ;;  %v1599_v4 = vand.u32 2147483647, %v8365_v24  ;;  %vm1497_vm0 = vcmp.lt.s32.totalorder %v8215_v22, 0 }
 0x313   :  { %v4175_v19 = vand.u32 2147483647, %v4174_v3  ;;  %v1558_v1 = vshll.u32 %v1557_v32, 30  ;;  %v4214_v60 = vsub.s32 32, %v4213_v57  ;;  %v4216_v8 = vshll.u32 %v6289_v21, %v4213_v57 }
 0x314   :  { %v4219_v55 = vshll.u32 %v6290_v25, %v4213_v57  ;;  %v4222_v20 = vshll.u32 %v6291_v27, %v4213_v57  ;;  %v4225_v63 = vshll.u32 %v6292_v29, %v4213_v57  ;;  %v5690_v36 = vadd.s32 4294967169, %v1603_v11 }
 0x315   :  { %v4178_v6 = vmul.f32 %v4177_v46, %v4175_v19  ;;  %v8384_v23 = vsub.s32 %v1555_v0, %v1558_v1  ;;  %v4217_v33 = vshrl.u32 %v6290_v25, %v4214_v60  ;;  %v4220_v26 = vshrl.u32 %v6291_v27, %v4214_v60 }
 0x316   :  { %v4223_v61 = vshrl.u32 %v6292_v29, %v4214_v60  ;;  %v4212_v59 = vshrl.u32 %v4211_v18, 5  ;;  %v4226_v34 = vshrl.u32 %v6293_v31, %v4214_v60  ;;  %v4228_v14 = vshll.u32 %v6293_v31, %v4213_v57 }
 0x317   :  { %v4179_v62 = vxor.u32 2147483648, %v4178_v6  ;;  %v1561_v2 = vsub.s32 0, %v8384_v23  ;;  %v8397_v12 = vshll.u32 %v4207_v15, 8  ;;  %v4218_v13 = vor.u32 %v4217_v33, %v4216_v8 }
 0x318   :  { %v4221_v5 = vor.u32 %v4220_v26, %v4219_v55  ;;  %v4224_v40 = vor.u32 %v4223_v61, %v4222_v20  ;;  %v4227_v0 = vor.u32 %v4226_v34, %v4225_v63  ;;  %v4229_v17 = vshrl.u32 %v6294_v38, %v4214_v60 }
 0x319   :  { %v4180_v48 = vsel %vm4097_vm5, %v4179_v62, %v4178_v6  ;;  %v5687_v52 = vmin.u32 %v1561_v2, %v8384_v23  ;;  %v1581_v58 = vsub.s32 4, %v1557_v32  ;;  %v1609_v50 = vadd.s32 1, %v5690_v36 }
 0x31a   :  { %v4183_v54 = vsel %vm8338_vm9, %v8184_v42, %v4180_v48  ;;  %v4215_v53 = vshrl.u32 %v6289_v21, %v4214_v60  ;;  %v4230_v49 = vor.u32 %v4229_v17, %v4228_v14  ;;  %vm4231_vm3 = vcmp.lt.s32.totalorder %v4212_v59, 1 }
 0x31b   :  { %6148 = vcosq.f32 %v4183_v54  ;;  %v1563_v28 = vclz %v5687_v52  ;;  %vm8409_vm4 = vcmp.le.f32.partialorder %v1495_v9, 0.7853982  ;;  %vm4233_vm5 = vcmp.lt.s32.totalorder %v4212_v59, 3  ;;  %v8417_v9 = vpop.f32.mrb[15].mxu0 }
 0x31c   :  { %6150 = vsinq.f32 %v4183_v54  ;;  %vm4234_vm6 = vcmp.lt.s32.totalorder %v4212_v59, 4  ;;  %v4239_v35 = vsel %vm4231_vm3, %v4218_v13, %v4221_v5  ;;  %v4243_v57 = vsel %vm4231_vm3, %v4221_v5, %v4224_v40 }
 0x31d   :  { %v5688_v30 = vadd.s32 4294967294, %v1563_v28  ;;  %v4236_v18 = vsel %vm4234_vm6, %v4224_v40, 2102212464  ;;  %v4240_v3 = vsel %vm4234_vm6, %v4227_v0, 920167782  ;;  %vm4232_vm8 = vcmp.lt.s32.totalorder %v4212_v59, 2 }
 0x31e   :  { %v4244_v19 = vsel %vm4234_vm6, %v4230_v49, 1326507024  ;;  %v4241_v46 = vsel %vm4233_vm5, %v4224_v40, %v4240_v3  ;;  %v1582_v15 = vsel %vm1497_vm0, %v1581_v58, %v1557_v32  ;;  %vm4190_vm10 = vcmp.lt.s32.totalorder %v8378_v7, 2 }
 0x31f   :  { %vm5689_vm7 = vcmp.lt.s32.totalorder %v5688_v30, 0  ;;  %v4245_v1 = vsel %vm4233_vm5, %v4227_v0, %v4244_v19  ;;  %v4242_v60 = vsel %vm4232_vm8, %v4239_v35, %v4241_v46  ;;  %v4235_v33 = vsel %vm4231_vm3, %v4215_v53, %v4218_v13 }
 0x320   :  { %v1566_v11 = vsel %vm5689_vm7, 0, %v5688_v30  ;;  %v4246_v6 = vsel %vm4232_vm8, %v4243_v57, %v4245_v1  ;;  %v4237_v26 = vsel %vm4233_vm5, %v4221_v5, %v4236_v18  ;;  %vm4187_vm9 = vweird.f32 %v8184_v42 }
 0x321   :  { %v1567_v8 = vsub.s32 32, %v1566_v11  ;;  %v1571_v55 = vsub.s32 4294967266, %v1566_v11  ;;  %v8428_v20 = vmul.u32.u64.low %v8397_v12, %v4246_v6  ;;  %v8429_v63 = vmul.u32.u64.high %v8397_v12, %v4246_v6, %v8428_v20 }
 0x322   :  { %v8432_v32 = vmul.u32.u64.low %v8397_v12, %v4242_v60  ;;  %v8433_v62 = vmul.u32.u64.high %v8397_v12, %v4242_v60, %v8432_v32  ;;  %v1568_v2 = vshll.u32 %v8384_v23, %v1566_v11  ;;  %vm1610_vm11 = vcmp.gt.s32.totalorder %v1609_v50, 0 }
 0x323   :  { %v1569_v61 = vshrl.u32 %v8381_v39, %v1567_v8  ;;  %v1572_v36 = vadd.s32 127, %v1571_v55  ;;  %vm4191_vm12 = vcmp.eq.s32.totalorder %v8378_v7, 0  ;;  %v4238_v34 = vsel %vm4232_vm8, %v4235_v33, %v4237_v26 }
 0x324   :  { %v1606_v14 = vand.u32 8388607, %v1599_v4  ;;  %v1611_v48 = vsel %vm1610_vm11, %v1609_v50, 0  ;;  %vm4194_vm13 = vcmp.eq.s32.totalorder %v8378_v7, 2  ;;  %v1584_v39 = vsel %vm8409_vm4, 0, %v1582_v15 }
 0x325   :  { %v6149_v52 = vpop.eup %6148  ;;  %v1570_v13 = vor.u32 %v1569_v61, %v1568_v2  ;;  %v1573_v5 = vshll.u32 %v1572_v36, 23  ;;  %v1613_v54 = vand.u32 31, %v1611_v48  ;;  %vm4256_vm14 = vc.u32 %v8429_v63, %v8432_v32 }
 0x326   :  { %v6151_v40 = vpop.eup %6150  ;;  %v4195_v23 = vxor.u32 2147483648, %v6149_v52  ;;  %v4257_v59 = vadd.s32 1, %v8433_v62  ;;  %v4254_v28 = vmul.u32 %v8397_v12, %v4238_v34  ;;  %v1607_v49 = vor.u32 8388608, %v1606_v14 }
 0x327   :  { %v4192_v0 = vxor.u32 2147483648, %v6151_v40  ;;  %v1574_v17 = vor.u32 4788187, %v1573_v5  ;;  %v1614_v58 = vsub.s32 32, %v1613_v54  ;;  %v8452_v30 = vadd.f32 %v8008_v37, %v6470_v43 }
 0x328   :  { %v4196_v50 = vsel %vm4194_vm13, %v4195_v23, %v6151_v40  ;;  %v4258_v53 = vsel %vm4256_vm14, %v4257_v59, %v8433_v62  ;;  %v1577_v3 = vcvt.s32.f32 %v1570_v13  ;;  %v1588_v46 = vadd.s32 3, %v1584_v39 }
 0x329   :  { %v4193_v35 = vsel %vm4191_vm12, %v6149_v52, %v4192_v0  ;;  %v1575_v18 = vand.u32 2147483647, %v1574_v17  ;;  %v4259_v57 = vadd.s32 %v4258_v53, %v4254_v28  ;;  %v1617_v12 = vshrl.u32 %v6290_v25, %v1614_v58 }
 0x32a   :  { %v4197_v19 = vsel %vm4190_vm10, %v4193_v35, %v4196_v50  ;;  %v1620_v1 = vshrl.u32 %v6291_v27, %v1614_v58  ;;  %v1612_v60 = vshrl.u32 %v1611_v48, 5  ;;  %v1616_v6 = vshll.u32 %v6289_v21, %v1613_v54 }
 0x32b   :  { %v4198_v11 = vsel %vm4187_vm9, nan, %v4197_v19  ;;  %v1578_v15 = vmul.f32 %v1577_v3, %v1575_v18  ;;  %v4260_v37 = vadd.s32 536870912, %v4259_v57  ;;  %v1619_v8 = vshll.u32 %v6290_v25, %v1613_v54 }
 0x32c   :  { %5587 = vst [vmem:[#allocation2 + $0x120] sm:$0xff] %v4198_v11  ;;  %v1623_v55 = vshrl.u32 %v6292_v29, %v1614_v58  ;;  %v1626_v7 = vshrl.u32 %v6293_v31, %v1614_v58  ;;  %v1622_v20 = vshll.u32 %v6291_v27, %v1613_v54  ;;  %v1625_v42 = vshll.u32 %v6292_v29, %v1613_v54 }
 0x32d   :  { %v1579_v33 = vxor.u32 2147483648, %v1578_v15  ;;  %v8466_v26 = vshrl.u32 %v4260_v37, 30  ;;  %v1618_v62 = vor.u32 %v1617_v12, %v1616_v6  ;;  %v1621_v2 = vor.u32 %v1620_v1, %v1619_v8  ;;  %v8496_v1 = vpop.f32.mrb[15].mxu1 }
 0x32e   :  { %v1628_v61 = vshll.u32 %v6293_v31, %v1613_v54  ;;  %v1629_v36 = vshrl.u32 %v6294_v38, %v1614_v58  ;;  %v1627_v48 = vor.u32 %v1626_v7, %v1625_v42  ;;  %v8478_v13 = vand.u32 3, %v1588_v46 }
 0x32f   :  { %v1580_v34 = vsel %vm1497_vm0, %v1579_v33, %v1578_v15  ;;  %v4262_v14 = vshll.u32 %v8466_v26, 30  ;;  %v1624_v5 = vor.u32 %v1623_v55, %v1622_v20  ;;  %vm1631_vm15 = vcmp.lt.s32.totalorder %v1612_v60, 1 }
 0x330   :  { %v1583_v52 = vsel %vm8409_vm4, %v8215_v22, %v1580_v34  ;;  %v1630_v40 = vor.u32 %v1629_v36, %v1628_v61  ;;  %v1647_v54 = vshll.u32 %v1607_v49, 8  ;;  %vm1634_vm1 = vcmp.lt.s32.totalorder %v1612_v60, 4 }
 0x331   :  { %6152 = vcosq.f32 %v1583_v52  ;;  %v8480_v23 = vsub.s32 %v4259_v57, %v4262_v14  ;;  %v1639_v39 = vsel %vm1631_vm15, %v1618_v62, %v1621_v2  ;;  %v4306_v59 = vand.u32 2139095040, %v8452_v30 }
 0x332   :  { %6154 = vsinq.f32 %v1583_v52  ;;  %vm1632_vm2 = vcmp.lt.s32.totalorder %v1612_v60, 2  ;;  %vm1633_vm0 = vcmp.lt.s32.totalorder %v1612_v60, 3  ;;  %v1640_v16 = vsel %vm1634_vm1, %v1627_v48, 920167782 }
 0x333   :  { %v4265_v0 = vsub.s32 0, %v8480_v23  ;;  %v1636_v17 = vsel %vm1634_vm1, %v1624_v5, 2102212464  ;;  %v1641_v28 = vsel %vm1633_vm0, %v1624_v5, %v1640_v16  ;;  %v1643_v50 = vsel %vm1631_vm15, %v1621_v2, %v1624_v5 }
 0x334   :  { %v1644_v53 = vsel %vm1634_vm1, %v1630_v40, 1326507024  ;;  %v1615_v49 = vshrl.u32 %v6289_v21, %v1614_v58  ;;  %v1642_v18 = vsel %vm1632_vm2, %v1639_v39, %v1641_v28  ;;  %v4307_v12 = vshrl.u32 %v4306_v59, 23 }
 0x335   :  { %v5791_v35 = vmin.u32 %v4265_v0, %v8480_v23  ;;  %v1645_v3 = vsel %vm1633_vm0, %v1627_v48, %v1644_v53  ;;  %v8492_v19 = vmul.u32.u64.low %v1647_v54, %v1642_v18  ;;  %v8493_v46 = vmul.u32.u64.high %v1647_v54, %v1642_v18, %v8492_v19 }
 0x336   :  { %v1646_v57 = vsel %vm1632_vm2, %v1643_v50, %v1645_v3  ;;  %vm8500_vm3 = vcmp.le.f32.partialorder %v4199_v10, 0.7853982  ;;  %v1635_v15 = vsel %vm1631_vm15, %v1615_v49, %v1618_v62  ;;  %v1637_v37 = vsel %vm1633_vm0, %v1621_v2, %v1636_v17 }
 0x337   :  { %v4267_v58 = vclz %v5791_v35  ;;  %vm1587_vm4 = vweird.f32 %v8215_v22  ;;  %v4285_v6 = vsub.s32 4, %v8466_v26  ;;  %v5794_v7 = vadd.s32 4294967169, %v4307_v12 }
 0x338   :  { %v8508_v8 = vmul.u32.u64.low %v1647_v54, %v1646_v57  ;;  %v8509_v55 = vmul.u32.u64.high %v1647_v54, %v1646_v57, %v8508_v8  ;;  %vm4201_vm5 = vcmp.lt.s32.totalorder %v8232_v56, 0  ;;  %v4303_v10 = vand.u32 2147483647, %v8452_v30 }
 0x339   :  { %v5792_v33 = vadd.s32 4294967294, %v4267_v58  ;;  %v8515_v20 = vadd.f32 %v8101_v51, %v6472_v44  ;;  %vm1590_vm6 = vcmp.lt.s32.totalorder %v8478_v13, 2  ;;  %v1638_v42 = vsel %vm1632_vm2, %v1635_v15, %v1637_v37 }
 0x33a   :  { %v1657_v62 = vadd.s32 1, %v8493_v46  ;;  %v4313_v2 = vadd.s32 1, %v5794_v7  ;;  %vm1591_vm7 = vcmp.eq.s32.totalorder %v8478_v13, 0  ;;  %vm1594_vm8 = vcmp.eq.s32.totalorder %v8478_v13, 2 }
 0x33b   :  { %v6153_v61 = vpop.eup %6152  ;;  %v4255_v36 = vadd.s32 %v8432_v32, %v8429_v63  ;;  %vm5793_vm10 = vcmp.lt.s32.totalorder %v5792_v33, 0  ;;  %v4286_v60 = vsel %vm4201_vm5, %v4285_v6, %v8466_v26  ;;  %vm1656_vm9 = vc.u32 %v8509_v55, %v8492_v19 }
 0x33c   :  { %v6155_v34 = vpop.eup %6154  ;;  %v1595_v14 = vxor.u32 2147483648, %v6153_v61  ;;  %v4270_v51 = vsel %vm5793_vm10, 0, %v5792_v33  ;;  %v1654_v40 = vmul.u32 %v1647_v54, %v1638_v42  ;;  %v1658_v63 = vsel %vm1656_vm9, %v1657_v62, %v8493_v46 }
 0x33d   :  { %v1592_v48 = vxor.u32 2147483648, %v6155_v34  ;;  %v4271_v52 = vsub.s32 32, %v4270_v51  ;;  %v4275_v5 = vsub.s32 4294967266, %v4270_v51  ;;  %v4272_v59 = vshll.u32 %v8480_v23, %v4270_v51 }
 0x33e   :  { %v1596_v39 = vsel %vm1594_vm8, %v1595_v14, %v6155_v34  ;;  %vm4314_vm11 = vcmp.gt.s32.totalorder %v4313_v2, 0  ;;  %v1659_v17 = vadd.s32 %v1658_v63, %v1654_v40  ;;  %v4288_v28 = vsel %vm8500_vm3, 0, %v4286_v60 }
 0x33f   :  { %v1593_v32 = vsel %vm1591_vm7, %v6153_v61, %v1592_v48  ;;  %v4273_v0 = vshrl.u32 %v4255_v36, %v4271_v52  ;;  %v4276_v16 = vadd.s32 127, %v4275_v5  ;;  %v4310_v54 = vand.u32 8388607, %v4303_v10 }
 0x340   :  { %v1597_v26 = vsel %vm1590_vm6, %v1593_v32, %v1596_v39  ;;  %v4315_v50 = vsel %vm4314_vm11, %v4313_v2, 0  ;;  %v1660_v49 = vadd.s32 536870912, %v1659_v17  ;;  %v4292_v57 = vadd.s32 3, %v4288_v28 }
 0x341   :  { %v1598_v23 = vsel %vm1587_vm4, nan, %v1597_v26  ;;  %v4274_v53 = vor.u32 %v4273_v0, %v4272_v59  ;;  %v4277_v35 = vshll.u32 %v4276_v16, 23  ;;  %v4317_v18 = vand.u32 31, %v4315_v50 }
 0x342   :  { %5562 = vst [vmem:[#allocation2 + $0x58] sm:$0xff] %v1598_v23  ;;  %v8541_v46 = vshrl.u32 %v1660_v49, 30  ;;  %v1703_v13 = vand.u32 2147483647, %v8515_v20  ;;  %v4311_v58 = vor.u32 8388608, %v4310_v54  ;;  %v1706_v37 = vand.u32 2139095040, %v8515_v20 }
 0x343   :  { %v4278_v3 = vor.u32 4788187, %v4277_v35  ;;  %v4281_v12 = vcvt.s32.f32 %v4274_v53  ;;  %v4318_v15 = vsub.s32 32, %v4317_v18  ;;  %v4320_v8 = vshll.u32 %v6289_v21, %v4317_v18 }
 0x344   :  { %v1662_v22 = vshll.u32 %v8541_v46, 30  ;;  %v4323_v7 = vshll.u32 %v6290_v25, %v4317_v18  ;;  %v4326_v62 = vshll.u32 %v6291_v27, %v4317_v18  ;;  %v4329_v34 = vshll.u32 %v6292_v29, %v4317_v18 }
 0x345   :  { %v4279_v6 = vand.u32 2147483647, %v4278_v3  ;;  %v4321_v33 = vshrl.u32 %v6290_v25, %v4318_v15  ;;  %v4324_v42 = vshrl.u32 %v6291_v27, %v4318_v15  ;;  %v4327_v2 = vshrl.u32 %v6292_v29, %v4318_v15 }
 0x346   :  { %v8552_v36 = vsub.s32 %v1659_v17, %v1662_v22  ;;  %v4330_v14 = vshrl.u32 %v6293_v31, %v4318_v15  ;;  %v8556_v51 = vand.u32 3, %v4292_v57  ;;  %v1655_v60 = vadd.s32 %v8492_v19, %v8509_v55 }
 0x347   :  { %v4282_v61 = vmul.f32 %v4281_v12, %v4279_v6  ;;  %v1707_v48 = vshrl.u32 %v1706_v37, 23  ;;  %v8562_v52 = vand.u32 8388607, %v1703_v13  ;;  %v4316_v39 = vshrl.u32 %v4315_v50, 5 }
 0x348   :  { %v1665_v40 = vsub.s32 0, %v8552_v36  ;;  %v4322_v59 = vor.u32 %v4321_v33, %v4320_v8  ;;  %v4325_v63 = vor.u32 %v4324_v42, %v4323_v7  ;;  %v4328_v32 = vor.u32 %v4327_v2, %v4326_v62 }
 0x349   :  { %v4283_v5 = vxor.u32 2147483648, %v4282_v61  ;;  %v4332_v0 = vshll.u32 %v6293_v31, %v4317_v18  ;;  %v4333_v16 = vshrl.u32 %v6294_v38, %v4318_v15  ;;  %v4331_v55 = vor.u32 %v4330_v14, %v4329_v34  ;;  %v8585_v34 = vpop.f32.mrb[16].mxu0 }
 0x34a   :  { %v5691_v19 = vmin.u32 %v1665_v40, %v8552_v36  ;;  %v8570_v26 = vshll.u32 %v4311_v58, 8  ;;  %v4319_v54 = vshrl.u32 %v6289_v21, %v4318_v15  ;;  %v5694_v23 = vadd.s32 4294967169, %v1707_v48 }
 0x34b   :  { %v4284_v17 = vsel %vm4201_vm5, %v4283_v5, %v4282_v61  ;;  %v4334_v50 = vor.u32 %v4333_v16, %v4332_v0  ;;  %vm4335_vm12 = vcmp.lt.s32.totalorder %v4316_v39, 1  ;;  %vm4338_vm13 = vcmp.lt.s32.totalorder %v4316_v39, 4 }
 0x34c   :  { %v4287_v28 = vsel %vm8500_vm3, %v8232_v56, %v4284_v17  ;;  %v1667_v53 = vclz %v5691_v19  ;;  %vm1601_vm14 = vcmp.lt.s32.totalorder %v8365_v24, 0  ;;  %vm4336_vm15 = vcmp.lt.s32.totalorder %v4316_v39, 2 }
 0x34d   :  { %6156 = vcosq.f32 %v4287_v28  ;;  %v4340_v35 = vsel %vm4338_vm13, %v4328_v32, 2102212464  ;;  %v4343_v49 = vsel %vm4335_vm12, %v4322_v59, %v4325_v63  ;;  %vm4337_vm1 = vcmp.lt.s32.totalorder %v4316_v39, 3 }
 0x34e   :  { %6158 = vsinq.f32 %v4287_v28  ;;  %v5692_v18 = vadd.s32 4294967294, %v1667_v53  ;;  %v4344_v3 = vsel %vm4338_vm13, %v4331_v55, 920167782  ;;  %v4347_v57 = vsel %vm4335_vm12, %v4325_v63, %v4328_v32 }
 0x34f   :  { %v4339_v11 = vsel %vm4335_vm12, %v4319_v54, %v4322_v59  ;;  %v4345_v12 = vsel %vm4337_vm1, %v4328_v32, %v4344_v3  ;;  %v4348_v58 = vsel %vm4338_vm13, %v4334_v50, 1326507024  ;;  %v1713_v15 = vadd.s32 1, %v5694_v23 }
 0x350   :  { %vm5693_vm2 = vcmp.lt.s32.totalorder %v5692_v18, 0  ;;  %v4341_v37 = vsel %vm4337_vm1, %v4325_v63, %v4340_v35  ;;  %v4346_v6 = vsel %vm4336_vm15, %v4343_v49, %v4345_v12  ;;  %v4349_v22 = vsel %vm4337_vm1, %v4331_v55, %v4348_v58 }
 0x351   :  { %v1670_v8 = vsel %vm5693_vm2, 0, %v5692_v18  ;;  %v4350_v7 = vsel %vm4336_vm15, %v4347_v57, %v4349_v22  ;;  %v8580_v33 = vmul.u32.u64.low %v8570_v26, %v4346_v6  ;;  %v8581_v42 = vmul.u32.u64.high %v8570_v26, %v4346_v6, %v8580_v33 }
 0x352   :  { %v1671_v62 = vsub.s32 32, %v1670_v8  ;;  %v1675_v2 = vsub.s32 4294967266, %v1670_v8  ;;  %v1685_v61 = vsub.s32 4, %v8541_v46  ;;  %vm1714_vm0 = vcmp.gt.s32.totalorder %v1713_v15, 0 }
 0x353   :  { %vm4291_vm3 = vweird.f32 %v8232_v56  ;;  %v4342_v14 = vsel %vm4336_vm15, %v4339_v11, %v4341_v37  ;;  %v8590_v48 = vmul.u32.u64.low %v8570_v26, %v4350_v7  ;;  %v8591_v5 = vmul.u32.u64.high %v8570_v26, %v4350_v7, %v8590_v48 }
 0x354   :  { %v1715_v40 = vsel %vm1714_vm0, %v1713_v15, 0  ;;  %v1672_v59 = vshll.u32 %v8552_v36, %v1670_v8  ;;  %v1673_v63 = vshrl.u32 %v1655_v60, %v1671_v62  ;;  %v1676_v32 = vadd.s32 127, %v1675_v2 }
 0x355   :  { %v1717_v0 = vand.u32 31, %v1715_v40  ;;  %vm4294_vm4 = vcmp.lt.s32.totalorder %v8556_v51, 2  ;;  %vm4295_vm5 = vcmp.eq.s32.totalorder %v8556_v51, 0  ;;  %vm8598_vm6 = vcmp.le.f32.partialorder %v1599_v4, 0.7853982 }
 0x356   :  { %v4361_v39 = vadd.s32 1, %v8581_v42  ;;  %vm4298_vm7 = vcmp.eq.s32.totalorder %v8556_v51, 2  ;;  %v1674_v19 = vor.u32 %v1673_v63, %v1672_v59  ;;  %v1677_v36 = vshll.u32 %v1676_v32, 23 }
 0x357   :  { %v6157_v17 = vpop.eup %6156  ;;  %v1686_v60 = vsel %vm1601_vm14, %v1685_v61, %v8541_v46  ;;  %v4358_v54 = vmul.u32 %v8570_v26, %v4342_v14  ;;  %vm4360_vm8 = vc.u32 %v8591_v5, %v8580_v33  ;;  %v1718_v4 = vsub.s32 32, %v1717_v0 }
 0x358   :  { %v6159_v55 = vpop.eup %6158  ;;  %v4299_v28 = vxor.u32 2147483648, %v6157_v17  ;;  %v1678_v23 = vor.u32 4788187, %v1677_v36  ;;  %v4362_v53 = vsel %vm4360_vm8, %v4361_v39, %v8581_v42  ;;  %v1711_v35 = vor.u32 8388608, %v8562_v52 }
 0x359   :  { %v4296_v50 = vxor.u32 2147483648, %v6159_v55  ;;  %v1688_v18 = vsel %vm8598_vm6, 0, %v1686_v60  ;;  %v4363_v3 = vadd.s32 %v4362_v53, %v4358_v54  ;;  %v8616_v46 = vadd.f32 %v8186_v45, %v6472_v44 }
 0x35a   :  { %v4300_v49 = vsel %vm4298_vm7, %v4299_v28, %v6159_v55  ;;  %v1679_v57 = vand.u32 2147483647, %v1678_v23  ;;  %v1681_v11 = vcvt.s32.f32 %v1674_v19  ;;  %v8620_v12 = vshrl.u32 %v1715_v40, 5 }
 0x35b   :  { %v4297_v26 = vsel %vm4295_vm5, %v6157_v17, %v4296_v50  ;;  %v4364_v52 = vadd.s32 536870912, %v4363_v3  ;;  %v1721_v15 = vshrl.u32 %v6290_v25, %v1718_v4  ;;  %v1724_v37 = vshrl.u32 %v6291_v27, %v1718_v4 }
 0x35c   :  { %v4301_v58 = vsel %vm4294_vm4, %v4297_v26, %v4300_v49  ;;  %v1682_v45 = vmul.f32 %v1681_v11, %v1679_v57  ;;  %v1720_v22 = vshll.u32 %v6289_v21, %v1717_v0  ;;  %v1727_v8 = vshrl.u32 %v6292_v29, %v1718_v4 }
 0x35d   :  { %v4302_v6 = vsel %vm4291_vm3, nan, %v4301_v58  ;;  %v8630_v7 = vshrl.u32 %v4364_v52, 30  ;;  %v1723_v42 = vshll.u32 %v6290_v25, %v1717_v0  ;;  %v1726_v51 = vshll.u32 %v6291_v27, %v1717_v0 }
 0x35e   :  { %5588 = vst [vmem:[#allocation2 + $0x128] sm:$0xff] %v4302_v6  ;;  %v1730_v62 = vshrl.u32 %v6293_v31, %v1718_v4  ;;  %v1683_v2 = vxor.u32 2147483648, %v1682_v45  ;;  %v1729_v61 = vshll.u32 %v6292_v29, %v1717_v0  ;;  %v1732_v56 = vshll.u32 %v6293_v31, %v1717_v0 }
 0x35f   :  { %v1733_v14 = vshrl.u32 %v6294_v38, %v1718_v4  ;;  %v4366_v48 = vshll.u32 %v8630_v7, 30  ;;  %v1722_v40 = vor.u32 %v1721_v15, %v1720_v22  ;;  %v1725_v59 = vor.u32 %v1724_v37, %v1723_v42 }
 0x360   :  { %v8639_v63 = vshll.u32 %v1711_v35, 8  ;;  %v1684_v32 = vsel %vm1601_vm14, %v1683_v2, %v1682_v45  ;;  %v1728_v39 = vor.u32 %v1727_v8, %v1726_v51  ;;  %v1731_v17 = vor.u32 %v1730_v62, %v1729_v61 }
 0x361   :  { %v1734_v19 = vor.u32 %v1733_v14, %v1732_v56  ;;  %v1687_v36 = vsel %vm8598_vm6, %v8365_v24, %v1684_v32  ;;  %v1692_v60 = vadd.s32 3, %v1688_v18  ;;  %v8646_v0 = vsub.s32 %v4363_v3, %v4366_v48 }
 0x362   :  { %v4410_v55 = vand.u32 2139095040, %v8616_v46  ;;  %6160 = vcosq.f32 %v1687_v36  ;;  %v1719_v28 = vshrl.u32 %v6289_v21, %v1718_v4  ;;  %vm1735_vm10 = vcmp.lt.s32.totalorder %v8620_v12, 1 }
 0x363   :  { %vm1737_vm9 = vcmp.lt.s32.totalorder %v8620_v12, 3  ;;  %6162 = vsinq.f32 %v1687_v36  ;;  %v4369_v54 = vsub.s32 0, %v8646_v0  ;;  %vm1738_vm11 = vcmp.lt.s32.totalorder %v8620_v12, 4 }
 0x364   :  { %v1743_v16 = vsel %vm1735_vm10, %v1722_v40, %v1725_v59  ;;  %v1740_v50 = vsel %vm1738_vm11, %v1728_v39, 2102212464  ;;  %v1744_v23 = vsel %vm1738_vm11, %v1731_v17, 920167782  ;;  %v1747_v53 = vsel %vm1735_vm10, %v1725_v59, %v1728_v39 }
 0x365   :  { %v1748_v35 = vsel %vm1738_vm11, %v1734_v19, 1326507024  ;;  %v5795_v4 = vmin.u32 %v4369_v54, %v8646_v0  ;;  %vm1736_vm12 = vcmp.lt.s32.totalorder %v8620_v12, 2  ;;  %v1745_v49 = vsel %vm1737_vm9, %v1728_v39, %v1744_v23 }
 0x366   :  { %v1749_v18 = vsel %vm1737_vm9, %v1731_v17, %v1748_v35  ;;  %v1693_v3 = vand.u32 3, %v1692_v60  ;;  %v1746_v26 = vsel %vm1736_vm12, %v1743_v16, %v1745_v49  ;;  %v4411_v11 = vshrl.u32 %v4410_v55, 23 }
 0x367   :  { %v1750_v57 = vsel %vm1736_vm12, %v1747_v53, %v1749_v18  ;;  %v4371_v58 = vclz %v5795_v4  ;;  %v4389_v52 = vsub.s32 4, %v8630_v7  ;;  %v1739_v15 = vsel %vm1735_vm10, %v1719_v28, %v1722_v40 }
 0x368   :  { %v1741_v37 = vsel %vm1737_vm9, %v1725_v59, %v1740_v50  ;;  %v8674_v6 = vmul.u32.u64.low %v8639_v63, %v1750_v57  ;;  %v8675_v45 = vmul.u32.u64.high %v8639_v63, %v1750_v57, %v8674_v6  ;;  %vm1691_vm13 = vweird.f32 %v8365_v24 }
 0x369   :  { %v8678_v22 = vmul.u32.u64.low %v8639_v63, %v1746_v26  ;;  %v8679_v8 = vmul.u32.u64.high %v8639_v63, %v1746_v26, %v8678_v22  ;;  %vm8685_vm14 = vcmp.le.f32.partialorder %v4303_v10, 0.7853982  ;;  %vm4305_vm15 = vcmp.lt.s32.totalorder %v8452_v30, 0 }
 0x36a   :  { %v5796_v51 = vadd.s32 4294967294, %v4371_v58  ;;  %v5798_v62 = vadd.s32 4294967169, %v4411_v11  ;;  %vm1694_vm1 = vcmp.lt.s32.totalorder %v1693_v3, 2  ;;  %vm1695_vm2 = vcmp.eq.s32.totalorder %v1693_v3, 0 }
 0x36b   :  { %vm1698_vm0 = vcmp.eq.s32.totalorder %v1693_v3, 2  ;;  %v1742_v2 = vsel %vm1736_vm12, %v1739_v15, %v1741_v37  ;;  %v4359_v61 = vadd.s32 %v8580_v33, %v8591_v5  ;;  %v4407_v56 = vand.u32 2147483647, %v8616_v46 }
 0x36c   :  { %vm5797_vm3 = vcmp.lt.s32.totalorder %v5796_v51, 0  ;;  %v4417_v10 = vadd.s32 1, %v5798_v62  ;;  %v6161_v14 = vpop.eup %6160  ;;  %v4390_v40 = vsel %vm4305_vm15, %v4389_v52, %v8630_v7  ;;  %vm1760_vm4 = vc.u32 %v8675_v45, %v8678_v22 }
 0x36d   :  { %v4374_v48 = vsel %vm5797_vm3, 0, %v5796_v51  ;;  %v1761_v59 = vadd.s32 1, %v8679_v8  ;;  %v6163_v12 = vpop.eup %6162  ;;  %v1699_v32 = vxor.u32 2147483648, %v6161_v14  ;;  %v1758_v33 = vmul.u32 %v8639_v63, %v1742_v2 }
 0x36e   :  { %v4375_v39 = vsub.s32 32, %v4374_v48  ;;  %v4379_v17 = vsub.s32 4294967266, %v4374_v48  ;;  %v1696_v5 = vxor.u32 2147483648, %v6163_v12  ;;  %v4376_v19 = vshll.u32 %v8646_v0, %v4374_v48 }
 0x36f   :  { %v1762_v36 = vsel %vm1760_vm4, %v1761_v59, %v8679_v8  ;;  %vm4418_vm5 = vcmp.gt.s32.totalorder %v4417_v10, 0  ;;  %v1700_v60 = vsel %vm1698_vm0, %v1699_v32, %v6163_v12  ;;  %v4392_v16 = vsel %vm8685_vm14, 0, %v4390_v40 }
 0x370   :  { %v4377_v7 = vshrl.u32 %v4359_v61, %v4375_v39  ;;  %v4380_v55 = vadd.s32 127, %v4379_v17  ;;  %v1763_v28 = vadd.s32 %v1762_v36, %v1758_v33  ;;  %v1697_v54 = vsel %vm1695_vm2, %v6161_v14, %v1696_v5  ;;  %v8726_v61 = vpop.f32.mrb[16].mxu1 }
 0x371   :  { %v4414_v50 = vand.u32 8388607, %v4407_v56  ;;  %v4419_v63 = vsel %vm4418_vm5, %v4417_v10, 0  ;;  %v1701_v23 = vsel %vm1694_vm1, %v1697_v54, %v1700_v60  ;;  %v4396_v26 = vadd.s32 3, %v4392_v16 }
 0x372   :  { %v4378_v0 = vor.u32 %v4377_v7, %v4376_v19  ;;  %v4381_v53 = vshll.u32 %v4380_v55, 23  ;;  %v1764_v35 = vadd.s32 536870912, %v1763_v28  ;;  %v1702_v4 = vsel %vm1691_vm13, nan, %v1701_v23 }
 0x373   :  { %v4421_v49 = vand.u32 31, %v4419_v63  ;;  %5563 = vst [vmem:[#allocation2 + $0x60] sm:$0xff] %v1702_v4  ;;  %v4415_v58 = vor.u32 8388608, %v4414_v50  ;;  %v8717_v15 = vadd.f32 %v8283_v47, %v6470_v43  ;;  %v8732_v40 = vand.u32 3, %v4396_v26 }
 0x374   :  { %v4382_v18 = vor.u32 4788187, %v4381_v53  ;;  %v8713_v57 = vshrl.u32 %v1764_v35, 30  ;;  %v4385_v11 = vcvt.s32.f32 %v4378_v0  ;;  %v4420_v39 = vshrl.u32 %v4419_v63, 5 }
 0x375   :  { %v4422_v52 = vsub.s32 32, %v4421_v49  ;;  %v4424_v6 = vshll.u32 %v6289_v21, %v4421_v49  ;;  %v4427_v24 = vshll.u32 %v6290_v25, %v4421_v49  ;;  %v4430_v62 = vshll.u32 %v6291_v27, %v4421_v49 }
 0x376   :  { %v4383_v3 = vand.u32 2147483647, %v4382_v18  ;;  %v1766_v37 = vshll.u32 %v8713_v57, 30  ;;  %v4433_v14 = vshll.u32 %v6292_v29, %v4421_v49  ;;  %v8734_v59 = vshll.u32 %v4415_v58, 8 }
 0x377   :  { %v4425_v8 = vshrl.u32 %v6290_v25, %v4422_v52  ;;  %v4428_v51 = vshrl.u32 %v6291_v27, %v4422_v52  ;;  %v4431_v2 = vshrl.u32 %v6292_v29, %v4422_v52  ;;  %v4434_v48 = vshrl.u32 %v6293_v31, %v4422_v52 }
 0x378   :  { %v4386_v10 = vmul.f32 %v4385_v11, %v4383_v3  ;;  %v8728_v47 = vsub.s32 %v1763_v28, %v1766_v37  ;;  %v4436_v19 = vshll.u32 %v6293_v31, %v4421_v49  ;;  %v4437_v36 = vshrl.u32 %v6294_v38, %v4422_v52 }
 0x379   :  { %v4426_v17 = vor.u32 %v4425_v8, %v4424_v6  ;;  %v4429_v33 = vor.u32 %v4428_v51, %v4427_v24  ;;  %v4432_v5 = vor.u32 %v4431_v2, %v4430_v62  ;;  %v4435_v55 = vor.u32 %v4434_v48, %v4433_v14 }
 0x37a   :  { %v4387_v12 = vxor.u32 2147483648, %v4386_v10  ;;  %v1769_v32 = vsub.s32 0, %v8728_v47  ;;  %v1810_v28 = vand.u32 2139095040, %v8717_v15  ;;  %v1789_v16 = vsub.s32 4, %v8713_v57 }
 0x37b   :  { %v4423_v50 = vshrl.u32 %v6289_v21, %v4422_v52  ;;  %v4438_v63 = vor.u32 %v4437_v36, %v4436_v19  ;;  %vm1705_vm6 = vcmp.lt.s32.totalorder %v8515_v20, 0  ;;  %vm4439_vm7 = vcmp.lt.s32.totalorder %v4420_v39, 1 }
 0x37c   :  { %v4388_v60 = vsel %vm4305_vm15, %v4387_v12, %v4386_v10  ;;  %v5695_v7 = vmin.u32 %v1769_v32, %v8728_v47  ;;  %vm4442_vm8 = vcmp.lt.s32.totalorder %v4420_v39, 4  ;;  %vm4440_vm10 = vcmp.lt.s32.totalorder %v4420_v39, 2 }
 0x37d   :  { %v4391_v54 = vsel %vm8685_vm14, %v8452_v30, %v4388_v60  ;;  %v4444_v0 = vsel %vm4442_vm8, %v4432_v5, 2102212464  ;;  %v4447_v53 = vsel %vm4439_vm7, %v4426_v17, %v4429_v33  ;;  %vm4441_vm9 = vcmp.lt.s32.totalorder %v4420_v39, 3 }
 0x37e   :  { %6164 = vcosq.f32 %v4391_v54  ;;  %v1771_v23 = vclz %v5695_v7  ;;  %v4448_v4 = vsel %vm4442_vm8, %v4435_v55, 920167782  ;;  %v4451_v42 = vsel %vm4439_vm7, %v4429_v33, %v4432_v5 }
 0x37f   :  { %6166 = vsinq.f32 %v4391_v54  ;;  %vm8751_vm11 = vcmp.le.f32.partialorder %v1703_v13, 0.7853982  ;;  %v4443_v18 = vsel %vm4439_vm7, %v4423_v50, %v4426_v17  ;;  %v4449_v26 = vsel %vm4441_vm9, %v4432_v5, %v4448_v4  ;;  %v8762_v13 = vpop.f32.mrb[17].mxu0 }
 0x380   :  { %v5696_v35 = vadd.s32 4294967294, %v1771_v23  ;;  %v4452_v11 = vsel %vm4442_vm8, %v4438_v63, 1326507024  ;;  %v1811_v58 = vshrl.u32 %v1810_v28, 23  ;;  %v4445_v52 = vsel %vm4441_vm9, %v4429_v33, %v4444_v0 }
 0x381   :  { %v4450_v3 = vsel %vm4440_vm10, %v4447_v53, %v4449_v26  ;;  %v4453_v37 = vsel %vm4441_vm9, %v4435_v55, %v4452_v11  ;;  %v1759_v62 = vadd.s32 %v8678_v22, %v8675_v45  ;;  %vm4395_vm13 = vweird.f32 %v8452_v30 }
 0x382   :  { %vm5697_vm12 = vcmp.lt.s32.totalorder %v5696_v35, 0  ;;  %v4454_v24 = vsel %vm4440_vm10, %v4451_v42, %v4453_v37  ;;  %v8758_v8 = vmul.u32.u64.low %v8734_v59, %v4450_v3  ;;  %v8759_v51 = vmul.u32.u64.high %v8734_v59, %v4450_v3, %v8758_v8 }
 0x383   :  { %v1774_v6 = vsel %vm5697_vm12, 0, %v5696_v35  ;;  %v5698_v14 = vadd.s32 4294967169, %v1811_v58  ;;  %vm4398_vm14 = vcmp.lt.s32.totalorder %v8732_v40, 2  ;;  %v4446_v48 = vsel %vm4440_vm10, %v4443_v18, %v4445_v52 }
 0x384   :  { %v1775_v2 = vsub.s32 32, %v1774_v6  ;;  %v1779_v10 = vsub.s32 4294967266, %v1774_v6  ;;  %v8770_v12 = vmul.u32.u64.low %v8734_v59, %v4454_v24  ;;  %v8771_v32 = vmul.u32.u64.high %v8734_v59, %v4454_v24, %v8770_v12 }
 0x385   :  { %v1776_v17 = vshll.u32 %v8728_v47, %v1774_v6  ;;  %v1817_v19 = vadd.s32 1, %v5698_v14  ;;  %vm4399_vm15 = vcmp.eq.s32.totalorder %v8732_v40, 0  ;;  %vm4402_vm1 = vcmp.eq.s32.totalorder %v8732_v40, 2 }
 0x386   :  { %v1777_v33 = vshrl.u32 %v1759_v62, %v1775_v2  ;;  %v1780_v5 = vadd.s32 127, %v1779_v10  ;;  %v1790_v45 = vsel %vm1705_vm6, %v1789_v16, %v8713_v57  ;;  %v4465_v22 = vadd.s32 1, %v8759_v51 }
 0x387   :  { %v1807_v7 = vand.u32 2147483647, %v8717_v15  ;;  %vm1818_vm2 = vcmp.gt.s32.totalorder %v1817_v19, 0  ;;  %v4462_v28 = vmul.u32 %v8734_v59, %v4446_v48  ;;  %vm4464_vm0 = vc.u32 %v8771_v32, %v8758_v8 }
 0x388   :  { %v6165_v39 = vpop.eup %6164  ;;  %v1778_v36 = vor.u32 %v1777_v33, %v1776_v17  ;;  %v1781_v60 = vshll.u32 %v1780_v5, 23  ;;  %v1819_v54 = vsel %vm1818_vm2, %v1817_v19, 0  ;;  %v1792_v57 = vsel %vm8751_vm11, 0, %v1790_v45 }
 0x389   :  { %v6167_v47 = vpop.eup %6166  ;;  %v4403_v55 = vxor.u32 2147483648, %v6165_v39  ;;  %v4466_v16 = vsel %vm4464_vm0, %v4465_v22, %v8759_v51  ;;  %v1821_v53 = vand.u32 31, %v1819_v54  ;;  %v8791_v35 = vadd.f32 %v8352_v41, %v6470_v43 }
 0x38a   :  { %v4400_v50 = vxor.u32 2147483648, %v6167_v47  ;;  %v1782_v63 = vor.u32 4788187, %v1781_v60  ;;  %v4467_v0 = vadd.s32 %v4466_v16, %v4462_v28  ;;  %v1785_v42 = vcvt.s32.f32 %v1778_v36 }
 0x38b   :  { %v4404_v23 = vsel %vm4402_vm1, %v4403_v55, %v6167_v47  ;;  %v1814_v18 = vand.u32 8388607, %v1807_v7  ;;  %v1796_v11 = vadd.s32 3, %v1792_v57  ;;  %v1822_v52 = vsub.s32 32, %v1821_v53 }
 0x38c   :  { %v4401_v59 = vsel %vm4399_vm15, %v6165_v39, %v4400_v50  ;;  %v1783_v4 = vand.u32 2147483647, %v1782_v63  ;;  %v4468_v58 = vadd.s32 536870912, %v4467_v0  ;;  %v1824_v41 = vshll.u32 %v6289_v21, %v1821_v53 }
 0x38d   :  { %v4405_v26 = vsel %vm4398_vm14, %v4401_v59, %v4404_v23  ;;  %v1827_v6 = vshll.u32 %v6290_v25, %v1821_v53  ;;  %v1825_v51 = vshrl.u32 %v6290_v25, %v1822_v52  ;;  %v1828_v62 = vshrl.u32 %v6291_v27, %v1822_v52 }
 0x38e   :  { %v4406_v3 = vsel %vm4395_vm13, nan, %v4405_v26  ;;  %v1786_v37 = vmul.f32 %v1785_v42, %v1783_v4  ;;  %v8803_v24 = vshrl.u32 %v4468_v58, 30  ;;  %v1830_v40 = vshll.u32 %v6291_v27, %v1821_v53 }
 0x38f   :  { %5589 = vst [vmem:[#allocation2 + $0x130] sm:$0xff] %v4406_v3  ;;  %v1831_v10 = vshrl.u32 %v6292_v29, %v1822_v52  ;;  %v1833_v30 = vshll.u32 %v6292_v29, %v1821_v53  ;;  %v1834_v14 = vshrl.u32 %v6293_v31, %v1822_v52  ;;  %v1820_v12 = vshrl.u32 %v1819_v54, 5 }
 0x390   :  { %v1787_v2 = vxor.u32 2147483648, %v1786_v37  ;;  %v4470_v48 = vshll.u32 %v8803_v24, 30  ;;  %v1826_v17 = vor.u32 %v1825_v51, %v1824_v41  ;;  %v4514_v33 = vand.u32 2139095040, %v8791_v35 }
 0x391   :  { %v1829_v19 = vor.u32 %v1828_v62, %v1827_v6  ;;  %v1832_v45 = vor.u32 %v1831_v10, %v1830_v40  ;;  %v1835_v22 = vor.u32 %v1834_v14, %v1833_v30  ;;  %v1836_v60 = vshll.u32 %v6293_v31, %v1821_v53 }
 0x392   :  { %v1788_v5 = vsel %vm1705_vm6, %v1787_v2, %v1786_v37  ;;  %v8818_v36 = vsub.s32 %v4467_v0, %v4470_v48  ;;  %v1837_v47 = vshrl.u32 %v6294_v38, %v1822_v52  ;;  %v8822_v55 = vand.u32 3, %v1796_v11 }
 0x393   :  { %v1791_v39 = vsel %vm8751_vm11, %v8515_v20, %v1788_v5  ;;  %v1815_v28 = vor.u32 8388608, %v1814_v18  ;;  %vm4409_vm3 = vcmp.lt.s32.totalorder %v8616_v46, 0  ;;  %v4515_v63 = vshrl.u32 %v4514_v33, 23  ;;  %v8829_v18 = vpop.f32.mrb[17].mxu1 }
 0x394   :  { %6168 = vcosq.f32 %v1791_v39  ;;  %v4473_v54 = vsub.s32 0, %v8818_v36  ;;  %v1838_v50 = vor.u32 %v1837_v47, %v1836_v60  ;;  %v1823_v49 = vshrl.u32 %v6289_v21, %v1822_v52 }
 0x395   :  { %6170 = vsinq.f32 %v1791_v39  ;;  %vm1839_vm4 = vcmp.lt.s32.totalorder %v1820_v12, 1  ;;  %vm1841_vm5 = vcmp.lt.s32.totalorder %v1820_v12, 3  ;;  %vm1842_vm6 = vcmp.lt.s32.totalorder %v1820_v12, 4 }
 0x396   :  { %v5799_v57 = vmin.u32 %v4473_v54, %v8818_v36  ;;  %v1844_v16 = vsel %vm1842_vm6, %v1832_v45, 2102212464  ;;  %v1847_v23 = vsel %vm1839_vm4, %v1826_v17, %v1829_v19  ;;  %v1848_v0 = vsel %vm1842_vm6, %v1835_v22, 920167782 }
 0x397   :  { %v1849_v53 = vsel %vm1841_vm5, %v1832_v45, %v1848_v0  ;;  %v1851_v59 = vsel %vm1839_vm4, %v1829_v19, %v1832_v45  ;;  %v1852_v4 = vsel %vm1842_vm6, %v1838_v50, 1326507024  ;;  %v1855_v42 = vshll.u32 %v1815_v28, 8 }
 0x398   :  { %vm8833_vm7 = vcmp.le.f32.partialorder %v4407_v56, 0.7853982  ;;  %v4475_v11 = vclz %v5799_v57  ;;  %vm1840_vm8 = vcmp.lt.s32.totalorder %v1820_v12, 2  ;;  %v1843_v58 = vsel %vm1839_vm4, %v1823_v49, %v1826_v17 }
 0x399   :  { %v1845_v52 = vsel %vm1841_vm5, %v1829_v19, %v1844_v16  ;;  %v4493_v3 = vsub.s32 4, %v8803_v24  ;;  %v1850_v37 = vsel %vm1840_vm8, %v1847_v23, %v1849_v53  ;;  %v1853_v41 = vsel %vm1841_vm5, %v1835_v22, %v1852_v4 }
 0x39a   :  { %v5802_v6 = vadd.s32 4294967169, %v4515_v63  ;;  %vm1795_vm10 = vweird.f32 %v8515_v20  ;;  %v5800_v51 = vadd.s32 4294967294, %v4475_v11  ;;  %v1854_v62 = vsel %vm1840_vm8, %v1851_v59, %v1853_v41 }
 0x39b   :  { %v8841_v40 = vmul.u32.u64.low %v1855_v42, %v1850_v37  ;;  %v8842_v56 = vmul.u32.u64.high %v1855_v42, %v1850_v37, %v8841_v40  ;;  %vm1798_vm9 = vcmp.lt.s32.totalorder %v8822_v55, 2  ;;  %v1846_v2 = vsel %vm1840_vm8, %v1843_v58, %v1845_v52 }
 0x39c   :  { %v8846_v10 = vmul.u32.u64.low %v1855_v42, %v1854_v62  ;;  %v8847_v30 = vmul.u32.u64.high %v1855_v42, %v1854_v62, %v8846_v10  ;;  %vm1799_vm11 = vcmp.eq.s32.totalorder %v8822_v55, 0  ;;  %vm1802_vm12 = vcmp.eq.s32.totalorder %v8822_v55, 2 }
 0x39d   :  { %vm5801_vm13 = vcmp.lt.s32.totalorder %v5800_v51, 0  ;;  %v4521_v14 = vadd.s32 1, %v5802_v6  ;;  %v4463_v12 = vadd.s32 %v8758_v8, %v8771_v32  ;;  %v4494_v33 = vsel %vm4409_vm3, %v4493_v3, %v8803_v24 }
 0x39e   :  { %v6169_v48 = vpop.eup %6168  ;;  %v4478_v17 = vsel %vm5801_vm13, 0, %v5800_v51  ;;  %v4511_v5 = vand.u32 2147483647, %v8791_v35  ;;  %v1862_v60 = vmul.u32 %v1855_v42, %v1846_v2  ;;  %vm1864_vm14 = vc.u32 %v8847_v30, %v8841_v40 }
 0x39f   :  { %v6171_v19 = vpop.eup %6170  ;;  %v1803_v45 = vxor.u32 2147483648, %v6169_v48  ;;  %v4479_v22 = vsub.s32 32, %v4478_v17  ;;  %v4483_v39 = vsub.s32 4294967266, %v4478_v17  ;;  %v4480_v28 = vshll.u32 %v8818_v36, %v4478_v17 }
 0x3a0   :  { %v1800_v47 = vxor.u32 2147483648, %v6171_v19  ;;  %v1865_v8 = vadd.s32 1, %v8842_v56  ;;  %vm4522_vm15 = vcmp.gt.s32.totalorder %v4521_v14, 0  ;;  %v4496_v63 = vsel %vm8833_vm7, 0, %v4494_v33 }
 0x3a1   :  { %v1804_v32 = vsel %vm1802_vm12, %v1803_v45, %v6171_v19  ;;  %v4481_v54 = vshrl.u32 %v4463_v12, %v4479_v22  ;;  %v4484_v24 = vadd.s32 127, %v4483_v39  ;;  %v4523_v36 = vsel %vm4522_vm15, %v4521_v14, 0 }
 0x3a2   :  { %v1801_v50 = vsel %vm1799_vm11, %v6169_v48, %v1800_v47  ;;  %v1866_v49 = vsel %vm1864_vm14, %v1865_v8, %v8842_v56  ;;  %v4525_v59 = vand.u32 31, %v4523_v36  ;;  %v4518_v11 = vand.u32 8388607, %v4511_v5 }
 0x3a3   :  { %v1805_v57 = vsel %vm1798_vm9, %v1801_v50, %v1804_v32  ;;  %v4482_v16 = vor.u32 %v4481_v54, %v4480_v28  ;;  %v4485_v23 = vshll.u32 %v4484_v24, 23  ;;  %v1867_v0 = vadd.s32 %v1866_v49, %v1862_v60 }
 0x3a4   :  { %v1806_v53 = vsel %vm1795_vm10, nan, %v1805_v57  ;;  %v8876_v58 = vadd.f32 %v8417_v9, %v6472_v44  ;;  %v4500_v55 = vadd.s32 3, %v4496_v63  ;;  %v4526_v3 = vsub.s32 32, %v4525_v59 }
 0x3a5   :  { %5564 = vst [vmem:[#allocation2 + $0x68] sm:$0xff] %v1806_v53  ;;  %v4486_v4 = vor.u32 4788187, %v4485_v23  ;;  %v1868_v42 = vadd.s32 536870912, %v1867_v0  ;;  %v4489_v52 = vcvt.s32.f32 %v4482_v16  ;;  %v4528_v37 = vshll.u32 %v6289_v21, %v4525_v59 }
 0x3a6   :  { %v4531_v20 = vshll.u32 %v6290_v25, %v4525_v59  ;;  %v4534_v51 = vshll.u32 %v6291_v27, %v4525_v59  ;;  %v4529_v62 = vshrl.u32 %v6290_v25, %v4526_v3  ;;  %v4532_v56 = vshrl.u32 %v6291_v27, %v4526_v3 }
 0x3a7   :  { %v4487_v41 = vand.u32 2147483647, %v4486_v4  ;;  %v8879_v6 = vshrl.u32 %v1868_v42, 30  ;;  %v4535_v2 = vshrl.u32 %v6292_v29, %v4526_v3  ;;  %v4537_v9 = vshll.u32 %v6292_v29, %v4525_v59 }
 0x3a8   :  { %v4519_v48 = vor.u32 8388608, %v4518_v11  ;;  %v4538_v12 = vshrl.u32 %v6293_v31, %v4526_v3  ;;  %v4524_v17 = vshrl.u32 %v4523_v36, 5  ;;  %v4540_v33 = vshll.u32 %v6293_v31, %v4525_v59 }
 0x3a9   :  { %v4490_v10 = vmul.f32 %v4489_v52, %v4487_v41  ;;  %v1870_v14 = vshll.u32 %v8879_v6, 30  ;;  %v4541_v19 = vshrl.u32 %v6294_v38, %v4526_v3  ;;  %v1914_v45 = vand.u32 2139095040, %v8876_v58 }
 0x3aa   :  { %v8892_v39 = vand.u32 3, %v4500_v55  ;;  %v4536_v47 = vor.u32 %v4535_v2, %v4534_v51  ;;  %v4530_v28 = vor.u32 %v4529_v62, %v4528_v37  ;;  %v4533_v8 = vor.u32 %v4532_v56, %v4531_v20 }
 0x3ab   :  { %v4491_v22 = vxor.u32 2147483648, %v4490_v10  ;;  %v8894_v60 = vsub.s32 %v1867_v0, %v1870_v14  ;;  %v4539_v32 = vor.u32 %v4538_v12, %v4537_v9  ;;  %v1911_v54 = vand.u32 2147483647, %v8876_v58 }
 0x3ac   :  { %v4527_v63 = vshrl.u32 %v6289_v21, %v4526_v3  ;;  %v4559_v49 = vshll.u32 %v4519_v48, 8  ;;  %v4542_v57 = vor.u32 %v4541_v19, %v4540_v33  ;;  %vm4546_vm1 = vcmp.lt.s32.totalorder %v4524_v17, 4 }
 0x3ad   :  { %v4492_v24 = vsel %vm4409_vm3, %v4491_v22, %v4490_v10  ;;  %v1873_v50 = vsub.s32 0, %v8894_v60  ;;  %v1915_v16 = vshrl.u32 %v1914_v45, 23  ;;  %vm4543_vm2 = vcmp.lt.s32.totalorder %v4524_v17, 1 }
 0x3ae   :  { %v4495_v36 = vsel %vm8833_vm7, %v8616_v46, %v4492_v24  ;;  %v4548_v0 = vsel %vm4546_vm1, %v4536_v47, 2102212464  ;;  %vm4545_vm0 = vcmp.lt.s32.totalorder %v4524_v17, 3  ;;  %v4551_v53 = vsel %vm4543_vm2, %v4530_v28, %v4533_v8 }
 0x3af   :  { %6172 = vcosq.f32 %v4495_v36  ;;  %v5699_v23 = vmin.u32 %v1873_v50, %v8894_v60  ;;  %v4552_v59 = vsel %vm4546_vm1, %v4539_v32, 920167782  ;;  %vm8909_vm3 = vcmp.le.f32.partialorder %v1807_v7, 0.7853982 }
 0x3b0   :  { %6174 = vsinq.f32 %v4495_v36  ;;  %v4547_v42 = vsel %vm4543_vm2, %v4527_v63, %v4530_v28  ;;  %v4549_v11 = vsel %vm4545_vm0, %v4533_v8, %v4548_v0  ;;  %v4555_v52 = vsel %vm4543_vm2, %v4533_v8, %v4536_v47 }
 0x3b1   :  { %v1875_v26 = vclz %v5699_v23  ;;  %vm4544_vm4 = vcmp.lt.s32.totalorder %v4524_v17, 2  ;;  %v4553_v55 = vsel %vm4545_vm0, %v4536_v47, %v4552_v59  ;;  %v4556_v3 = vsel %vm4546_vm1, %v4542_v57, 1326507024 }
 0x3b2   :  { %v5702_v37 = vadd.s32 4294967169, %v1915_v16  ;;  %v1893_v20 = vsub.s32 4, %v8879_v6  ;;  %v4554_v51 = vsel %vm4544_vm4, %v4551_v53, %v4553_v55  ;;  %v4557_v62 = vsel %vm4545_vm0, %v4539_v32, %v4556_v3  ;;  %v8933_v32 = vpop.f32.mrb[18].mxu0 }
 0x3b3   :  { %v5700_v41 = vadd.s32 4294967294, %v1875_v26  ;;  %v4550_v56 = vsel %vm4544_vm4, %v4547_v42, %v4549_v11  ;;  %v4558_v2 = vsel %vm4544_vm4, %v4555_v52, %v4557_v62  ;;  %vm4499_vm6 = vweird.f32 %v8616_v46 }
 0x3b4   :  { %v8915_v7 = vmul.u32.u64.low %v4559_v49, %v4554_v51  ;;  %v8916_v9 = vmul.u32.u64.high %v4559_v49, %v4554_v51, %v8915_v7  ;;  %v8919_v10 = vmul.u32.u64.low %v4559_v49, %v4558_v2  ;;  %v8920_v14 = vmul.u32.u64.high %v4559_v49, %v4558_v2, %v8919_v10 }
 0x3b5   :  { %vm5701_vm5 = vcmp.lt.s32.totalorder %v5700_v41, 0  ;;  %v1921_v48 = vadd.s32 1, %v5702_v37  ;;  %vm4506_vm7 = vcmp.eq.s32.totalorder %v8892_v39, 2  ;;  %vm1809_vm8 = vcmp.lt.s32.totalorder %v8717_v15, 0 }
 0x3b6   :  { %v1863_v12 = vadd.s32 %v8841_v40, %v8847_v30  ;;  %v1878_v17 = vsel %vm5701_vm5, 0, %v5700_v41  ;;  %v1894_v45 = vsel %vm1809_vm8, %v1893_v20, %v8879_v6  ;;  %v4566_v22 = vmul.u32 %v4559_v49, %v4550_v56 }
 0x3b7   :  { %v1879_v33 = vsub.s32 32, %v1878_v17  ;;  %v1883_v19 = vsub.s32 4294967266, %v1878_v17  ;;  %vm1922_vm10 = vcmp.gt.s32.totalorder %v1921_v48, 0  ;;  %v4569_v47 = vadd.s32 1, %v8916_v9 }
 0x3b8   :  { %v1918_v28 = vand.u32 8388607, %v1911_v54  ;;  %v1923_v8 = vsel %vm1922_vm10, %v1921_v48, 0  ;;  %v1880_v40 = vshll.u32 %v8894_v60, %v1878_v17  ;;  %vm4568_vm9 = vc.u32 %v8920_v14, %v8915_v7 }
 0x3b9   :  { %v6173_v24 = vpop.eup %6172  ;;  %v1881_v30 = vshrl.u32 %v1863_v12, %v1879_v33  ;;  %v1884_v50 = vadd.s32 127, %v1883_v19  ;;  %v1896_v49 = vsel %vm8909_vm3, 0, %v1894_v45  ;;  %v4570_v36 = vsel %vm4568_vm9, %v4569_v47, %v8916_v9 }
 0x3ba   :  { %v6175_v63 = vpop.eup %6174  ;;  %v4507_v6 = vxor.u32 2147483648, %v6173_v24  ;;  %v1925_v57 = vand.u32 31, %v1923_v8  ;;  %v4571_v53 = vadd.s32 %v4570_v36, %v4566_v22  ;;  %vm4503_vm11 = vcmp.eq.s32.totalorder %v8892_v39, 0 }
 0x3bb   :  { %v4504_v16 = vxor.u32 2147483648, %v6175_v63  ;;  %v1882_v23 = vor.u32 %v1881_v30, %v1880_v40  ;;  %v1885_v0 = vshll.u32 %v1884_v50, 23  ;;  %v8946_v26 = vadd.f32 %v8496_v1, %v6472_v44 }
 0x3bc   :  { %v4508_v60 = vsel %vm4506_vm7, %v4507_v6, %v6175_v63  ;;  %v1926_v59 = vsub.s32 32, %v1925_v57  ;;  %vm4502_vm12 = vcmp.lt.s32.totalorder %v8892_v39, 2  ;;  %v4572_v52 = vadd.s32 536870912, %v4571_v53 }
 0x3bd   :  { %v4505_v42 = vsel %vm4503_vm11, %v6173_v24, %v4504_v16  ;;  %v1886_v11 = vor.u32 4788187, %v1885_v0  ;;  %v1900_v3 = vadd.s32 3, %v1896_v49  ;;  %v1919_v37 = vor.u32 8388608, %v1918_v28 }
 0x3be   :  { %v4509_v55 = vsel %vm4502_vm12, %v4505_v42, %v4508_v60  ;;  %v8951_v41 = vadd.f32 %v8585_v34, %v6470_v43  ;;  %v1889_v62 = vcvt.s32.f32 %v1882_v23  ;;  %v4573_v56 = vshrl.u32 %v4572_v52, 30 }
 0x3bf   :  { %v4510_v20 = vsel %vm4499_vm6, nan, %v4509_v55  ;;  %v1887_v51 = vand.u32 2147483647, %v1886_v11  ;;  %v1924_v1 = vshrl.u32 %v1923_v8, 5  ;;  %v1929_v39 = vshrl.u32 %v6290_v25, %v1926_v59 }
 0x3c0   :  { %5590 = vst [vmem:[#allocation2 + $0x138] sm:$0xff] %v4510_v20  ;;  %v1932_v2 = vshrl.u32 %v6291_v27, %v1926_v59  ;;  %v1935_v9 = vshrl.u32 %v6292_v29, %v1926_v59  ;;  %v4574_v48 = vshll.u32 %v4573_v56, 30  ;;  %v1934_v12 = vshll.u32 %v6291_v27, %v1925_v57 }
 0x3c1   :  { %v1890_v10 = vmul.f32 %v1889_v62, %v1887_v51  ;;  %v1938_v34 = vshrl.u32 %v6293_v31, %v1926_v59  ;;  %vm4513_vm13 = vcmp.lt.s32.totalorder %v8791_v35, 0  ;;  %v1928_v46 = vshll.u32 %v6289_v21, %v1925_v57 }
 0x3c2   :  { %v1931_v17 = vshll.u32 %v6290_v25, %v1925_v57  ;;  %v1937_v33 = vshll.u32 %v6292_v29, %v1925_v57  ;;  %v1941_v19 = vshrl.u32 %v6294_v38, %v1926_v59  ;;  %v8965_v22 = vand.u32 3, %v1900_v3 }
 0x3c3   :  { %v1891_v45 = vxor.u32 2147483648, %v1890_v10  ;;  %v8967_v47 = vsub.s32 %v4571_v53, %v4574_v48  ;;  %v1936_v28 = vor.u32 %v1935_v9, %v1934_v12  ;;  %v1930_v8 = vor.u32 %v1929_v39, %v1928_v46 }
 0x3c4   :  { %v1933_v24 = vor.u32 %v1932_v2, %v1931_v17  ;;  %v1939_v40 = vor.u32 %v1938_v34, %v1937_v33  ;;  %v1940_v30 = vshll.u32 %v6293_v31, %v1925_v57  ;;  %v1927_v6 = vshrl.u32 %v6289_v21, %v1926_v59 }
 0x3c5   :  { %v1892_v50 = vsel %vm1809_vm8, %v1891_v45, %v1890_v10  ;;  %v4577_v63 = vsub.s32 0, %v8967_v47  ;;  %v1959_v49 = vshll.u32 %v1919_v37, 8  ;;  %v4597_v16 = vsub.s32 4, %v4573_v56  ;;  %v8979_v37 = vpop.f32.mrb[18].mxu1 }
 0x3c6   :  { %v1895_v36 = vsel %vm8909_vm3, %v8717_v15, %v1892_v50  ;;  %v1942_v23 = vor.u32 %v1941_v19, %v1940_v30  ;;  %vm1946_vm14 = vcmp.lt.s32.totalorder %v1924_v1, 4  ;;  %vm1943_vm15 = vcmp.lt.s32.totalorder %v1924_v1, 1 }
 0x3c7   :  { %6176 = vcosq.f32 %v1895_v36  ;;  %v5803_v0 = vmin.u32 %v4577_v63, %v8967_v47  ;;  %v1948_v57 = vsel %vm1946_vm14, %v1936_v28, 2102212464  ;;  %vm1944_vm1 = vcmp.lt.s32.totalorder %v1924_v1, 2 }
 0x3c8   :  { %6178 = vsinq.f32 %v1895_v36  ;;  %v1951_v53 = vsel %vm1943_vm15, %v1930_v8, %v1933_v24  ;;  %v1952_v60 = vsel %vm1946_vm14, %v1939_v40, 920167782  ;;  %vm1945_vm2 = vcmp.lt.s32.totalorder %v1924_v1, 3 }
 0x3c9   :  { %v4579_v42 = vclz %v5803_v0  ;;  %v1947_v59 = vsel %vm1943_vm15, %v1927_v6, %v1930_v8  ;;  %v1955_v11 = vsel %vm1943_vm15, %v1933_v24, %v1936_v28  ;;  %v1949_v52 = vsel %vm1945_vm2, %v1933_v24, %v1948_v57 }
 0x3ca   :  { %v1953_v55 = vsel %vm1945_vm2, %v1936_v28, %v1952_v60  ;;  %v1956_v4 = vsel %vm1946_vm14, %v1942_v23, 1326507024  ;;  %v4618_v3 = vand.u32 2139095040, %v8946_v26  ;;  %v4598_v51 = vsel %vm4513_vm13, %v4597_v16, %v4573_v56 }
 0x3cb   :  { %v5804_v20 = vadd.s32 4294967294, %v4579_v42  ;;  %v1954_v62 = vsel %vm1944_vm1, %v1951_v53, %v1953_v55  ;;  %v1957_v39 = vsel %vm1945_vm2, %v1939_v40, %v1956_v4  ;;  %v1950_v12 = vsel %vm1944_vm1, %v1947_v59, %v1949_v52 }
 0x3cc   :  { %v1958_v2 = vsel %vm1944_vm1, %v1955_v11, %v1957_v39  ;;  %v8985_v9 = vmul.u32.u64.low %v1959_v49, %v1954_v62  ;;  %v8986_v10 = vmul.u32.u64.high %v1959_v49, %v1954_v62, %v8985_v9  ;;  %v4619_v48 = vshrl.u32 %v4618_v3, 23 }
 0x3cd   :  { %vm5805_vm0 = vcmp.lt.s32.totalorder %v5804_v20, 0  ;;  %v8990_v34 = vmul.u32.u64.low %v1959_v49, %v1958_v2  ;;  %v8991_v46 = vmul.u32.u64.high %v1959_v49, %v1958_v2, %v8990_v34  ;;  %vm1906_vm3 = vcmp.eq.s32.totalorder %v8965_v22, 2 }
 0x3ce   :  { %vm8996_vm4 = vcmp.le.f32.partialorder %v4511_v5, 0.7853982  ;;  %v4582_v17 = vsel %vm5805_vm0, 0, %v5804_v20  ;;  %v5806_v33 = vadd.s32 4294967169, %v4619_v48  ;;  %v4567_v19 = vadd.s32 %v8915_v7, %v8920_v14 }
 0x3cf   :  { %v4583_v45 = vsub.s32 32, %v4582_v17  ;;  %v4587_v28 = vsub.s32 4294967266, %v4582_v17  ;;  %v4600_v1 = vsel %vm8996_vm4, 0, %v4598_v51  ;;  %v1966_v8 = vmul.u32 %v1959_v49, %v1950_v12 }
 0x3d0   :  { %v1969_v24 = vadd.s32 1, %v8986_v10  ;;  %v4615_v40 = vand.u32 2147483647, %v8946_v26  ;;  %v4625_v30 = vadd.s32 1, %v5806_v33  ;;  %v4584_v50 = vshll.u32 %v8967_v47, %v4582_v17 }
 0x3d1   :  { %v6177_v5 = vpop.eup %6176  ;;  %v4585_v63 = vshrl.u32 %v4567_v19, %v4583_v45  ;;  %v4588_v6 = vadd.s32 127, %v4587_v28  ;;  %vm1968_vm5 = vc.u32 %v8991_v46, %v8985_v9  ;;  %v4604_v36 = vadd.s32 3, %v4600_v1 }
 0x3d2   :  { %v6179_v7 = vpop.eup %6178  ;;  %v1907_v14 = vxor.u32 2147483648, %v6177_v5  ;;  %v1970_v16 = vsel %vm1968_vm5, %v1969_v24, %v8986_v10  ;;  %vm4626_vm6 = vcmp.gt.s32.totalorder %v4625_v30, 0  ;;  %vm1903_vm7 = vcmp.eq.s32.totalorder %v8965_v22, 0 }
 0x3d3   :  { %v1904_v49 = vxor.u32 2147483648, %v6179_v7  ;;  %v4586_v23 = vor.u32 %v4585_v63, %v4584_v50  ;;  %v4589_v0 = vshll.u32 %v4588_v6, 23  ;;  %v1971_v57 = vadd.s32 %v1970_v16, %v1966_v8 }
 0x3d4   :  { %v1908_v47 = vsel %vm1906_vm3, %v1907_v14, %v6179_v7  ;;  %v4622_v53 = vand.u32 8388607, %v4615_v40  ;;  %v4627_v60 = vsel %vm4626_vm6, %v4625_v30, 0  ;;  %vm1902_vm8 = vcmp.lt.s32.totalorder %v8965_v22, 2 }
 0x3d5   :  { %v1905_v42 = vsel %vm1903_vm7, %v6177_v5, %v1904_v49  ;;  %v4590_v59 = vor.u32 4788187, %v4589_v0  ;;  %v1972_v11 = vadd.s32 536870912, %v1971_v57  ;;  %vm1899_vm10 = vweird.f32 %v8717_v15 }
 0x3d6   :  { %v1909_v52 = vsel %vm1902_vm8, %v1905_v42, %v1908_v47  ;;  %v9017_v55 = vand.u32 3, %v4604_v36  ;;  %v4629_v4 = vand.u32 31, %v4627_v60  ;;  %v4593_v51 = vcvt.s32.f32 %v4586_v23 }
 0x3d7   :  { %v1910_v3 = vsel %vm1899_vm10, nan, %v1909_v52  ;;  %v4591_v20 = vand.u32 2147483647, %v4590_v59  ;;  %v9019_v62 = vshrl.u32 %v1972_v11, 30  ;;  %v4623_v39 = vor.u32 8388608, %v4622_v53 }
 0x3d8   :  { %5565 = vst [vmem:[#allocation2 + $0x70] sm:$0xff] %v1910_v3  ;;  %v4630_v2 = vsub.s32 32, %v4629_v4  ;;  %v4632_v10 = vshll.u32 %v6289_v21, %v4629_v4  ;;  %v2018_v22 = vand.u32 2139095040, %v8951_v41  ;;  %v4635_v15 = vshll.u32 %v6290_v25, %v4629_v4 }
 0x3d9   :  { %v4594_v48 = vmul.f32 %v4593_v51, %v4591_v20  ;;  %v1974_v12 = vshll.u32 %v9019_v62, 30  ;;  %v4638_v34 = vshll.u32 %v6291_v27, %v4629_v4  ;;  %v4641_v45 = vshll.u32 %v6292_v29, %v4629_v4 }
 0x3da   :  { %v4633_v17 = vshrl.u32 %v6290_v25, %v4630_v2  ;;  %v4636_v33 = vshrl.u32 %v6291_v27, %v4630_v2  ;;  %v4639_v19 = vshrl.u32 %v6292_v29, %v4630_v2  ;;  %v4642_v8 = vshrl.u32 %v6293_v31, %v4630_v2 }
 0x3db   :  { %v4595_v28 = vxor.u32 2147483648, %v4594_v48  ;;  %v9030_v1 = vsub.s32 %v1971_v57, %v1974_v12  ;;  %v2015_v24 = vand.u32 2147483647, %v8951_v41  ;;  %v4628_v30 = vshrl.u32 %v4627_v60, 5 }
 0x3dc   :  { %v4634_v5 = vor.u32 %v4633_v17, %v4632_v10  ;;  %v9034_v50 = vshll.u32 %v4623_v39, 8  ;;  %v2019_v63 = vshrl.u32 %v2018_v22, 23  ;;  %v4637_v14 = vor.u32 %v4636_v33, %v4635_v15  ;;  %v9072_v33 = vpop.f32.mrb[19].mxu0 }
 0x3dd   :  { %v4596_v6 = vsel %vm4513_vm13, %v4595_v28, %v4594_v48  ;;  %v1977_v7 = vsub.s32 0, %v9030_v1  ;;  %v4640_v36 = vor.u32 %v4639_v19, %v4638_v34  ;;  %vm1913_vm9 = vcmp.lt.s32.totalorder %v8876_v58, 0 }
 0x3de   :  { %v4599_v16 = vsel %vm8996_vm4, %v8791_v35, %v4596_v6  ;;  %v4643_v49 = vor.u32 %v4642_v8, %v4641_v45  ;;  %v4644_v23 = vshll.u32 %v6293_v31, %v4629_v4  ;;  %v4645_v0 = vshrl.u32 %v6294_v38, %v4630_v2 }
 0x3df   :  { %6180 = vcosq.f32 %v4599_v16  ;;  %v1967_v57 = vadd.s32 %v8985_v9, %v8991_v46  ;;  %v5703_v47 = vmin.u32 %v1977_v7, %v9030_v1  ;;  %v4631_v53 = vshrl.u32 %v6289_v21, %v4630_v2 }
 0x3e0   :  { %6182 = vsinq.f32 %v4599_v16  ;;  %v1997_v60 = vsub.s32 4, %v9019_v62  ;;  %v4646_v56 = vor.u32 %v4645_v0, %v4644_v23  ;;  %v5706_v42 = vadd.s32 4294967169, %v2019_v63 }
 0x3e1   :  { %vm9052_vm11 = vcmp.le.f32.partialorder %v1911_v54, 0.7853982  ;;  %v1979_v11 = vclz %v5703_v47  ;;  %vm4647_vm12 = vcmp.lt.s32.totalorder %v4628_v30, 1  ;;  %vm4648_vm13 = vcmp.lt.s32.totalorder %v4628_v30, 2 }
 0x3e2   :  { %vm4650_vm14 = vcmp.lt.s32.totalorder %v4628_v30, 4  ;;  %vm4649_vm15 = vcmp.lt.s32.totalorder %v4628_v30, 3  ;;  %v4655_v46 = vsel %vm4647_vm12, %v4634_v5, %v4637_v14  ;;  %vm4610_vm1 = vcmp.eq.s32.totalorder %v9017_v55, 2 }
 0x3e3   :  { %v4652_v9 = vsel %vm4650_vm14, %v4640_v36, 2102212464  ;;  %v4656_v52 = vsel %vm4650_vm14, %v4643_v49, 920167782  ;;  %v5704_v4 = vadd.s32 4294967294, %v1979_v11  ;;  %v4651_v3 = vsel %vm4647_vm12, %v4631_v53, %v4634_v5 }
 0x3e4   :  { %v4657_v20 = vsel %vm4649_vm15, %v4640_v36, %v4656_v52  ;;  %v4659_v51 = vsel %vm4647_vm12, %v4637_v14, %v4640_v36  ;;  %vm4607_vm2 = vcmp.eq.s32.totalorder %v9017_v55, 0  ;;  %v4653_v54 = vsel %vm4649_vm15, %v4637_v14, %v4652_v9 }
 0x3e5   :  { %v4658_v39 = vsel %vm4648_vm13, %v4655_v46, %v4657_v20  ;;  %v4660_v2 = vsel %vm4650_vm14, %v4646_v56, 1326507024  ;;  %v2025_v10 = vadd.s32 1, %v5706_v42  ;;  %vm4606_vm0 = vcmp.lt.s32.totalorder %v9017_v55, 2 }
 0x3e6   :  { %vm5705_vm3 = vcmp.lt.s32.totalorder %v5704_v4, 0  ;;  %v4661_v22 = vsel %vm4649_vm15, %v4643_v49, %v4660_v2  ;;  %v9064_v48 = vmul.u32.u64.low %v9034_v50, %v4658_v39  ;;  %v9065_v12 = vmul.u32.u64.high %v9034_v50, %v4658_v39, %v9064_v48 }
 0x3e7   :  { %vm4603_vm4 = vweird.f32 %v8791_v35  ;;  %v1982_v15 = vsel %vm5705_vm3, 0, %v5704_v4  ;;  %v4662_v34 = vsel %vm4648_vm13, %v4659_v51, %v4661_v22  ;;  %v2022_v17 = vand.u32 8388607, %v2015_v24 }
 0x3e8   :  { %vm2026_vm5 = vcmp.gt.s32.totalorder %v2025_v10, 0  ;;  %v1983_v19 = vsub.s32 32, %v1982_v15  ;;  %v1987_v45 = vsub.s32 4294967266, %v1982_v15  ;;  %v1998_v28 = vsel %vm1913_vm9, %v1997_v60, %v9019_v62 }
 0x3e9   :  { %v2027_v8 = vsel %vm2026_vm5, %v2025_v10, 0  ;;  %v4654_v5 = vsel %vm4648_vm13, %v4651_v3, %v4653_v54  ;;  %v9079_v63 = vmul.u32.u64.low %v9034_v50, %v4662_v34  ;;  %v9080_v6 = vmul.u32.u64.high %v9034_v50, %v4662_v34, %v9079_v63  ;;  %v6181_v14 = vpop.eup %6180 }
 0x3ea   :  { %v2029_v7 = vand.u32 31, %v2027_v8  ;;  %v1984_v36 = vshll.u32 %v9030_v1, %v1982_v15  ;;  %v1985_v16 = vshrl.u32 %v1967_v57, %v1983_v19  ;;  %v1988_v49 = vadd.s32 127, %v1987_v45  ;;  %v6183_v0 = vpop.eup %6182 }
 0x3eb   :  { %v4673_v23 = vadd.s32 1, %v9065_v12  ;;  %v4611_v47 = vxor.u32 2147483648, %v6181_v14  ;;  %v2000_v62 = vsel %vm9052_vm11, 0, %v1998_v28  ;;  %v2023_v53 = vor.u32 8388608, %v2022_v17 }
 0x3ec   :  { %v2030_v30 = vsub.s32 32, %v2029_v7  ;;  %v4608_v60 = vxor.u32 2147483648, %v6183_v0  ;;  %v1986_v56 = vor.u32 %v1985_v16, %v1984_v36  ;;  %v1989_v42 = vshll.u32 %v1988_v49, 23 }
 0x3ed   :  { %v4670_v11 = vmul.u32 %v9034_v50, %v4654_v5  ;;  %v4612_v9 = vsel %vm4610_vm1, %v4611_v47, %v6183_v0  ;;  %vm4672_vm6 = vc.u32 %v9080_v6, %v9064_v48  ;;  %v9091_v1 = vshrl.u32 %v2027_v8, 5 }
 0x3ee   :  { %v2032_v57 = vshll.u32 %v6289_v21, %v2029_v7  ;;  %v4609_v46 = vsel %vm4607_vm2, %v6181_v14, %v4608_v60  ;;  %v1990_v52 = vor.u32 4788187, %v1989_v42  ;;  %v4674_v4 = vsel %vm4672_vm6, %v4673_v23, %v9065_v12 }
 0x3ef   :  { %v2035_v3 = vshll.u32 %v6290_v25, %v2029_v7  ;;  %v4613_v50 = vsel %vm4606_vm0, %v4609_v46, %v4612_v9  ;;  %v4675_v20 = vadd.s32 %v4674_v4, %v4670_v11  ;;  %v2033_v51 = vshrl.u32 %v6290_v25, %v2030_v30 }
 0x3f0   :  { %v2036_v54 = vshrl.u32 %v6291_v27, %v2030_v30  ;;  %v4614_v39 = vsel %vm4603_vm4, nan, %v4613_v50  ;;  %v1991_v2 = vand.u32 2147483647, %v1990_v52  ;;  %v1993_v10 = vcvt.s32.f32 %v1986_v56 }
 0x3f1   :  { %v2039_v22 = vshrl.u32 %v6292_v29, %v2030_v30  ;;  %5591 = vst [vmem:[#allocation2 + $0x140] sm:$0xff] %v4614_v39  ;;  %v4676_v15 = vadd.s32 536870912, %v4675_v20  ;;  %v2038_v12 = vshll.u32 %v6291_v27, %v2029_v7  ;;  %v2041_v34 = vshll.u32 %v6292_v29, %v2029_v7 }
 0x3f2   :  { %v2042_v55 = vshrl.u32 %v6293_v31, %v2030_v30  ;;  %v1994_v17 = vmul.f32 %v1993_v10, %v1991_v2  ;;  %v2034_v19 = vor.u32 %v2033_v51, %v2032_v57  ;;  %v2037_v45 = vor.u32 %v2036_v54, %v2035_v3  ;;  %v9157_v2 = vpop.f32.mrb[19].mxu1 }
 0x3f3   :  { %v2045_v28 = vshrl.u32 %v6294_v38, %v2030_v30  ;;  %v4677_v8 = vshrl.u32 %v4676_v15, 30  ;;  %v2004_v63 = vadd.s32 3, %v2000_v62  ;;  %v2040_v14 = vor.u32 %v2039_v22, %v2038_v12 }
 0x3f4   :  { %v2043_v35 = vor.u32 %v2042_v55, %v2041_v34  ;;  %v1995_v5 = vxor.u32 2147483648, %v1994_v17  ;;  %v2044_v36 = vshll.u32 %v6293_v31, %v2029_v7  ;;  %vm2047_vm7 = vcmp.lt.s32.totalorder %v9091_v1, 1 }
 0x3f5   :  { %v4678_v16 = vshll.u32 %v4677_v8, 30  ;;  %vm2050_vm8 = vcmp.lt.s32.totalorder %v9091_v1, 4  ;;  %v9112_v49 = vshll.u32 %v2023_v53, 8  ;;  %v2055_v47 = vsel %vm2047_vm7, %v2034_v19, %v2037_v45 }
 0x3f6   :  { %v1996_v23 = vsel %vm1913_vm9, %v1995_v5, %v1994_v17  ;;  %v2046_v0 = vor.u32 %v2045_v28, %v2044_v36  ;;  %v2056_v62 = vsel %vm2050_vm8, %v2043_v35, 920167782  ;;  %v2031_v56 = vshrl.u32 %v6289_v21, %v2030_v30 }
 0x3f7   :  { %v1999_v7 = vsel %vm9052_vm11, %v8876_v58, %v1996_v23  ;;  %v9123_v60 = vsub.s32 %v4675_v20, %v4678_v16  ;;  %vm2049_vm10 = vcmp.lt.s32.totalorder %v9091_v1, 3  ;;  %vm2048_vm9 = vcmp.lt.s32.totalorder %v9091_v1, 2 }
 0x3f8   :  { %6184 = vcosq.f32 %v1999_v7  ;;  %v2052_v53 = vsel %vm2050_vm8, %v2040_v14, 2102212464  ;;  %v2057_v42 = vsel %vm2049_vm10, %v2040_v14, %v2056_v62  ;;  %v2059_v30 = vsel %vm2047_vm7, %v2037_v45, %v2040_v14 }
 0x3f9   :  { %6186 = vsinq.f32 %v1999_v7  ;;  %v4681_v11 = vsub.s32 0, %v9123_v60  ;;  %v2058_v59 = vsel %vm2048_vm9, %v2055_v47, %v2057_v42  ;;  %v4701_v9 = vsub.s32 4, %v4677_v8 }
 0x3fa   :  { %v2060_v57 = vsel %vm2050_vm8, %v2046_v0, 1326507024  ;;  %v9140_v46 = vmul.u32.u64.low %v9112_v49, %v2058_v59  ;;  %v9141_v52 = vmul.u32.u64.high %v9112_v49, %v2058_v59, %v9140_v46  ;;  %v2005_v4 = vand.u32 3, %v2004_v63 }
 0x3fb   :  { %v5807_v3 = vmin.u32 %v4681_v11, %v9123_v60  ;;  %v2061_v50 = vsel %vm2049_vm10, %v2043_v35, %v2060_v57  ;;  %v2051_v20 = vsel %vm2047_vm7, %v2031_v56, %v2034_v19  ;;  %v2053_v51 = vsel %vm2049_vm10, %v2037_v45, %v2052_v53 }
 0x3fc   :  { %v2062_v54 = vsel %vm2048_vm9, %v2059_v30, %v2061_v50  ;;  %v9155_v39 = vadd.f32 %v8726_v61, %v6470_v43  ;;  %vm4617_vm11 = vcmp.lt.s32.totalorder %v8946_v26, 0  ;;  %vm2003_vm12 = vweird.f32 %v8876_v58 }
 0x3fd   :  { %v4683_v10 = vclz %v5807_v3  ;;  %v4702_v22 = vsel %vm4617_vm11, %v4701_v9, %v4677_v8  ;;  %v9163_v15 = vmul.u32.u64.low %v9112_v49, %v2062_v54  ;;  %v9164_v12 = vmul.u32.u64.high %v9112_v49, %v2062_v54, %v9163_v15 }
 0x3fe   :  { %vm9169_vm13 = vcmp.le.f32.partialorder %v4615_v40, 0.7853982  ;;  %v2054_v55 = vsel %vm2048_vm9, %v2051_v20, %v2053_v51  ;;  %v4722_v17 = vand.u32 2139095040, %v9155_v39  ;;  %vm2006_vm14 = vcmp.lt.s32.totalorder %v2005_v4, 2 }
 0x3ff   :  { %v5808_v61 = vadd.s32 4294967294, %v4683_v10  ;;  %vm2007_vm15 = vcmp.eq.s32.totalorder %v2005_v4, 0  ;;  %vm2010_vm1 = vcmp.eq.s32.totalorder %v2005_v4, 2  ;;  %v2073_v19 = vadd.s32 1, %v9141_v52 }
 0x400   :  { %v4671_v45 = vadd.s32 %v9064_v48, %v9080_v6  ;;  %v4704_v40 = vsel %vm9169_vm13, 0, %v4702_v22  ;;  %v4723_v28 = vshrl.u32 %v4722_v17, 23  ;;  %v2070_v1 = vmul.u32 %v9112_v49, %v2054_v55 }
 0x401   :  { %vm5809_vm2 = vcmp.lt.s32.totalorder %v5808_v61, 0  ;;  %vm2072_vm0 = vc.u32 %v9164_v12, %v9140_v46  ;;  %v9186_v5 = vadd.f32 %v8762_v13, %v6472_v44  ;;  %v4719_v6 = vand.u32 2147483647, %v9155_v39 }
 0x402   :  { %v6185_v8 = vpop.eup %6184  ;;  %v4686_v35 = vsel %vm5809_vm2, 0, %v5808_v61  ;;  %v2074_v0 = vsel %vm2072_vm0, %v2073_v19, %v9141_v52  ;;  %v5810_v47 = vadd.s32 4294967169, %v4723_v28  ;;  %v4708_v53 = vadd.s32 3, %v4704_v40 }
 0x403   :  { %v6187_v63 = vpop.eup %6186  ;;  %v2011_v14 = vxor.u32 2147483648, %v6185_v8  ;;  %v4687_v36 = vsub.s32 32, %v4686_v35  ;;  %v4691_v48 = vsub.s32 4294967266, %v4686_v35  ;;  %v4688_v23 = vshll.u32 %v9123_v60, %v4686_v35 }
 0x404   :  { %v2008_v16 = vxor.u32 2147483648, %v6187_v63  ;;  %v2075_v56 = vadd.s32 %v2074_v0, %v2070_v1  ;;  %v4729_v42 = vadd.s32 1, %v5810_v47  ;;  %v2122_v11 = vand.u32 2139095040, %v9186_v5 }
 0x405   :  { %v2012_v49 = vsel %vm2010_vm1, %v2011_v14, %v6187_v63  ;;  %v4689_v62 = vshrl.u32 %v4671_v45, %v4687_v36  ;;  %v4692_v7 = vadd.s32 127, %v4691_v48  ;;  %v4726_v52 = vand.u32 8388607, %v4719_v6 }
 0x406   :  { %v2009_v13 = vsel %vm2007_vm15, %v6185_v8, %v2008_v16  ;;  %v2076_v57 = vadd.s32 536870912, %v2075_v56  ;;  %vm4730_vm3 = vcmp.gt.s32.totalorder %v4729_v42, 0  ;;  %v9199_v51 = vand.u32 3, %v4708_v53 }
 0x407   :  { %v2013_v59 = vsel %vm2006_vm14, %v2009_v13, %v2012_v49  ;;  %v4690_v30 = vor.u32 %v4689_v62, %v4688_v23  ;;  %v4693_v9 = vshll.u32 %v4692_v7, 23  ;;  %v4731_v20 = vsel %vm4730_vm3, %v4729_v42, 0 }
 0x408   :  { %v2014_v60 = vsel %vm2003_vm12, nan, %v2013_v59  ;;  %v2077_v50 = vshrl.u32 %v2076_v57, 30  ;;  %v4733_v54 = vand.u32 31, %v4731_v20  ;;  %v9203_v4 = vadd.f32 %v8829_v18, %v6472_v44 }
 0x409   :  { %5566 = vst [vmem:[#allocation2 + $0x78] sm:$0xff] %v2014_v60  ;;  %v4694_v3 = vor.u32 4788187, %v4693_v9  ;;  %v4697_v22 = vcvt.s32.f32 %v4690_v30  ;;  %vm2017_vm4 = vcmp.lt.s32.totalorder %v8951_v41, 0  ;;  %v2123_v15 = vshrl.u32 %v2122_v11, 23 }
 0x40a   :  { %v2078_v58 = vshll.u32 %v2077_v50, 30  ;;  %v2071_v61 = vadd.s32 %v9140_v46, %v9164_v12  ;;  %v4727_v55 = vor.u32 8388608, %v4726_v52  ;;  %v4734_v17 = vsub.s32 32, %v4733_v54 }
 0x40b   :  { %v4695_v10 = vand.u32 2147483647, %v4694_v3  ;;  %v2119_v19 = vand.u32 2147483647, %v9186_v5  ;;  %v4736_v28 = vshll.u32 %v6289_v21, %v4733_v54  ;;  %v4739_v18 = vshll.u32 %v6290_v25, %v4733_v54 }
 0x40c   :  { %v9209_v40 = vsub.s32 %v2075_v56, %v2078_v58  ;;  %v4737_v8 = vshrl.u32 %v6290_v25, %v4734_v17  ;;  %v4740_v35 = vshrl.u32 %v6291_v27, %v4734_v17  ;;  %v4742_v1 = vshll.u32 %v6291_v27, %v4733_v54 }
 0x40d   :  { %v4698_v45 = vmul.f32 %v4697_v22, %v4695_v10  ;;  %v4745_v63 = vshll.u32 %v6292_v29, %v4733_v54  ;;  %v4743_v14 = vshrl.u32 %v6292_v29, %v4734_v17  ;;  %v5710_v36 = vadd.s32 4294967169, %v2123_v15 }
 0x40e   :  { %v2081_v12 = vsub.s32 0, %v9209_v40  ;;  %v2101_v48 = vsub.s32 4, %v2077_v50  ;;  %v4732_v16 = vshrl.u32 %v4731_v20, 5  ;;  %v4746_v23 = vshrl.u32 %v6293_v31, %v4734_v17 }
 0x40f   :  { %v4699_v46 = vxor.u32 2147483648, %v4698_v45  ;;  %v4748_v0 = vshll.u32 %v6293_v31, %v4733_v54  ;;  %v4738_v62 = vor.u32 %v4737_v8, %v4736_v28  ;;  %v4741_v7 = vor.u32 %v4740_v35, %v4739_v18 }
 0x410   :  { %v5707_v49 = vmin.u32 %v2081_v12, %v9209_v40  ;;  %v4744_v13 = vor.u32 %v4743_v14, %v4742_v1  ;;  %v4747_v53 = vor.u32 %v4746_v23, %v4745_v63  ;;  %v4749_v42 = vshrl.u32 %v6294_v38, %v4734_v17 }
 0x411   :  { %v4700_v47 = vsel %vm4617_vm11, %v4699_v46, %v4698_v45  ;;  %v9228_v59 = vshll.u32 %v4727_v55, 8  ;;  %v2129_v30 = vadd.s32 1, %v5710_v36  ;;  %v2102_v9 = vsel %vm2017_vm4, %v2101_v48, %v2077_v50  ;;  %v9254_v46 = vpop.f32.mrb[20].mxu0 }
 0x412   :  { %v4703_v56 = vsel %vm9169_vm13, %v8946_v26, %v4700_v47  ;;  %v2083_v11 = vclz %v5707_v49  ;;  %v4735_v57 = vshrl.u32 %v6289_v21, %v4734_v17  ;;  %v4750_v60 = vor.u32 %v4749_v42, %v4748_v0 }
 0x413   :  { %6188 = vcosq.f32 %v4703_v56  ;;  %vm9235_vm5 = vcmp.le.f32.partialorder %v2015_v24, 0.7853982  ;;  %vm4751_vm6 = vcmp.lt.s32.totalorder %v4732_v16, 1  ;;  %vm4753_vm7 = vcmp.lt.s32.totalorder %v4732_v16, 3 }
 0x414   :  { %6190 = vsinq.f32 %v4703_v56  ;;  %v5708_v52 = vadd.s32 4294967294, %v2083_v11  ;;  %vm4754_vm8 = vcmp.lt.s32.totalorder %v4732_v16, 4  ;;  %v4759_v20 = vsel %vm4751_vm6, %v4738_v62, %v4741_v7 }
 0x415   :  { %v4756_v3 = vsel %vm4754_vm8, %v4744_v13, 2102212464  ;;  %v4760_v54 = vsel %vm4754_vm8, %v4747_v53, 920167782  ;;  %v4763_v10 = vsel %vm4751_vm6, %v4741_v7, %v4744_v13  ;;  %vm4752_vm9 = vcmp.lt.s32.totalorder %v4732_v16, 2 }
 0x416   :  { %vm5709_vm10 = vcmp.lt.s32.totalorder %v5708_v52, 0  ;;  %v4761_v50 = vsel %vm4753_vm7, %v4744_v13, %v4760_v54  ;;  %v4764_v22 = vsel %vm4754_vm8, %v4750_v60, 1326507024  ;;  %v4755_v15 = vsel %vm4751_vm6, %v4735_v57, %v4738_v62 }
 0x417   :  { %v2086_v58 = vsel %vm5709_vm10, 0, %v5708_v52  ;;  %v4762_v24 = vsel %vm4752_vm9, %v4759_v20, %v4761_v50  ;;  %v4765_v55 = vsel %vm4753_vm7, %v4747_v53, %v4764_v22  ;;  %v4757_v28 = vsel %vm4753_vm7, %v4741_v7, %v4756_v3 }
 0x418   :  { %v2087_v17 = vsub.s32 32, %v2086_v58  ;;  %v2091_v45 = vsub.s32 4294967266, %v2086_v58  ;;  %v4766_v18 = vsel %vm4752_vm9, %v4763_v10, %v4765_v55  ;;  %vm4707_vm11 = vweird.f32 %v8946_v26 }
 0x419   :  { %v9246_v8 = vmul.u32.u64.low %v9228_v59, %v4766_v18  ;;  %v9247_v35 = vmul.u32.u64.high %v9228_v59, %v4766_v18, %v9246_v8  ;;  %v9250_v1 = vmul.u32.u64.low %v9228_v59, %v4762_v24  ;;  %v9251_v63 = vmul.u32.u64.high %v9228_v59, %v4762_v24, %v9250_v1 }
 0x41a   :  { %v2088_v12 = vshll.u32 %v9209_v40, %v2086_v58  ;;  %v2089_v14 = vshrl.u32 %v2071_v61, %v2087_v17  ;;  %v2092_v36 = vadd.s32 127, %v2091_v45  ;;  %vm2130_vm12 = vcmp.gt.s32.totalorder %v2129_v30, 0 }
 0x41b   :  { %vm4710_vm13 = vcmp.lt.s32.totalorder %v9199_v51, 2  ;;  %v4758_v48 = vsel %vm4752_vm9, %v4755_v15, %v4757_v28  ;;  %v2126_v23 = vand.u32 8388607, %v2119_v19  ;;  %v2131_v0 = vsel %vm2130_vm12, %v2129_v30, 0 }
 0x41c   :  { %vm4714_vm14 = vcmp.eq.s32.totalorder %v9199_v51, 2  ;;  %v2090_v49 = vor.u32 %v2089_v14, %v2088_v12  ;;  %v2093_v62 = vshll.u32 %v2092_v36, 23  ;;  %v2133_v7 = vand.u32 31, %v2131_v0 }
 0x41d   :  { %v6189_v47 = vpop.eup %6188  ;;  %v2104_v61 = vsel %vm9235_vm5, 0, %v2102_v9  ;;  %vm4776_vm15 = vc.u32 %v9247_v35, %v9250_v1  ;;  %v4777_v40 = vadd.s32 1, %v9251_v63  ;;  %v4774_v42 = vmul.u32 %v9228_v59, %v4758_v48 }
 0x41e   :  { %v6191_v56 = vpop.eup %6190  ;;  %v4715_v13 = vxor.u32 2147483648, %v6189_v47  ;;  %v2094_v53 = vor.u32 4788187, %v2093_v62  ;;  %v2134_v11 = vsub.s32 32, %v2133_v7  ;;  %vm4711_vm1 = vcmp.eq.s32.totalorder %v9199_v51, 0 }
 0x41f   :  { %v4712_v16 = vxor.u32 2147483648, %v6191_v56  ;;  %v4778_v57 = vsel %vm4776_vm15, %v4777_v40, %v9251_v63  ;;  %v2127_v60 = vor.u32 8388608, %v2126_v23  ;;  %v2097_v20 = vcvt.s32.f32 %v2090_v49 }
 0x420   :  { %v4716_v30 = vsel %vm4714_vm14, %v4715_v13, %v6191_v56  ;;  %v2095_v3 = vand.u32 2147483647, %v2094_v53  ;;  %v4779_v9 = vadd.s32 %v4778_v57, %v4774_v42  ;;  %v2108_v10 = vadd.s32 3, %v2104_v61 }
 0x421   :  { %v4713_v52 = vsel %vm4711_vm1, %v6189_v47, %v4712_v16  ;;  %v2137_v50 = vshrl.u32 %v6290_v25, %v2134_v11  ;;  %v2140_v22 = vshrl.u32 %v6291_v27, %v2134_v11  ;;  %v2132_v24 = vshrl.u32 %v2131_v0, 5 }
 0x422   :  { %v4717_v54 = vsel %vm4710_vm13, %v4713_v52, %v4716_v30  ;;  %v2098_v58 = vmul.f32 %v2097_v20, %v2095_v3  ;;  %v4780_v15 = vadd.s32 536870912, %v4779_v9  ;;  %v2136_v55 = vshll.u32 %v6289_v21, %v2133_v7 }
 0x423   :  { %v4718_v59 = vsel %vm4707_vm11, nan, %v4717_v54  ;;  %v2139_v17 = vshll.u32 %v6290_v25, %v2133_v7  ;;  %v2143_v45 = vshrl.u32 %v6292_v29, %v2134_v11  ;;  %v2146_v51 = vshrl.u32 %v6293_v31, %v2134_v11 }
 0x424   :  { %5592 = vst [vmem:[#allocation2 + $0x148] sm:$0xff] %v4718_v59  ;;  %v2099_v28 = vxor.u32 2147483648, %v2098_v58  ;;  %v4781_v18 = vshrl.u32 %v4780_v15, 30  ;;  %v2142_v8 = vshll.u32 %v6291_v27, %v2133_v7  ;;  %v2145_v63 = vshll.u32 %v6292_v29, %v2133_v7 }
 0x425   :  { %v2138_v26 = vor.u32 %v2137_v50, %v2136_v55  ;;  %v2141_v12 = vor.u32 %v2140_v22, %v2139_v17  ;;  %v2148_v14 = vshll.u32 %v6293_v31, %v2133_v7  ;;  %v2149_v36 = vshrl.u32 %v6294_v38, %v2134_v11 }
 0x426   :  { %v2100_v48 = vsel %vm2017_vm4, %v2099_v28, %v2098_v58  ;;  %vm4721_vm2 = vcmp.lt.s32.totalorder %v9155_v39, 0  ;;  %v4782_v23 = vshll.u32 %v4781_v18, 30  ;;  %v2147_v0 = vor.u32 %v2146_v51, %v2145_v63  ;;  %v9323_v28 = vpop.f32.mrb[20].mxu1 }
 0x427   :  { %v2103_v47 = vsel %vm9235_vm5, %v8951_v41, %v2100_v48  ;;  %v9290_v49 = vand.u32 3, %v2108_v10  ;;  %v2144_v62 = vor.u32 %v2143_v45, %v2142_v8  ;;  %v2150_v56 = vor.u32 %v2149_v36, %v2148_v14 }
 0x428   :  { %6192 = vcosq.f32 %v2103_v47  ;;  %v9292_v13 = vsub.s32 %v4779_v9, %v4782_v23  ;;  %vm2151_vm0 = vcmp.lt.s32.totalorder %v2132_v24, 1  ;;  %v2167_v7 = vshll.u32 %v2127_v60, 8 }
 0x429   :  { %6194 = vsinq.f32 %v2103_v47  ;;  %vm2152_vm3 = vcmp.lt.s32.totalorder %v2132_v24, 2  ;;  %vm2154_vm4 = vcmp.lt.s32.totalorder %v2132_v24, 4  ;;  %v2159_v61 = vsel %vm2151_vm0, %v2138_v26, %v2141_v12 }
 0x42a   :  { %v4785_v40 = vsub.s32 0, %v9292_v13  ;;  %v4805_v16 = vsub.s32 4, %v4781_v18  ;;  %vm2153_vm6 = vcmp.lt.s32.totalorder %v2132_v24, 3  ;;  %v2160_v34 = vsel %vm2154_vm4, %v2147_v0, 920167782 }
 0x42b   :  { %v2156_v53 = vsel %vm2154_vm4, %v2144_v62, 2102212464  ;;  %v2161_v42 = vsel %vm2153_vm6, %v2144_v62, %v2160_v34  ;;  %v2163_v30 = vsel %vm2151_vm0, %v2141_v12, %v2144_v62  ;;  %v2164_v57 = vsel %vm2154_vm4, %v2150_v56, 1326507024 }
 0x42c   :  { %v5811_v52 = vmin.u32 %v4785_v40, %v9292_v13  ;;  %v2135_v60 = vshrl.u32 %v6289_v21, %v2134_v11  ;;  %v2162_v3 = vsel %vm2152_vm3, %v2159_v61, %v2161_v42  ;;  %v2165_v20 = vsel %vm2153_vm6, %v2147_v0, %v2164_v57 }
 0x42d   :  { %v2166_v9 = vsel %vm2152_vm3, %v2163_v30, %v2165_v20  ;;  %v9303_v54 = vmul.u32.u64.low %v2167_v7, %v2162_v3  ;;  %v9304_v10 = vmul.u32.u64.high %v2167_v7, %v2162_v3, %v9303_v54  ;;  %v4826_v50 = vand.u32 2139095040, %v9203_v4 }
 0x42e   :  { %vm9309_vm5 = vcmp.le.f32.partialorder %v4719_v6, 0.7853982  ;;  %v4787_v59 = vclz %v5811_v52  ;;  %v2155_v11 = vsel %vm2151_vm0, %v2135_v60, %v2138_v26  ;;  %v2157_v58 = vsel %vm2153_vm6, %v2141_v12, %v2156_v53 }
 0x42f   :  { %v4806_v15 = vsel %vm4721_vm2, %v4805_v16, %v4781_v18  ;;  %v9317_v55 = vmul.u32.u64.low %v2167_v7, %v2166_v9  ;;  %v9318_v17 = vmul.u32.u64.high %v2167_v7, %v2166_v9, %v9317_v55  ;;  %v4827_v45 = vshrl.u32 %v4826_v50, 23 }
 0x430   :  { %vm2107_vm7 = vweird.f32 %v8951_v41  ;;  %vm2110_vm8 = vcmp.lt.s32.totalorder %v9290_v49, 2  ;;  %v5812_v6 = vadd.s32 4294967294, %v4787_v59  ;;  %v4823_v51 = vand.u32 2147483647, %v9203_v4 }
 0x431   :  { %vm2111_vm10 = vcmp.eq.s32.totalorder %v9290_v49, 0  ;;  %v2158_v8 = vsel %vm2152_vm3, %v2155_v11, %v2157_v58  ;;  %v2177_v63 = vadd.s32 1, %v9304_v10  ;;  %v5814_v18 = vadd.s32 4294967169, %v4827_v45 }
 0x432   :  { %v6193_v26 = vpop.eup %6192  ;;  %vm2114_vm9 = vcmp.eq.s32.totalorder %v9290_v49, 2  ;;  %v4775_v12 = vadd.s32 %v9250_v1, %v9247_v35  ;;  %vm5813_vm11 = vcmp.lt.s32.totalorder %v5812_v6, 0  ;;  %v4808_v14 = vsel %vm9309_vm5, 0, %v4806_v15 }
 0x433   :  { %v6195_v36 = vpop.eup %6194  ;;  %v2115_v48 = vxor.u32 2147483648, %v6193_v26  ;;  %v4790_v23 = vsel %vm5813_vm11, 0, %v5812_v6  ;;  %vm2176_vm12 = vc.u32 %v9318_v17, %v9303_v54  ;;  %v9336_v24 = vadd.f32 %v8933_v32, %v6470_v43 }
 0x434   :  { %v2112_v0 = vxor.u32 2147483648, %v6195_v36  ;;  %v4791_v47 = vsub.s32 32, %v4790_v23  ;;  %v4795_v62 = vsub.s32 4294967266, %v4790_v23  ;;  %v2174_v56 = vmul.u32 %v2167_v7, %v2158_v8 }
 0x435   :  { %v2116_v61 = vsel %vm2114_vm9, %v2115_v48, %v6195_v36  ;;  %v4792_v35 = vshll.u32 %v9292_v13, %v4790_v23  ;;  %v2178_v1 = vsel %vm2176_vm12, %v2177_v63, %v9304_v10  ;;  %v4833_v40 = vadd.s32 1, %v5814_v18 }
 0x436   :  { %v2113_v16 = vsel %vm2111_vm10, %v6193_v26, %v2112_v0  ;;  %v4793_v34 = vshrl.u32 %v4775_v12, %v4791_v47  ;;  %v4796_v53 = vadd.s32 127, %v4795_v62  ;;  %v2179_v42 = vadd.s32 %v2178_v1, %v2174_v56 }
 0x437   :  { %v2117_v32 = vsel %vm2110_vm8, %v2113_v16, %v2116_v61  ;;  %v4812_v30 = vadd.s32 3, %v4808_v14  ;;  %vm4834_vm13 = vcmp.gt.s32.totalorder %v4833_v40, 0  ;;  %v2226_v57 = vand.u32 2139095040, %v9336_v24 }
 0x438   :  { %v2118_v7 = vsel %vm2107_vm7, nan, %v2117_v32  ;;  %v4794_v13 = vor.u32 %v4793_v34, %v4792_v35  ;;  %v4797_v52 = vshll.u32 %v4796_v53, 23  ;;  %v2180_v60 = vadd.s32 536870912, %v2179_v42 }
 0x439   :  { %5567 = vst [vmem:[#allocation2 + $0x80] sm:$0xff] %v2118_v7  ;;  %v4830_v3 = vand.u32 8388607, %v4823_v51  ;;  %v4835_v20 = vsel %vm4834_vm13, %v4833_v40, 0  ;;  %v9349_v50 = vand.u32 3, %v4812_v30  ;;  %v2227_v15 = vshrl.u32 %v2226_v57, 23 }
 0x43a   :  { %v4798_v9 = vor.u32 4788187, %v4797_v52  ;;  %v2181_v10 = vshrl.u32 %v2180_v60, 30  ;;  %v4837_v49 = vand.u32 31, %v4835_v20  ;;  %v4801_v11 = vcvt.s32.f32 %v4794_v13 }
 0x43b   :  { %v9352_v41 = vadd.s32 %v9303_v54, %v9318_v17  ;;  %v4831_v55 = vor.u32 8388608, %v4830_v3  ;;  %v2223_v6 = vand.u32 2147483647, %v9336_v24  ;;  %vm2121_vm14 = vcmp.lt.s32.totalorder %v9186_v5, 0 }
 0x43c   :  { %v4799_v59 = vand.u32 2147483647, %v4798_v9  ;;  %v2182_v58 = vshll.u32 %v2181_v10, 30  ;;  %v4838_v45 = vsub.s32 32, %v4837_v49  ;;  %v4840_v18 = vshll.u32 %v6289_v21, %v4837_v49 }
 0x43d   :  { %v4843_v26 = vshll.u32 %v6290_v25, %v4837_v49  ;;  %v4846_v36 = vshll.u32 %v6291_v27, %v4837_v49  ;;  %v4849_v54 = vshll.u32 %v6292_v29, %v4837_v49  ;;  %v5714_v0 = vadd.s32 4294967169, %v2227_v15 }
 0x43e   :  { %v4802_v8 = vmul.f32 %v4801_v11, %v4799_v59  ;;  %v9355_v63 = vsub.s32 %v2179_v42, %v2182_v58  ;;  %v4841_v12 = vshrl.u32 %v6290_v25, %v4838_v45  ;;  %v4844_v14 = vshrl.u32 %v6291_v27, %v4838_v45 }
 0x43f   :  { %v4847_v23 = vshrl.u32 %v6292_v29, %v4838_v45  ;;  %v4836_v47 = vshrl.u32 %v4835_v20, 5  ;;  %v4850_v62 = vshrl.u32 %v6293_v31, %v4838_v45  ;;  %v4852_v56 = vshll.u32 %v6293_v31, %v4837_v49 }
 0x440   :  { %v4803_v17 = vxor.u32 2147483648, %v4802_v8  ;;  %v2185_v48 = vsub.s32 0, %v9355_v63  ;;  %v9368_v61 = vshll.u32 %v4831_v55, 8  ;;  %v4842_v40 = vor.u32 %v4841_v12, %v4840_v18 }
 0x441   :  { %v4845_v16 = vor.u32 %v4844_v14, %v4843_v26  ;;  %v4848_v53 = vor.u32 %v4847_v23, %v4846_v36  ;;  %v4851_v42 = vor.u32 %v4850_v62, %v4849_v54  ;;  %v4853_v32 = vshrl.u32 %v6294_v38, %v4838_v45 }
 0x442   :  { %v4804_v35 = vsel %vm4721_vm2, %v4803_v17, %v4802_v8  ;;  %v5711_v1 = vmin.u32 %v2185_v48, %v9355_v63  ;;  %v2205_v57 = vsub.s32 4, %v2181_v10  ;;  %v2233_v7 = vadd.s32 1, %v5714_v0 }
 0x443   :  { %v4807_v34 = vsel %vm9309_vm5, %v9155_v39, %v4804_v35  ;;  %v4839_v13 = vshrl.u32 %v6289_v21, %v4838_v45  ;;  %v4854_v52 = vor.u32 %v4853_v32, %v4852_v56  ;;  %vm4855_vm15 = vcmp.lt.s32.totalorder %v4836_v47, 1 }
 0x444   :  { %6196 = vcosq.f32 %v4807_v34  ;;  %v2187_v30 = vclz %v5711_v1  ;;  %vm9380_vm1 = vcmp.le.f32.partialorder %v2119_v19, 0.7853982  ;;  %vm4857_vm2 = vcmp.lt.s32.totalorder %v4836_v47, 3  ;;  %v9388_v19 = vpop.f32.mrb[21].mxu0 }
 0x445   :  { %6198 = vsinq.f32 %v4807_v34  ;;  %vm4858_vm0 = vcmp.lt.s32.totalorder %v4836_v47, 4  ;;  %v4863_v3 = vsel %vm4855_vm15, %v4842_v40, %v4845_v16  ;;  %v4867_v49 = vsel %vm4855_vm15, %v4845_v16, %v4848_v53 }
 0x446   :  { %v5712_v22 = vadd.s32 4294967294, %v2187_v30  ;;  %v4860_v20 = vsel %vm4858_vm0, %v4848_v53, 2102212464  ;;  %v4864_v9 = vsel %vm4858_vm0, %v4851_v42, 920167782  ;;  %vm4856_vm4 = vcmp.lt.s32.totalorder %v4836_v47, 2 }
 0x447   :  { %v4868_v59 = vsel %vm4858_vm0, %v4854_v52, 1326507024  ;;  %v4865_v11 = vsel %vm4857_vm2, %v4848_v53, %v4864_v9  ;;  %v2206_v55 = vsel %vm2121_vm14, %v2205_v57, %v2181_v10  ;;  %vm4814_vm6 = vcmp.lt.s32.totalorder %v9349_v50, 2 }
 0x448   :  { %vm5713_vm3 = vcmp.lt.s32.totalorder %v5712_v22, 0  ;;  %v4869_v58 = vsel %vm4857_vm2, %v4851_v42, %v4868_v59  ;;  %v4866_v45 = vsel %vm4856_vm4, %v4863_v3, %v4865_v11  ;;  %v4859_v12 = vsel %vm4855_vm15, %v4839_v13, %v4842_v40 }
 0x449   :  { %v2190_v15 = vsel %vm5713_vm3, 0, %v5712_v22  ;;  %v4870_v8 = vsel %vm4856_vm4, %v4867_v49, %v4869_v58  ;;  %v4861_v14 = vsel %vm4857_vm2, %v4845_v16, %v4860_v20  ;;  %vm4811_vm5 = vweird.f32 %v9155_v39 }
 0x44a   :  { %v2191_v18 = vsub.s32 32, %v2190_v15  ;;  %v2195_v26 = vsub.s32 4294967266, %v2190_v15  ;;  %v9399_v36 = vmul.u32.u64.low %v9368_v61, %v4870_v8  ;;  %v9400_v54 = vmul.u32.u64.high %v9368_v61, %v4870_v8, %v9399_v36 }
 0x44b   :  { %v9403_v10 = vmul.u32.u64.low %v9368_v61, %v4866_v45  ;;  %v9404_v17 = vmul.u32.u64.high %v9368_v61, %v4866_v45, %v9403_v10  ;;  %v2192_v48 = vshll.u32 %v9355_v63, %v2190_v15  ;;  %vm2234_vm7 = vcmp.gt.s32.totalorder %v2233_v7, 0 }
 0x44c   :  { %v2193_v23 = vshrl.u32 %v9352_v41, %v2191_v18  ;;  %v2196_v0 = vadd.s32 127, %v2195_v26  ;;  %vm4815_vm8 = vcmp.eq.s32.totalorder %v9349_v50, 0  ;;  %v4862_v62 = vsel %vm4856_vm4, %v4859_v12, %v4861_v14 }
 0x44d   :  { %v2230_v56 = vand.u32 8388607, %v2223_v6  ;;  %v2235_v35 = vsel %vm2234_vm7, %v2233_v7, 0  ;;  %vm4818_vm10 = vcmp.eq.s32.totalorder %v9349_v50, 2  ;;  %v2208_v41 = vsel %vm9380_vm1, 0, %v2206_v55 }
 0x44e   :  { %v6197_v1 = vpop.eup %6196  ;;  %v2194_v40 = vor.u32 %v2193_v23, %v2192_v48  ;;  %v2197_v16 = vshll.u32 %v2196_v0, 23  ;;  %v2237_v34 = vand.u32 31, %v2235_v35  ;;  %vm4880_vm9 = vc.u32 %v9400_v54, %v9403_v10 }
 0x44f   :  { %v6199_v53 = vpop.eup %6198  ;;  %v4819_v63 = vxor.u32 2147483648, %v6197_v1  ;;  %v4881_v47 = vadd.s32 1, %v9404_v17  ;;  %v4878_v30 = vmul.u32 %v9368_v61, %v4862_v62  ;;  %v2231_v52 = vor.u32 8388608, %v2230_v56 }
 0x450   :  { %v4816_v42 = vxor.u32 2147483648, %v6199_v53  ;;  %v2198_v32 = vor.u32 4788187, %v2197_v16  ;;  %v2238_v57 = vsub.s32 32, %v2237_v34  ;;  %v9423_v22 = vadd.f32 %v8979_v37, %v6470_v43 }
 0x451   :  { %v4820_v7 = vsel %vm4818_vm10, %v4819_v63, %v6199_v53  ;;  %v4882_v13 = vsel %vm4880_vm9, %v4881_v47, %v9404_v17  ;;  %v2201_v9 = vcvt.s32.f32 %v2194_v40  ;;  %v2212_v11 = vadd.s32 3, %v2208_v41 }
 0x452   :  { %v4817_v3 = vsel %vm4815_vm8, %v6197_v1, %v4816_v42  ;;  %v2199_v20 = vand.u32 2147483647, %v2198_v32  ;;  %v4883_v49 = vadd.s32 %v4882_v13, %v4878_v30  ;;  %v2241_v61 = vshrl.u32 %v6290_v25, %v2238_v57 }
 0x453   :  { %v4821_v59 = vsel %vm4814_vm6, %v4817_v3, %v4820_v7  ;;  %v2244_v58 = vshrl.u32 %v6291_v27, %v2238_v57  ;;  %v2236_v45 = vshrl.u32 %v2235_v35, 5  ;;  %v2240_v8 = vshll.u32 %v6289_v21, %v2237_v34 }
 0x454   :  { %v4822_v15 = vsel %vm4811_vm5, nan, %v4821_v59  ;;  %v2202_v55 = vmul.f32 %v2201_v9, %v2199_v20  ;;  %v4884_v37 = vadd.s32 536870912, %v4883_v49  ;;  %v2243_v18 = vshll.u32 %v6290_v25, %v2237_v34 }
 0x455   :  { %5593 = vst [vmem:[#allocation2 + $0x150] sm:$0xff] %v4822_v15  ;;  %v2247_v26 = vshrl.u32 %v6292_v29, %v2238_v57  ;;  %v2250_v50 = vshrl.u32 %v6293_v31, %v2238_v57  ;;  %v2246_v36 = vshll.u32 %v6291_v27, %v2237_v34  ;;  %v2249_v39 = vshll.u32 %v6292_v29, %v2237_v34 }
 0x456   :  { %v2203_v12 = vxor.u32 2147483648, %v2202_v55  ;;  %v9437_v14 = vshrl.u32 %v4884_v37, 30  ;;  %v2242_v17 = vor.u32 %v2241_v61, %v2240_v8  ;;  %v2245_v48 = vor.u32 %v2244_v58, %v2243_v18  ;;  %v9467_v58 = vpop.f32.mrb[21].mxu1 }
 0x457   :  { %v2252_v23 = vshll.u32 %v6293_v31, %v2237_v34  ;;  %v2253_v0 = vshrl.u32 %v6294_v38, %v2238_v57  ;;  %v2251_v35 = vor.u32 %v2250_v50, %v2249_v39  ;;  %v9449_v40 = vand.u32 3, %v2212_v11 }
 0x458   :  { %v2204_v62 = vsel %vm2121_vm14, %v2203_v12, %v2202_v55  ;;  %v4886_v56 = vshll.u32 %v9437_v14, 30  ;;  %v2248_v16 = vor.u32 %v2247_v26, %v2246_v36  ;;  %vm2255_vm11 = vcmp.lt.s32.totalorder %v2236_v45, 1 }
 0x459   :  { %v2207_v1 = vsel %vm9380_vm1, %v9186_v5, %v2204_v62  ;;  %v2254_v53 = vor.u32 %v2253_v0, %v2252_v23  ;;  %v2271_v34 = vshll.u32 %v2231_v52, 8  ;;  %vm2258_vm12 = vcmp.lt.s32.totalorder %v2236_v45, 4 }
 0x45a   :  { %6200 = vcosq.f32 %v2207_v1  ;;  %v9451_v63 = vsub.s32 %v4883_v49, %v4886_v56  ;;  %v2263_v41 = vsel %vm2255_vm11, %v2242_v17, %v2245_v48  ;;  %v4930_v47 = vand.u32 2139095040, %v9423_v22 }
 0x45b   :  { %6202 = vsinq.f32 %v2207_v1  ;;  %vm2256_vm13 = vcmp.lt.s32.totalorder %v2236_v45, 2  ;;  %vm2257_vm14 = vcmp.lt.s32.totalorder %v2236_v45, 3  ;;  %v2264_v60 = vsel %vm2258_vm12, %v2251_v35, 920167782 }
 0x45c   :  { %v4889_v42 = vsub.s32 0, %v9451_v63  ;;  %v2260_v32 = vsel %vm2258_vm12, %v2248_v16, 2102212464  ;;  %v2265_v30 = vsel %vm2257_vm14, %v2248_v16, %v2264_v60  ;;  %v2267_v7 = vsel %vm2255_vm11, %v2245_v48, %v2248_v16 }
 0x45d   :  { %v2268_v13 = vsel %vm2258_vm12, %v2254_v53, 1326507024  ;;  %v2239_v52 = vshrl.u32 %v6289_v21, %v2238_v57  ;;  %v2266_v20 = vsel %vm2256_vm13, %v2263_v41, %v2265_v30  ;;  %v4931_v61 = vshrl.u32 %v4930_v47, 23 }
 0x45e   :  { %v5815_v3 = vmin.u32 %v4889_v42, %v9451_v63  ;;  %v2269_v9 = vsel %vm2257_vm14, %v2251_v35, %v2268_v13  ;;  %v9463_v59 = vmul.u32.u64.low %v2271_v34, %v2266_v20  ;;  %v9464_v11 = vmul.u32.u64.high %v2271_v34, %v2266_v20, %v9463_v59 }
 0x45f   :  { %v2270_v49 = vsel %vm2256_vm13, %v2267_v7, %v2269_v9  ;;  %vm9471_vm15 = vcmp.le.f32.partialorder %v4823_v51, 0.7853982  ;;  %v2259_v55 = vsel %vm2255_vm11, %v2239_v52, %v2242_v17  ;;  %v2261_v37 = vsel %vm2257_vm14, %v2245_v48, %v2260_v32 }
 0x460   :  { %v4891_v57 = vclz %v5815_v3  ;;  %vm2211_vm1 = vweird.f32 %v9186_v5  ;;  %v4909_v8 = vsub.s32 4, %v9437_v14  ;;  %v5818_v50 = vadd.s32 4294967169, %v4931_v61 }
 0x461   :  { %v9479_v18 = vmul.u32.u64.low %v2271_v34, %v2270_v49  ;;  %v9480_v26 = vmul.u32.u64.high %v2271_v34, %v2270_v49, %v9479_v18  ;;  %vm4825_vm2 = vcmp.lt.s32.totalorder %v9203_v4, 0  ;;  %v4927_v51 = vand.u32 2147483647, %v9423_v22 }
 0x462   :  { %v5816_v12 = vadd.s32 4294967294, %v4891_v57  ;;  %v9486_v36 = vadd.f32 %v9072_v33, %v6472_v44  ;;  %vm2214_vm0 = vcmp.lt.s32.totalorder %v9449_v40, 2  ;;  %v2262_v39 = vsel %vm2256_vm13, %v2259_v55, %v2261_v37 }
 0x463   :  { %v2281_v17 = vadd.s32 1, %v9464_v11  ;;  %v4937_v48 = vadd.s32 1, %v5818_v50  ;;  %vm2215_vm3 = vcmp.eq.s32.totalorder %v9449_v40, 0  ;;  %vm2218_vm4 = vcmp.eq.s32.totalorder %v9449_v40, 2 }
 0x464   :  { %v6201_v23 = vpop.eup %6200  ;;  %v4879_v0 = vadd.s32 %v9403_v10, %v9400_v54  ;;  %vm5817_vm6 = vcmp.lt.s32.totalorder %v5816_v12, 0  ;;  %v4910_v45 = vsel %vm4825_vm2, %v4909_v8, %v9437_v14  ;;  %vm2280_vm5 = vc.u32 %v9480_v26, %v9463_v59 }
 0x465   :  { %v6203_v62 = vpop.eup %6202  ;;  %v2219_v56 = vxor.u32 2147483648, %v6201_v23  ;;  %v4894_v33 = vsel %vm5817_vm6, 0, %v5816_v12  ;;  %v2278_v53 = vmul.u32 %v2271_v34, %v2262_v39  ;;  %v2282_v54 = vsel %vm2280_vm5, %v2281_v17, %v9464_v11 }
 0x466   :  { %v2216_v35 = vxor.u32 2147483648, %v6203_v62  ;;  %v4895_v1 = vsub.s32 32, %v4894_v33  ;;  %v4899_v16 = vsub.s32 4294967266, %v4894_v33  ;;  %v4896_v47 = vshll.u32 %v9451_v63, %v4894_v33 }
 0x467   :  { %v2220_v41 = vsel %vm2218_vm4, %v2219_v56, %v6203_v62  ;;  %vm4938_vm7 = vcmp.gt.s32.totalorder %v4937_v48, 0  ;;  %v2283_v32 = vadd.s32 %v2282_v54, %v2278_v53  ;;  %v4912_v30 = vsel %vm9471_vm15, 0, %v4910_v45 }
 0x468   :  { %v2217_v10 = vsel %vm2215_vm3, %v6201_v23, %v2216_v35  ;;  %v4897_v42 = vshrl.u32 %v4879_v0, %v4895_v1  ;;  %v4900_v60 = vadd.s32 127, %v4899_v16  ;;  %v4934_v34 = vand.u32 8388607, %v4927_v51 }
 0x469   :  { %v2221_v14 = vsel %vm2214_vm0, %v2217_v10, %v2220_v41  ;;  %v4939_v7 = vsel %vm4938_vm7, %v4937_v48, 0  ;;  %v2284_v52 = vadd.s32 536870912, %v2283_v32  ;;  %v4916_v49 = vadd.s32 3, %v4912_v30 }
 0x46a   :  { %v2222_v63 = vsel %vm2211_vm1, nan, %v2221_v14  ;;  %v4898_v13 = vor.u32 %v4897_v42, %v4896_v47  ;;  %v4901_v3 = vshll.u32 %v4900_v60, 23  ;;  %v4941_v20 = vand.u32 31, %v4939_v7 }
 0x46b   :  { %5568 = vst [vmem:[#allocation2 + $0x88] sm:$0xff] %v2222_v63  ;;  %v9512_v11 = vshrl.u32 %v2284_v52, 30  ;;  %v2327_v40 = vand.u32 2147483647, %v9486_v36  ;;  %v4935_v57 = vor.u32 8388608, %v4934_v34  ;;  %v2330_v37 = vand.u32 2139095040, %v9486_v36 }
 0x46c   :  { %v4902_v9 = vor.u32 4788187, %v4901_v3  ;;  %v4905_v61 = vcvt.s32.f32 %v4898_v13  ;;  %v4942_v55 = vsub.s32 32, %v4941_v20  ;;  %v4944_v18 = vshll.u32 %v6289_v21, %v4941_v20 }
 0x46d   :  { %v2286_v5 = vshll.u32 %v9512_v11, 30  ;;  %v4947_v50 = vshll.u32 %v6290_v25, %v4941_v20  ;;  %v4950_v17 = vshll.u32 %v6291_v27, %v4941_v20  ;;  %v4953_v62 = vshll.u32 %v6292_v29, %v4941_v20 }
 0x46e   :  { %v4903_v8 = vand.u32 2147483647, %v4902_v9  ;;  %v4945_v12 = vshrl.u32 %v6290_v25, %v4942_v55  ;;  %v4948_v39 = vshrl.u32 %v6291_v27, %v4942_v55  ;;  %v4951_v48 = vshrl.u32 %v6292_v29, %v4942_v55 }
 0x46f   :  { %v9523_v0 = vsub.s32 %v2283_v32, %v2286_v5  ;;  %v4954_v56 = vshrl.u32 %v6293_v31, %v4942_v55  ;;  %v9527_v33 = vand.u32 3, %v4916_v49  ;;  %v2279_v45 = vadd.s32 %v9463_v59, %v9480_v26 }
 0x470   :  { %v4906_v23 = vmul.f32 %v4905_v61, %v4903_v8  ;;  %v2331_v35 = vshrl.u32 %v2330_v37, 23  ;;  %v9533_v1 = vand.u32 8388607, %v2327_v40  ;;  %v4940_v41 = vshrl.u32 %v4939_v7, 5 }
 0x471   :  { %v2289_v53 = vsub.s32 0, %v9523_v0  ;;  %v4946_v47 = vor.u32 %v4945_v12, %v4944_v18  ;;  %v4949_v54 = vor.u32 %v4948_v39, %v4947_v50  ;;  %v4952_v10 = vor.u32 %v4951_v48, %v4950_v17 }
 0x472   :  { %v4907_v16 = vxor.u32 2147483648, %v4906_v23  ;;  %v4956_v42 = vshll.u32 %v6293_v31, %v4941_v20  ;;  %v4957_v60 = vshrl.u32 %v6294_v38, %v4942_v55  ;;  %v4955_v26 = vor.u32 %v4954_v56, %v4953_v62  ;;  %v9556_v62 = vpop.f32.mrb[22].mxu0 }
 0x473   :  { %v5715_v59 = vmin.u32 %v2289_v53, %v9523_v0  ;;  %v9541_v14 = vshll.u32 %v4935_v57, 8  ;;  %v4943_v34 = vshrl.u32 %v6289_v21, %v4942_v55  ;;  %v5718_v63 = vadd.s32 4294967169, %v2331_v35 }
 0x474   :  { %v4908_v32 = vsel %vm4825_vm2, %v4907_v16, %v4906_v23  ;;  %v4958_v7 = vor.u32 %v4957_v60, %v4956_v42  ;;  %vm4959_vm8 = vcmp.lt.s32.totalorder %v4940_v41, 1  ;;  %vm4962_vm10 = vcmp.lt.s32.totalorder %v4940_v41, 4 }
 0x475   :  { %v4911_v30 = vsel %vm9471_vm15, %v9203_v4, %v4908_v32  ;;  %v2291_v13 = vclz %v5715_v59  ;;  %vm2225_vm9 = vcmp.lt.s32.totalorder %v9336_v24, 0  ;;  %vm4960_vm11 = vcmp.lt.s32.totalorder %v4940_v41, 2 }
 0x476   :  { %6204 = vcosq.f32 %v4911_v30  ;;  %v4964_v3 = vsel %vm4962_vm10, %v4952_v10, 2102212464  ;;  %v4967_v52 = vsel %vm4959_vm8, %v4946_v47, %v4949_v54  ;;  %vm4961_vm12 = vcmp.lt.s32.totalorder %v4940_v41, 3 }
 0x477   :  { %6206 = vsinq.f32 %v4911_v30  ;;  %v5716_v20 = vadd.s32 4294967294, %v2291_v13  ;;  %v4968_v9 = vsel %vm4962_vm10, %v4955_v26, 920167782  ;;  %v4971_v49 = vsel %vm4959_vm8, %v4949_v54, %v4952_v10 }
 0x478   :  { %v4963_v15 = vsel %vm4959_vm8, %v4943_v34, %v4946_v47  ;;  %v4969_v61 = vsel %vm4961_vm12, %v4952_v10, %v4968_v9  ;;  %v4972_v57 = vsel %vm4962_vm10, %v4958_v7, 1326507024  ;;  %v2337_v55 = vadd.s32 1, %v5718_v63 }
 0x479   :  { %vm5717_vm13 = vcmp.lt.s32.totalorder %v5716_v20, 0  ;;  %v4965_v37 = vsel %vm4961_vm12, %v4949_v54, %v4964_v3  ;;  %v4970_v8 = vsel %vm4960_vm11, %v4967_v52, %v4969_v61  ;;  %v4973_v5 = vsel %vm4961_vm12, %v4955_v26, %v4972_v57 }
 0x47a   :  { %v2294_v18 = vsel %vm5717_vm13, 0, %v5716_v20  ;;  %v4974_v50 = vsel %vm4960_vm11, %v4971_v49, %v4973_v5  ;;  %v9551_v12 = vmul.u32.u64.low %v9541_v14, %v4970_v8  ;;  %v9552_v39 = vmul.u32.u64.high %v9541_v14, %v4970_v8, %v9551_v12 }
 0x47b   :  { %v2295_v17 = vsub.s32 32, %v2294_v18  ;;  %v2299_v48 = vsub.s32 4294967266, %v2294_v18  ;;  %v2309_v23 = vsub.s32 4, %v9512_v11  ;;  %vm2338_vm14 = vcmp.gt.s32.totalorder %v2337_v55, 0 }
 0x47c   :  { %vm4915_vm15 = vweird.f32 %v9203_v4  ;;  %v4966_v56 = vsel %vm4960_vm11, %v4963_v15, %v4965_v37  ;;  %v9561_v35 = vmul.u32.u64.low %v9541_v14, %v4974_v50  ;;  %v9562_v16 = vmul.u32.u64.high %v9541_v14, %v4974_v50, %v9561_v35 }
 0x47d   :  { %v2339_v53 = vsel %vm2338_vm14, %v2337_v55, 0  ;;  %v2296_v47 = vshll.u32 %v9523_v0, %v2294_v18  ;;  %v2297_v54 = vshrl.u32 %v2279_v45, %v2295_v17  ;;  %v2300_v10 = vadd.s32 127, %v2299_v48 }
 0x47e   :  { %v2341_v42 = vand.u32 31, %v2339_v53  ;;  %vm4918_vm1 = vcmp.lt.s32.totalorder %v9527_v33, 2  ;;  %vm4919_vm2 = vcmp.eq.s32.totalorder %v9527_v33, 0  ;;  %vm9569_vm0 = vcmp.le.f32.partialorder %v2223_v6, 0.7853982 }
 0x47f   :  { %v4985_v41 = vadd.s32 1, %v9552_v39  ;;  %vm4922_vm3 = vcmp.eq.s32.totalorder %v9527_v33, 2  ;;  %v2298_v59 = vor.u32 %v2297_v54, %v2296_v47  ;;  %v2301_v0 = vshll.u32 %v2300_v10, 23 }
 0x480   :  { %v6205_v32 = vpop.eup %6204  ;;  %v2310_v45 = vsel %vm2225_vm9, %v2309_v23, %v9512_v11  ;;  %v4982_v34 = vmul.u32 %v9541_v14, %v4966_v56  ;;  %vm4984_vm4 = vc.u32 %v9562_v16, %v9551_v12  ;;  %v2342_v6 = vsub.s32 32, %v2341_v42 }
 0x481   :  { %v6207_v26 = vpop.eup %6206  ;;  %v4923_v30 = vxor.u32 2147483648, %v6205_v32  ;;  %v2302_v63 = vor.u32 4788187, %v2301_v0  ;;  %v4986_v13 = vsel %vm4984_vm4, %v4985_v41, %v9552_v39  ;;  %v2335_v3 = vor.u32 8388608, %v9533_v1 }
 0x482   :  { %v4920_v7 = vxor.u32 2147483648, %v6207_v26  ;;  %v2312_v20 = vsel %vm9569_vm0, 0, %v2310_v45  ;;  %v4987_v9 = vadd.s32 %v4986_v13, %v4982_v34  ;;  %v9587_v11 = vadd.f32 %v9157_v2, %v6472_v44 }
 0x483   :  { %v4924_v52 = vsel %vm4922_vm3, %v4923_v30, %v6207_v26  ;;  %v2303_v49 = vand.u32 2147483647, %v2302_v63  ;;  %v2305_v15 = vcvt.s32.f32 %v2298_v59  ;;  %v9591_v61 = vshrl.u32 %v2339_v53, 5 }
 0x484   :  { %v4921_v14 = vsel %vm4919_vm2, %v6205_v32, %v4920_v7  ;;  %v4988_v1 = vadd.s32 536870912, %v4987_v9  ;;  %v2345_v55 = vshrl.u32 %v6290_v25, %v2342_v6  ;;  %v2348_v37 = vshrl.u32 %v6291_v27, %v2342_v6 }
 0x485   :  { %v4925_v57 = vsel %vm4918_vm1, %v4921_v14, %v4924_v52  ;;  %v2306_v2 = vmul.f32 %v2305_v15, %v2303_v49  ;;  %v2344_v5 = vshll.u32 %v6289_v21, %v2341_v42  ;;  %v2351_v18 = vshrl.u32 %v6292_v29, %v2342_v6 }
 0x486   :  { %v4926_v8 = vsel %vm4915_vm15, nan, %v4925_v57  ;;  %v9601_v50 = vshrl.u32 %v4988_v1, 30  ;;  %v2347_v39 = vshll.u32 %v6290_v25, %v2341_v42  ;;  %v2350_v33 = vshll.u32 %v6291_v27, %v2341_v42 }
 0x487   :  { %5594 = vst [vmem:[#allocation2 + $0x158] sm:$0xff] %v4926_v8  ;;  %v2354_v17 = vshrl.u32 %v6293_v31, %v2342_v6  ;;  %v2307_v48 = vxor.u32 2147483648, %v2306_v2  ;;  %v2353_v23 = vshll.u32 %v6292_v29, %v2341_v42  ;;  %v2356_v4 = vshll.u32 %v6293_v31, %v2341_v42 }
 0x488   :  { %v2357_v56 = vshrl.u32 %v6294_v38, %v2342_v6  ;;  %v4990_v35 = vshll.u32 %v9601_v50, 30  ;;  %v2346_v53 = vor.u32 %v2345_v55, %v2344_v5  ;;  %v2349_v47 = vor.u32 %v2348_v37, %v2347_v39 }
 0x489   :  { %v9610_v54 = vshll.u32 %v2335_v3, 8  ;;  %v2308_v10 = vsel %vm2225_vm9, %v2307_v48, %v2306_v2  ;;  %v2352_v41 = vor.u32 %v2351_v18, %v2350_v33  ;;  %v2355_v32 = vor.u32 %v2354_v17, %v2353_v23 }
 0x48a   :  { %v2358_v59 = vor.u32 %v2357_v56, %v2356_v4  ;;  %v2311_v0 = vsel %vm9569_vm0, %v9336_v24, %v2308_v10  ;;  %v2316_v45 = vadd.s32 3, %v2312_v20  ;;  %v9617_v42 = vsub.s32 %v4987_v9, %v4990_v35 }
 0x48b   :  { %v5034_v26 = vand.u32 2139095040, %v9587_v11  ;;  %6208 = vcosq.f32 %v2311_v0  ;;  %v2343_v30 = vshrl.u32 %v6289_v21, %v2342_v6  ;;  %vm2359_vm6 = vcmp.lt.s32.totalorder %v9591_v61, 1 }
 0x48c   :  { %vm2361_vm5 = vcmp.lt.s32.totalorder %v9591_v61, 3  ;;  %6210 = vsinq.f32 %v2311_v0  ;;  %v4993_v34 = vsub.s32 0, %v9617_v42  ;;  %vm2362_vm7 = vcmp.lt.s32.totalorder %v9591_v61, 4 }
 0x48d   :  { %v2367_v60 = vsel %vm2359_vm6, %v2346_v53, %v2349_v47  ;;  %v2364_v7 = vsel %vm2362_vm7, %v2352_v41, 2102212464  ;;  %v2368_v63 = vsel %vm2362_vm7, %v2355_v32, 920167782  ;;  %v2371_v13 = vsel %vm2359_vm6, %v2349_v47, %v2352_v41 }
 0x48e   :  { %v2372_v3 = vsel %vm2362_vm7, %v2358_v59, 1326507024  ;;  %v5819_v6 = vmin.u32 %v4993_v34, %v9617_v42  ;;  %vm2360_vm8 = vcmp.lt.s32.totalorder %v9591_v61, 2  ;;  %v2369_v52 = vsel %vm2361_vm5, %v2352_v41, %v2368_v63 }
 0x48f   :  { %v2373_v20 = vsel %vm2361_vm5, %v2355_v32, %v2372_v3  ;;  %v2317_v9 = vand.u32 3, %v2316_v45  ;;  %v2370_v14 = vsel %vm2360_vm8, %v2367_v60, %v2369_v52  ;;  %v5035_v15 = vshrl.u32 %v5034_v26, 23 }
 0x490   :  { %v2374_v49 = vsel %vm2360_vm8, %v2371_v13, %v2373_v20  ;;  %v4995_v57 = vclz %v5819_v6  ;;  %v5013_v1 = vsub.s32 4, %v9601_v50  ;;  %v2363_v55 = vsel %vm2359_vm6, %v2343_v30, %v2346_v53 }
 0x491   :  { %v2365_v37 = vsel %vm2361_vm5, %v2349_v47, %v2364_v7  ;;  %v9645_v8 = vmul.u32.u64.low %v9610_v54, %v2374_v49  ;;  %v9646_v2 = vmul.u32.u64.high %v9610_v54, %v2374_v49, %v9645_v8  ;;  %vm2315_vm10 = vweird.f32 %v9336_v24 }
 0x492   :  { %v9649_v5 = vmul.u32.u64.low %v9610_v54, %v2370_v14  ;;  %v9650_v18 = vmul.u32.u64.high %v9610_v54, %v2370_v14, %v9649_v5  ;;  %vm9656_vm9 = vcmp.le.f32.partialorder %v4927_v51, 0.7853982  ;;  %vm4929_vm11 = vcmp.lt.s32.totalorder %v9423_v22, 0 }
 0x493   :  { %v5820_v33 = vadd.s32 4294967294, %v4995_v57  ;;  %v5822_v17 = vadd.s32 4294967169, %v5035_v15  ;;  %vm2318_vm12 = vcmp.lt.s32.totalorder %v2317_v9, 2  ;;  %vm2319_vm13 = vcmp.eq.s32.totalorder %v2317_v9, 0 }
 0x494   :  { %vm2322_vm14 = vcmp.eq.s32.totalorder %v2317_v9, 2  ;;  %v2366_v48 = vsel %vm2360_vm8, %v2363_v55, %v2365_v37  ;;  %v4983_v23 = vadd.s32 %v9551_v12, %v9562_v16  ;;  %v5031_v4 = vand.u32 2147483647, %v9587_v11 }
 0x495   :  { %vm5821_vm15 = vcmp.lt.s32.totalorder %v5820_v33, 0  ;;  %v5041_v51 = vadd.s32 1, %v5822_v17  ;;  %v6209_v56 = vpop.eup %6208  ;;  %v5014_v53 = vsel %vm4929_vm11, %v5013_v1, %v9601_v50  ;;  %vm2384_vm1 = vc.u32 %v9646_v2, %v9649_v5 }
 0x496   :  { %v4998_v35 = vsel %vm5821_vm15, 0, %v5820_v33  ;;  %v2385_v47 = vadd.s32 1, %v9650_v18  ;;  %v6211_v61 = vpop.eup %6210  ;;  %v2323_v10 = vxor.u32 2147483648, %v6209_v56  ;;  %v2382_v12 = vmul.u32 %v9610_v54, %v2366_v48 }
 0x497   :  { %v4999_v41 = vsub.s32 32, %v4998_v35  ;;  %v5003_v32 = vsub.s32 4294967266, %v4998_v35  ;;  %v2320_v16 = vxor.u32 2147483648, %v6211_v61  ;;  %v5000_v59 = vshll.u32 %v9617_v42, %v4998_v35 }
 0x498   :  { %v2386_v0 = vsel %vm2384_vm1, %v2385_v47, %v9650_v18  ;;  %vm5042_vm2 = vcmp.gt.s32.totalorder %v5041_v51, 0  ;;  %v2324_v45 = vsel %vm2322_vm14, %v2323_v10, %v6211_v61  ;;  %v5016_v60 = vsel %vm9656_vm9, 0, %v5014_v53 }
 0x499   :  { %v5001_v50 = vshrl.u32 %v4983_v23, %v4999_v41  ;;  %v5004_v26 = vadd.s32 127, %v5003_v32  ;;  %v2387_v30 = vadd.s32 %v2386_v0, %v2382_v12  ;;  %v2321_v34 = vsel %vm2319_vm13, %v6209_v56, %v2320_v16  ;;  %v9697_v23 = vpop.f32.mrb[22].mxu1 }
 0x49a   :  { %v5038_v7 = vand.u32 8388607, %v5031_v4  ;;  %v5043_v54 = vsel %vm5042_vm2, %v5041_v51, 0  ;;  %v2325_v63 = vsel %vm2318_vm12, %v2321_v34, %v2324_v45  ;;  %v5020_v14 = vadd.s32 3, %v5016_v60 }
 0x49b   :  { %v5002_v42 = vor.u32 %v5001_v50, %v5000_v59  ;;  %v5005_v13 = vshll.u32 %v5004_v26, 23  ;;  %v2388_v3 = vadd.s32 536870912, %v2387_v30  ;;  %v2326_v6 = vsel %vm2315_vm10, nan, %v2325_v63 }
 0x49c   :  { %v5045_v52 = vand.u32 31, %v5043_v54  ;;  %5569 = vst [vmem:[#allocation2 + $0x90] sm:$0xff] %v2326_v6  ;;  %v5039_v57 = vor.u32 8388608, %v5038_v7  ;;  %v9688_v55 = vadd.f32 %v9254_v46, %v6470_v43  ;;  %v9703_v53 = vand.u32 3, %v5020_v14 }
 0x49d   :  { %v5006_v20 = vor.u32 4788187, %v5005_v13  ;;  %v9684_v49 = vshrl.u32 %v2388_v3, 30  ;;  %v5009_v15 = vcvt.s32.f32 %v5002_v42  ;;  %v5044_v41 = vshrl.u32 %v5043_v54, 5 }
 0x49e   :  { %v5046_v1 = vsub.s32 32, %v5045_v52  ;;  %v5048_v8 = vshll.u32 %v6289_v21, %v5045_v52  ;;  %v5051_v24 = vshll.u32 %v6290_v25, %v5045_v52  ;;  %v5054_v17 = vshll.u32 %v6291_v27, %v5045_v52 }
 0x49f   :  { %v5007_v9 = vand.u32 2147483647, %v5006_v20  ;;  %v2390_v37 = vshll.u32 %v9684_v49, 30  ;;  %v5057_v56 = vshll.u32 %v6292_v29, %v5045_v52  ;;  %v9705_v47 = vshll.u32 %v5039_v57, 8 }
 0x4a0   :  { %v5049_v18 = vshrl.u32 %v6290_v25, %v5046_v1  ;;  %v5052_v33 = vshrl.u32 %v6291_v27, %v5046_v1  ;;  %v5055_v48 = vshrl.u32 %v6292_v29, %v5046_v1  ;;  %v5058_v35 = vshrl.u32 %v6293_v31, %v5046_v1 }
 0x4a1   :  { %v5010_v51 = vmul.f32 %v5009_v15, %v5007_v9  ;;  %v9699_v46 = vsub.s32 %v2387_v30, %v2390_v37  ;;  %v5060_v59 = vshll.u32 %v6293_v31, %v5045_v52  ;;  %v5061_v0 = vshrl.u32 %v6294_v38, %v5046_v1 }
 0x4a2   :  { %v5050_v32 = vor.u32 %v5049_v18, %v5048_v8  ;;  %v5053_v12 = vor.u32 %v5052_v33, %v5051_v24  ;;  %v5056_v16 = vor.u32 %v5055_v48, %v5054_v17  ;;  %v5059_v26 = vor.u32 %v5058_v35, %v5057_v56 }
 0x4a3   :  { %v5011_v61 = vxor.u32 2147483648, %v5010_v51  ;;  %v2393_v10 = vsub.s32 0, %v9699_v46  ;;  %v2434_v30 = vand.u32 2139095040, %v9688_v55  ;;  %v2413_v60 = vsub.s32 4, %v9684_v49 }
 0x4a4   :  { %v5047_v7 = vshrl.u32 %v6289_v21, %v5046_v1  ;;  %v5062_v54 = vor.u32 %v5061_v0, %v5060_v59  ;;  %vm2329_vm0 = vcmp.lt.s32.totalorder %v9486_v36, 0  ;;  %vm5063_vm3 = vcmp.lt.s32.totalorder %v5044_v41, 1 }
 0x4a5   :  { %v5012_v45 = vsel %vm4929_vm11, %v5011_v61, %v5010_v51  ;;  %v5719_v50 = vmin.u32 %v2393_v10, %v9699_v46  ;;  %vm5066_vm4 = vcmp.lt.s32.totalorder %v5044_v41, 4  ;;  %vm5064_vm6 = vcmp.lt.s32.totalorder %v5044_v41, 2 }
 0x4a6   :  { %v5015_v34 = vsel %vm9656_vm9, %v9423_v22, %v5012_v45  ;;  %v5068_v42 = vsel %vm5066_vm4, %v5056_v16, 2102212464  ;;  %v5071_v13 = vsel %vm5063_vm3, %v5050_v32, %v5053_v12  ;;  %vm5065_vm5 = vcmp.lt.s32.totalorder %v5044_v41, 3 }
 0x4a7   :  { %6212 = vcosq.f32 %v5015_v34  ;;  %v2395_v63 = vclz %v5719_v50  ;;  %v5072_v6 = vsel %vm5066_vm4, %v5059_v26, 920167782  ;;  %v5075_v39 = vsel %vm5063_vm3, %v5053_v12, %v5056_v16 }
 0x4a8   :  { %6214 = vsinq.f32 %v5015_v34  ;;  %vm9722_vm7 = vcmp.le.f32.partialorder %v2327_v40, 0.7853982  ;;  %v5067_v20 = vsel %vm5063_vm3, %v5047_v7, %v5050_v32  ;;  %v5073_v14 = vsel %vm5065_vm5, %v5056_v16, %v5072_v6  ;;  %v9733_v40 = vpop.f32.mrb[23].mxu0 }
 0x4a9   :  { %v5720_v3 = vadd.s32 4294967294, %v2395_v63  ;;  %v5076_v15 = vsel %vm5066_vm4, %v5062_v54, 1326507024  ;;  %v2435_v57 = vshrl.u32 %v2434_v30, 23  ;;  %v5069_v1 = vsel %vm5065_vm5, %v5053_v12, %v5068_v42 }
 0x4aa   :  { %v5074_v9 = vsel %vm5064_vm6, %v5071_v13, %v5073_v14  ;;  %v5077_v37 = vsel %vm5065_vm5, %v5059_v26, %v5076_v15  ;;  %v2383_v17 = vadd.s32 %v9649_v5, %v9646_v2  ;;  %vm5019_vm10 = vweird.f32 %v9423_v22 }
 0x4ab   :  { %vm5721_vm8 = vcmp.lt.s32.totalorder %v5720_v3, 0  ;;  %v5078_v24 = vsel %vm5064_vm6, %v5075_v39, %v5077_v37  ;;  %v9729_v18 = vmul.u32.u64.low %v9705_v47, %v5074_v9  ;;  %v9730_v33 = vmul.u32.u64.high %v9705_v47, %v5074_v9, %v9729_v18 }
 0x4ac   :  { %v2398_v8 = vsel %vm5721_vm8, 0, %v5720_v3  ;;  %v5722_v56 = vadd.s32 4294967169, %v2435_v57  ;;  %vm5022_vm9 = vcmp.lt.s32.totalorder %v9703_v53, 2  ;;  %v5070_v35 = vsel %vm5064_vm6, %v5067_v20, %v5069_v1 }
 0x4ad   :  { %v2399_v48 = vsub.s32 32, %v2398_v8  ;;  %v2403_v51 = vsub.s32 4294967266, %v2398_v8  ;;  %v9741_v61 = vmul.u32.u64.low %v9705_v47, %v5078_v24  ;;  %v9742_v10 = vmul.u32.u64.high %v9705_v47, %v5078_v24, %v9741_v61 }
 0x4ae   :  { %v2400_v32 = vshll.u32 %v9699_v46, %v2398_v8  ;;  %v2441_v59 = vadd.s32 1, %v5722_v56  ;;  %vm5023_vm11 = vcmp.eq.s32.totalorder %v9703_v53, 0  ;;  %vm5026_vm12 = vcmp.eq.s32.totalorder %v9703_v53, 2 }
 0x4af   :  { %v2401_v12 = vshrl.u32 %v2383_v17, %v2399_v48  ;;  %v2404_v16 = vadd.s32 127, %v2403_v51  ;;  %v2414_v2 = vsel %vm2329_vm0, %v2413_v60, %v9684_v49  ;;  %v5089_v5 = vadd.s32 1, %v9730_v33 }
 0x4b0   :  { %v2431_v50 = vand.u32 2147483647, %v9688_v55  ;;  %vm2442_vm13 = vcmp.gt.s32.totalorder %v2441_v59, 0  ;;  %v5086_v30 = vmul.u32 %v9705_v47, %v5070_v35  ;;  %vm5088_vm14 = vc.u32 %v9742_v10, %v9729_v18 }
 0x4b1   :  { %v6213_v41 = vpop.eup %6212  ;;  %v2402_v0 = vor.u32 %v2401_v12, %v2400_v32  ;;  %v2405_v45 = vshll.u32 %v2404_v16, 23  ;;  %v2443_v34 = vsel %vm2442_vm13, %v2441_v59, 0  ;;  %v2416_v49 = vsel %vm9722_vm7, 0, %v2414_v2 }
 0x4b2   :  { %v6215_v46 = vpop.eup %6214  ;;  %v5027_v26 = vxor.u32 2147483648, %v6213_v41  ;;  %v5090_v60 = vsel %vm5088_vm14, %v5089_v5, %v9730_v33  ;;  %v2445_v13 = vand.u32 31, %v2443_v34  ;;  %v9762_v3 = vadd.f32 %v9323_v28, %v6470_v43 }
 0x4b3   :  { %v5024_v7 = vxor.u32 2147483648, %v6215_v46  ;;  %v2406_v54 = vor.u32 4788187, %v2405_v45  ;;  %v5091_v42 = vadd.s32 %v5090_v60, %v5086_v30  ;;  %v2409_v39 = vcvt.s32.f32 %v2402_v0 }
 0x4b4   :  { %v5028_v63 = vsel %vm5026_vm12, %v5027_v26, %v6215_v46  ;;  %v2438_v20 = vand.u32 8388607, %v2431_v50  ;;  %v2420_v15 = vadd.s32 3, %v2416_v49  ;;  %v2446_v1 = vsub.s32 32, %v2445_v13 }
 0x4b5   :  { %v5025_v47 = vsel %vm5023_vm11, %v6213_v41, %v5024_v7  ;;  %v2407_v6 = vand.u32 2147483647, %v2406_v54  ;;  %v5092_v57 = vadd.s32 536870912, %v5091_v42  ;;  %v2448_v28 = vshll.u32 %v6289_v21, %v2445_v13 }
 0x4b6   :  { %v5029_v14 = vsel %vm5022_vm9, %v5025_v47, %v5028_v63  ;;  %v2451_v8 = vshll.u32 %v6290_v25, %v2445_v13  ;;  %v2449_v33 = vshrl.u32 %v6290_v25, %v2446_v1  ;;  %v2452_v17 = vshrl.u32 %v6291_v27, %v2446_v1 }
 0x4b7   :  { %v5030_v9 = vsel %vm5019_vm10, nan, %v5029_v14  ;;  %v2410_v37 = vmul.f32 %v2409_v39, %v2407_v6  ;;  %v9774_v24 = vshrl.u32 %v5092_v57, 30  ;;  %v2454_v53 = vshll.u32 %v6291_v27, %v2445_v13 }
 0x4b8   :  { %5595 = vst [vmem:[#allocation2 + $0x160] sm:$0xff] %v5030_v9  ;;  %v2455_v51 = vshrl.u32 %v6292_v29, %v2446_v1  ;;  %v2457_v22 = vshll.u32 %v6292_v29, %v2445_v13  ;;  %v2458_v56 = vshrl.u32 %v6293_v31, %v2446_v1  ;;  %v2444_v61 = vshrl.u32 %v2443_v34, 5 }
 0x4b9   :  { %v2411_v48 = vxor.u32 2147483648, %v2410_v37  ;;  %v5094_v35 = vshll.u32 %v9774_v24, 30  ;;  %v2450_v32 = vor.u32 %v2449_v33, %v2448_v28  ;;  %v5138_v12 = vand.u32 2139095040, %v9762_v3 }
 0x4ba   :  { %v2453_v59 = vor.u32 %v2452_v17, %v2451_v8  ;;  %v2456_v2 = vor.u32 %v2455_v51, %v2454_v53  ;;  %v2459_v5 = vor.u32 %v2458_v56, %v2457_v22  ;;  %v2460_v45 = vshll.u32 %v6293_v31, %v2445_v13 }
 0x4bb   :  { %v2412_v16 = vsel %vm2329_vm0, %v2411_v48, %v2410_v37  ;;  %v9789_v0 = vsub.s32 %v5091_v42, %v5094_v35  ;;  %v2461_v46 = vshrl.u32 %v6294_v38, %v2446_v1  ;;  %v9793_v26 = vand.u32 3, %v2420_v15 }
 0x4bc   :  { %v2415_v41 = vsel %vm9722_vm7, %v9486_v36, %v2412_v16  ;;  %v2439_v30 = vor.u32 8388608, %v2438_v20  ;;  %vm5033_vm15 = vcmp.lt.s32.totalorder %v9587_v11, 0  ;;  %v5139_v54 = vshrl.u32 %v5138_v12, 23  ;;  %v9800_v20 = vpop.f32.mrb[23].mxu1 }
 0x4bd   :  { %6216 = vcosq.f32 %v2415_v41  ;;  %v5097_v34 = vsub.s32 0, %v9789_v0  ;;  %v2462_v7 = vor.u32 %v2461_v46, %v2460_v45  ;;  %v2447_v52 = vshrl.u32 %v6289_v21, %v2446_v1 }
 0x4be   :  { %6218 = vsinq.f32 %v2415_v41  ;;  %vm2463_vm1 = vcmp.lt.s32.totalorder %v2444_v61, 1  ;;  %vm2465_vm2 = vcmp.lt.s32.totalorder %v2444_v61, 3  ;;  %vm2466_vm0 = vcmp.lt.s32.totalorder %v2444_v61, 4 }
 0x4bf   :  { %v5823_v49 = vmin.u32 %v5097_v34, %v9789_v0  ;;  %v2468_v60 = vsel %vm2466_vm0, %v2456_v2, 2102212464  ;;  %v2471_v63 = vsel %vm2463_vm1, %v2450_v32, %v2453_v59  ;;  %v2472_v42 = vsel %vm2466_vm0, %v2459_v5, 920167782 }
 0x4c0   :  { %v2473_v13 = vsel %vm2465_vm2, %v2456_v2, %v2472_v42  ;;  %v2475_v47 = vsel %vm2463_vm1, %v2453_v59, %v2456_v2  ;;  %v2476_v6 = vsel %vm2466_vm0, %v2462_v7, 1326507024  ;;  %v2479_v39 = vshll.u32 %v2439_v30, 8 }
 0x4c1   :  { %vm9804_vm3 = vcmp.le.f32.partialorder %v5031_v4, 0.7853982  ;;  %v5099_v15 = vclz %v5823_v49  ;;  %vm2464_vm4 = vcmp.lt.s32.totalorder %v2444_v61, 2  ;;  %v2467_v57 = vsel %vm2463_vm1, %v2447_v52, %v2450_v32 }
 0x4c2   :  { %v2469_v1 = vsel %vm2465_vm2, %v2453_v59, %v2468_v60  ;;  %v5117_v9 = vsub.s32 4, %v9774_v24  ;;  %v2474_v37 = vsel %vm2464_vm4, %v2471_v63, %v2473_v13  ;;  %v2477_v28 = vsel %vm2465_vm2, %v2459_v5, %v2476_v6 }
 0x4c3   :  { %v5826_v8 = vadd.s32 4294967169, %v5139_v54  ;;  %vm2419_vm6 = vweird.f32 %v9486_v36  ;;  %v5824_v33 = vadd.s32 4294967294, %v5099_v15  ;;  %v2478_v17 = vsel %vm2464_vm4, %v2475_v47, %v2477_v28 }
 0x4c4   :  { %v9812_v53 = vmul.u32.u64.low %v2479_v39, %v2474_v37  ;;  %v9813_v4 = vmul.u32.u64.high %v2479_v39, %v2474_v37, %v9812_v53  ;;  %vm2422_vm5 = vcmp.lt.s32.totalorder %v9793_v26, 2  ;;  %v2470_v48 = vsel %vm2464_vm4, %v2467_v57, %v2469_v1 }
 0x4c5   :  { %v9817_v51 = vmul.u32.u64.low %v2479_v39, %v2478_v17  ;;  %v9818_v22 = vmul.u32.u64.high %v2479_v39, %v2478_v17, %v9817_v51  ;;  %vm2423_vm7 = vcmp.eq.s32.totalorder %v9793_v26, 0  ;;  %vm2426_vm8 = vcmp.eq.s32.totalorder %v9793_v26, 2 }
 0x4c6   :  { %vm5825_vm10 = vcmp.lt.s32.totalorder %v5824_v33, 0  ;;  %v5145_v56 = vadd.s32 1, %v5826_v8  ;;  %v5087_v61 = vadd.s32 %v9729_v18, %v9742_v10  ;;  %v5118_v12 = vsel %vm5033_vm15, %v5117_v9, %v9774_v24 }
 0x4c7   :  { %v6217_v35 = vpop.eup %6216  ;;  %v5102_v32 = vsel %vm5825_vm10, 0, %v5824_v33  ;;  %v5135_v16 = vand.u32 2147483647, %v9762_v3  ;;  %v2486_v45 = vmul.u32 %v2479_v39, %v2470_v48  ;;  %vm2488_vm9 = vc.u32 %v9818_v22, %v9812_v53 }
 0x4c8   :  { %v6219_v59 = vpop.eup %6218  ;;  %v2427_v2 = vxor.u32 2147483648, %v6217_v35  ;;  %v5103_v5 = vsub.s32 32, %v5102_v32  ;;  %v5107_v41 = vsub.s32 4294967266, %v5102_v32  ;;  %v5104_v30 = vshll.u32 %v9789_v0, %v5102_v32 }
 0x4c9   :  { %v2424_v46 = vxor.u32 2147483648, %v6219_v59  ;;  %v2489_v18 = vadd.s32 1, %v9813_v4  ;;  %vm5146_vm11 = vcmp.gt.s32.totalorder %v5145_v56, 0  ;;  %v5120_v54 = vsel %vm9804_vm3, 0, %v5118_v12 }
 0x4ca   :  { %v2428_v10 = vsel %vm2426_vm8, %v2427_v2, %v6219_v59  ;;  %v5105_v34 = vshrl.u32 %v5087_v61, %v5103_v5  ;;  %v5108_v24 = vadd.s32 127, %v5107_v41  ;;  %v5147_v0 = vsel %vm5146_vm11, %v5145_v56, 0 }
 0x4cb   :  { %v2425_v7 = vsel %vm2423_vm7, %v6217_v35, %v2424_v46  ;;  %v2490_v52 = vsel %vm2488_vm9, %v2489_v18, %v9813_v4  ;;  %v5149_v47 = vand.u32 31, %v5147_v0  ;;  %v5142_v15 = vand.u32 8388607, %v5135_v16 }
 0x4cc   :  { %v2429_v49 = vsel %vm2422_vm5, %v2425_v7, %v2428_v10  ;;  %v5106_v60 = vor.u32 %v5105_v34, %v5104_v30  ;;  %v5109_v63 = vshll.u32 %v5108_v24, 23  ;;  %v2491_v42 = vadd.s32 %v2490_v52, %v2486_v45 }
 0x4cd   :  { %v2430_v13 = vsel %vm2419_vm6, nan, %v2429_v49  ;;  %v9847_v57 = vadd.f32 %v9388_v19, %v6472_v44  ;;  %v5124_v26 = vadd.s32 3, %v5120_v54  ;;  %v5150_v9 = vsub.s32 32, %v5149_v47 }
 0x4ce   :  { %5570 = vst [vmem:[#allocation2 + $0x98] sm:$0xff] %v2430_v13  ;;  %v5110_v6 = vor.u32 4788187, %v5109_v63  ;;  %v2492_v39 = vadd.s32 536870912, %v2491_v42  ;;  %v5113_v1 = vcvt.s32.f32 %v5106_v60  ;;  %v5152_v37 = vshll.u32 %v6289_v21, %v5149_v47 }
 0x4cf   :  { %v5155_v36 = vshll.u32 %v6290_v25, %v5149_v47  ;;  %v5158_v33 = vshll.u32 %v6291_v27, %v5149_v47  ;;  %v5153_v17 = vshrl.u32 %v6290_v25, %v5150_v9  ;;  %v5156_v4 = vshrl.u32 %v6291_v27, %v5150_v9 }
 0x4d0   :  { %v5111_v28 = vand.u32 2147483647, %v5110_v6  ;;  %v9850_v8 = vshrl.u32 %v2492_v39, 30  ;;  %v5159_v48 = vshrl.u32 %v6292_v29, %v5150_v9  ;;  %v5161_v19 = vshll.u32 %v6292_v29, %v5149_v47 }
 0x4d1   :  { %v5143_v35 = vor.u32 8388608, %v5142_v15  ;;  %v5162_v61 = vshrl.u32 %v6293_v31, %v5150_v9  ;;  %v5148_v32 = vshrl.u32 %v5147_v0, 5  ;;  %v5164_v12 = vshll.u32 %v6293_v31, %v5149_v47 }
 0x4d2   :  { %v5114_v51 = vmul.f32 %v5113_v1, %v5111_v28  ;;  %v2494_v56 = vshll.u32 %v9850_v8, 30  ;;  %v5165_v59 = vshrl.u32 %v6294_v38, %v5150_v9  ;;  %v2538_v2 = vand.u32 2139095040, %v9847_v57 }
 0x4d3   :  { %v9863_v41 = vand.u32 3, %v5124_v26  ;;  %v5160_v46 = vor.u32 %v5159_v48, %v5158_v33  ;;  %v5154_v30 = vor.u32 %v5153_v17, %v5152_v37  ;;  %v5157_v18 = vor.u32 %v5156_v4, %v5155_v36 }
 0x4d4   :  { %v5115_v5 = vxor.u32 2147483648, %v5114_v51  ;;  %v9865_v45 = vsub.s32 %v2491_v42, %v2494_v56  ;;  %v5163_v10 = vor.u32 %v5162_v61, %v5161_v19  ;;  %v2535_v34 = vand.u32 2147483647, %v9847_v57 }
 0x4d5   :  { %v5151_v54 = vshrl.u32 %v6289_v21, %v5150_v9  ;;  %v5183_v52 = vshll.u32 %v5143_v35, 8  ;;  %v5166_v49 = vor.u32 %v5165_v59, %v5164_v12  ;;  %vm5170_vm12 = vcmp.lt.s32.totalorder %v5148_v32, 4 }
 0x4d6   :  { %v5116_v24 = vsel %vm5033_vm15, %v5115_v5, %v5114_v51  ;;  %v2497_v7 = vsub.s32 0, %v9865_v45  ;;  %v2539_v60 = vshrl.u32 %v2538_v2, 23  ;;  %vm5167_vm13 = vcmp.lt.s32.totalorder %v5148_v32, 1 }
 0x4d7   :  { %v5119_v0 = vsel %vm9804_vm3, %v9587_v11, %v5116_v24  ;;  %v5172_v42 = vsel %vm5170_vm12, %v5160_v46, 2102212464  ;;  %vm5169_vm14 = vcmp.lt.s32.totalorder %v5148_v32, 3  ;;  %v5175_v13 = vsel %vm5167_vm13, %v5154_v30, %v5157_v18 }
 0x4d8   :  { %6220 = vcosq.f32 %v5119_v0  ;;  %v5723_v63 = vmin.u32 %v2497_v7, %v9865_v45  ;;  %v5176_v47 = vsel %vm5170_vm12, %v5163_v10, 920167782  ;;  %vm9880_vm15 = vcmp.le.f32.partialorder %v2431_v50, 0.7853982 }
 0x4d9   :  { %6222 = vsinq.f32 %v5119_v0  ;;  %v5171_v39 = vsel %vm5167_vm13, %v5151_v54, %v5154_v30  ;;  %v5173_v15 = vsel %vm5169_vm14, %v5157_v18, %v5172_v42  ;;  %v5179_v1 = vsel %vm5167_vm13, %v5157_v18, %v5160_v46 }
 0x4da   :  { %v2499_v14 = vclz %v5723_v63  ;;  %vm5168_vm1 = vcmp.lt.s32.totalorder %v5148_v32, 2  ;;  %v5177_v26 = vsel %vm5169_vm14, %v5160_v46, %v5176_v47  ;;  %v5180_v9 = vsel %vm5170_vm12, %v5166_v49, 1326507024 }
 0x4db   :  { %v5726_v37 = vadd.s32 4294967169, %v2539_v60  ;;  %v2517_v36 = vsub.s32 4, %v9850_v8  ;;  %v5178_v33 = vsel %vm5168_vm1, %v5175_v13, %v5177_v26  ;;  %v5181_v17 = vsel %vm5169_vm14, %v5163_v10, %v5180_v9  ;;  %v9904_v10 = vpop.f32.mrb[24].mxu0 }
 0x4dc   :  { %v5724_v28 = vadd.s32 4294967294, %v2499_v14  ;;  %v5174_v4 = vsel %vm5168_vm1, %v5171_v39, %v5173_v15  ;;  %v5182_v48 = vsel %vm5168_vm1, %v5179_v1, %v5181_v17  ;;  %vm5123_vm0 = vweird.f32 %v9587_v11 }
 0x4dd   :  { %v9886_v50 = vmul.u32.u64.low %v5183_v52, %v5178_v33  ;;  %v9887_v19 = vmul.u32.u64.high %v5183_v52, %v5178_v33, %v9886_v50  ;;  %v9890_v51 = vmul.u32.u64.low %v5183_v52, %v5182_v48  ;;  %v9891_v56 = vmul.u32.u64.high %v5183_v52, %v5182_v48, %v9890_v51 }
 0x4de   :  { %vm5725_vm2 = vcmp.lt.s32.totalorder %v5724_v28, 0  ;;  %v2545_v35 = vadd.s32 1, %v5726_v37  ;;  %vm5130_vm3 = vcmp.eq.s32.totalorder %v9863_v41, 2  ;;  %vm2433_vm4 = vcmp.lt.s32.totalorder %v9688_v55, 0 }
 0x4df   :  { %v2487_v61 = vadd.s32 %v9812_v53, %v9818_v22  ;;  %v2502_v32 = vsel %vm5725_vm2, 0, %v5724_v28  ;;  %v2518_v2 = vsel %vm2433_vm4, %v2517_v36, %v9850_v8  ;;  %v5190_v5 = vmul.u32 %v5183_v52, %v5174_v4 }
 0x4e0   :  { %v2503_v12 = vsub.s32 32, %v2502_v32  ;;  %v2507_v59 = vsub.s32 4294967266, %v2502_v32  ;;  %vm2546_vm6 = vcmp.gt.s32.totalorder %v2545_v35, 0  ;;  %v5193_v46 = vadd.s32 1, %v9887_v19 }
 0x4e1   :  { %v2542_v30 = vand.u32 8388607, %v2535_v34  ;;  %v2547_v18 = vsel %vm2546_vm6, %v2545_v35, 0  ;;  %v2504_v53 = vshll.u32 %v9865_v45, %v2502_v32  ;;  %vm5192_vm5 = vc.u32 %v9891_v56, %v9886_v50 }
 0x4e2   :  { %v6221_v24 = vpop.eup %6220  ;;  %v2505_v22 = vshrl.u32 %v2487_v61, %v2503_v12  ;;  %v2508_v7 = vadd.s32 127, %v2507_v59  ;;  %v2520_v52 = vsel %vm9880_vm15, 0, %v2518_v2  ;;  %v5194_v0 = vsel %vm5192_vm5, %v5193_v46, %v9887_v19 }
 0x4e3   :  { %v6223_v54 = vpop.eup %6222  ;;  %v5131_v8 = vxor.u32 2147483648, %v6221_v24  ;;  %v2549_v49 = vand.u32 31, %v2547_v18  ;;  %v5195_v13 = vadd.s32 %v5194_v0, %v5190_v5  ;;  %vm5127_vm7 = vcmp.eq.s32.totalorder %v9863_v41, 0 }
 0x4e4   :  { %v5128_v60 = vxor.u32 2147483648, %v6223_v54  ;;  %v2506_v63 = vor.u32 %v2505_v22, %v2504_v53  ;;  %v2509_v42 = vshll.u32 %v2508_v7, 23  ;;  %v9917_v14 = vadd.f32 %v9467_v58, %v6472_v44 }
 0x4e5   :  { %v5132_v45 = vsel %vm5130_vm3, %v5131_v8, %v6223_v54  ;;  %v2550_v47 = vsub.s32 32, %v2549_v49  ;;  %vm5126_vm8 = vcmp.lt.s32.totalorder %v9863_v41, 2  ;;  %v5196_v1 = vadd.s32 536870912, %v5195_v13 }
 0x4e6   :  { %v5129_v39 = vsel %vm5127_vm7, %v6221_v24, %v5128_v60  ;;  %v2510_v15 = vor.u32 4788187, %v2509_v42  ;;  %v2524_v9 = vadd.s32 3, %v2520_v52  ;;  %v2543_v37 = vor.u32 8388608, %v2542_v30 }
 0x4e7   :  { %v5133_v26 = vsel %vm5126_vm8, %v5129_v39, %v5132_v45  ;;  %v9922_v28 = vadd.f32 %v9556_v62, %v6470_v43  ;;  %v2513_v17 = vcvt.s32.f32 %v2506_v63  ;;  %v5197_v4 = vshrl.u32 %v5196_v1, 30 }
 0x4e8   :  { %v5134_v36 = vsel %vm5123_vm0, nan, %v5133_v26  ;;  %v2511_v33 = vand.u32 2147483647, %v2510_v15  ;;  %v2548_v58 = vshrl.u32 %v2547_v18, 5  ;;  %v2553_v41 = vshrl.u32 %v6290_v25, %v2550_v47 }
 0x4e9   :  { %5596 = vst [vmem:[#allocation2 + $0x168] sm:$0xff] %v5134_v36  ;;  %v2556_v48 = vshrl.u32 %v6291_v27, %v2550_v47  ;;  %v2559_v19 = vshrl.u32 %v6292_v29, %v2550_v47  ;;  %v5198_v35 = vshll.u32 %v5197_v4, 30  ;;  %v2558_v61 = vshll.u32 %v6291_v27, %v2549_v49 }
 0x4ea   :  { %v2514_v51 = vmul.f32 %v2513_v17, %v2511_v33  ;;  %v2562_v62 = vshrl.u32 %v6293_v31, %v2550_v47  ;;  %vm5137_vm10 = vcmp.lt.s32.totalorder %v9762_v3, 0  ;;  %v2552_v11 = vshll.u32 %v6289_v21, %v2549_v49 }
 0x4eb   :  { %v2555_v32 = vshll.u32 %v6290_v25, %v2549_v49  ;;  %v2561_v12 = vshll.u32 %v6292_v29, %v2549_v49  ;;  %v2565_v59 = vshrl.u32 %v6294_v38, %v2550_v47  ;;  %v9936_v5 = vand.u32 3, %v2524_v9 }
 0x4ec   :  { %v2515_v2 = vxor.u32 2147483648, %v2514_v51  ;;  %v9938_v46 = vsub.s32 %v5195_v13, %v5198_v35  ;;  %v2560_v30 = vor.u32 %v2559_v19, %v2558_v61  ;;  %v2554_v18 = vor.u32 %v2553_v41, %v2552_v11  ;;  %v9953_v41 = vpop.f32.mrb[25].mxu0 }
 0x4ed   :  { %v2557_v24 = vor.u32 %v2556_v48, %v2555_v32  ;;  %v2563_v53 = vor.u32 %v2562_v62, %v2561_v12  ;;  %v2564_v22 = vshll.u32 %v6293_v31, %v2549_v49  ;;  %v2551_v8 = vshrl.u32 %v6289_v21, %v2550_v47 }
 0x4ee   :  { %v2516_v7 = vsel %vm2433_vm4, %v2515_v2, %v2514_v51  ;;  %v5201_v54 = vsub.s32 0, %v9938_v46  ;;  %v2583_v52 = vshll.u32 %v2543_v37, 8  ;;  %v5221_v60 = vsub.s32 4, %v5197_v4 }
 0x4ef   :  { %v2519_v0 = vsel %vm9880_vm15, %v9688_v55, %v2516_v7  ;;  %v2566_v63 = vor.u32 %v2565_v59, %v2564_v22  ;;  %vm2570_vm9 = vcmp.lt.s32.totalorder %v2548_v58, 4  ;;  %vm2567_vm11 = vcmp.lt.s32.totalorder %v2548_v58, 1 }
 0x4f0   :  { %6224 = vcosq.f32 %v2519_v0  ;;  %v5827_v42 = vmin.u32 %v5201_v54, %v9938_v46  ;;  %v2572_v49 = vsel %vm2570_vm9, %v2560_v30, 2102212464  ;;  %vm2568_vm12 = vcmp.lt.s32.totalorder %v2548_v58, 2 }
 0x4f1   :  { %6226 = vsinq.f32 %v2519_v0  ;;  %v2575_v13 = vsel %vm2567_vm11, %v2554_v18, %v2557_v24  ;;  %v2576_v45 = vsel %vm2570_vm9, %v2563_v53, 920167782  ;;  %vm2569_vm13 = vcmp.lt.s32.totalorder %v2548_v58, 3 }
 0x4f2   :  { %v5203_v39 = vclz %v5827_v42  ;;  %v2571_v47 = vsel %vm2567_vm11, %v2551_v8, %v2554_v18  ;;  %v2579_v15 = vsel %vm2567_vm11, %v2557_v24, %v2560_v30  ;;  %v2573_v1 = vsel %vm2569_vm13, %v2557_v24, %v2572_v49 }
 0x4f3   :  { %v2577_v26 = vsel %vm2569_vm13, %v2560_v30, %v2576_v45  ;;  %v2580_v6 = vsel %vm2570_vm9, %v2566_v63, 1326507024  ;;  %v5242_v9 = vand.u32 2139095040, %v9917_v14  ;;  %v5222_v36 = vsel %vm5137_vm10, %v5221_v60, %v5197_v4 }
 0x4f4   :  { %v5828_v37 = vadd.s32 4294967294, %v5203_v39  ;;  %v2578_v33 = vsel %vm2568_vm12, %v2575_v13, %v2577_v26  ;;  %v2581_v17 = vsel %vm2569_vm13, %v2563_v53, %v2580_v6  ;;  %v2574_v61 = vsel %vm2568_vm12, %v2571_v47, %v2573_v1 }
 0x4f5   :  { %v2582_v48 = vsel %vm2568_vm12, %v2579_v15, %v2581_v17  ;;  %v9956_v19 = vmul.u32.u64.low %v2583_v52, %v2578_v33  ;;  %v9957_v51 = vmul.u32.u64.high %v2583_v52, %v2578_v33, %v9956_v19  ;;  %v5243_v35 = vshrl.u32 %v5242_v9, 23 }
 0x4f6   :  { %vm5829_vm14 = vcmp.lt.s32.totalorder %v5828_v37, 0  ;;  %v9961_v62 = vmul.u32.u64.low %v2583_v52, %v2582_v48  ;;  %v9962_v11 = vmul.u32.u64.high %v2583_v52, %v2582_v48, %v9961_v62  ;;  %vm2530_vm15 = vcmp.eq.s32.totalorder %v9936_v5, 2 }
 0x4f7   :  { %vm9967_vm1 = vcmp.le.f32.partialorder %v5135_v16, 0.7853982  ;;  %v5206_v32 = vsel %vm5829_vm14, 0, %v5828_v37  ;;  %v5830_v12 = vadd.s32 4294967169, %v5243_v35  ;;  %v5191_v59 = vadd.s32 %v9886_v50, %v9891_v56 }
 0x4f8   :  { %v5207_v2 = vsub.s32 32, %v5206_v32  ;;  %v5211_v30 = vsub.s32 4294967266, %v5206_v32  ;;  %v5224_v58 = vsel %vm9967_vm1, 0, %v5222_v36  ;;  %v2590_v18 = vmul.u32 %v2583_v52, %v2574_v61 }
 0x4f9   :  { %v2593_v24 = vadd.s32 1, %v9957_v51  ;;  %v5239_v53 = vand.u32 2147483647, %v9917_v14  ;;  %v5249_v22 = vadd.s32 1, %v5830_v12  ;;  %v5208_v7 = vshll.u32 %v9938_v46, %v5206_v32 }
 0x4fa   :  { %v6225_v16 = vpop.eup %6224  ;;  %v5209_v54 = vshrl.u32 %v5191_v59, %v5207_v2  ;;  %v5212_v8 = vadd.s32 127, %v5211_v30  ;;  %vm2592_vm2 = vc.u32 %v9962_v11, %v9956_v19  ;;  %v5228_v0 = vadd.s32 3, %v5224_v58 }
 0x4fb   :  { %v6227_v50 = vpop.eup %6226  ;;  %v2531_v56 = vxor.u32 2147483648, %v6225_v16  ;;  %v2594_v60 = vsel %vm2592_vm2, %v2593_v24, %v9957_v51  ;;  %vm5250_vm0 = vcmp.gt.s32.totalorder %v5249_v22, 0  ;;  %vm2527_vm3 = vcmp.eq.s32.totalorder %v9936_v5, 0 }
 0x4fc   :  { %v2528_v52 = vxor.u32 2147483648, %v6227_v50  ;;  %v5210_v63 = vor.u32 %v5209_v54, %v5208_v7  ;;  %v5213_v42 = vshll.u32 %v5212_v8, 23  ;;  %v2595_v49 = vadd.s32 %v2594_v60, %v2590_v18 }
 0x4fd   :  { %v2532_v46 = vsel %vm2530_vm15, %v2531_v56, %v6227_v50  ;;  %v5246_v13 = vand.u32 8388607, %v5239_v53  ;;  %v5251_v45 = vsel %vm5250_vm0, %v5249_v22, 0  ;;  %vm2526_vm4 = vcmp.lt.s32.totalorder %v9936_v5, 2 }
 0x4fe   :  { %v2529_v39 = vsel %vm2527_vm3, %v6225_v16, %v2528_v52  ;;  %v5214_v47 = vor.u32 4788187, %v5213_v42  ;;  %v2596_v15 = vadd.s32 536870912, %v2595_v49  ;;  %vm2523_vm6 = vweird.f32 %v9688_v55 }
 0x4ff   :  { %v2533_v1 = vsel %vm2526_vm4, %v2529_v39, %v2532_v46  ;;  %v9988_v26 = vand.u32 3, %v5228_v0  ;;  %v5253_v6 = vand.u32 31, %v5251_v45  ;;  %v5217_v36 = vcvt.s32.f32 %v5210_v63 }
 0x500   :  { %v2534_v9 = vsel %vm2523_vm6, nan, %v2533_v1  ;;  %v5215_v37 = vand.u32 2147483647, %v5214_v47  ;;  %v9990_v33 = vshrl.u32 %v2596_v15, 30  ;;  %v5247_v17 = vor.u32 8388608, %v5246_v13 }
 0x501   :  { %5571 = vst [vmem:[#allocation2 + $0xa0] sm:$0xff] %v2534_v9  ;;  %v5254_v48 = vsub.s32 32, %v5253_v6  ;;  %v5256_v51 = vshll.u32 %v6289_v21, %v5253_v6  ;;  %v2642_v5 = vand.u32 2139095040, %v9922_v28  ;;  %v5259_v55 = vshll.u32 %v6290_v25, %v5253_v6 }
 0x502   :  { %v5218_v35 = vmul.f32 %v5217_v36, %v5215_v37  ;;  %v2598_v61 = vshll.u32 %v9990_v33, 30  ;;  %v5262_v62 = vshll.u32 %v6291_v27, %v5253_v6  ;;  %v5265_v2 = vshll.u32 %v6292_v29, %v5253_v6 }
 0x503   :  { %v5257_v32 = vshrl.u32 %v6290_v25, %v5254_v48  ;;  %v5260_v12 = vshrl.u32 %v6291_v27, %v5254_v48  ;;  %v5263_v59 = vshrl.u32 %v6292_v29, %v5254_v48  ;;  %v5266_v18 = vshrl.u32 %v6293_v31, %v5254_v48 }
 0x504   :  { %v5219_v30 = vxor.u32 2147483648, %v5218_v35  ;;  %v10001_v58 = vsub.s32 %v2595_v49, %v2598_v61  ;;  %v2639_v24 = vand.u32 2147483647, %v9922_v28  ;;  %v5252_v22 = vshrl.u32 %v5251_v45, 5 }
 0x505   :  { %v5258_v16 = vor.u32 %v5257_v32, %v5256_v51  ;;  %v10005_v7 = vshll.u32 %v5247_v17, 8  ;;  %v2643_v54 = vshrl.u32 %v2642_v5, 23  ;;  %v5261_v56 = vor.u32 %v5260_v12, %v5259_v55 }
 0x506   :  { %v5220_v8 = vsel %vm5137_vm10, %v5219_v30, %v5218_v35  ;;  %v2601_v50 = vsub.s32 0, %v10001_v58  ;;  %v5264_v0 = vor.u32 %v5263_v59, %v5262_v62  ;;  %vm2537_vm5 = vcmp.lt.s32.totalorder %v9847_v57, 0 }
 0x507   :  { %v5223_v60 = vsel %vm9967_vm1, %v9762_v3, %v5220_v8  ;;  %v5267_v52 = vor.u32 %v5266_v18, %v5265_v2  ;;  %v5268_v63 = vshll.u32 %v6293_v31, %v5253_v6  ;;  %v5269_v42 = vshrl.u32 %v6294_v38, %v5254_v48 }
 0x508   :  { %6228 = vcosq.f32 %v5223_v60  ;;  %v2591_v49 = vadd.s32 %v9956_v19, %v9962_v11  ;;  %v5727_v46 = vmin.u32 %v2601_v50, %v10001_v58  ;;  %v5255_v13 = vshrl.u32 %v6289_v21, %v5254_v48 }
 0x509   :  { %6230 = vsinq.f32 %v5223_v60  ;;  %v2621_v45 = vsub.s32 4, %v9990_v33  ;;  %v5270_v4 = vor.u32 %v5269_v42, %v5268_v63  ;;  %v5730_v39 = vadd.s32 4294967169, %v2643_v54 }
 0x50a   :  { %vm10023_vm7 = vcmp.le.f32.partialorder %v2535_v34, 0.7853982  ;;  %v2603_v15 = vclz %v5727_v46  ;;  %vm5271_vm8 = vcmp.lt.s32.totalorder %v5252_v22, 1  ;;  %vm5272_vm10 = vcmp.lt.s32.totalorder %v5252_v22, 2 }
 0x50b   :  { %vm5274_vm9 = vcmp.lt.s32.totalorder %v5252_v22, 4  ;;  %vm5273_vm11 = vcmp.lt.s32.totalorder %v5252_v22, 3  ;;  %v5279_v11 = vsel %vm5271_vm8, %v5258_v16, %v5261_v56  ;;  %vm5234_vm12 = vcmp.eq.s32.totalorder %v9988_v26, 2 }
 0x50c   :  { %v5276_v19 = vsel %vm5274_vm9, %v5264_v0, 2102212464  ;;  %v5280_v1 = vsel %vm5274_vm9, %v5267_v52, 920167782  ;;  %v5728_v6 = vadd.s32 4294967294, %v2603_v15  ;;  %v5275_v9 = vsel %vm5271_vm8, %v5255_v13, %v5258_v16 }
 0x50d   :  { %v5281_v37 = vsel %vm5273_vm11, %v5264_v0, %v5280_v1  ;;  %v5283_v36 = vsel %vm5271_vm8, %v5261_v56, %v5264_v0  ;;  %vm5231_vm13 = vcmp.eq.s32.totalorder %v9988_v26, 0  ;;  %v5277_v34 = vsel %vm5273_vm11, %v5261_v56, %v5276_v19 }
 0x50e   :  { %v5282_v17 = vsel %vm5272_vm10, %v5279_v11, %v5281_v37  ;;  %v5284_v48 = vsel %vm5274_vm9, %v5270_v4, 1326507024  ;;  %v2649_v51 = vadd.s32 1, %v5730_v39  ;;  %vm5230_vm14 = vcmp.lt.s32.totalorder %v9988_v26, 2 }
 0x50f   :  { %vm5729_vm15 = vcmp.lt.s32.totalorder %v5728_v6, 0  ;;  %v5285_v5 = vsel %vm5273_vm11, %v5267_v52, %v5284_v48  ;;  %v10035_v35 = vmul.u32.u64.low %v10005_v7, %v5282_v17  ;;  %v10036_v61 = vmul.u32.u64.high %v10005_v7, %v5282_v17, %v10035_v35 }
 0x510   :  { %vm5227_vm1 = vweird.f32 %v9762_v3  ;;  %v2606_v55 = vsel %vm5729_vm15, 0, %v5728_v6  ;;  %v5286_v62 = vsel %vm5272_vm10, %v5283_v36, %v5285_v5  ;;  %v2646_v32 = vand.u32 8388607, %v2639_v24 }
 0x511   :  { %vm2650_vm2 = vcmp.gt.s32.totalorder %v2649_v51, 0  ;;  %v2607_v12 = vsub.s32 32, %v2606_v55  ;;  %v2611_v59 = vsub.s32 4294967266, %v2606_v55  ;;  %v2622_v2 = vsel %vm2537_vm5, %v2621_v45, %v9990_v33 }
 0x512   :  { %v2651_v30 = vsel %vm2650_vm2, %v2649_v51, 0  ;;  %v5278_v18 = vsel %vm5272_vm10, %v5275_v9, %v5277_v34  ;;  %v10048_v16 = vmul.u32.u64.low %v10005_v7, %v5286_v62  ;;  %v10049_v54 = vmul.u32.u64.high %v10005_v7, %v5286_v62, %v10048_v16  ;;  %v6229_v50 = vpop.eup %6228 }
 0x513   :  { %v2653_v8 = vand.u32 31, %v2651_v30  ;;  %v2608_v56 = vshll.u32 %v10001_v58, %v2606_v55  ;;  %v2609_v0 = vshrl.u32 %v2591_v49, %v2607_v12  ;;  %v2612_v60 = vadd.s32 127, %v2611_v59  ;;  %v6231_v63 = vpop.eup %6230 }
 0x514   :  { %v5297_v52 = vadd.s32 1, %v10036_v61  ;;  %v5235_v42 = vxor.u32 2147483648, %v6229_v50  ;;  %v2624_v33 = vsel %vm10023_vm7, 0, %v2622_v2  ;;  %v2647_v46 = vor.u32 8388608, %v2646_v32 }
 0x515   :  { %v2654_v22 = vsub.s32 32, %v2653_v8  ;;  %v5232_v13 = vxor.u32 2147483648, %v6231_v63  ;;  %v2610_v45 = vor.u32 %v2609_v0, %v2608_v56  ;;  %v2613_v4 = vshll.u32 %v2612_v60, 23 }
 0x516   :  { %v5294_v39 = vmul.u32 %v10005_v7, %v5278_v18  ;;  %v5236_v15 = vsel %vm5234_vm12, %v5235_v42, %v6231_v63  ;;  %vm5296_vm0 = vc.u32 %v10049_v54, %v10035_v35  ;;  %v10060_v58 = vshrl.u32 %v2651_v30, 5 }
 0x517   :  { %v2656_v49 = vshll.u32 %v6289_v21, %v2653_v8  ;;  %v5233_v19 = vsel %vm5231_vm13, %v6229_v50, %v5232_v13  ;;  %v2614_v11 = vor.u32 4788187, %v2613_v4  ;;  %v5298_v1 = vsel %vm5296_vm0, %v5297_v52, %v10036_v61 }
 0x518   :  { %v2659_v6 = vshll.u32 %v6290_v25, %v2653_v8  ;;  %v5237_v7 = vsel %vm5230_vm14, %v5233_v19, %v5236_v15  ;;  %v5299_v9 = vadd.s32 %v5298_v1, %v5294_v39  ;;  %v2657_v37 = vshrl.u32 %v6290_v25, %v2654_v22 }
 0x519   :  { %v2660_v36 = vshrl.u32 %v6291_v27, %v2654_v22  ;;  %v5238_v34 = vsel %vm5227_vm1, nan, %v5237_v7  ;;  %v2615_v17 = vand.u32 2147483647, %v2614_v11  ;;  %v2617_v48 = vcvt.s32.f32 %v2610_v45 }
 0x51a   :  { %v2663_v51 = vshrl.u32 %v6292_v29, %v2654_v22  ;;  %5597 = vst [vmem:[#allocation2 + $0x170] sm:$0xff] %v5238_v34  ;;  %v5300_v5 = vadd.s32 536870912, %v5299_v9  ;;  %v2662_v61 = vshll.u32 %v6291_v27, %v2653_v8  ;;  %v2665_v55 = vshll.u32 %v6292_v29, %v2653_v8 }
 0x51b   :  { %v2666_v26 = vshrl.u32 %v6293_v31, %v2654_v22  ;;  %v2618_v62 = vmul.f32 %v2617_v48, %v2615_v17  ;;  %v2658_v32 = vor.u32 %v2657_v37, %v2656_v49  ;;  %v2661_v12 = vor.u32 %v2660_v36, %v2659_v6 }
 0x51c   :  { %v2669_v59 = vshrl.u32 %v6294_v38, %v2654_v22  ;;  %v5301_v2 = vshrl.u32 %v5300_v5, 30  ;;  %v2628_v18 = vadd.s32 3, %v2624_v33  ;;  %v2664_v16 = vor.u32 %v2663_v51, %v2662_v61 }
 0x51d   :  { %v2667_v3 = vor.u32 %v2666_v26, %v2665_v55  ;;  %v2619_v30 = vxor.u32 2147483648, %v2618_v62  ;;  %v2668_v50 = vshll.u32 %v6293_v31, %v2653_v8  ;;  %vm2671_vm3 = vcmp.lt.s32.totalorder %v10060_v58, 1 }
 0x51e   :  { %v5302_v56 = vshll.u32 %v5301_v2, 30  ;;  %vm2674_vm4 = vcmp.lt.s32.totalorder %v10060_v58, 4  ;;  %v10081_v0 = vshll.u32 %v2647_v46, 8  ;;  %v2679_v63 = vsel %vm2671_vm3, %v2658_v32, %v2661_v12 }
 0x51f   :  { %v2620_v60 = vsel %vm2537_vm5, %v2619_v30, %v2618_v62  ;;  %v2670_v52 = vor.u32 %v2669_v59, %v2668_v50  ;;  %v2680_v42 = vsel %vm2674_vm4, %v2667_v3, 920167782  ;;  %v2655_v13 = vshrl.u32 %v6289_v21, %v2654_v22 }
 0x520   :  { %v2623_v8 = vsel %vm10023_vm7, %v9847_v57, %v2620_v60  ;;  %v10092_v33 = vsub.s32 %v5299_v9, %v5302_v56  ;;  %vm2673_vm6 = vcmp.lt.s32.totalorder %v10060_v58, 3  ;;  %vm2672_vm5 = vcmp.lt.s32.totalorder %v10060_v58, 2 }
 0x521   :  { %6232 = vcosq.f32 %v2623_v8  ;;  %v2676_v46 = vsel %vm2674_vm4, %v2664_v16, 2102212464  ;;  %v2681_v45 = vsel %vm2673_vm6, %v2664_v16, %v2680_v42  ;;  %v2683_v22 = vsel %vm2671_vm3, %v2661_v12, %v2664_v16 }
 0x522   :  { %6234 = vsinq.f32 %v2623_v8  ;;  %v5305_v4 = vsub.s32 0, %v10092_v33  ;;  %v2682_v47 = vsel %vm2672_vm5, %v2679_v63, %v2681_v45  ;;  %v5325_v39 = vsub.s32 4, %v5301_v2 }
 0x523   :  { %v2684_v15 = vsel %vm2674_vm4, %v2670_v52, 1326507024  ;;  %v10109_v49 = vmul.u32.u64.low %v10081_v0, %v2682_v47  ;;  %v10110_v19 = vmul.u32.u64.high %v10081_v0, %v2682_v47, %v10109_v49  ;;  %v2629_v11 = vand.u32 3, %v2628_v18 }
 0x524   :  { %v5831_v1 = vmin.u32 %v5305_v4, %v10092_v33  ;;  %v2685_v6 = vsel %vm2673_vm6, %v2667_v3, %v2684_v15  ;;  %v2675_v7 = vsel %vm2671_vm3, %v2655_v13, %v2658_v32  ;;  %v2677_v9 = vsel %vm2673_vm6, %v2661_v12, %v2676_v46 }
 0x525   :  { %v2686_v37 = vsel %vm2672_vm5, %v2683_v22, %v2685_v6  ;;  %v10124_v36 = vadd.f32 %v9697_v23, %v6470_v43  ;;  %vm5241_vm7 = vcmp.lt.s32.totalorder %v9917_v14, 0  ;;  %vm2627_vm8 = vweird.f32 %v9847_v57 }
 0x526   :  { %v5307_v34 = vclz %v5831_v1  ;;  %v5326_v17 = vsel %vm5241_vm7, %v5325_v39, %v5301_v2  ;;  %v10130_v48 = vmul.u32.u64.low %v10081_v0, %v2686_v37  ;;  %v10131_v51 = vmul.u32.u64.high %v10081_v0, %v2686_v37, %v10130_v48 }
 0x527   :  { %vm10136_vm10 = vcmp.le.f32.partialorder %v5239_v53, 0.7853982  ;;  %v2678_v61 = vsel %vm2672_vm5, %v2675_v7, %v2677_v9  ;;  %v5346_v55 = vand.u32 2139095040, %v10124_v36  ;;  %vm2630_vm9 = vcmp.lt.s32.totalorder %v2629_v11, 2 }
 0x528   :  { %v5832_v23 = vadd.s32 4294967294, %v5307_v34  ;;  %vm2631_vm11 = vcmp.eq.s32.totalorder %v2629_v11, 0  ;;  %vm2634_vm12 = vcmp.eq.s32.totalorder %v2629_v11, 2  ;;  %v2697_v26 = vadd.s32 1, %v10110_v19 }
 0x529   :  { %v5295_v62 = vadd.s32 %v10035_v35, %v10049_v54  ;;  %v5328_v53 = vsel %vm10136_vm10, 0, %v5326_v17  ;;  %v5347_v32 = vshrl.u32 %v5346_v55, 23  ;;  %v2694_v58 = vmul.u32 %v10081_v0, %v2678_v61 }
 0x52a   :  { %vm5833_vm13 = vcmp.lt.s32.totalorder %v5832_v23, 0  ;;  %vm2696_vm14 = vc.u32 %v10131_v51, %v10109_v49  ;;  %v10153_v2 = vadd.f32 %v9733_v40, %v6472_v44  ;;  %v5343_v54 = vand.u32 2147483647, %v10124_v36 }
 0x52b   :  { %v6233_v12 = vpop.eup %6232  ;;  %v5310_v59 = vsel %vm5833_vm13, 0, %v5832_v23  ;;  %v2698_v56 = vsel %vm2696_vm14, %v2697_v26, %v10110_v19  ;;  %v5834_v60 = vadd.s32 4294967169, %v5347_v32  ;;  %v5332_v8 = vadd.s32 3, %v5328_v53 }
 0x52c   :  { %v6235_v3 = vpop.eup %6234  ;;  %v2635_v30 = vxor.u32 2147483648, %v6233_v12  ;;  %v5311_v18 = vsub.s32 32, %v5310_v59  ;;  %v5315_v35 = vsub.s32 4294967266, %v5310_v59  ;;  %v5312_v50 = vshll.u32 %v10092_v33, %v5310_v59 }
 0x52d   :  { %v2632_v16 = vxor.u32 2147483648, %v6235_v3  ;;  %v2699_v42 = vadd.s32 %v2698_v56, %v2694_v58  ;;  %v5353_v13 = vadd.s32 1, %v5834_v60  ;;  %v2746_v46 = vand.u32 2139095040, %v10153_v2 }
 0x52e   :  { %v2636_v0 = vsel %vm2634_vm12, %v2635_v30, %v6235_v3  ;;  %v5313_v52 = vshrl.u32 %v5295_v62, %v5311_v18  ;;  %v5316_v63 = vadd.s32 127, %v5315_v35  ;;  %v5350_v39 = vand.u32 8388607, %v5343_v54 }
 0x52f   :  { %v2633_v40 = vsel %vm2631_vm11, %v6233_v12, %v2632_v16  ;;  %v2700_v22 = vadd.s32 536870912, %v2699_v42  ;;  %vm5354_vm15 = vcmp.gt.s32.totalorder %v5353_v13, 0  ;;  %v10166_v6 = vand.u32 3, %v5332_v8 }
 0x530   :  { %v2637_v45 = vsel %vm2630_vm9, %v2633_v40, %v2636_v0  ;;  %v5314_v4 = vor.u32 %v5313_v52, %v5312_v50  ;;  %v5317_v47 = vshll.u32 %v5316_v63, 23  ;;  %v5355_v1 = vsel %vm5354_vm15, %v5353_v13, 0 }
 0x531   :  { %v2638_v33 = vsel %vm2627_vm8, nan, %v2637_v45  ;;  %v2701_v19 = vshrl.u32 %v2700_v22, 30  ;;  %v5357_v7 = vand.u32 31, %v5355_v1  ;;  %vm2641_vm1 = vcmp.lt.s32.totalorder %v9922_v28, 0 }
 0x532   :  { %5572 = vst [vmem:[#allocation2 + $0xa8] sm:$0xff] %v2638_v33  ;;  %v5318_v15 = vor.u32 4788187, %v5317_v47  ;;  %v5321_v11 = vcvt.s32.f32 %v5314_v4  ;;  %v2747_v34 = vshrl.u32 %v2746_v46, 23  ;;  %v2695_v57 = vadd.s32 %v10109_v49, %v10131_v51 }
 0x533   :  { %v2702_v37 = vshll.u32 %v2701_v19, 30  ;;  %v5351_v17 = vor.u32 8388608, %v5350_v39  ;;  %v5358_v48 = vsub.s32 32, %v5357_v7  ;;  %v2743_v23 = vand.u32 2147483647, %v10153_v2 }
 0x534   :  { %v5319_v9 = vand.u32 2147483647, %v5318_v15  ;;  %v5360_v26 = vshll.u32 %v6289_v21, %v5357_v7  ;;  %v5363_v62 = vshll.u32 %v6290_v25, %v5357_v7  ;;  %v5366_v12 = vshll.u32 %v6291_v27, %v5357_v7 }
 0x535   :  { %v10172_v55 = vsub.s32 %v2699_v42, %v2702_v37  ;;  %v5361_v53 = vshrl.u32 %v6290_v25, %v5358_v48  ;;  %v5364_v32 = vshrl.u32 %v6291_v27, %v5358_v48  ;;  %v5369_v59 = vshll.u32 %v6292_v29, %v5357_v7 }
 0x536   :  { %v5322_v61 = vmul.f32 %v5321_v11, %v5319_v9  ;;  %v5367_v58 = vshrl.u32 %v6292_v29, %v5358_v48  ;;  %v5734_v3 = vadd.s32 4294967169, %v2747_v34  ;;  %v2725_v30 = vsub.s32 4, %v2701_v19 }
 0x537   :  { %v2705_v51 = vsub.s32 0, %v10172_v55  ;;  %v5356_v18 = vshrl.u32 %v5355_v1, 5  ;;  %v5370_v35 = vshrl.u32 %v6293_v31, %v5358_v48  ;;  %v5372_v16 = vshll.u32 %v6293_v31, %v5357_v7 }
 0x538   :  { %v5323_v49 = vxor.u32 2147483648, %v5322_v61  ;;  %v5362_v60 = vor.u32 %v5361_v53, %v5360_v26  ;;  %v5365_v0 = vor.u32 %v5364_v32, %v5363_v62  ;;  %v5368_v63 = vor.u32 %v5367_v58, %v5366_v12 }
 0x539   :  { %v5731_v56 = vmin.u32 %v2705_v51, %v10172_v55  ;;  %v5371_v42 = vor.u32 %v5370_v35, %v5369_v59  ;;  %v5373_v40 = vshrl.u32 %v6294_v38, %v5358_v48  ;;  %v5391_v13 = vshll.u32 %v5351_v17, 8 }
 0x53a   :  { %v5324_v50 = vsel %vm5241_vm7, %v5323_v49, %v5322_v61  ;;  %v2753_v46 = vadd.s32 1, %v5734_v3  ;;  %v2726_v45 = vsel %vm2641_vm1, %v2725_v30, %v2701_v19  ;;  %v5359_v4 = vshrl.u32 %v6289_v21, %v5358_v48 }
 0x53b   :  { %v5327_v52 = vsel %vm10136_vm10, %v9917_v14, %v5324_v50  ;;  %v2707_v8 = vclz %v5731_v56  ;;  %v5374_v47 = vor.u32 %v5373_v40, %v5372_v16  ;;  %vm10196_vm2 = vcmp.le.f32.partialorder %v2639_v24, 0.7853982 }
 0x53c   :  { %6236 = vcosq.f32 %v5327_v52  ;;  %vm5375_vm0 = vcmp.lt.s32.totalorder %v5356_v18, 1  ;;  %vm5377_vm3 = vcmp.lt.s32.totalorder %v5356_v18, 3  ;;  %vm5378_vm4 = vcmp.lt.s32.totalorder %v5356_v18, 4 }
 0x53d   :  { %6238 = vsinq.f32 %v5327_v52  ;;  %v5732_v22 = vadd.s32 4294967294, %v2707_v8  ;;  %v5380_v33 = vsel %vm5378_vm4, %v5368_v63, 2102212464  ;;  %v5383_v39 = vsel %vm5375_vm0, %v5362_v60, %v5365_v0 }
 0x53e   :  { %v5384_v15 = vsel %vm5378_vm4, %v5371_v42, 920167782  ;;  %v5387_v1 = vsel %vm5375_vm0, %v5365_v0, %v5368_v63  ;;  %vm5376_vm5 = vcmp.lt.s32.totalorder %v5356_v18, 2  ;;  %v5388_v7 = vsel %vm5378_vm4, %v5374_v47, 1326507024 }
 0x53f   :  { %vm5733_vm6 = vcmp.lt.s32.totalorder %v5732_v22, 0  ;;  %v5385_v19 = vsel %vm5377_vm3, %v5368_v63, %v5384_v15  ;;  %v5379_v11 = vsel %vm5375_vm0, %v5359_v4, %v5362_v60  ;;  %v5389_v37 = vsel %vm5377_vm3, %v5371_v42, %v5388_v7 }
 0x540   :  { %v2710_v9 = vsel %vm5733_vm6, 0, %v5732_v22  ;;  %v5386_v24 = vsel %vm5376_vm5, %v5383_v39, %v5385_v19  ;;  %v5381_v48 = vsel %vm5377_vm3, %v5365_v0, %v5380_v33  ;;  %v5390_v61 = vsel %vm5376_vm5, %v5387_v1, %v5389_v37 }
 0x541   :  { %v2711_v34 = vsub.s32 32, %v2710_v9  ;;  %v2715_v17 = vsub.s32 4294967266, %v2710_v9  ;;  %vm5331_vm7 = vweird.f32 %v9917_v14  ;;  %v2712_v12 = vshll.u32 %v10172_v55, %v2710_v9 }
 0x542   :  { %v10206_v26 = vmul.u32.u64.low %v5391_v13, %v5390_v61  ;;  %v10207_v62 = vmul.u32.u64.high %v5391_v13, %v5390_v61, %v10206_v26  ;;  %v10209_v53 = vmul.u32.u64.low %v5391_v13, %v5386_v24  ;;  %v10210_v32 = vmul.u32.u64.high %v5391_v13, %v5386_v24, %v10209_v53 }
 0x543   :  { %v2713_v59 = vshrl.u32 %v2695_v57, %v2711_v34  ;;  %v2716_v49 = vadd.s32 127, %v2715_v17  ;;  %vm2754_vm8 = vcmp.gt.s32.totalorder %v2753_v46, 0  ;;  %vm5334_vm10 = vcmp.lt.s32.totalorder %v10166_v6, 2 }
 0x544   :  { %v5382_v51 = vsel %vm5376_vm5, %v5379_v11, %v5381_v48  ;;  %v2750_v58 = vand.u32 8388607, %v2743_v23  ;;  %v2755_v3 = vsel %vm2754_vm8, %v2753_v46, 0  ;;  %vm5338_vm9 = vcmp.eq.s32.totalorder %v10166_v6, 2 }
 0x545   :  { %v2714_v35 = vor.u32 %v2713_v59, %v2712_v12  ;;  %v2717_v16 = vshll.u32 %v2716_v49, 23  ;;  %v2757_v50 = vand.u32 31, %v2755_v3  ;;  %v2728_v57 = vsel %vm10196_vm2, 0, %v2726_v45 }
 0x546   :  { %v6237_v30 = vpop.eup %6236  ;;  %vm5400_vm11 = vc.u32 %v10207_v62, %v10209_v53  ;;  %v5401_v55 = vadd.s32 1, %v10210_v32  ;;  %v5398_v52 = vmul.u32 %v5391_v13, %v5382_v51  ;;  %vm5335_vm12 = vcmp.eq.s32.totalorder %v10166_v6, 0 }
 0x547   :  { %v6239_v56 = vpop.eup %6238  ;;  %v5339_v60 = vxor.u32 2147483648, %v6237_v30  ;;  %v2718_v0 = vor.u32 4788187, %v2717_v16  ;;  %v2758_v63 = vsub.s32 32, %v2757_v50  ;;  %v2751_v8 = vor.u32 8388608, %v2750_v58 }
 0x548   :  { %v5336_v18 = vxor.u32 2147483648, %v6239_v56  ;;  %v5402_v40 = vsel %vm5400_vm11, %v5401_v55, %v10210_v32  ;;  %v2721_v47 = vcvt.s32.f32 %v2714_v35  ;;  %v2732_v33 = vadd.s32 3, %v2728_v57 }
 0x549   :  { %v5340_v42 = vsel %vm5338_vm9, %v5339_v60, %v6239_v56  ;;  %v2719_v4 = vand.u32 2147483647, %v2718_v0  ;;  %v5403_v22 = vadd.s32 %v5402_v40, %v5398_v52  ;;  %v2761_v39 = vshrl.u32 %v6290_v25, %v2758_v63 }
 0x54a   :  { %v5337_v46 = vsel %vm5335_vm12, %v6237_v30, %v5336_v18  ;;  %v2764_v15 = vshrl.u32 %v6291_v27, %v2758_v63  ;;  %v2756_v7 = vshrl.u32 %v2755_v3, 5  ;;  %v2760_v9 = vshll.u32 %v6289_v21, %v2757_v50 }
 0x54b   :  { %v5341_v45 = vsel %vm5334_vm10, %v5337_v46, %v5340_v42  ;;  %v2722_v1 = vmul.f32 %v2721_v47, %v2719_v4  ;;  %v5404_v19 = vadd.s32 536870912, %v5403_v22  ;;  %v2763_v11 = vshll.u32 %v6290_v25, %v2757_v50 }
 0x54c   :  { %v5342_v13 = vsel %vm5331_vm7, nan, %v5341_v45  ;;  %v2767_v24 = vshrl.u32 %v6292_v29, %v2758_v63  ;;  %v2770_v6 = vshrl.u32 %v6293_v31, %v2758_v63  ;;  %v2766_v17 = vshll.u32 %v6291_v27, %v2757_v50 }
 0x54d   :  { %5598 = vst [vmem:[#allocation2 + $0x178] sm:$0xff] %v5342_v13  ;;  %v2723_v37 = vxor.u32 2147483648, %v2722_v1  ;;  %v5405_v34 = vshrl.u32 %v5404_v19, 30  ;;  %v2769_v48 = vshll.u32 %v6292_v29, %v2757_v50  ;;  %v2762_v14 = vor.u32 %v2761_v39, %v2760_v9 }
 0x54e   :  { %v2765_v61 = vor.u32 %v2764_v15, %v2763_v11  ;;  %v2772_v26 = vshll.u32 %v6293_v31, %v2757_v50  ;;  %v2773_v32 = vshrl.u32 %v6294_v38, %v2758_v63  ;;  %v10244_v51 = vadd.f32 %v9800_v20, %v6472_v44 }
 0x54f   :  { %v2724_v12 = vsel %vm2641_vm1, %v2723_v37, %v2722_v1  ;;  %v5406_v59 = vshll.u32 %v5405_v34, 30  ;;  %v2771_v49 = vor.u32 %v2770_v6, %v2769_v48  ;;  %v10249_v3 = vand.u32 3, %v2732_v33 }
 0x550   :  { %v2727_v58 = vsel %vm10196_vm2, %v9922_v28, %v2724_v12  ;;  %v2768_v30 = vor.u32 %v2767_v24, %v2766_v17  ;;  %v2774_v35 = vor.u32 %v2773_v32, %v2772_v26  ;;  %vm2775_vm13 = vcmp.lt.s32.totalorder %v2756_v7, 1 }
 0x551   :  { %6240 = vcosq.f32 %v2727_v58  ;;  %v10251_v16 = vsub.s32 %v5403_v22, %v5406_v59  ;;  %v2791_v50 = vshll.u32 %v2751_v8, 8  ;;  %vm2776_vm14 = vcmp.lt.s32.totalorder %v2756_v7, 2 }
 0x552   :  { %6242 = vsinq.f32 %v2727_v58  ;;  %vm2778_vm15 = vcmp.lt.s32.totalorder %v2756_v7, 4  ;;  %v2783_v56 = vsel %vm2775_vm13, %v2762_v14, %v2765_v61  ;;  %v5429_v60 = vsub.s32 4, %v5405_v34 }
 0x553   :  { %v5409_v20 = vsub.s32 0, %v10251_v16  ;;  %vm2777_vm1 = vcmp.lt.s32.totalorder %v2756_v7, 3  ;;  %v2784_v5 = vsel %vm2778_vm15, %v2771_v49, 920167782  ;;  %v2780_v57 = vsel %vm2778_vm15, %v2768_v30, 2102212464 }
 0x554   :  { %v2785_v55 = vsel %vm2777_vm1, %v2768_v30, %v2784_v5  ;;  %v2787_v18 = vsel %vm2775_vm13, %v2765_v61, %v2768_v30  ;;  %v2788_v0 = vsel %vm2778_vm15, %v2774_v35, 1326507024  ;;  %v2759_v42 = vshrl.u32 %v6289_v21, %v2758_v63 }
 0x555   :  { %v5835_v52 = vmin.u32 %v5409_v20, %v10251_v16  ;;  %v2786_v40 = vsel %vm2776_vm14, %v2783_v56, %v2785_v55  ;;  %v2789_v8 = vsel %vm2777_vm1, %v2771_v49, %v2788_v0  ;;  %v5450_v22 = vand.u32 2139095040, %v10244_v51 }
 0x556   :  { %v2790_v46 = vsel %vm2776_vm14, %v2787_v18, %v2789_v8  ;;  %v10262_v4 = vmul.u32.u64.low %v2791_v50, %v2786_v40  ;;  %v10263_v47 = vmul.u32.u64.high %v2791_v50, %v2786_v40, %v10262_v4  ;;  %vm5345_vm2 = vcmp.lt.s32.totalorder %v10124_v36, 0 }
 0x557   :  { %v5411_v45 = vclz %v5835_v52  ;;  %v2779_v33 = vsel %vm2775_vm13, %v2759_v42, %v2762_v14  ;;  %v2781_v39 = vsel %vm2777_vm1, %v2765_v61, %v2780_v57  ;;  %vm2731_vm0 = vweird.f32 %v9922_v28 }
 0x558   :  { %v5430_v63 = vsel %vm5345_vm2, %v5429_v60, %v5405_v34  ;;  %v10272_v15 = vmul.u32.u64.low %v2791_v50, %v2790_v46  ;;  %v10273_v13 = vmul.u32.u64.high %v2791_v50, %v2790_v46, %v10272_v15  ;;  %v5451_v1 = vshrl.u32 %v5450_v22, 23 }
 0x559   :  { %vm2734_vm3 = vcmp.lt.s32.totalorder %v10249_v3, 2  ;;  %vm10278_vm4 = vcmp.le.f32.partialorder %v5343_v54, 0.7853982  ;;  %v5836_v9 = vadd.s32 4294967294, %v5411_v45  ;;  %v5447_v11 = vand.u32 2147483647, %v10244_v51 }
 0x55a   :  { %vm2735_vm6 = vcmp.eq.s32.totalorder %v10249_v3, 0  ;;  %v2782_v24 = vsel %vm2776_vm14, %v2779_v33, %v2781_v39  ;;  %v2801_v6 = vadd.s32 1, %v10263_v47  ;;  %v5838_v37 = vadd.s32 4294967169, %v5451_v1 }
 0x55b   :  { %v6241_v34 = vpop.eup %6240  ;;  %vm2738_vm5 = vcmp.eq.s32.totalorder %v10249_v3, 2  ;;  %v5399_v17 = vadd.s32 %v10209_v53, %v10207_v62  ;;  %vm5837_vm7 = vcmp.lt.s32.totalorder %v5836_v9, 0  ;;  %v5432_v54 = vsel %vm10278_vm4, 0, %v5430_v63 }
 0x55c   :  { %v6243_v48 = vpop.eup %6242  ;;  %v2739_v14 = vxor.u32 2147483648, %v6241_v34  ;;  %v5414_v61 = vsel %vm5837_vm7, 0, %v5836_v9  ;;  %vm2800_vm8 = vc.u32 %v10273_v13, %v10262_v4  ;;  %v10294_v7 = vadd.f32 %v9904_v10, %v6470_v43 }
 0x55d   :  { %v2736_v26 = vxor.u32 2147483648, %v6243_v48  ;;  %v5415_v32 = vsub.s32 32, %v5414_v61  ;;  %v5419_v12 = vsub.s32 4294967266, %v5414_v61  ;;  %v2798_v59 = vmul.u32 %v2791_v50, %v2782_v24 }
 0x55e   :  { %v2740_v49 = vsel %vm2738_vm5, %v2739_v14, %v6243_v48  ;;  %v5416_v62 = vshll.u32 %v10251_v16, %v5414_v61  ;;  %v2802_v53 = vsel %vm2800_vm8, %v2801_v6, %v10263_v47  ;;  %v5457_v58 = vadd.s32 1, %v5838_v37 }
 0x55f   :  { %v2737_v30 = vsel %vm2735_vm6, %v6241_v34, %v2736_v26  ;;  %v5417_v35 = vshrl.u32 %v5399_v17, %v5415_v32  ;;  %v5420_v56 = vadd.s32 127, %v5419_v12  ;;  %v2803_v20 = vadd.s32 %v2802_v53, %v2798_v59 }
 0x560   :  { %v2741_v43 = vsel %vm2734_vm3, %v2737_v30, %v2740_v49  ;;  %v5436_v10 = vadd.s32 3, %v5432_v54  ;;  %vm5458_vm10 = vcmp.gt.s32.totalorder %v5457_v58, 0  ;;  %v2850_v60 = vand.u32 2139095040, %v10294_v7 }
 0x561   :  { %v2742_v50 = vsel %vm2731_vm0, nan, %v2741_v43  ;;  %v5418_v16 = vor.u32 %v5417_v35, %v5416_v62  ;;  %v5421_v5 = vshll.u32 %v5420_v56, 23  ;;  %v2804_v57 = vadd.s32 536870912, %v2803_v20 }
 0x562   :  { %5573 = vst [vmem:[#allocation2 + $0xb0] sm:$0xff] %v2742_v50  ;;  %v5454_v55 = vand.u32 8388607, %v5447_v11  ;;  %v5459_v18 = vsel %vm5458_vm10, %v5457_v58, 0  ;;  %v10307_v42 = vand.u32 3, %v5436_v10  ;;  %v2851_v47 = vshrl.u32 %v2850_v60, 23 }
 0x563   :  { %v5422_v0 = vor.u32 4788187, %v5421_v5  ;;  %v2805_v52 = vshrl.u32 %v2804_v57, 30  ;;  %v5461_v3 = vand.u32 31, %v5459_v18  ;;  %v5425_v8 = vcvt.s32.f32 %v5418_v16 }
 0x564   :  { %v10310_v28 = vadd.s32 %v10262_v4, %v10273_v13  ;;  %v5455_v22 = vor.u32 8388608, %v5454_v55  ;;  %v2847_v33 = vand.u32 2147483647, %v10294_v7  ;;  %vm2745_vm9 = vcmp.lt.s32.totalorder %v10153_v2, 0 }
 0x565   :  { %v5423_v40 = vand.u32 2147483647, %v5422_v0  ;;  %v2806_v46 = vshll.u32 %v2805_v52, 30  ;;  %v5462_v45 = vsub.s32 32, %v5461_v3  ;;  %v5464_v15 = vshll.u32 %v6289_v21, %v5461_v3 }
 0x566   :  { %v5467_v1 = vshll.u32 %v6290_v25, %v5461_v3  ;;  %v5470_v6 = vshll.u32 %v6291_v27, %v5461_v3  ;;  %v5473_v4 = vshll.u32 %v6292_v29, %v5461_v3  ;;  %v5738_v17 = vadd.s32 4294967169, %v2851_v47 }
 0x567   :  { %v5426_v39 = vmul.f32 %v5425_v8, %v5423_v40  ;;  %v10313_v63 = vsub.s32 %v2803_v20, %v2806_v46  ;;  %v5465_v9 = vshrl.u32 %v6290_v25, %v5462_v45  ;;  %v5468_v24 = vshrl.u32 %v6291_v27, %v5462_v45 }
 0x568   :  { %v5471_v34 = vshrl.u32 %v6292_v29, %v5462_v45  ;;  %v5460_v54 = vshrl.u32 %v5459_v18, 5  ;;  %v5474_v48 = vshrl.u32 %v6293_v31, %v5462_v45  ;;  %v5476_v14 = vshll.u32 %v6293_v31, %v5461_v3 }
 0x569   :  { %v5427_v13 = vxor.u32 2147483648, %v5426_v39  ;;  %v2809_v37 = vsub.s32 0, %v10313_v63  ;;  %v10326_v61 = vshll.u32 %v5455_v22, 8  ;;  %v5466_v12 = vor.u32 %v5465_v9, %v5464_v15 }
 0x56a   :  { %v5469_v59 = vor.u32 %v5468_v24, %v5467_v1  ;;  %v5472_v62 = vor.u32 %v5471_v34, %v5470_v6  ;;  %v5475_v53 = vor.u32 %v5474_v48, %v5473_v4  ;;  %v5477_v58 = vshrl.u32 %v6294_v38, %v5462_v45 }
 0x56b   :  { %v5428_v26 = vsel %vm5345_vm2, %v5427_v13, %v5426_v39  ;;  %v5735_v32 = vmin.u32 %v2809_v37, %v10313_v63  ;;  %v2829_v35 = vsub.s32 4, %v2805_v52  ;;  %v2857_v56 = vadd.s32 1, %v5738_v17 }
 0x56c   :  { %v5431_v49 = vsel %vm10278_vm4, %v10124_v36, %v5428_v26  ;;  %v5463_v20 = vshrl.u32 %v6289_v21, %v5462_v45  ;;  %v5478_v43 = vor.u32 %v5477_v58, %v5476_v14  ;;  %vm5479_vm11 = vcmp.lt.s32.totalorder %v5460_v54, 1 }
 0x56d   :  { %6244 = vcosq.f32 %v5431_v49  ;;  %v2811_v30 = vclz %v5735_v32  ;;  %vm10338_vm12 = vcmp.le.f32.partialorder %v2743_v23, 0.7853982  ;;  %vm5481_vm13 = vcmp.lt.s32.totalorder %v5460_v54, 3 }
 0x56e   :  { %6246 = vsinq.f32 %v5431_v49  ;;  %vm5482_vm14 = vcmp.lt.s32.totalorder %v5460_v54, 4  ;;  %v5487_v60 = vsel %vm5479_vm11, %v5466_v12, %v5469_v59  ;;  %v5491_v5 = vsel %vm5479_vm11, %v5469_v59, %v5472_v62 }
 0x56f   :  { %v5736_v19 = vadd.s32 4294967294, %v2811_v30  ;;  %v5484_v50 = vsel %vm5482_vm14, %v5472_v62, 2102212464  ;;  %v5488_v16 = vsel %vm5482_vm14, %v5475_v53, 920167782  ;;  %vm5480_vm1 = vcmp.lt.s32.totalorder %v5460_v54, 2 }
 0x570   :  { %v5492_v57 = vsel %vm5482_vm14, %v5478_v43, 1326507024  ;;  %v5489_v55 = vsel %vm5481_vm13, %v5472_v62, %v5488_v16  ;;  %v2830_v0 = vsel %vm2745_vm9, %v2829_v35, %v2805_v52  ;;  %vm5438_vm2 = vcmp.lt.s32.totalorder %v10307_v42, 2 }
 0x571   :  { %vm5737_vm15 = vcmp.lt.s32.totalorder %v5736_v19, 0  ;;  %v5493_v18 = vsel %vm5481_vm13, %v5475_v53, %v5492_v57  ;;  %v5490_v3 = vsel %vm5480_vm1, %v5487_v60, %v5489_v55  ;;  %v5483_v47 = vsel %vm5479_vm11, %v5463_v20, %v5466_v12 }
 0x572   :  { %v2814_v23 = vsel %vm5737_vm15, 0, %v5736_v19  ;;  %v5494_v40 = vsel %vm5480_vm1, %v5491_v5, %v5493_v18  ;;  %v5485_v22 = vsel %vm5481_vm13, %v5469_v59, %v5484_v50  ;;  %vm5435_vm0 = vweird.f32 %v10124_v36 }
 0x573   :  { %v2815_v8 = vsub.s32 32, %v2814_v23  ;;  %v2819_v46 = vsub.s32 4294967266, %v2814_v23  ;;  %v10355_v45 = vmul.u32.u64.low %v10326_v61, %v5494_v40  ;;  %v10356_v39 = vmul.u32.u64.high %v10326_v61, %v5494_v40, %v10355_v45 }
 0x574   :  { %v10359_v52 = vmul.u32.u64.low %v10326_v61, %v5490_v3  ;;  %v10360_v15 = vmul.u32.u64.high %v10326_v61, %v5490_v3, %v10359_v52  ;;  %v2816_v1 = vshll.u32 %v10313_v63, %v2814_v23  ;;  %vm2858_vm3 = vcmp.gt.s32.totalorder %v2857_v56, 0 }
 0x575   :  { %v2817_v9 = vshrl.u32 %v10310_v28, %v2815_v8  ;;  %v2820_v24 = vadd.s32 127, %v2819_v46  ;;  %vm5439_vm4 = vcmp.eq.s32.totalorder %v10307_v42, 0  ;;  %v5486_v6 = vsel %vm5480_vm1, %v5483_v47, %v5485_v22 }
 0x576   :  { %v2854_v4 = vand.u32 8388607, %v2847_v33  ;;  %v2859_v13 = vsel %vm2858_vm3, %v2857_v56, 0  ;;  %vm5442_vm6 = vcmp.eq.s32.totalorder %v10307_v42, 2  ;;  %v2832_v28 = vsel %vm10338_vm12, 0, %v2830_v0 }
 0x577   :  { %v6245_v37 = vpop.eup %6244  ;;  %v2818_v34 = vor.u32 %v2817_v9, %v2816_v1  ;;  %v2821_v17 = vshll.u32 %v2820_v24, 23  ;;  %v2861_v48 = vand.u32 31, %v2859_v13  ;;  %vm5504_vm5 = vc.u32 %v10356_v39, %v10359_v52 }
 0x578   :  { %v6247_v14 = vpop.eup %6246  ;;  %v5443_v63 = vxor.u32 2147483648, %v6245_v37  ;;  %v5505_v54 = vadd.s32 1, %v10360_v15  ;;  %v5502_v12 = vmul.u32 %v10326_v61, %v5486_v6  ;;  %v2855_v53 = vor.u32 8388608, %v2854_v4 }
 0x579   :  { %v5440_v26 = vxor.u32 2147483648, %v6247_v14  ;;  %v2822_v32 = vor.u32 4788187, %v2821_v17  ;;  %v2862_v59 = vsub.s32 32, %v2861_v48  ;;  %v10379_v58 = vadd.f32 %v9953_v41, %v6472_v44 }
 0x57a   :  { %v5444_v49 = vsel %vm5442_vm6, %v5443_v63, %v6247_v14  ;;  %v5506_v62 = vsel %vm5504_vm5, %v5505_v54, %v10360_v15  ;;  %v2825_v56 = vcvt.s32.f32 %v2818_v34  ;;  %v2836_v19 = vadd.s32 3, %v2832_v28 }
 0x57b   :  { %v5441_v30 = vsel %vm5439_vm4, %v6245_v37, %v5440_v26  ;;  %v2823_v35 = vand.u32 2147483647, %v2822_v32  ;;  %v5507_v20 = vadd.s32 %v5506_v62, %v5502_v12  ;;  %v2865_v61 = vshrl.u32 %v6290_v25, %v2862_v59 }
 0x57c   :  { %v5445_v43 = vsel %vm5438_vm2, %v5441_v30, %v5444_v49  ;;  %v2868_v60 = vshrl.u32 %v6291_v27, %v2862_v59  ;;  %v2860_v41 = vshrl.u32 %v2859_v13, 5  ;;  %v2864_v5 = vshll.u32 %v6289_v21, %v2861_v48 }
 0x57d   :  { %v5446_v50 = vsel %vm5435_vm0, nan, %v5445_v43  ;;  %v2826_v16 = vmul.f32 %v2825_v56, %v2823_v35  ;;  %v5508_v44 = vadd.s32 536870912, %v5507_v20  ;;  %v2867_v57 = vshll.u32 %v6290_v25, %v2861_v48 }
 0x57e   :  { %5599 = vst [vmem:[#allocation2 + $0x180] sm:$0xff] %v5446_v50  ;;  %v2871_v55 = vshrl.u32 %v6292_v29, %v2862_v59  ;;  %v2874_v42 = vshrl.u32 %v6293_v31, %v2862_v59  ;;  %v2870_v0 = vshll.u32 %v6291_v27, %v2861_v48  ;;  %v2873_v36 = vshll.u32 %v6292_v29, %v2861_v48 }
 0x57f   :  { %v2827_v18 = vxor.u32 2147483648, %v2826_v16  ;;  %v10393_v23 = vshrl.u32 %v5508_v44, 30  ;;  %v2866_v3 = vor.u32 %v2865_v61, %v2864_v5  ;;  %v2869_v40 = vor.u32 %v2868_v60, %v2867_v57 }
 0x580   :  { %v2876_v8 = vshll.u32 %v6293_v31, %v2861_v48  ;;  %v2877_v46 = vshrl.u32 %v6294_v38, %v2862_v59  ;;  %v2875_v45 = vor.u32 %v2874_v42, %v2873_v36  ;;  %v10405_v1 = vand.u32 3, %v2836_v19 }
 0x581   :  { %v2828_v47 = vsel %vm2745_vm9, %v2827_v18, %v2826_v16  ;;  %v5510_v22 = vshll.u32 %v10393_v23, 30  ;;  %v2872_v9 = vor.u32 %v2871_v55, %v2870_v0  ;;  %vm2879_vm7 = vcmp.lt.s32.totalorder %v2860_v41, 1 }
 0x582   :  { %v2831_v15 = vsel %vm10338_vm12, %v10153_v2, %v2828_v47  ;;  %v2878_v24 = vor.u32 %v2877_v46, %v2876_v8  ;;  %v2895_v4 = vshll.u32 %v2855_v53, 8  ;;  %vm2882_vm8 = vcmp.lt.s32.totalorder %v2860_v41, 4 }
 0x583   :  { %6248 = vcosq.f32 %v2831_v15  ;;  %v5511_v6 = vsub.s32 %v5507_v20, %v5510_v22  ;;  %v2887_v13 = vsel %vm2879_vm7, %v2866_v3, %v2869_v40  ;;  %v2954_v37 = vand.u32 2139095040, %v10379_v58 }
 0x584   :  { %6250 = vsinq.f32 %v2831_v15  ;;  %vm2880_vm10 = vcmp.lt.s32.totalorder %v2860_v41, 2  ;;  %vm2881_vm9 = vcmp.lt.s32.totalorder %v2860_v41, 3  ;;  %v2888_v17 = vsel %vm2882_vm8, %v2875_v45, 920167782 }
 0x585   :  { %v5513_v34 = vsub.s32 0, %v5511_v6  ;;  %v2884_v10 = vsel %vm2882_vm8, %v2872_v9, 2102212464  ;;  %v2889_v48 = vsel %vm2881_vm9, %v2872_v9, %v2888_v17  ;;  %v2891_v14 = vsel %vm2879_vm7, %v2869_v40, %v2872_v9 }
 0x586   :  { %v2892_v63 = vsel %vm2882_vm8, %v2878_v24, 1326507024  ;;  %v2863_v54 = vshrl.u32 %v6289_v21, %v2862_v59  ;;  %v2890_v26 = vsel %vm2880_vm10, %v2887_v13, %v2889_v48  ;;  %v2955_v53 = vshrl.u32 %v2954_v37, 23 }
 0x587   :  { %v5839_v28 = vmin.u32 %v5513_v34, %v5511_v6  ;;  %v2893_v32 = vsel %vm2881_vm9, %v2875_v45, %v2892_v63  ;;  %v10413_v49 = vmul.u32.u64.low %v2895_v4, %v2890_v26  ;;  %v10414_v62 = vmul.u32.u64.high %v2895_v4, %v2890_v26, %v10413_v49 }
 0x588   :  { %v2894_v12 = vsel %vm2880_vm10, %v2891_v14, %v2893_v32  ;;  %v2883_v35 = vsel %vm2879_vm7, %v2863_v54, %v2866_v3  ;;  %v2885_v56 = vsel %vm2881_vm9, %v2869_v40, %v2884_v10  ;;  %v5742_v19 = vadd.s32 4294967169, %v2955_v53 }
 0x589   :  { %v5515_v30 = vclz %v5839_v28  ;;  %v10418_v20 = vmul.u32.u64.low %v2895_v4, %v2894_v12  ;;  %v10419_v43 = vmul.u32.u64.high %v2895_v4, %v2894_v12, %v10418_v20  ;;  %vm2838_vm11 = vcmp.lt.s32.totalorder %v10405_v1, 2 }
 0x58a   :  { %v2886_v59 = vsel %vm2880_vm10, %v2883_v35, %v2885_v56  ;;  %v2905_v60 = vadd.s32 1, %v10414_v62  ;;  %v2961_v50 = vadd.s32 1, %v5742_v19  ;;  %vm2839_vm12 = vcmp.eq.s32.totalorder %v10405_v1, 0 }
 0x58b   :  { %v5840_v61 = vadd.s32 4294967294, %v5515_v30  ;;  %vm2842_vm13 = vcmp.eq.s32.totalorder %v10405_v1, 2  ;;  %v5503_v44 = vadd.s32 %v10359_v52, %v10356_v39  ;;  %v5533_v42 = vsub.s32 4, %v10393_v23 }
 0x58c   :  { %vm2904_vm15 = vc.u32 %v10419_v43, %v10413_v49  ;;  %v2902_v36 = vmul.u32 %v2895_v4, %v2886_v59  ;;  %vm2962_vm1 = vcmp.gt.s32.totalorder %v2961_v50, 0  ;;  %vm2835_vm2 = vweird.f32 %v10153_v2 }
 0x58d   :  { %v6249_v16 = vpop.eup %6248  ;;  %vm5841_vm14 = vcmp.lt.s32.totalorder %v5840_v61, 0  ;;  %v2906_v8 = vsel %vm2904_vm15, %v2905_v60, %v10414_v62  ;;  %v2951_v45 = vand.u32 2147483647, %v10379_v58  ;;  %v2963_v15 = vsel %vm2962_vm1, %v2961_v50, 0 }
 0x58e   :  { %v6251_v5 = vpop.eup %6250  ;;  %v2843_v57 = vxor.u32 2147483648, %v6249_v16  ;;  %v5518_v55 = vsel %vm5841_vm14, 0, %v5840_v61  ;;  %v2907_v47 = vadd.s32 %v2906_v8, %v2902_v36  ;;  %vm5449_vm0 = vcmp.lt.s32.totalorder %v10244_v51, 0 }
 0x58f   :  { %v2840_v41 = vxor.u32 2147483648, %v6251_v5  ;;  %v5519_v18 = vsub.s32 32, %v5518_v55  ;;  %v5523_v0 = vsub.s32 4294967266, %v5518_v55  ;;  %v5520_v40 = vshll.u32 %v5511_v6, %v5518_v55 }
 0x590   :  { %v2844_v3 = vsel %vm2842_vm13, %v2843_v57, %v6251_v5  ;;  %v2908_v4 = vadd.s32 536870912, %v2907_v47  ;;  %v2965_v13 = vand.u32 31, %v2963_v15  ;;  %v5534_v34 = vsel %vm5449_vm0, %v5533_v42, %v10393_v23 }
 0x591   :  { %v2841_v39 = vsel %vm2839_vm12, %v6249_v16, %v2840_v41  ;;  %v5521_v52 = vshrl.u32 %v5503_v44, %v5519_v18  ;;  %v5524_v46 = vadd.s32 127, %v5523_v0  ;;  %v2958_v1 = vand.u32 8388607, %v2951_v45 }
 0x592   :  { %v2845_v22 = vsel %vm2838_vm11, %v2841_v39, %v2844_v3  ;;  %v10442_v2 = vshrl.u32 %v2908_v4, 30  ;;  %v2966_v17 = vsub.s32 32, %v2965_v13  ;;  %vm10448_vm3 = vcmp.le.f32.partialorder %v5447_v11, 0.7853982 }
 0x593   :  { %v2846_v9 = vsel %vm2835_vm2, nan, %v2845_v22  ;;  %v5522_v24 = vor.u32 %v5521_v52, %v5520_v40  ;;  %v5525_v6 = vshll.u32 %v5524_v46, 23  ;;  %v5536_v28 = vsel %vm10448_vm3, 0, %v5534_v34 }
 0x594   :  { %5574 = vst [vmem:[#allocation2 + $0xb8] sm:$0xff] %v2846_v9  ;;  %v2910_v63 = vshll.u32 %v10442_v2, 30  ;;  %v2969_v23 = vshrl.u32 %v6290_v25, %v2966_v17  ;;  %v2972_v54 = vshrl.u32 %v6291_v27, %v2966_v17  ;;  %v2975_v26 = vshrl.u32 %v6292_v29, %v2966_v17 }
 0x595   :  { %v5526_v37 = vor.u32 4788187, %v5525_v6  ;;  %v5529_v14 = vcvt.s32.f32 %v5522_v24  ;;  %v2968_v11 = vshll.u32 %v6289_v21, %v2965_v13  ;;  %v2978_v62 = vshrl.u32 %v6293_v31, %v2966_v17 }
 0x596   :  { %v2911_v12 = vsub.s32 %v2907_v47, %v2910_v63  ;;  %v2959_v53 = vor.u32 8388608, %v2958_v1  ;;  %v2964_v30 = vshrl.u32 %v2963_v15, 5  ;;  %v2971_v35 = vshll.u32 %v6290_v25, %v2965_v13 }
 0x597   :  { %v5527_v48 = vand.u32 2147483647, %v5526_v37  ;;  %v2974_v56 = vshll.u32 %v6291_v27, %v2965_v13  ;;  %v2970_v61 = vor.u32 %v2969_v23, %v2968_v11  ;;  %v2977_v59 = vshll.u32 %v6292_v29, %v2965_v13 }
 0x598   :  { %v2913_v19 = vsub.s32 0, %v2911_v12  ;;  %v2973_v60 = vor.u32 %v2972_v54, %v2971_v35  ;;  %v2980_v16 = vshll.u32 %v6293_v31, %v2965_v13  ;;  %v2981_v44 = vshrl.u32 %v6294_v38, %v2966_v17 }
 0x599   :  { %v5530_v32 = vmul.f32 %v5529_v14, %v5527_v48  ;;  %v2976_v50 = vor.u32 %v2975_v26, %v2974_v56  ;;  %v2979_v55 = vor.u32 %v2978_v62, %v2977_v59  ;;  %v5540_v27 = vadd.s32 3, %v5536_v28 }
 0x59a   :  { %v5739_v57 = vmin.u32 %v2913_v19, %v2911_v12  ;;  %v2982_v42 = vor.u32 %v2981_v44, %v2980_v16  ;;  %v2999_v41 = vshll.u32 %v2959_v53, 8  ;;  %vm2983_vm4 = vcmp.lt.s32.totalorder %v2964_v30, 1 }
 0x59b   :  { %v5531_v20 = vxor.u32 2147483648, %v5530_v32  ;;  %vm2986_vm6 = vcmp.lt.s32.totalorder %v2964_v30, 4  ;;  %v2967_v31 = vshrl.u32 %v6289_v21, %v2966_v17  ;;  %v2991_v18 = vsel %vm2983_vm4, %v2970_v61, %v2973_v60 }
 0x59c   :  { %v2915_v29 = vclz %v5739_v57  ;;  %v2988_v38 = vsel %vm2986_vm6, %v2976_v50, 2102212464  ;;  %vm2985_vm5 = vcmp.lt.s32.totalorder %v2964_v30, 3  ;;  %v2992_v36 = vsel %vm2986_vm6, %v2979_v55, 920167782 }
 0x59d   :  { %v5532_v5 = vsel %vm5449_vm0, %v5531_v20, %v5530_v32  ;;  %v2995_v3 = vsel %vm2983_vm4, %v2973_v60, %v2976_v50  ;;  %vm2984_vm7 = vcmp.lt.s32.totalorder %v2964_v30, 2  ;;  %v2987_v40 = vsel %vm2983_vm4, %v2967_v31, %v2970_v61 }
 0x59e   :  { %v5535_v25 = vsel %vm10448_vm3, %v10244_v51, %v5532_v5  ;;  %v5740_v0 = vadd.s32 4294967294, %v2915_v29  ;;  %v2993_v8 = vsel %vm2985_vm5, %v2976_v50, %v2992_v36  ;;  %v2996_v39 = vsel %vm2986_vm6, %v2982_v42, 1326507024 }
 0x59f   :  { %6252 = vcosq.f32 %v5535_v25  ;;  %v2989_v52 = vsel %vm2985_vm5, %v2973_v60, %v2988_v38  ;;  %v2994_v46 = vsel %vm2984_vm7, %v2991_v18, %v2993_v8  ;;  %v2997_v47 = vsel %vm2985_vm5, %v2979_v55, %v2996_v39 }
 0x5a0   :  { %6254 = vsinq.f32 %v5535_v25  ;;  %vm5741_vm8 = vcmp.lt.s32.totalorder %v5740_v0, 0  ;;  %v2998_v15 = vsel %vm2984_vm7, %v2995_v3, %v2997_v47  ;;  %v2903_v24 = vadd.s32 %v10413_v49, %v10419_v43 }
 0x5a1   :  { %v2918_v22 = vsel %vm5741_vm8, 0, %v5740_v0  ;;  %v10473_v9 = vmul.u32.u64.low %v2999_v41, %v2994_v46  ;;  %v10474_v21 = vmul.u32.u64.high %v2999_v41, %v2994_v46, %v10473_v9  ;;  %v5541_v13 = vand.u32 3, %v5540_v27 }
 0x5a2   :  { %v2919_v6 = vsub.s32 32, %v2918_v22  ;;  %v2923_v4 = vsub.s32 4294967266, %v2918_v22  ;;  %v10478_v37 = vmul.u32.u64.low %v2999_v41, %v2998_v15  ;;  %v10479_v34 = vmul.u32.u64.high %v2999_v41, %v2998_v15, %v10478_v37 }
 0x5a3   :  { %v2920_v1 = vshll.u32 %v2911_v12, %v2918_v22  ;;  %v2990_v48 = vsel %vm2984_vm7, %v2987_v40, %v2989_v52  ;;  %v3009_v14 = vadd.s32 1, %v10474_v21  ;;  %vm5546_vm9 = vcmp.eq.s32.totalorder %v5541_v13, 2 }
 0x5a4   :  { %v2921_v17 = vshrl.u32 %v2903_v24, %v2919_v6  ;;  %v2924_v10 = vadd.s32 127, %v2923_v4  ;;  %v3006_v32 = vmul.u32 %v2999_v41, %v2990_v48  ;;  %vm3008_vm10 = vc.u32 %v10479_v34, %v10473_v9 }
 0x5a5   :  { %v3010_v11 = vsel %vm3008_vm10, %v3009_v14, %v10474_v21  ;;  %vm5543_vm11 = vcmp.eq.s32.totalorder %v5541_v13, 0  ;;  %vm5542_vm12 = vcmp.lt.s32.totalorder %v5541_v13, 2  ;;  %vm5539_vm13 = vweird.f32 %v10244_v51 }
 0x5a6   :  { %v2922_v28 = vor.u32 %v2921_v17, %v2920_v1  ;;  %v2925_v23 = vshll.u32 %v2924_v10, 23  ;;  %v3011_v62 = vadd.s32 %v3010_v11, %v3006_v32  ;;  %v2933_v59 = vsub.s32 4, %v10442_v2 }
 0x5a7   :  { %vm2849_vm14 = vcmp.lt.s32.totalorder %v10294_v7, 0  ;;  %vm2848_vm15 = vcmp.le.f32.partialorder %v2847_v33, 0.7853982  ;;  %v3007_v36 = vadd.s32 %v10473_v9, %v10479_v34  ;;  %vm2939_vm4 = vweird.f32 %v10294_v7 }
 0x5a8   :  { %v2926_v43 = vor.u32 4788187, %v2925_v23  ;;  %v2929_v35 = vcvt.s32.f32 %v2922_v28  ;;  %v3012_v20 = vadd.s32 536870912, %v3011_v62  ;;  %v2934_v5 = vsel %vm2849_vm14, %v2933_v59, %v10442_v2 }
 0x5a9   :  { %v6253_v63 = vpop.eup %6252  ;;  %v2936_v55 = vsel %vm2848_vm15, 0, %v2934_v5  ;;  %vm2953_vm6 = vcmp.lt.s32.totalorder %v10379_v58, 0  ;;  %vm2952_vm5 = vcmp.le.f32.partialorder %v2951_v45, 0.7853982 }
 0x5aa   :  { %v6255_v54 = vpop.eup %6254  ;;  %v5547_v26 = vxor.u32 2147483648, %v6253_v63  ;;  %v2927_v30 = vand.u32 2147483647, %v2926_v43  ;;  %v3013_v60 = vshrl.u32 %v3012_v20, 30  ;;  %v2940_v42 = vadd.s32 3, %v2936_v55 }
 0x5ab   :  { %v5544_v49 = vxor.u32 2147483648, %v6255_v54 }
 0x5ac   :  { %v5548_v12 = vsel %vm5546_vm9, %v5547_v26, %v6255_v54  ;;  %v2930_v61 = vmul.f32 %v2929_v35, %v2927_v30  ;;  %v3014_v16 = vshll.u32 %v3013_v60, 30  ;;  %v2941_v31 = vand.u32 3, %v2940_v42 }
 0x5ad   :  { %v5545_v53 = vsel %vm5543_vm11, %v6253_v63, %v5544_v49  ;;  %v3037_v37 = vsub.s32 4, %v3013_v60  ;;  %vm3043_vm9 = vweird.f32 %v10379_v58 }
 0x5ae   :  { %v5549_v56 = vsel %vm5542_vm12, %v5545_v53, %v5548_v12  ;;  %v2931_v50 = vxor.u32 2147483648, %v2930_v61  ;;  %v3015_v57 = vsub.s32 %v3011_v62, %v3014_v16  ;;  %vm2943_vm2 = vcmp.eq.s32.totalorder %v2941_v31, 0 }
 0x5af   :  { %v5550_v19 = vsel %vm5539_vm13, nan, %v5549_v56  ;;  %vm2946_vm0 = vcmp.eq.s32.totalorder %v2941_v31, 2  ;;  %vm2942_vm3 = vcmp.lt.s32.totalorder %v2941_v31, 2  ;;  %v3038_v17 = vsel %vm2953_vm6, %v3037_v37, %v3013_v60 }
 0x5b0   :  { %5600 = vst [vmem:[#allocation2 + $0x188] sm:$0xff] %v5550_v19  ;;  %v2932_v44 = vsel %vm2849_vm14, %v2931_v50, %v2930_v61  ;;  %v3017_v25 = vsub.s32 0, %v3015_v57  ;;  %v3040_v10 = vsel %vm2952_vm5, 0, %v3038_v17 }
 0x5b1   :  { %v2935_v51 = vsel %vm2848_vm15, %v10294_v7, %v2932_v44  ;;  %v3044_v48 = vadd.s32 3, %v3040_v10 }
 0x5b2   :  { %6256 = vcosq.f32 %v2935_v51  ;;  %v5743_v27 = vmin.u32 %v3017_v25, %v3015_v57 }
 0x5b3   :  { %6258 = vsinq.f32 %v2935_v51  ;;  %v3045_v14 = vand.u32 3, %v3044_v48 }
 0x5b4   :  { %v3019_v41 = vclz %v5743_v27 }
 0x5b5   :  { %vm3050_vm7 = vcmp.eq.s32.totalorder %v3045_v14, 2  ;;  %vm3047_vm8 = vcmp.eq.s32.totalorder %v3045_v14, 0  ;;  %vm3046_vm10 = vcmp.lt.s32.totalorder %v3045_v14, 2 }
 0x5b6   :  { %v5744_v29 = vadd.s32 4294967294, %v3019_v41 }
 0x5b8   :  { %vm5745_vm1 = vcmp.lt.s32.totalorder %v5744_v29, 0 }
 0x5b9   :  { %v3022_v18 = vsel %vm5745_vm1, 0, %v5744_v29 }
 0x5ba   :  { %v3023_v2 = vsub.s32 32, %v3022_v18  ;;  %v3027_v3 = vsub.s32 4294967266, %v3022_v18  ;;  %v3024_v39 = vshll.u32 %v3015_v57, %v3022_v18 }
 0x5bc   :  { %v6257_v38 = vpop.eup %6256  ;;  %v3025_v52 = vshrl.u32 %v3007_v36, %v3023_v2  ;;  %v3028_v46 = vadd.s32 127, %v3027_v3 }
 0x5bd   :  { %v6259_v0 = vpop.eup %6258  ;;  %v2947_v33 = vxor.u32 2147483648, %v6257_v38 }
 0x5be   :  { %v2944_v40 = vxor.u32 2147483648, %v6259_v0  ;;  %v3026_v15 = vor.u32 %v3025_v52, %v3024_v39  ;;  %v3029_v21 = vshll.u32 %v3028_v46, 23 }
 0x5bf   :  { %v2948_v8 = vsel %vm2946_vm0, %v2947_v33, %v6259_v0 }
 0x5c0   :  { %v2945_v47 = vsel %vm2943_vm2, %v6257_v38, %v2944_v40  ;;  %v3030_v6 = vor.u32 4788187, %v3029_v21  ;;  %v3033_v4 = vcvt.s32.f32 %v3026_v15 }
 0x5c1   :  { %v2949_v22 = vsel %vm2942_vm3, %v2945_v47, %v2948_v8 }
 0x5c2   :  { %v2950_v24 = vsel %vm2939_vm4, nan, %v2949_v22  ;;  %v3031_v9 = vand.u32 2147483647, %v3030_v6 }
 0x5c3   :  { %5575 = vst [vmem:[#allocation2 + $0xc0] sm:$0xff] %v2950_v24 }
 0x5c4   :  { %v3034_v13 = vmul.f32 %v3033_v4, %v3031_v9 }
 0x5c6   :  { %v3035_v34 = vxor.u32 2147483648, %v3034_v13 }
 0x5c8   :  { %v3036_v1 = vsel %vm2953_vm6, %v3035_v34, %v3034_v13 }
 0x5c9   :  { %v3039_v7 = vsel %vm2952_vm5, %v10379_v58, %v3036_v1 }
 0x5ca   :  { %6260 = vcosq.f32 %v3039_v7 }
 0x5cb   :  { %6262 = vsinq.f32 %v3039_v7 }
 0x5d4   :  { %v6261_v63 = vpop.eup %6260 }
 0x5d5   :  { %v6263_v28 = vpop.eup %6262  ;;  %v3051_v23 = vxor.u32 2147483648, %v6261_v63 }
 0x5d6   :  { %v3048_v54 = vxor.u32 2147483648, %v6263_v28 }
 0x5d7   :  { %v3052_v26 = vsel %vm3050_vm7, %v3051_v23, %v6263_v28 }
 0x5d8   :  { %v3049_v45 = vsel %vm3047_vm8, %v6261_v63, %v3048_v54 }
 0x5d9   :  { %v3053_v32 = vsel %vm3046_vm10, %v3049_v45, %v3052_v26 }
 0x5da   :  { %v3054_v49 = vsel %vm3043_vm9, nan, %v3053_v32 }
 0x5db   :  { %5576 = vst [vmem:[#allocation2 + $0xc8] sm:$0xff] %v3054_v49 }
 0x5dc   :  { %6275 = shalt.err (!%p6272_p4)
}
 0x5dd   :  { %s6276_s27 = scalar_lea.hbm %s10514_s3, 6400 }
 0x5de   :  { %p6277_p5 = scmp.ne.s32.totalorder %s10514_s3, %s6276_s27  ;;  %p6280_p6 = scmp.lt.u32.totalorder %s6276_s27, %s10514_s3 }
 0x5e0   :  { %p6282_p7 = pnand %p6280_p6, %p6277_p5 }
 0x5e2   :  { %6285 = shalt.err (!%p6282_p7)
}
 0x5e3   :  { %s6296_s1 = smov 256   ;;  %s6297_s5 = smov 16  }
 0x5e4   :  { %5612 = dma.vmem_to_hbm [thread:$0]  %s5607_s2, 6400, %s10514_s3, [#allocation3], %s6296_s1, %s6296_s1, %s6297_s5  }
 0x5e5   :  { %6286 = dma.done.wait [#allocation3], 6400  }
 0x5e6   :  { %6287 = vsyncadd [#allocation3], 4294960896 }
 0x5e7   :  { %5616 = vsyncpa [#allocation3], 1 }

</bundles_post_ra>
